<compile_context>
chip_gen: v7x
topology: tpu7x:2x2x1
jax: 0.10.0
libtpu: 0.0.40
codegen_flags: <defaults>
</compile_context>

<pallas_src>
import functools

import jax
import jax.numpy as jnp
from jax.experimental import pallas as pl
from jax.experimental.pallas import tpu as pltpu

D_MODEL = 32
NHEAD = 4
DIM_FF = 64
LN_EPS = 1e-5


# ---------------------------- fused Pallas kernel ----------------------------

def _decoder_layer_kernel(
    # activations (batch-major 2-D slabs)
    sa_in_ref,        # (b*t, 3c)   concat([tgt, q_time, q_pos], -1)
    tgt_ref,          # (b*t, c)
    ca_qx_ref,        # (b*t, ncat*c)  concat([q_sine, q_time (, q_pos)], -1)
    ca_k_in_ref,      # (bs*n_tokens, 2c) concat([memory, pos], -1)
    mem_ref,          # (bs*n_tokens, c)
    # self-attention weights
    sa_q_w_ref, sa_q_b_ref, sa_k_w_ref, sa_k_b_ref, sa_v_w_ref, sa_v_b_ref,
    sa_mi_w_ref, sa_mi_b_ref, sa_mo_w_ref, sa_mo_b_ref, n1_g_ref, n1_b_ref,
    # cross-attention weights
    ca_qc_w_ref, ca_qc_b_ref, ca_qx_w_ref, ca_qx_b_ref, ca_k_w_ref, ca_k_b_ref,
    ca_v_w_ref, ca_v_b_ref, ca_mi_w_ref, ca_mi_b_ref, ca_mo_w_ref, ca_mo_b_ref,
    n3_g_ref, n3_b_ref,
    # FFN weights
    w1_ref, b1_ref, w2_ref, b2_ref, n4_g_ref, n4_b_ref,
    # outputs
    out_ref,          # (b*t, c)  batch-major
    attw_ref,         # (b*t, t)  head-averaged self-attn weights, batch-major
    *, durations, nhead, t, b, n_tokens):
    f32 = jnp.float32
    c = out_ref.shape[1]
    dh = c // nhead
    scale = 1.0 / (dh ** 0.5)

    def lin(x, w_ref, b_ref):
        return jnp.dot(x, w_ref[...], preferred_element_type=f32) + b_ref[...]

    def layernorm(z, g_ref, bb_ref):
        mu = jnp.mean(z, axis=-1, keepdims=True)
        var = jnp.mean((z - mu) ** 2, axis=-1, keepdims=True)
        return (z - mu) * jax.lax.rsqrt(var + LN_EPS) * g_ref[...] + bb_ref[...]

    def qkT(qh, kh):
        # (L, dh) x (S, dh) -> (L, S), contract over head dim (no transpose op)
        return jax.lax.dot_general(qh, kh, (((1,), (1,)), ((), ())),
                                   preferred_element_type=f32)

    def softmax(s):
        s = s - jnp.max(s, axis=-1, keepdims=True)
        e = jnp.exp(s)
        return e / jnp.sum(e, axis=-1, keepdims=True)

    # ----------------------------- self attention -----------------------------
    sa_in = sa_in_ref[...]                               # (b*t, 3c)
    x_all = tgt_ref[...]                                 # (b*t, c)
    q_all = lin(sa_in, sa_q_w_ref, sa_q_b_ref)           # fused qcontent+qtime+qpos
    k_all = lin(sa_in, sa_k_w_ref, sa_k_b_ref)           # fused kcontent+ktime+kpos
    v_all = lin(x_all, sa_v_w_ref, sa_v_b_ref)

    mi_w = sa_mi_w_ref[...]                              # (c, 3c)
    mi_b = sa_mi_b_ref[...]                              # (1, 3c)
    qm = jnp.dot(q_all, mi_w[:, :c], preferred_element_type=f32) + mi_b[:, :c]
    km = jnp.dot(k_all, mi_w[:, c:2 * c], preferred_element_type=f32) + mi_b[:, c:2 * c]
    vm = jnp.dot(v_all, mi_w[:, 2 * c:], preferred_element_type=f32) + mi_b[:, 2 * c:]

    attn_rows = []
    for i_b in range(b):                                 # static unroll (b is tiny)
        r0 = i_b * t
        head_outs = []
        wsum = jnp.zeros((t, t), f32)
        for h in range(nhead):                           # static unroll
            c0 = h * dh
            qh = qm[r0:r0 + t, c0:c0 + dh] * scale
            kh = km[r0:r0 + t, c0:c0 + dh]
            vh = vm[r0:r0 + t, c0:c0 + dh]
            p = softmax(qkT(qh, kh))                     # (t, t)
            head_outs.append(jnp.dot(p, vh, preferred_element_type=f32))
            wsum = wsum + p
        attn_rows.append(jnp.concatenate(head_outs, axis=-1))   # (t, c)
        attw_ref[r0:r0 + t, :] = wsum * (1.0 / nhead)    # head-averaged weights
    attn_all = jnp.concatenate(attn_rows, axis=0)        # (b*t, c)
    sa_out = lin(attn_all, sa_mo_w_ref, sa_mo_b_ref)
    tgt1 = layernorm(x_all + sa_out, n1_g_ref, n1_b_ref)  # dropout1 = identity

    # ----------------------------- cross attention -----------------------------
    # query: ca_qcontent(tgt1) + [ca_qpos(q_pos)] + ca_qpos_sine(q_sine) + ca_qtime(q_time)
    q_cross = lin(tgt1, ca_qc_w_ref, ca_qc_b_ref) + lin(ca_qx_ref[...],
                                                        ca_qx_w_ref, ca_qx_b_ref)
    # key / value for all frames at once (bigger matmuls)
    kc = lin(ca_k_in_ref[...], ca_k_w_ref, ca_k_b_ref)   # (bs*nt, c)
    vc = lin(mem_ref[...], ca_v_w_ref, ca_v_b_ref)       # (bs*nt, c)

    cmi_w = ca_mi_w_ref[...]
    cmi_b = ca_mi_b_ref[...]
    cqm = jnp.dot(q_cross, cmi_w[:, :c], preferred_element_type=f32) + cmi_b[:, :c]
    ckm = jnp.dot(kc, cmi_w[:, c:2 * c], preferred_element_type=f32) + cmi_b[:, c:2 * c]
    cvm = jnp.dot(vc, cmi_w[:, 2 * c:], preferred_element_type=f32) + cmi_b[:, 2 * c:]

    # per-frame attention; queries gathered per clip via static slicing (durations static)
    frame_outs = []
    clip_start = 0
    for i_b in range(b):
        clip_len = durations[i_b]
        for j in range(clip_len):
            fidx = clip_start + j
            r = i_b * t + j
            qrow = cqm[r:r + 1, :]                                   # (1, c)
            kf = ckm[fidx * n_tokens:(fidx + 1) * n_tokens, :]       # (nt, c)
            vf = cvm[fidx * n_tokens:(fidx + 1) * n_tokens, :]
            houts = []
            for h in range(nhead):
                c0 = h * dh
                p = softmax(qkT(qrow[:, c0:c0 + dh] * scale,
                                kf[:, c0:c0 + dh]))                  # (1, nt)
                houts.append(jnp.dot(p, vf[:, c0:c0 + dh],
                                     preferred_element_type=f32))    # (1, dh)
            frame_outs.append(jnp.concatenate(houts, axis=-1))       # (1, c)
        clip_start += clip_len
    ca_concat = jnp.concatenate(frame_outs, axis=0)                  # (bs, c)
    ca_out = lin(ca_concat, ca_mo_w_ref, ca_mo_b_ref)                # out-proj once

    # scatter back to padded batch-major layout (zeros for frames >= clip_len)
    blocks = []
    clip_start = 0
    for i_b in range(b):
        clip_len = durations[i_b]
        blk = ca_out[clip_start:clip_start + clip_len, :]
        if clip_len < t:
            blk = jnp.concatenate(
                [blk, jnp.zeros((t - clip_len, c), f32)], axis=0)
        blocks.append(blk)
        clip_start += clip_len
    tgt2 = jnp.concatenate(blocks, axis=0)                           # (b*t, c)

    tgt3 = layernorm(tgt1 + tgt2, n3_g_ref, n3_b_ref)    # dropout3 = identity

    # ---------------------------------- FFN ----------------------------------
    hdn = jnp.maximum(lin(tgt3, w1_ref, b1_ref), 0.0)    # relu, dropout = identity
    y = lin(hdn, w2_ref, b2_ref)
    out_ref[...] = layernorm(tgt3 + y, n4_g_ref, n4_b_ref)  # dropout4 = identity


# ---------------------------- python wrapper ----------------------------

def transformer_decoder_layer_forward(params, tgt, memory, pos, query_pos,
                                      query_time_embed, query_sine_embed,
                                      durations, is_first=False, nhead=NHEAD):
    t, b, c = tgt.shape
    n_tokens, bs, f = memory.shape
    assert f == c
    durations = tuple(int(d) for d in durations)
    assert len(durations) == b and sum(durations) == bs
    assert all(d <= t for d in durations)

    def to_rows(x):  # (L, B, C) -> (B*L, C), batch-major rows
        L, B, C = x.shape
        return jnp.transpose(x, (1, 0, 2)).reshape(B * L, C)

    # ---- packed activations (batch-major 2-D slabs) ----
    sa_in = to_rows(jnp.concatenate([tgt, query_time_embed, query_pos], axis=-1))
    tgt2d = to_rows(tgt)
    qx_parts = [query_sine_embed, query_time_embed] + ([query_pos] if is_first else [])
    ca_qx = to_rows(jnp.concatenate(qx_parts, axis=-1))
    ca_k_in = to_rows(jnp.concatenate([memory, pos], axis=-1))     # (bs*nt, 2c)
    mem2d = to_rows(memory)                                        # (bs*nt, c)

    # ---- packed weights ----
    def wb(name):
        return params[name]

    w_qc, b_qc = wb('sa_qcontent'); w_qt, b_qt = wb('sa_qtime'); w_qp, b_qp = wb('sa_qpos')
    w_kc, b_kc = wb('sa_kcontent'); w_kt, b_kt = wb('sa_ktime'); w_kp, b_kp = wb('sa_kpos')
    w_sv, b_sv = wb('sa_v')
    sa_q_w = jnp.concatenate([w_qc, w_qt, w_qp], axis=0)
    sa_q_b = (b_qc + b_qt + b_qp).reshape(1, c)
    sa_k_w = jnp.concatenate([w_kc, w_kt, w_kp], axis=0)
    sa_k_b = (b_kc + b_kt + b_kp).reshape(1, c)
    sa_v_w, sa_v_b = w_sv, b_sv.reshape(1, c)

    sa = params['self_attn']
    sa_mi_w = sa['in_proj_w']; sa_mi_b = sa['in_proj_b'].reshape(1, 3 * c)
    sa_mo_w = sa['out_proj_w']; sa_mo_b = sa['out_proj_b'].reshape(1, c)
    n1_g, n1_b = [p.reshape(1, c) for p in params['norm1']]

    w_cqc, b_cqc = wb('ca_qcontent')
    w_cqs, b_cqs = wb('ca_qpos_sine'); w_cqt, b_cqt = wb('ca_qtime')
    ca_qc_w, ca_qc_b = w_cqc, b_cqc.reshape(1, c)
    if is_first:
        w_cqp, b_cqp = wb('ca_qpos')
        ca_qx_w = jnp.concatenate([w_cqs, w_cqt, w_cqp], axis=0)
        ca_qx_b = (b_cqs + b_cqt + b_cqp).reshape(1, c)
    else:
        ca_qx_w = jnp.concatenate([w_cqs, w_cqt], axis=0)
        ca_qx_b = (b_cqs + b_cqt).reshape(1, c)

    w_ckc, b_ckc = wb('ca_kcontent'); w_ckp, b_ckp = wb('ca_kpos')
    kfac = 2.0 if is_first else 1.0   # faithful: k_pos added twice when is_first
    ca_k_w = jnp.concatenate([w_ckc, kfac * w_ckp], axis=0)
    ca_k_b = (b_ckc + kfac * b_ckp).reshape(1, c)
    w_cv, b_cv = wb('ca_v')
    ca_v_w, ca_v_b = w_cv, b_cv.reshape(1, c)

    ca = params['cross_attn_image']
    ca_mi_w = ca['in_proj_w']; ca_mi_b = ca['in_proj_b'].reshape(1, 3 * c)
    ca_mo_w = ca['out_proj_w']; ca_mo_b = ca['out_proj_b'].reshape(1, c)
    n3_g, n3_b = [p.reshape(1, c) for p in params['norm3']]

    w1, b1v = params['linear1']
    w2, b2v = params['linear2']
    dff = w1.shape[1]
    b1 = b1v.reshape(1, dff)
    b2 = b2v.reshape(1, c)
    n4_g, n4_b = [p.reshape(1, c) for p in params['norm4']]

    inputs = (sa_in, tgt2d, ca_qx, ca_k_in, mem2d,
              sa_q_w, sa_q_b, sa_k_w, sa_k_b, sa_v_w, sa_v_b,
              sa_mi_w, sa_mi_b, sa_mo_w, sa_mo_b, n1_g, n1_b,
              ca_qc_w, ca_qc_b, ca_qx_w, ca_qx_b, ca_k_w, ca_k_b,
              ca_v_w, ca_v_b, ca_mi_w, ca_mi_b, ca_mo_w, ca_mo_b, n3_g, n3_b,
              w1, b1, w2, b2, n4_g, n4_b)

    kern = functools.partial(_decoder_layer_kernel,
                             durations=durations, nhead=nhead,
                             t=t, b=b, n_tokens=n_tokens)

    # Whole problem (<1 MiB of weights+activations) is resident in VMEM; a
    # single grid step, so no per-step / per-launch overheads beyond one call.
    # TODO(synk): on v7x a grid over clips could use the 2nd TensorCore, but
    #             ragged per-clip durations make it not worth it at these sizes.
    out2d, attw2d = pl.pallas_call(
        kern,
        out_shape=(jax.ShapeDtypeStruct((b * t, c), jnp.float32),
                   jax.ShapeDtypeStruct((b * t, t), jnp.float32)),
        grid=(1,),
        in_specs=[pl.BlockSpec(x.shape, lambda i: (0, 0)) for x in inputs],
        out_specs=(pl.BlockSpec((b * t, c), lambda i: (0, 0)),
                   pl.BlockSpec((b * t, t), lambda i: (0, 0))),
        compiler_params=pltpu.CompilerParams(
            dimension_semantics=("arbitrary",)),
    )(*inputs)

    tgt_out = out2d.reshape(b, t, c).transpose(1, 0, 2)   # back to (t, b, c)
    weights = attw2d.reshape(b, t, t)                     # (B, L, S) like torch MHA
    return tgt_out, weights


# ---------------------------- parameter init ----------------------------

def init_params(key, d=D_MODEL, dff=DIM_FF):
    params = {}
    lin_names = ['sa_qcontent', 'sa_qpos', 'sa_qtime', 'sa_kcontent',
                 'sa_kpos', 'sa_ktime', 'sa_v',
                 'ca_qcontent', 'ca_qpos', 'ca_kcontent', 'ca_kpos',
                 'ca_qtime', 'ca_v', 'ca_qpos_sine']
    key, *ks = jax.random.split(key, len(lin_names) + 1)
    for nm, kk in zip(lin_names, ks):
        kw, kb = jax.random.split(kk)
        params[nm] = (0.05 * jax.random.normal(kw, (d, d), jnp.float32),
                      0.05 * jax.random.normal(kb, (d,), jnp.float32))
    for nm in ['self_attn', 'cross_attn_image']:
        key, k1, k2, k3, k4 = jax.random.split(key, 5)
        params[nm] = dict(
            in_proj_w=0.05 * jax.random.normal(k1, (d, 3 * d), jnp.float32),
            in_proj_b=0.05 * jax.random.normal(k2, (3 * d,), jnp.float32),
            out_proj_w=0.05 * jax.random.normal(k3, (d, d), jnp.float32),
            out_proj_b=0.05 * jax.random.normal(k4, (d,), jnp.float32),
        )
    key, k1, k2, k3, k4 = jax.random.split(key, 5)
    params['linear1'] = (0.05 * jax.random.normal(k1, (d, dff), jnp.float32),
                         0.05 * jax.random.normal(k2, (dff,), jnp.float32))
    params['linear2'] = (0.05 * jax.random.normal(k3, (dff, d), jnp.float32),
                         0.05 * jax.random.normal(k4, (d,), jnp.float32))
    for nm in ['norm1', 'norm3', 'norm4']:
        params[nm] = (jnp.ones((d,), jnp.float32), jnp.zeros((d,), jnp.float32))
    return params


if __name__ == "__main__":
    key = jax.random.PRNGKey(0)
    t, b, c = 8, 2, D_MODEL            # t queries per clip, b clips
    durations = [3, 5]                 # frames per clip (static ints)
    bs = sum(durations)                # total frames
    n_tokens = 16                      # memory tokens per frame

    k_params, k_inp = jax.random.split(key)
    params = init_params(k_params)

    ks = jax.random.split(k_inp, 6)
    tgt = jax.random.normal(ks[0], (t, b, c), jnp.float32)
    memory = jax.random.normal(ks[1], (n_tokens, bs, c), jnp.float32)
    pos = jax.random.normal(ks[2], (n_tokens, bs, c), jnp.float32)
    query_pos = jax.random.normal(ks[3], (t, b, c), jnp.float32)
    query_time_embed = jax.random.normal(ks[4], (t, b, c), jnp.float32)
    query_sine_embed = jax.random.normal(ks[5], (t, b, c), jnp.float32)

    out, weights = transformer_decoder_layer_forward(
        params, tgt, memory, pos, query_pos, query_time_embed,
        query_sine_embed, durations, is_first=True)
    jax.block_until_ready((out, weights))
    assert out.shape == (t, b, c)
    assert weights.shape == (b, t, t)
    assert bool(jnp.all(jnp.isfinite(out))) and bool(jnp.all(jnp.isfinite(weights)))

    # exercise the non-first-layer branch too
    out2, weights2 = transformer_decoder_layer_forward(
        params, tgt, memory, pos, query_pos, query_time_embed,
        query_sine_embed, durations, is_first=False)
    jax.block_until_ready((out2, weights2))
    assert bool(jnp.all(jnp.isfinite(out2)))

    print("KERNEL_OK")
</pallas_src>

<mosaic_0001>
module attributes {stable_mosaic.version = 11 : i64} {
  func.func @_decoder_layer_kernel(%arg0: i32, %arg1: memref<16x96xf32, #tpu.memory_space<vmem>>, %arg2: memref<16x32xf32, #tpu.memory_space<vmem>>, %arg3: memref<16x96xf32, #tpu.memory_space<vmem>>, %arg4: memref<128x64xf32, #tpu.memory_space<vmem>>, %arg5: memref<128x32xf32, #tpu.memory_space<vmem>>, %arg6: memref<96x32xf32, #tpu.memory_space<vmem>>, %arg7: memref<1x32xf32, #tpu.memory_space<vmem>>, %arg8: memref<96x32xf32, #tpu.memory_space<vmem>>, %arg9: memref<1x32xf32, #tpu.memory_space<vmem>>, %arg10: memref<32x32xf32, #tpu.memory_space<vmem>>, %arg11: memref<1x32xf32, #tpu.memory_space<vmem>>, %arg12: memref<32x96xf32, #tpu.memory_space<vmem>>, %arg13: memref<1x96xf32, #tpu.memory_space<vmem>>, %arg14: memref<32x32xf32, #tpu.memory_space<vmem>>, %arg15: memref<1x32xf32, #tpu.memory_space<vmem>>, %arg16: memref<1x32xf32, #tpu.memory_space<vmem>>, %arg17: memref<1x32xf32, #tpu.memory_space<vmem>>, %arg18: memref<32x32xf32, #tpu.memory_space<vmem>>, %arg19: memref<1x32xf32, #tpu.memory_space<vmem>>, %arg20: memref<96x32xf32, #tpu.memory_space<vmem>>, %arg21: memref<1x32xf32, #tpu.memory_space<vmem>>, %arg22: memref<64x32xf32, #tpu.memory_space<vmem>>, %arg23: memref<1x32xf32, #tpu.memory_space<vmem>>, %arg24: memref<32x32xf32, #tpu.memory_space<vmem>>, %arg25: memref<1x32xf32, #tpu.memory_space<vmem>>, %arg26: memref<32x96xf32, #tpu.memory_space<vmem>>, %arg27: memref<1x96xf32, #tpu.memory_space<vmem>>, %arg28: memref<32x32xf32, #tpu.memory_space<vmem>>, %arg29: memref<1x32xf32, #tpu.memory_space<vmem>>, %arg30: memref<1x32xf32, #tpu.memory_space<vmem>>, %arg31: memref<1x32xf32, #tpu.memory_space<vmem>>, %arg32: memref<32x64xf32, #tpu.memory_space<vmem>>, %arg33: memref<1x64xf32, #tpu.memory_space<vmem>>, %arg34: memref<64x32xf32, #tpu.memory_space<vmem>>, %arg35: memref<1x32xf32, #tpu.memory_space<vmem>>, %arg36: memref<1x32xf32, #tpu.memory_space<vmem>>, %arg37: memref<1x32xf32, #tpu.memory_space<vmem>>, %arg38: memref<16x32xf32, #tpu.memory_space<vmem>>, %arg39: memref<16x8xf32, #tpu.memory_space<vmem>>) attributes {dimension_semantics = [#tpu.dimension_semantics<arbitrary>], iteration_bounds = array<i64: 1>, scalar_prefetch = 0 : i64, scratch_operands = 0 : i64, tpu.core_type = #tpu.core_type<tc>, window_params = [{pipeline_mode = #tpu.pipeline_mode<synchronous>, transform_indices = @transform_0, window_bounds = array<i64: 16, 96>}, {pipeline_mode = #tpu.pipeline_mode<synchronous>, transform_indices = @transform_1, window_bounds = array<i64: 16, 32>}, {pipeline_mode = #tpu.pipeline_mode<synchronous>, transform_indices = @transform_2, window_bounds = array<i64: 16, 96>}, {pipeline_mode = #tpu.pipeline_mode<synchronous>, transform_indices = @transform_3, window_bounds = array<i64: 128, 64>}, {pipeline_mode = #tpu.pipeline_mode<synchronous>, transform_indices = @transform_4, window_bounds = array<i64: 128, 32>}, {pipeline_mode = #tpu.pipeline_mode<synchronous>, transform_indices = @transform_5, window_bounds = array<i64: 96, 32>}, {pipeline_mode = #tpu.pipeline_mode<synchronous>, transform_indices = @transform_6, window_bounds = array<i64: 1, 32>}, {pipeline_mode = #tpu.pipeline_mode<synchronous>, transform_indices = @transform_7, window_bounds = array<i64: 96, 32>}, {pipeline_mode = #tpu.pipeline_mode<synchronous>, transform_indices = @transform_8, window_bounds = array<i64: 1, 32>}, {pipeline_mode = #tpu.pipeline_mode<synchronous>, transform_indices = @transform_9, window_bounds = array<i64: 32, 32>}, {pipeline_mode = #tpu.pipeline_mode<synchronous>, transform_indices = @transform_10, window_bounds = array<i64: 1, 32>}, {pipeline_mode = #tpu.pipeline_mode<synchronous>, transform_indices = @transform_11, window_bounds = array<i64: 32, 96>}, {pipeline_mode = #tpu.pipeline_mode<synchronous>, transform_indices = @transform_12, window_bounds = array<i64: 1, 96>}, {pipeline_mode = #tpu.pipeline_mode<synchronous>, transform_indices = @transform_13, window_bounds = array<i64: 32, 32>}, {pipeline_mode = #tpu.pipeline_mode<synchronous>, transform_indices = @transform_14, window_bounds = array<i64: 1, 32>}, {pipeline_mode = #tpu.pipeline_mode<synchronous>, transform_indices = @transform_15, window_bounds = array<i64: 1, 32>}, {pipeline_mode = #tpu.pipeline_mode<synchronous>, transform_indices = @transform_16, window_bounds = array<i64: 1, 32>}, {pipeline_mode = #tpu.pipeline_mode<synchronous>, transform_indices = @transform_17, window_bounds = array<i64: 32, 32>}, {pipeline_mode = #tpu.pipeline_mode<synchronous>, transform_indices = @transform_18, window_bounds = array<i64: 1, 32>}, {pipeline_mode = #tpu.pipeline_mode<synchronous>, transform_indices = @transform_19, window_bounds = array<i64: 96, 32>}, {pipeline_mode = #tpu.pipeline_mode<synchronous>, transform_indices = @transform_20, window_bounds = array<i64: 1, 32>}, {pipeline_mode = #tpu.pipeline_mode<synchronous>, transform_indices = @transform_21, window_bounds = array<i64: 64, 32>}, {pipeline_mode = #tpu.pipeline_mode<synchronous>, transform_indices = @transform_22, window_bounds = array<i64: 1, 32>}, {pipeline_mode = #tpu.pipeline_mode<synchronous>, transform_indices = @transform_23, window_bounds = array<i64: 32, 32>}, {pipeline_mode = #tpu.pipeline_mode<synchronous>, transform_indices = @transform_24, window_bounds = array<i64: 1, 32>}, {pipeline_mode = #tpu.pipeline_mode<synchronous>, transform_indices = @transform_25, window_bounds = array<i64: 32, 96>}, {pipeline_mode = #tpu.pipeline_mode<synchronous>, transform_indices = @transform_26, window_bounds = array<i64: 1, 96>}, {pipeline_mode = #tpu.pipeline_mode<synchronous>, transform_indices = @transform_27, window_bounds = array<i64: 32, 32>}, {pipeline_mode = #tpu.pipeline_mode<synchronous>, transform_indices = @transform_28, window_bounds = array<i64: 1, 32>}, {pipeline_mode = #tpu.pipeline_mode<synchronous>, transform_indices = @transform_29, window_bounds = array<i64: 1, 32>}, {pipeline_mode = #tpu.pipeline_mode<synchronous>, transform_indices = @transform_30, window_bounds = array<i64: 1, 32>}, {pipeline_mode = #tpu.pipeline_mode<synchronous>, transform_indices = @transform_31, window_bounds = array<i64: 32, 64>}, {pipeline_mode = #tpu.pipeline_mode<synchronous>, transform_indices = @transform_32, window_bounds = array<i64: 1, 64>}, {pipeline_mode = #tpu.pipeline_mode<synchronous>, transform_indices = @transform_33, window_bounds = array<i64: 64, 32>}, {pipeline_mode = #tpu.pipeline_mode<synchronous>, transform_indices = @transform_34, window_bounds = array<i64: 1, 32>}, {pipeline_mode = #tpu.pipeline_mode<synchronous>, transform_indices = @transform_35, window_bounds = array<i64: 1, 32>}, {pipeline_mode = #tpu.pipeline_mode<synchronous>, transform_indices = @transform_36, window_bounds = array<i64: 1, 32>}, {pipeline_mode = #tpu.pipeline_mode<synchronous>, transform_indices = @transform_37, window_bounds = array<i64: 16, 32>}, {pipeline_mode = #tpu.pipeline_mode<synchronous>, transform_indices = @transform_38, window_bounds = array<i64: 16, 8>}]} {
    %c0 = arith.constant 0 : index
    %c0_0 = arith.constant 0 : index
    %0 = vector.load %arg1[%c0, %c0_0] : memref<16x96xf32, #tpu.memory_space<vmem>>, vector<16x96xf32>
    %c0_1 = arith.constant 0 : index
    %c0_2 = arith.constant 0 : index
    %1 = vector.load %arg2[%c0_1, %c0_2] : memref<16x32xf32, #tpu.memory_space<vmem>>, vector<16x32xf32>
    %c0_3 = arith.constant 0 : index
    %c0_4 = arith.constant 0 : index
    %2 = vector.load %arg6[%c0_3, %c0_4] : memref<96x32xf32, #tpu.memory_space<vmem>>, vector<96x32xf32>
    %cst = arith.constant dense<0.000000e+00> : vector<16x32xf32>
    %3 = tpu.matmul %0, %2, %cst {dimension_numbers = #tpu.dot_dimension_numbers<[1], [0], [0], [1], [0, 0, 1, 1], [], []>} : vector<16x96xf32>, vector<96x32xf32>, vector<16x32xf32> -> vector<16x32xf32>
    %c0_5 = arith.constant 0 : index
    %c0_6 = arith.constant 0 : index
    %4 = vector.load %arg7[%c0_5, %c0_6] : memref<1x32xf32, #tpu.memory_space<vmem>>, vector<1x32xf32>
    %5 = vector.broadcast %4 : vector<1x32xf32> to vector<16x32xf32>
    %6 = arith.addf %3, %5 : vector<16x32xf32>
    %c0_7 = arith.constant 0 : index
    %c0_8 = arith.constant 0 : index
    %7 = vector.load %arg8[%c0_7, %c0_8] : memref<96x32xf32, #tpu.memory_space<vmem>>, vector<96x32xf32>
    %cst_9 = arith.constant dense<0.000000e+00> : vector<16x32xf32>
    %8 = tpu.matmul %0, %7, %cst_9 {dimension_numbers = #tpu.dot_dimension_numbers<[1], [0], [0], [1], [0, 0, 1, 1], [], []>} : vector<16x96xf32>, vector<96x32xf32>, vector<16x32xf32> -> vector<16x32xf32>
    %c0_10 = arith.constant 0 : index
    %c0_11 = arith.constant 0 : index
    %9 = vector.load %arg9[%c0_10, %c0_11] : memref<1x32xf32, #tpu.memory_space<vmem>>, vector<1x32xf32>
    %10 = vector.broadcast %9 : vector<1x32xf32> to vector<16x32xf32>
    %11 = arith.addf %8, %10 : vector<16x32xf32>
    %c0_12 = arith.constant 0 : index
    %c0_13 = arith.constant 0 : index
    %12 = vector.load %arg10[%c0_12, %c0_13] : memref<32x32xf32, #tpu.memory_space<vmem>>, vector<32x32xf32>
    %cst_14 = arith.constant dense<0.000000e+00> : vector<16x32xf32>
    %13 = tpu.matmul %1, %12, %cst_14 {dimension_numbers = #tpu.dot_dimension_numbers<[1], [0], [0], [1], [0, 0, 1, 1], [], []>} : vector<16x32xf32>, vector<32x32xf32>, vector<16x32xf32> -> vector<16x32xf32>
    %c0_15 = arith.constant 0 : index
    %c0_16 = arith.constant 0 : index
    %14 = vector.load %arg11[%c0_15, %c0_16] : memref<1x32xf32, #tpu.memory_space<vmem>>, vector<1x32xf32>
    %15 = vector.broadcast %14 : vector<1x32xf32> to vector<16x32xf32>
    %16 = arith.addf %13, %15 : vector<16x32xf32>
    %c0_17 = arith.constant 0 : index
    %c0_18 = arith.constant 0 : index
    %17 = vector.load %arg12[%c0_17, %c0_18] : memref<32x96xf32, #tpu.memory_space<vmem>>, vector<32x96xf32>
    %c0_19 = arith.constant 0 : index
    %c0_20 = arith.constant 0 : index
    %18 = vector.load %arg13[%c0_19, %c0_20] : memref<1x96xf32, #tpu.memory_space<vmem>>, vector<1x96xf32>
    %19 = vector.extract_strided_slice %17 {offsets = [0, 0], sizes = [32, 32], strides = [1, 1]} : vector<32x96xf32> to vector<32x32xf32>
    %cst_21 = arith.constant dense<0.000000e+00> : vector<16x32xf32>
    %20 = tpu.matmul %6, %19, %cst_21 {dimension_numbers = #tpu.dot_dimension_numbers<[1], [0], [0], [1], [0, 0, 1, 1], [], []>} : vector<16x32xf32>, vector<32x32xf32>, vector<16x32xf32> -> vector<16x32xf32>
    %21 = vector.extract_strided_slice %18 {offsets = [0, 0], sizes = [1, 32], strides = [1, 1]} : vector<1x96xf32> to vector<1x32xf32>
    %22 = vector.broadcast %21 : vector<1x32xf32> to vector<16x32xf32>
    %23 = arith.addf %20, %22 : vector<16x32xf32>
    %24 = vector.extract_strided_slice %17 {offsets = [0, 32], sizes = [32, 32], strides = [1, 1]} : vector<32x96xf32> to vector<32x32xf32>
    %cst_22 = arith.constant dense<0.000000e+00> : vector<16x32xf32>
    %25 = tpu.matmul %11, %24, %cst_22 {dimension_numbers = #tpu.dot_dimension_numbers<[1], [0], [0], [1], [0, 0, 1, 1], [], []>} : vector<16x32xf32>, vector<32x32xf32>, vector<16x32xf32> -> vector<16x32xf32>
    %26 = vector.extract_strided_slice %18 {offsets = [0, 32], sizes = [1, 32], strides = [1, 1]} : vector<1x96xf32> to vector<1x32xf32>
    %27 = vector.broadcast %26 : vector<1x32xf32> to vector<16x32xf32>
    %28 = arith.addf %25, %27 : vector<16x32xf32>
    %29 = vector.extract_strided_slice %17 {offsets = [0, 64], sizes = [32, 32], strides = [1, 1]} : vector<32x96xf32> to vector<32x32xf32>
    %cst_23 = arith.constant dense<0.000000e+00> : vector<16x32xf32>
    %30 = tpu.matmul %16, %29, %cst_23 {dimension_numbers = #tpu.dot_dimension_numbers<[1], [0], [0], [1], [0, 0, 1, 1], [], []>} : vector<16x32xf32>, vector<32x32xf32>, vector<16x32xf32> -> vector<16x32xf32>
    %31 = vector.extract_strided_slice %18 {offsets = [0, 64], sizes = [1, 32], strides = [1, 1]} : vector<1x96xf32> to vector<1x32xf32>
    %32 = vector.broadcast %31 : vector<1x32xf32> to vector<16x32xf32>
    %33 = arith.addf %30, %32 : vector<16x32xf32>
    %cst_24 = arith.constant 0.000000e+00 : f32
    %34 = vector.broadcast %cst_24 : f32 to vector<8x8xf32>
    %35 = vector.extract_strided_slice %23 {offsets = [0, 0], sizes = [8, 8], strides = [1, 1]} : vector<16x32xf32> to vector<8x8xf32>
    %cst_25 = arith.constant 0.353553385 : f32
    %36 = vector.broadcast %cst_25 : f32 to vector<8x8xf32>
    %37 = arith.mulf %35, %36 : vector<8x8xf32>
    %38 = vector.extract_strided_slice %28 {offsets = [0, 0], sizes = [8, 8], strides = [1, 1]} : vector<16x32xf32> to vector<8x8xf32>
    %39 = vector.extract_strided_slice %33 {offsets = [0, 0], sizes = [8, 8], strides = [1, 1]} : vector<16x32xf32> to vector<8x8xf32>
    %cst_26 = arith.constant dense<0.000000e+00> : vector<8x8xf32>
    %40 = tpu.matmul %37, %38, %cst_26 {dimension_numbers = #tpu.dot_dimension_numbers<[1], [1], [0], [0], [0, 0, 1, 0], [], []>} : vector<8x8xf32>, vector<8x8xf32>, vector<8x8xf32> -> vector<8x8xf32>
    %cst_27 = arith.constant dense<0xFF800000> : vector<8xf32>
    %41 = vector.multi_reduction <maximumf>, %40, %cst_27 [1] : vector<8x8xf32> to vector<8xf32>
    %42 = vector.shape_cast %41 : vector<8xf32> to vector<8x1xf32>
    %43 = vector.broadcast %42 : vector<8x1xf32> to vector<8x8xf32>
    %44 = arith.subf %40, %43 : vector<8x8xf32>
    %45 = math.exp %44 : vector<8x8xf32>
    %cst_28 = arith.constant dense<0.000000e+00> : vector<8xf32>
    %46 = vector.multi_reduction <add>, %45, %cst_28 [1] : vector<8x8xf32> to vector<8xf32>
    %47 = vector.shape_cast %46 : vector<8xf32> to vector<8x1xf32>
    %48 = vector.broadcast %47 : vector<8x1xf32> to vector<8x8xf32>
    %49 = arith.divf %45, %48 : vector<8x8xf32>
    %cst_29 = arith.constant dense<0.000000e+00> : vector<8x8xf32>
    %50 = tpu.matmul %49, %39, %cst_29 {dimension_numbers = #tpu.dot_dimension_numbers<[1], [0], [0], [1], [0, 0, 1, 1], [], []>} : vector<8x8xf32>, vector<8x8xf32>, vector<8x8xf32> -> vector<8x8xf32>
    %51 = arith.addf %34, %49 : vector<8x8xf32>
    %52 = vector.extract_strided_slice %23 {offsets = [0, 8], sizes = [8, 8], strides = [1, 1]} : vector<16x32xf32> to vector<8x8xf32>
    %cst_30 = arith.constant 0.353553385 : f32
    %53 = vector.broadcast %cst_30 : f32 to vector<8x8xf32>
    %54 = arith.mulf %52, %53 : vector<8x8xf32>
    %55 = vector.extract_strided_slice %28 {offsets = [0, 8], sizes = [8, 8], strides = [1, 1]} : vector<16x32xf32> to vector<8x8xf32>
    %56 = vector.extract_strided_slice %33 {offsets = [0, 8], sizes = [8, 8], strides = [1, 1]} : vector<16x32xf32> to vector<8x8xf32>
    %cst_31 = arith.constant dense<0.000000e+00> : vector<8x8xf32>
    %57 = tpu.matmul %54, %55, %cst_31 {dimension_numbers = #tpu.dot_dimension_numbers<[1], [1], [0], [0], [0, 0, 1, 0], [], []>} : vector<8x8xf32>, vector<8x8xf32>, vector<8x8xf32> -> vector<8x8xf32>
    %cst_32 = arith.constant dense<0xFF800000> : vector<8xf32>
    %58 = vector.multi_reduction <maximumf>, %57, %cst_32 [1] : vector<8x8xf32> to vector<8xf32>
    %59 = vector.shape_cast %58 : vector<8xf32> to vector<8x1xf32>
    %60 = vector.broadcast %59 : vector<8x1xf32> to vector<8x8xf32>
    %61 = arith.subf %57, %60 : vector<8x8xf32>
    %62 = math.exp %61 : vector<8x8xf32>
    %cst_33 = arith.constant dense<0.000000e+00> : vector<8xf32>
    %63 = vector.multi_reduction <add>, %62, %cst_33 [1] : vector<8x8xf32> to vector<8xf32>
    %64 = vector.shape_cast %63 : vector<8xf32> to vector<8x1xf32>
    %65 = vector.broadcast %64 : vector<8x1xf32> to vector<8x8xf32>
    %66 = arith.divf %62, %65 : vector<8x8xf32>
    %cst_34 = arith.constant dense<0.000000e+00> : vector<8x8xf32>
    %67 = tpu.matmul %66, %56, %cst_34 {dimension_numbers = #tpu.dot_dimension_numbers<[1], [0], [0], [1], [0, 0, 1, 1], [], []>} : vector<8x8xf32>, vector<8x8xf32>, vector<8x8xf32> -> vector<8x8xf32>
    %68 = arith.addf %51, %66 : vector<8x8xf32>
    %69 = vector.extract_strided_slice %23 {offsets = [0, 16], sizes = [8, 8], strides = [1, 1]} : vector<16x32xf32> to vector<8x8xf32>
    %cst_35 = arith.constant 0.353553385 : f32
    %70 = vector.broadcast %cst_35 : f32 to vector<8x8xf32>
    %71 = arith.mulf %69, %70 : vector<8x8xf32>
    %72 = vector.extract_strided_slice %28 {offsets = [0, 16], sizes = [8, 8], strides = [1, 1]} : vector<16x32xf32> to vector<8x8xf32>
    %73 = vector.extract_strided_slice %33 {offsets = [0, 16], sizes = [8, 8], strides = [1, 1]} : vector<16x32xf32> to vector<8x8xf32>
    %cst_36 = arith.constant dense<0.000000e+00> : vector<8x8xf32>
    %74 = tpu.matmul %71, %72, %cst_36 {dimension_numbers = #tpu.dot_dimension_numbers<[1], [1], [0], [0], [0, 0, 1, 0], [], []>} : vector<8x8xf32>, vector<8x8xf32>, vector<8x8xf32> -> vector<8x8xf32>
    %cst_37 = arith.constant dense<0xFF800000> : vector<8xf32>
    %75 = vector.multi_reduction <maximumf>, %74, %cst_37 [1] : vector<8x8xf32> to vector<8xf32>
    %76 = vector.shape_cast %75 : vector<8xf32> to vector<8x1xf32>
    %77 = vector.broadcast %76 : vector<8x1xf32> to vector<8x8xf32>
    %78 = arith.subf %74, %77 : vector<8x8xf32>
    %79 = math.exp %78 : vector<8x8xf32>
    %cst_38 = arith.constant dense<0.000000e+00> : vector<8xf32>
    %80 = vector.multi_reduction <add>, %79, %cst_38 [1] : vector<8x8xf32> to vector<8xf32>
    %81 = vector.shape_cast %80 : vector<8xf32> to vector<8x1xf32>
    %82 = vector.broadcast %81 : vector<8x1xf32> to vector<8x8xf32>
    %83 = arith.divf %79, %82 : vector<8x8xf32>
    %cst_39 = arith.constant dense<0.000000e+00> : vector<8x8xf32>
    %84 = tpu.matmul %83, %73, %cst_39 {dimension_numbers = #tpu.dot_dimension_numbers<[1], [0], [0], [1], [0, 0, 1, 1], [], []>} : vector<8x8xf32>, vector<8x8xf32>, vector<8x8xf32> -> vector<8x8xf32>
    %85 = arith.addf %68, %83 : vector<8x8xf32>
    %86 = vector.extract_strided_slice %23 {offsets = [0, 24], sizes = [8, 8], strides = [1, 1]} : vector<16x32xf32> to vector<8x8xf32>
    %cst_40 = arith.constant 0.353553385 : f32
    %87 = vector.broadcast %cst_40 : f32 to vector<8x8xf32>
    %88 = arith.mulf %86, %87 : vector<8x8xf32>
    %89 = vector.extract_strided_slice %28 {offsets = [0, 24], sizes = [8, 8], strides = [1, 1]} : vector<16x32xf32> to vector<8x8xf32>
    %90 = vector.extract_strided_slice %33 {offsets = [0, 24], sizes = [8, 8], strides = [1, 1]} : vector<16x32xf32> to vector<8x8xf32>
    %cst_41 = arith.constant dense<0.000000e+00> : vector<8x8xf32>
    %91 = tpu.matmul %88, %89, %cst_41 {dimension_numbers = #tpu.dot_dimension_numbers<[1], [1], [0], [0], [0, 0, 1, 0], [], []>} : vector<8x8xf32>, vector<8x8xf32>, vector<8x8xf32> -> vector<8x8xf32>
    %cst_42 = arith.constant dense<0xFF800000> : vector<8xf32>
    %92 = vector.multi_reduction <maximumf>, %91, %cst_42 [1] : vector<8x8xf32> to vector<8xf32>
    %93 = vector.shape_cast %92 : vector<8xf32> to vector<8x1xf32>
    %94 = vector.broadcast %93 : vector<8x1xf32> to vector<8x8xf32>
    %95 = arith.subf %91, %94 : vector<8x8xf32>
    %96 = math.exp %95 : vector<8x8xf32>
    %cst_43 = arith.constant dense<0.000000e+00> : vector<8xf32>
    %97 = vector.multi_reduction <add>, %96, %cst_43 [1] : vector<8x8xf32> to vector<8xf32>
    %98 = vector.shape_cast %97 : vector<8xf32> to vector<8x1xf32>
    %99 = vector.broadcast %98 : vector<8x1xf32> to vector<8x8xf32>
    %100 = arith.divf %96, %99 : vector<8x8xf32>
    %cst_44 = arith.constant dense<0.000000e+00> : vector<8x8xf32>
    %101 = tpu.matmul %100, %90, %cst_44 {dimension_numbers = #tpu.dot_dimension_numbers<[1], [0], [0], [1], [0, 0, 1, 1], [], []>} : vector<8x8xf32>, vector<8x8xf32>, vector<8x8xf32> -> vector<8x8xf32>
    %102 = arith.addf %85, %100 : vector<8x8xf32>
    %103 = tpu.concatenate %50, %67, %84, %101 in 1 : vector<8x8xf32>, vector<8x8xf32>, vector<8x8xf32>, vector<8x8xf32> -> vector<8x32xf32>
    %cst_45 = arith.constant 2.500000e-01 : f32
    %104 = vector.broadcast %cst_45 : f32 to vector<8x8xf32>
    %105 = arith.mulf %102, %104 : vector<8x8xf32>
    %c0_46 = arith.constant 0 : index
    %c0_47 = arith.constant 0 : index
    %106 = vector.load %arg39[%c0_46, %c0_47] : memref<16x8xf32, #tpu.memory_space<vmem>>, vector<8x8xf32>
    tpu.vector_store %arg39[%c0_46, %c0_47], %105 {strides = array<i32>} : memref<16x8xf32, #tpu.memory_space<vmem>>, vector<8x8xf32>,
    %cst_48 = arith.constant 0.000000e+00 : f32
    %107 = vector.broadcast %cst_48 : f32 to vector<8x8xf32>
    %108 = vector.extract_strided_slice %23 {offsets = [8, 0], sizes = [8, 8], strides = [1, 1]} : vector<16x32xf32> to vector<8x8xf32>
    %cst_49 = arith.constant 0.353553385 : f32
    %109 = vector.broadcast %cst_49 : f32 to vector<8x8xf32>
    %110 = arith.mulf %108, %109 : vector<8x8xf32>
    %111 = vector.extract_strided_slice %28 {offsets = [8, 0], sizes = [8, 8], strides = [1, 1]} : vector<16x32xf32> to vector<8x8xf32>
    %112 = vector.extract_strided_slice %33 {offsets = [8, 0], sizes = [8, 8], strides = [1, 1]} : vector<16x32xf32> to vector<8x8xf32>
    %cst_50 = arith.constant dense<0.000000e+00> : vector<8x8xf32>
    %113 = tpu.matmul %110, %111, %cst_50 {dimension_numbers = #tpu.dot_dimension_numbers<[1], [1], [0], [0], [0, 0, 1, 0], [], []>} : vector<8x8xf32>, vector<8x8xf32>, vector<8x8xf32> -> vector<8x8xf32>
    %cst_51 = arith.constant dense<0xFF800000> : vector<8xf32>
    %114 = vector.multi_reduction <maximumf>, %113, %cst_51 [1] : vector<8x8xf32> to vector<8xf32>
    %115 = vector.shape_cast %114 : vector<8xf32> to vector<8x1xf32>
    %116 = vector.broadcast %115 : vector<8x1xf32> to vector<8x8xf32>
    %117 = arith.subf %113, %116 : vector<8x8xf32>
    %118 = math.exp %117 : vector<8x8xf32>
    %cst_52 = arith.constant dense<0.000000e+00> : vector<8xf32>
    %119 = vector.multi_reduction <add>, %118, %cst_52 [1] : vector<8x8xf32> to vector<8xf32>
    %120 = vector.shape_cast %119 : vector<8xf32> to vector<8x1xf32>
    %121 = vector.broadcast %120 : vector<8x1xf32> to vector<8x8xf32>
    %122 = arith.divf %118, %121 : vector<8x8xf32>
    %cst_53 = arith.constant dense<0.000000e+00> : vector<8x8xf32>
    %123 = tpu.matmul %122, %112, %cst_53 {dimension_numbers = #tpu.dot_dimension_numbers<[1], [0], [0], [1], [0, 0, 1, 1], [], []>} : vector<8x8xf32>, vector<8x8xf32>, vector<8x8xf32> -> vector<8x8xf32>
    %124 = arith.addf %107, %122 : vector<8x8xf32>
    %125 = vector.extract_strided_slice %23 {offsets = [8, 8], sizes = [8, 8], strides = [1, 1]} : vector<16x32xf32> to vector<8x8xf32>
    %cst_54 = arith.constant 0.353553385 : f32
    %126 = vector.broadcast %cst_54 : f32 to vector<8x8xf32>
    %127 = arith.mulf %125, %126 : vector<8x8xf32>
    %128 = vector.extract_strided_slice %28 {offsets = [8, 8], sizes = [8, 8], strides = [1, 1]} : vector<16x32xf32> to vector<8x8xf32>
    %129 = vector.extract_strided_slice %33 {offsets = [8, 8], sizes = [8, 8], strides = [1, 1]} : vector<16x32xf32> to vector<8x8xf32>
    %cst_55 = arith.constant dense<0.000000e+00> : vector<8x8xf32>
    %130 = tpu.matmul %127, %128, %cst_55 {dimension_numbers = #tpu.dot_dimension_numbers<[1], [1], [0], [0], [0, 0, 1, 0], [], []>} : vector<8x8xf32>, vector<8x8xf32>, vector<8x8xf32> -> vector<8x8xf32>
    %cst_56 = arith.constant dense<0xFF800000> : vector<8xf32>
    %131 = vector.multi_reduction <maximumf>, %130, %cst_56 [1] : vector<8x8xf32> to vector<8xf32>
    %132 = vector.shape_cast %131 : vector<8xf32> to vector<8x1xf32>
    %133 = vector.broadcast %132 : vector<8x1xf32> to vector<8x8xf32>
    %134 = arith.subf %130, %133 : vector<8x8xf32>
    %135 = math.exp %134 : vector<8x8xf32>
    %cst_57 = arith.constant dense<0.000000e+00> : vector<8xf32>
    %136 = vector.multi_reduction <add>, %135, %cst_57 [1] : vector<8x8xf32> to vector<8xf32>
    %137 = vector.shape_cast %136 : vector<8xf32> to vector<8x1xf32>
    %138 = vector.broadcast %137 : vector<8x1xf32> to vector<8x8xf32>
    %139 = arith.divf %135, %138 : vector<8x8xf32>
    %cst_58 = arith.constant dense<0.000000e+00> : vector<8x8xf32>
    %140 = tpu.matmul %139, %129, %cst_58 {dimension_numbers = #tpu.dot_dimension_numbers<[1], [0], [0], [1], [0, 0, 1, 1], [], []>} : vector<8x8xf32>, vector<8x8xf32>, vector<8x8xf32> -> vector<8x8xf32>
    %141 = arith.addf %124, %139 : vector<8x8xf32>
    %142 = vector.extract_strided_slice %23 {offsets = [8, 16], sizes = [8, 8], strides = [1, 1]} : vector<16x32xf32> to vector<8x8xf32>
    %cst_59 = arith.constant 0.353553385 : f32
    %143 = vector.broadcast %cst_59 : f32 to vector<8x8xf32>
    %144 = arith.mulf %142, %143 : vector<8x8xf32>
    %145 = vector.extract_strided_slice %28 {offsets = [8, 16], sizes = [8, 8], strides = [1, 1]} : vector<16x32xf32> to vector<8x8xf32>
    %146 = vector.extract_strided_slice %33 {offsets = [8, 16], sizes = [8, 8], strides = [1, 1]} : vector<16x32xf32> to vector<8x8xf32>
    %cst_60 = arith.constant dense<0.000000e+00> : vector<8x8xf32>
    %147 = tpu.matmul %144, %145, %cst_60 {dimension_numbers = #tpu.dot_dimension_numbers<[1], [1], [0], [0], [0, 0, 1, 0], [], []>} : vector<8x8xf32>, vector<8x8xf32>, vector<8x8xf32> -> vector<8x8xf32>
    %cst_61 = arith.constant dense<0xFF800000> : vector<8xf32>
    %148 = vector.multi_reduction <maximumf>, %147, %cst_61 [1] : vector<8x8xf32> to vector<8xf32>
    %149 = vector.shape_cast %148 : vector<8xf32> to vector<8x1xf32>
    %150 = vector.broadcast %149 : vector<8x1xf32> to vector<8x8xf32>
    %151 = arith.subf %147, %150 : vector<8x8xf32>
    %152 = math.exp %151 : vector<8x8xf32>
    %cst_62 = arith.constant dense<0.000000e+00> : vector<8xf32>
    %153 = vector.multi_reduction <add>, %152, %cst_62 [1] : vector<8x8xf32> to vector<8xf32>
    %154 = vector.shape_cast %153 : vector<8xf32> to vector<8x1xf32>
    %155 = vector.broadcast %154 : vector<8x1xf32> to vector<8x8xf32>
    %156 = arith.divf %152, %155 : vector<8x8xf32>
    %cst_63 = arith.constant dense<0.000000e+00> : vector<8x8xf32>
    %157 = tpu.matmul %156, %146, %cst_63 {dimension_numbers = #tpu.dot_dimension_numbers<[1], [0], [0], [1], [0, 0, 1, 1], [], []>} : vector<8x8xf32>, vector<8x8xf32>, vector<8x8xf32> -> vector<8x8xf32>
    %158 = arith.addf %141, %156 : vector<8x8xf32>
    %159 = vector.extract_strided_slice %23 {offsets = [8, 24], sizes = [8, 8], strides = [1, 1]} : vector<16x32xf32> to vector<8x8xf32>
    %cst_64 = arith.constant 0.353553385 : f32
    %160 = vector.broadcast %cst_64 : f32 to vector<8x8xf32>
    %161 = arith.mulf %159, %160 : vector<8x8xf32>
    %162 = vector.extract_strided_slice %28 {offsets = [8, 24], sizes = [8, 8], strides = [1, 1]} : vector<16x32xf32> to vector<8x8xf32>
    %163 = vector.extract_strided_slice %33 {offsets = [8, 24], sizes = [8, 8], strides = [1, 1]} : vector<16x32xf32> to vector<8x8xf32>
    %cst_65 = arith.constant dense<0.000000e+00> : vector<8x8xf32>
    %164 = tpu.matmul %161, %162, %cst_65 {dimension_numbers = #tpu.dot_dimension_numbers<[1], [1], [0], [0], [0, 0, 1, 0], [], []>} : vector<8x8xf32>, vector<8x8xf32>, vector<8x8xf32> -> vector<8x8xf32>
    %cst_66 = arith.constant dense<0xFF800000> : vector<8xf32>
    %165 = vector.multi_reduction <maximumf>, %164, %cst_66 [1] : vector<8x8xf32> to vector<8xf32>
    %166 = vector.shape_cast %165 : vector<8xf32> to vector<8x1xf32>
    %167 = vector.broadcast %166 : vector<8x1xf32> to vector<8x8xf32>
    %168 = arith.subf %164, %167 : vector<8x8xf32>
    %169 = math.exp %168 : vector<8x8xf32>
    %cst_67 = arith.constant dense<0.000000e+00> : vector<8xf32>
    %170 = vector.multi_reduction <add>, %169, %cst_67 [1] : vector<8x8xf32> to vector<8xf32>
    %171 = vector.shape_cast %170 : vector<8xf32> to vector<8x1xf32>
    %172 = vector.broadcast %171 : vector<8x1xf32> to vector<8x8xf32>
    %173 = arith.divf %169, %172 : vector<8x8xf32>
    %cst_68 = arith.constant dense<0.000000e+00> : vector<8x8xf32>
    %174 = tpu.matmul %173, %163, %cst_68 {dimension_numbers = #tpu.dot_dimension_numbers<[1], [0], [0], [1], [0, 0, 1, 1], [], []>} : vector<8x8xf32>, vector<8x8xf32>, vector<8x8xf32> -> vector<8x8xf32>
    %175 = arith.addf %158, %173 : vector<8x8xf32>
    %176 = tpu.concatenate %123, %140, %157, %174 in 1 : vector<8x8xf32>, vector<8x8xf32>, vector<8x8xf32>, vector<8x8xf32> -> vector<8x32xf32>
    %cst_69 = arith.constant 2.500000e-01 : f32
    %177 = vector.broadcast %cst_69 : f32 to vector<8x8xf32>
    %178 = arith.mulf %175, %177 : vector<8x8xf32>
    %c8 = arith.constant 8 : index
    %c0_70 = arith.constant 0 : index
    %179 = vector.load %arg39[%c8, %c0_70] : memref<16x8xf32, #tpu.memory_space<vmem>>, vector<8x8xf32>
    tpu.vector_store %arg39[%c8, %c0_70], %178 {strides = array<i32>} : memref<16x8xf32, #tpu.memory_space<vmem>>, vector<8x8xf32>,
    %180 = tpu.concatenate %103, %176 in 0 : vector<8x32xf32>, vector<8x32xf32> -> vector<16x32xf32>
    %c0_71 = arith.constant 0 : index
    %c0_72 = arith.constant 0 : index
    %181 = vector.load %arg14[%c0_71, %c0_72] : memref<32x32xf32, #tpu.memory_space<vmem>>, vector<32x32xf32>
    %cst_73 = arith.constant dense<0.000000e+00> : vector<16x32xf32>
    %182 = tpu.matmul %180, %181, %cst_73 {dimension_numbers = #tpu.dot_dimension_numbers<[1], [0], [0], [1], [0, 0, 1, 1], [], []>} : vector<16x32xf32>, vector<32x32xf32>, vector<16x32xf32> -> vector<16x32xf32>
    %c0_74 = arith.constant 0 : index
    %c0_75 = arith.constant 0 : index
    %183 = vector.load %arg15[%c0_74, %c0_75] : memref<1x32xf32, #tpu.memory_space<vmem>>, vector<1x32xf32>
    %184 = vector.broadcast %183 : vector<1x32xf32> to vector<16x32xf32>
    %185 = arith.addf %182, %184 : vector<16x32xf32>
    %186 = arith.addf %1, %185 : vector<16x32xf32>
    %cst_76 = arith.constant dense<0.000000e+00> : vector<16xf32>
    %187 = vector.multi_reduction <add>, %186, %cst_76 [1] : vector<16x32xf32> to vector<16xf32>
    %188 = vector.shape_cast %187 : vector<16xf32> to vector<16x1xf32>
    %cst_77 = arith.constant 3.200000e+01 : f32
    %189 = vector.broadcast %cst_77 : f32 to vector<16x1xf32>
    %190 = arith.divf %188, %189 : vector<16x1xf32>
    %191 = vector.broadcast %190 : vector<16x1xf32> to vector<16x32xf32>
    %192 = arith.subf %186, %191 : vector<16x32xf32>
    %193 = arith.mulf %192, %192 : vector<16x32xf32>
    %cst_78 = arith.constant dense<0.000000e+00> : vector<16xf32>
    %194 = vector.multi_reduction <add>, %193, %cst_78 [1] : vector<16x32xf32> to vector<16xf32>
    %195 = vector.shape_cast %194 : vector<16xf32> to vector<16x1xf32>
    %cst_79 = arith.constant 3.200000e+01 : f32
    %196 = vector.broadcast %cst_79 : f32 to vector<16x1xf32>
    %197 = arith.divf %195, %196 : vector<16x1xf32>
    %198 = vector.broadcast %190 : vector<16x1xf32> to vector<16x32xf32>
    %199 = arith.subf %186, %198 : vector<16x32xf32>
    %cst_80 = arith.constant 9.99999974E-6 : f32
    %200 = vector.broadcast %cst_80 : f32 to vector<16x1xf32>
    %201 = arith.addf %197, %200 : vector<16x1xf32>
    %202 = math.rsqrt %201 : vector<16x1xf32>
    %203 = vector.broadcast %202 : vector<16x1xf32> to vector<16x32xf32>
    %204 = arith.mulf %199, %203 : vector<16x32xf32>
    %c0_81 = arith.constant 0 : index
    %c0_82 = arith.constant 0 : index
    %205 = vector.load %arg16[%c0_81, %c0_82] : memref<1x32xf32, #tpu.memory_space<vmem>>, vector<1x32xf32>
    %206 = vector.broadcast %205 : vector<1x32xf32> to vector<16x32xf32>
    %207 = arith.mulf %204, %206 : vector<16x32xf32>
    %c0_83 = arith.constant 0 : index
    %c0_84 = arith.constant 0 : index
    %208 = vector.load %arg17[%c0_83, %c0_84] : memref<1x32xf32, #tpu.memory_space<vmem>>, vector<1x32xf32>
    %209 = vector.broadcast %208 : vector<1x32xf32> to vector<16x32xf32>
    %210 = arith.addf %207, %209 : vector<16x32xf32>
    %c0_85 = arith.constant 0 : index
    %c0_86 = arith.constant 0 : index
    %211 = vector.load %arg18[%c0_85, %c0_86] : memref<32x32xf32, #tpu.memory_space<vmem>>, vector<32x32xf32>
    %cst_87 = arith.constant dense<0.000000e+00> : vector<16x32xf32>
    %212 = tpu.matmul %210, %211, %cst_87 {dimension_numbers = #tpu.dot_dimension_numbers<[1], [0], [0], [1], [0, 0, 1, 1], [], []>} : vector<16x32xf32>, vector<32x32xf32>, vector<16x32xf32> -> vector<16x32xf32>
    %c0_88 = arith.constant 0 : index
    %c0_89 = arith.constant 0 : index
    %213 = vector.load %arg19[%c0_88, %c0_89] : memref<1x32xf32, #tpu.memory_space<vmem>>, vector<1x32xf32>
    %214 = vector.broadcast %213 : vector<1x32xf32> to vector<16x32xf32>
    %215 = arith.addf %212, %214 : vector<16x32xf32>
    %c0_90 = arith.constant 0 : index
    %c0_91 = arith.constant 0 : index
    %216 = vector.load %arg3[%c0_90, %c0_91] : memref<16x96xf32, #tpu.memory_space<vmem>>, vector<16x96xf32>
    %c0_92 = arith.constant 0 : index
    %c0_93 = arith.constant 0 : index
    %217 = vector.load %arg20[%c0_92, %c0_93] : memref<96x32xf32, #tpu.memory_space<vmem>>, vector<96x32xf32>
    %cst_94 = arith.constant dense<0.000000e+00> : vector<16x32xf32>
    %218 = tpu.matmul %216, %217, %cst_94 {dimension_numbers = #tpu.dot_dimension_numbers<[1], [0], [0], [1], [0, 0, 1, 1], [], []>} : vector<16x96xf32>, vector<96x32xf32>, vector<16x32xf32> -> vector<16x32xf32>
    %c0_95 = arith.constant 0 : index
    %c0_96 = arith.constant 0 : index
    %219 = vector.load %arg21[%c0_95, %c0_96] : memref<1x32xf32, #tpu.memory_space<vmem>>, vector<1x32xf32>
    %220 = vector.broadcast %219 : vector<1x32xf32> to vector<16x32xf32>
    %221 = arith.addf %218, %220 : vector<16x32xf32>
    %222 = arith.addf %215, %221 : vector<16x32xf32>
    %c0_97 = arith.constant 0 : index
    %c0_98 = arith.constant 0 : index
    %223 = vector.load %arg4[%c0_97, %c0_98] : memref<128x64xf32, #tpu.memory_space<vmem>>, vector<128x64xf32>
    %c0_99 = arith.constant 0 : index
    %c0_100 = arith.constant 0 : index
    %224 = vector.load %arg22[%c0_99, %c0_100] : memref<64x32xf32, #tpu.memory_space<vmem>>, vector<64x32xf32>
    %cst_101 = arith.constant dense<0.000000e+00> : vector<128x32xf32>
    %225 = tpu.matmul %223, %224, %cst_101 {dimension_numbers = #tpu.dot_dimension_numbers<[1], [0], [0], [1], [0, 0, 1, 1], [], []>} : vector<128x64xf32>, vector<64x32xf32>, vector<128x32xf32> -> vector<128x32xf32>
    %c0_102 = arith.constant 0 : index
    %c0_103 = arith.constant 0 : index
    %226 = vector.load %arg23[%c0_102, %c0_103] : memref<1x32xf32, #tpu.memory_space<vmem>>, vector<1x32xf32>
    %227 = vector.broadcast %226 : vector<1x32xf32> to vector<128x32xf32>
    %228 = arith.addf %225, %227 : vector<128x32xf32>
    %c0_104 = arith.constant 0 : index
    %c0_105 = arith.constant 0 : index
    %229 = vector.load %arg5[%c0_104, %c0_105] : memref<128x32xf32, #tpu.memory_space<vmem>>, vector<128x32xf32>
    %c0_106 = arith.constant 0 : index
    %c0_107 = arith.constant 0 : index
    %230 = vector.load %arg24[%c0_106, %c0_107] : memref<32x32xf32, #tpu.memory_space<vmem>>, vector<32x32xf32>
    %cst_108 = arith.constant dense<0.000000e+00> : vector<128x32xf32>
    %231 = tpu.matmul %229, %230, %cst_108 {dimension_numbers = #tpu.dot_dimension_numbers<[1], [0], [0], [1], [0, 0, 1, 1], [], []>} : vector<128x32xf32>, vector<32x32xf32>, vector<128x32xf32> -> vector<128x32xf32>
    %c0_109 = arith.constant 0 : index
    %c0_110 = arith.constant 0 : index
    %232 = vector.load %arg25[%c0_109, %c0_110] : memref<1x32xf32, #tpu.memory_space<vmem>>, vector<1x32xf32>
    %233 = vector.broadcast %232 : vector<1x32xf32> to vector<128x32xf32>
    %234 = arith.addf %231, %233 : vector<128x32xf32>
    %c0_111 = arith.constant 0 : index
    %c0_112 = arith.constant 0 : index
    %235 = vector.load %arg26[%c0_111, %c0_112] : memref<32x96xf32, #tpu.memory_space<vmem>>, vector<32x96xf32>
    %c0_113 = arith.constant 0 : index
    %c0_114 = arith.constant 0 : index
    %236 = vector.load %arg27[%c0_113, %c0_114] : memref<1x96xf32, #tpu.memory_space<vmem>>, vector<1x96xf32>
    %237 = vector.extract_strided_slice %235 {offsets = [0, 0], sizes = [32, 32], strides = [1, 1]} : vector<32x96xf32> to vector<32x32xf32>
    %cst_115 = arith.constant dense<0.000000e+00> : vector<16x32xf32>
    %238 = tpu.matmul %222, %237, %cst_115 {dimension_numbers = #tpu.dot_dimension_numbers<[1], [0], [0], [1], [0, 0, 1, 1], [], []>} : vector<16x32xf32>, vector<32x32xf32>, vector<16x32xf32> -> vector<16x32xf32>
    %239 = vector.extract_strided_slice %236 {offsets = [0, 0], sizes = [1, 32], strides = [1, 1]} : vector<1x96xf32> to vector<1x32xf32>
    %240 = vector.broadcast %239 : vector<1x32xf32> to vector<16x32xf32>
    %241 = arith.addf %238, %240 : vector<16x32xf32>
    %242 = vector.extract_strided_slice %235 {offsets = [0, 32], sizes = [32, 32], strides = [1, 1]} : vector<32x96xf32> to vector<32x32xf32>
    %cst_116 = arith.constant dense<0.000000e+00> : vector<128x32xf32>
    %243 = tpu.matmul %228, %242, %cst_116 {dimension_numbers = #tpu.dot_dimension_numbers<[1], [0], [0], [1], [0, 0, 1, 1], [], []>} : vector<128x32xf32>, vector<32x32xf32>, vector<128x32xf32> -> vector<128x32xf32>
    %244 = vector.extract_strided_slice %236 {offsets = [0, 32], sizes = [1, 32], strides = [1, 1]} : vector<1x96xf32> to vector<1x32xf32>
    %245 = vector.broadcast %244 : vector<1x32xf32> to vector<128x32xf32>
    %246 = arith.addf %243, %245 : vector<128x32xf32>
    %247 = vector.extract_strided_slice %235 {offsets = [0, 64], sizes = [32, 32], strides = [1, 1]} : vector<32x96xf32> to vector<32x32xf32>
    %cst_117 = arith.constant dense<0.000000e+00> : vector<128x32xf32>
    %248 = tpu.matmul %234, %247, %cst_117 {dimension_numbers = #tpu.dot_dimension_numbers<[1], [0], [0], [1], [0, 0, 1, 1], [], []>} : vector<128x32xf32>, vector<32x32xf32>, vector<128x32xf32> -> vector<128x32xf32>
    %249 = vector.extract_strided_slice %236 {offsets = [0, 64], sizes = [1, 32], strides = [1, 1]} : vector<1x96xf32> to vector<1x32xf32>
    %250 = vector.broadcast %249 : vector<1x32xf32> to vector<128x32xf32>
    %251 = arith.addf %248, %250 : vector<128x32xf32>
    %252 = vector.extract_strided_slice %241 {offsets = [0, 0], sizes = [1, 32], strides = [1, 1]} : vector<16x32xf32> to vector<1x32xf32>
    %253 = vector.extract_strided_slice %246 {offsets = [0, 0], sizes = [16, 32], strides = [1, 1]} : vector<128x32xf32> to vector<16x32xf32>
    %254 = vector.extract_strided_slice %251 {offsets = [0, 0], sizes = [16, 32], strides = [1, 1]} : vector<128x32xf32> to vector<16x32xf32>
    %255 = vector.extract_strided_slice %252 {offsets = [0, 0], sizes = [1, 8], strides = [1, 1]} : vector<1x32xf32> to vector<1x8xf32>
    %cst_118 = arith.constant 0.353553385 : f32
    %256 = vector.broadcast %cst_118 : f32 to vector<1x8xf32>
    %257 = arith.mulf %255, %256 : vector<1x8xf32>
    %258 = vector.extract_strided_slice %253 {offsets = [0, 0], sizes = [16, 8], strides = [1, 1]} : vector<16x32xf32> to vector<16x8xf32>
    %cst_119 = arith.constant dense<0.000000e+00> : vector<1x16xf32>
    %259 = tpu.matmul %257, %258, %cst_119 {dimension_numbers = #tpu.dot_dimension_numbers<[1], [1], [0], [0], [0, 0, 1, 0], [], []>} : vector<1x8xf32>, vector<16x8xf32>, vector<1x16xf32> -> vector<1x16xf32>
    %cst_120 = arith.constant dense<0xFF800000> : vector<1xf32>
    %260 = vector.multi_reduction <maximumf>, %259, %cst_120 [1] : vector<1x16xf32> to vector<1xf32>
    %261 = vector.shape_cast %260 : vector<1xf32> to vector<1x1xf32>
    %262 = vector.broadcast %261 : vector<1x1xf32> to vector<1x16xf32>
    %263 = arith.subf %259, %262 : vector<1x16xf32>
    %264 = math.exp %263 : vector<1x16xf32>
    %cst_121 = arith.constant dense<0.000000e+00> : vector<1xf32>
    %265 = vector.multi_reduction <add>, %264, %cst_121 [1] : vector<1x16xf32> to vector<1xf32>
    %266 = vector.shape_cast %265 : vector<1xf32> to vector<1x1xf32>
    %267 = vector.broadcast %266 : vector<1x1xf32> to vector<1x16xf32>
    %268 = arith.divf %264, %267 : vector<1x16xf32>
    %269 = vector.extract_strided_slice %254 {offsets = [0, 0], sizes = [16, 8], strides = [1, 1]} : vector<16x32xf32> to vector<16x8xf32>
    %cst_122 = arith.constant dense<0.000000e+00> : vector<1x8xf32>
    %270 = tpu.matmul %268, %269, %cst_122 {dimension_numbers = #tpu.dot_dimension_numbers<[1], [0], [0], [1], [0, 0, 1, 1], [], []>} : vector<1x16xf32>, vector<16x8xf32>, vector<1x8xf32> -> vector<1x8xf32>
    %271 = vector.extract_strided_slice %252 {offsets = [0, 8], sizes = [1, 8], strides = [1, 1]} : vector<1x32xf32> to vector<1x8xf32>
    %cst_123 = arith.constant 0.353553385 : f32
    %272 = vector.broadcast %cst_123 : f32 to vector<1x8xf32>
    %273 = arith.mulf %271, %272 : vector<1x8xf32>
    %274 = vector.extract_strided_slice %253 {offsets = [0, 8], sizes = [16, 8], strides = [1, 1]} : vector<16x32xf32> to vector<16x8xf32>
    %cst_124 = arith.constant dense<0.000000e+00> : vector<1x16xf32>
    %275 = tpu.matmul %273, %274, %cst_124 {dimension_numbers = #tpu.dot_dimension_numbers<[1], [1], [0], [0], [0, 0, 1, 0], [], []>} : vector<1x8xf32>, vector<16x8xf32>, vector<1x16xf32> -> vector<1x16xf32>
    %cst_125 = arith.constant dense<0xFF800000> : vector<1xf32>
    %276 = vector.multi_reduction <maximumf>, %275, %cst_125 [1] : vector<1x16xf32> to vector<1xf32>
    %277 = vector.shape_cast %276 : vector<1xf32> to vector<1x1xf32>
    %278 = vector.broadcast %277 : vector<1x1xf32> to vector<1x16xf32>
    %279 = arith.subf %275, %278 : vector<1x16xf32>
    %280 = math.exp %279 : vector<1x16xf32>
    %cst_126 = arith.constant dense<0.000000e+00> : vector<1xf32>
    %281 = vector.multi_reduction <add>, %280, %cst_126 [1] : vector<1x16xf32> to vector<1xf32>
    %282 = vector.shape_cast %281 : vector<1xf32> to vector<1x1xf32>
    %283 = vector.broadcast %282 : vector<1x1xf32> to vector<1x16xf32>
    %284 = arith.divf %280, %283 : vector<1x16xf32>
    %285 = vector.extract_strided_slice %254 {offsets = [0, 8], sizes = [16, 8], strides = [1, 1]} : vector<16x32xf32> to vector<16x8xf32>
    %cst_127 = arith.constant dense<0.000000e+00> : vector<1x8xf32>
    %286 = tpu.matmul %284, %285, %cst_127 {dimension_numbers = #tpu.dot_dimension_numbers<[1], [0], [0], [1], [0, 0, 1, 1], [], []>} : vector<1x16xf32>, vector<16x8xf32>, vector<1x8xf32> -> vector<1x8xf32>
    %287 = vector.extract_strided_slice %252 {offsets = [0, 16], sizes = [1, 8], strides = [1, 1]} : vector<1x32xf32> to vector<1x8xf32>
    %cst_128 = arith.constant 0.353553385 : f32
    %288 = vector.broadcast %cst_128 : f32 to vector<1x8xf32>
    %289 = arith.mulf %287, %288 : vector<1x8xf32>
    %290 = vector.extract_strided_slice %253 {offsets = [0, 16], sizes = [16, 8], strides = [1, 1]} : vector<16x32xf32> to vector<16x8xf32>
    %cst_129 = arith.constant dense<0.000000e+00> : vector<1x16xf32>
    %291 = tpu.matmul %289, %290, %cst_129 {dimension_numbers = #tpu.dot_dimension_numbers<[1], [1], [0], [0], [0, 0, 1, 0], [], []>} : vector<1x8xf32>, vector<16x8xf32>, vector<1x16xf32> -> vector<1x16xf32>
    %cst_130 = arith.constant dense<0xFF800000> : vector<1xf32>
    %292 = vector.multi_reduction <maximumf>, %291, %cst_130 [1] : vector<1x16xf32> to vector<1xf32>
    %293 = vector.shape_cast %292 : vector<1xf32> to vector<1x1xf32>
    %294 = vector.broadcast %293 : vector<1x1xf32> to vector<1x16xf32>
    %295 = arith.subf %291, %294 : vector<1x16xf32>
    %296 = math.exp %295 : vector<1x16xf32>
    %cst_131 = arith.constant dense<0.000000e+00> : vector<1xf32>
    %297 = vector.multi_reduction <add>, %296, %cst_131 [1] : vector<1x16xf32> to vector<1xf32>
    %298 = vector.shape_cast %297 : vector<1xf32> to vector<1x1xf32>
    %299 = vector.broadcast %298 : vector<1x1xf32> to vector<1x16xf32>
    %300 = arith.divf %296, %299 : vector<1x16xf32>
    %301 = vector.extract_strided_slice %254 {offsets = [0, 16], sizes = [16, 8], strides = [1, 1]} : vector<16x32xf32> to vector<16x8xf32>
    %cst_132 = arith.constant dense<0.000000e+00> : vector<1x8xf32>
    %302 = tpu.matmul %300, %301, %cst_132 {dimension_numbers = #tpu.dot_dimension_numbers<[1], [0], [0], [1], [0, 0, 1, 1], [], []>} : vector<1x16xf32>, vector<16x8xf32>, vector<1x8xf32> -> vector<1x8xf32>
    %303 = vector.extract_strided_slice %252 {offsets = [0, 24], sizes = [1, 8], strides = [1, 1]} : vector<1x32xf32> to vector<1x8xf32>
    %cst_133 = arith.constant 0.353553385 : f32
    %304 = vector.broadcast %cst_133 : f32 to vector<1x8xf32>
    %305 = arith.mulf %303, %304 : vector<1x8xf32>
    %306 = vector.extract_strided_slice %253 {offsets = [0, 24], sizes = [16, 8], strides = [1, 1]} : vector<16x32xf32> to vector<16x8xf32>
    %cst_134 = arith.constant dense<0.000000e+00> : vector<1x16xf32>
    %307 = tpu.matmul %305, %306, %cst_134 {dimension_numbers = #tpu.dot_dimension_numbers<[1], [1], [0], [0], [0, 0, 1, 0], [], []>} : vector<1x8xf32>, vector<16x8xf32>, vector<1x16xf32> -> vector<1x16xf32>
    %cst_135 = arith.constant dense<0xFF800000> : vector<1xf32>
    %308 = vector.multi_reduction <maximumf>, %307, %cst_135 [1] : vector<1x16xf32> to vector<1xf32>
    %309 = vector.shape_cast %308 : vector<1xf32> to vector<1x1xf32>
    %310 = vector.broadcast %309 : vector<1x1xf32> to vector<1x16xf32>
    %311 = arith.subf %307, %310 : vector<1x16xf32>
    %312 = math.exp %311 : vector<1x16xf32>
    %cst_136 = arith.constant dense<0.000000e+00> : vector<1xf32>
    %313 = vector.multi_reduction <add>, %312, %cst_136 [1] : vector<1x16xf32> to vector<1xf32>
    %314 = vector.shape_cast %313 : vector<1xf32> to vector<1x1xf32>
    %315 = vector.broadcast %314 : vector<1x1xf32> to vector<1x16xf32>
    %316 = arith.divf %312, %315 : vector<1x16xf32>
    %317 = vector.extract_strided_slice %254 {offsets = [0, 24], sizes = [16, 8], strides = [1, 1]} : vector<16x32xf32> to vector<16x8xf32>
    %cst_137 = arith.constant dense<0.000000e+00> : vector<1x8xf32>
    %318 = tpu.matmul %316, %317, %cst_137 {dimension_numbers = #tpu.dot_dimension_numbers<[1], [0], [0], [1], [0, 0, 1, 1], [], []>} : vector<1x16xf32>, vector<16x8xf32>, vector<1x8xf32> -> vector<1x8xf32>
    %319 = tpu.concatenate %270, %286, %302, %318 in 1 : vector<1x8xf32>, vector<1x8xf32>, vector<1x8xf32>, vector<1x8xf32> -> vector<1x32xf32>
    %320 = vector.extract_strided_slice %241 {offsets = [1, 0], sizes = [1, 32], strides = [1, 1]} : vector<16x32xf32> to vector<1x32xf32>
    %321 = vector.extract_strided_slice %246 {offsets = [16, 0], sizes = [16, 32], strides = [1, 1]} : vector<128x32xf32> to vector<16x32xf32>
    %322 = vector.extract_strided_slice %251 {offsets = [16, 0], sizes = [16, 32], strides = [1, 1]} : vector<128x32xf32> to vector<16x32xf32>
    %323 = vector.extract_strided_slice %320 {offsets = [0, 0], sizes = [1, 8], strides = [1, 1]} : vector<1x32xf32> to vector<1x8xf32>
    %cst_138 = arith.constant 0.353553385 : f32
    %324 = vector.broadcast %cst_138 : f32 to vector<1x8xf32>
    %325 = arith.mulf %323, %324 : vector<1x8xf32>
    %326 = vector.extract_strided_slice %321 {offsets = [0, 0], sizes = [16, 8], strides = [1, 1]} : vector<16x32xf32> to vector<16x8xf32>
    %cst_139 = arith.constant dense<0.000000e+00> : vector<1x16xf32>
    %327 = tpu.matmul %325, %326, %cst_139 {dimension_numbers = #tpu.dot_dimension_numbers<[1], [1], [0], [0], [0, 0, 1, 0], [], []>} : vector<1x8xf32>, vector<16x8xf32>, vector<1x16xf32> -> vector<1x16xf32>
    %cst_140 = arith.constant dense<0xFF800000> : vector<1xf32>
    %328 = vector.multi_reduction <maximumf>, %327, %cst_140 [1] : vector<1x16xf32> to vector<1xf32>
    %329 = vector.shape_cast %328 : vector<1xf32> to vector<1x1xf32>
    %330 = vector.broadcast %329 : vector<1x1xf32> to vector<1x16xf32>
    %331 = arith.subf %327, %330 : vector<1x16xf32>
    %332 = math.exp %331 : vector<1x16xf32>
    %cst_141 = arith.constant dense<0.000000e+00> : vector<1xf32>
    %333 = vector.multi_reduction <add>, %332, %cst_141 [1] : vector<1x16xf32> to vector<1xf32>
    %334 = vector.shape_cast %333 : vector<1xf32> to vector<1x1xf32>
    %335 = vector.broadcast %334 : vector<1x1xf32> to vector<1x16xf32>
    %336 = arith.divf %332, %335 : vector<1x16xf32>
    %337 = vector.extract_strided_slice %322 {offsets = [0, 0], sizes = [16, 8], strides = [1, 1]} : vector<16x32xf32> to vector<16x8xf32>
    %cst_142 = arith.constant dense<0.000000e+00> : vector<1x8xf32>
    %338 = tpu.matmul %336, %337, %cst_142 {dimension_numbers = #tpu.dot_dimension_numbers<[1], [0], [0], [1], [0, 0, 1, 1], [], []>} : vector<1x16xf32>, vector<16x8xf32>, vector<1x8xf32> -> vector<1x8xf32>
    %339 = vector.extract_strided_slice %320 {offsets = [0, 8], sizes = [1, 8], strides = [1, 1]} : vector<1x32xf32> to vector<1x8xf32>
    %cst_143 = arith.constant 0.353553385 : f32
    %340 = vector.broadcast %cst_143 : f32 to vector<1x8xf32>
    %341 = arith.mulf %339, %340 : vector<1x8xf32>
    %342 = vector.extract_strided_slice %321 {offsets = [0, 8], sizes = [16, 8], strides = [1, 1]} : vector<16x32xf32> to vector<16x8xf32>
    %cst_144 = arith.constant dense<0.000000e+00> : vector<1x16xf32>
    %343 = tpu.matmul %341, %342, %cst_144 {dimension_numbers = #tpu.dot_dimension_numbers<[1], [1], [0], [0], [0, 0, 1, 0], [], []>} : vector<1x8xf32>, vector<16x8xf32>, vector<1x16xf32> -> vector<1x16xf32>
    %cst_145 = arith.constant dense<0xFF800000> : vector<1xf32>
    %344 = vector.multi_reduction <maximumf>, %343, %cst_145 [1] : vector<1x16xf32> to vector<1xf32>
    %345 = vector.shape_cast %344 : vector<1xf32> to vector<1x1xf32>
    %346 = vector.broadcast %345 : vector<1x1xf32> to vector<1x16xf32>
    %347 = arith.subf %343, %346 : vector<1x16xf32>
    %348 = math.exp %347 : vector<1x16xf32>
    %cst_146 = arith.constant dense<0.000000e+00> : vector<1xf32>
    %349 = vector.multi_reduction <add>, %348, %cst_146 [1] : vector<1x16xf32> to vector<1xf32>
    %350 = vector.shape_cast %349 : vector<1xf32> to vector<1x1xf32>
    %351 = vector.broadcast %350 : vector<1x1xf32> to vector<1x16xf32>
    %352 = arith.divf %348, %351 : vector<1x16xf32>
    %353 = vector.extract_strided_slice %322 {offsets = [0, 8], sizes = [16, 8], strides = [1, 1]} : vector<16x32xf32> to vector<16x8xf32>
    %cst_147 = arith.constant dense<0.000000e+00> : vector<1x8xf32>
    %354 = tpu.matmul %352, %353, %cst_147 {dimension_numbers = #tpu.dot_dimension_numbers<[1], [0], [0], [1], [0, 0, 1, 1], [], []>} : vector<1x16xf32>, vector<16x8xf32>, vector<1x8xf32> -> vector<1x8xf32>
    %355 = vector.extract_strided_slice %320 {offsets = [0, 16], sizes = [1, 8], strides = [1, 1]} : vector<1x32xf32> to vector<1x8xf32>
    %cst_148 = arith.constant 0.353553385 : f32
    %356 = vector.broadcast %cst_148 : f32 to vector<1x8xf32>
    %357 = arith.mulf %355, %356 : vector<1x8xf32>
    %358 = vector.extract_strided_slice %321 {offsets = [0, 16], sizes = [16, 8], strides = [1, 1]} : vector<16x32xf32> to vector<16x8xf32>
    %cst_149 = arith.constant dense<0.000000e+00> : vector<1x16xf32>
    %359 = tpu.matmul %357, %358, %cst_149 {dimension_numbers = #tpu.dot_dimension_numbers<[1], [1], [0], [0], [0, 0, 1, 0], [], []>} : vector<1x8xf32>, vector<16x8xf32>, vector<1x16xf32> -> vector<1x16xf32>
    %cst_150 = arith.constant dense<0xFF800000> : vector<1xf32>
    %360 = vector.multi_reduction <maximumf>, %359, %cst_150 [1] : vector<1x16xf32> to vector<1xf32>
    %361 = vector.shape_cast %360 : vector<1xf32> to vector<1x1xf32>
    %362 = vector.broadcast %361 : vector<1x1xf32> to vector<1x16xf32>
    %363 = arith.subf %359, %362 : vector<1x16xf32>
    %364 = math.exp %363 : vector<1x16xf32>
    %cst_151 = arith.constant dense<0.000000e+00> : vector<1xf32>
    %365 = vector.multi_reduction <add>, %364, %cst_151 [1] : vector<1x16xf32> to vector<1xf32>
    %366 = vector.shape_cast %365 : vector<1xf32> to vector<1x1xf32>
    %367 = vector.broadcast %366 : vector<1x1xf32> to vector<1x16xf32>
    %368 = arith.divf %364, %367 : vector<1x16xf32>
    %369 = vector.extract_strided_slice %322 {offsets = [0, 16], sizes = [16, 8], strides = [1, 1]} : vector<16x32xf32> to vector<16x8xf32>
    %cst_152 = arith.constant dense<0.000000e+00> : vector<1x8xf32>
    %370 = tpu.matmul %368, %369, %cst_152 {dimension_numbers = #tpu.dot_dimension_numbers<[1], [0], [0], [1], [0, 0, 1, 1], [], []>} : vector<1x16xf32>, vector<16x8xf32>, vector<1x8xf32> -> vector<1x8xf32>
    %371 = vector.extract_strided_slice %320 {offsets = [0, 24], sizes = [1, 8], strides = [1, 1]} : vector<1x32xf32> to vector<1x8xf32>
    %cst_153 = arith.constant 0.353553385 : f32
    %372 = vector.broadcast %cst_153 : f32 to vector<1x8xf32>
    %373 = arith.mulf %371, %372 : vector<1x8xf32>
    %374 = vector.extract_strided_slice %321 {offsets = [0, 24], sizes = [16, 8], strides = [1, 1]} : vector<16x32xf32> to vector<16x8xf32>
    %cst_154 = arith.constant dense<0.000000e+00> : vector<1x16xf32>
    %375 = tpu.matmul %373, %374, %cst_154 {dimension_numbers = #tpu.dot_dimension_numbers<[1], [1], [0], [0], [0, 0, 1, 0], [], []>} : vector<1x8xf32>, vector<16x8xf32>, vector<1x16xf32> -> vector<1x16xf32>
    %cst_155 = arith.constant dense<0xFF800000> : vector<1xf32>
    %376 = vector.multi_reduction <maximumf>, %375, %cst_155 [1] : vector<1x16xf32> to vector<1xf32>
    %377 = vector.shape_cast %376 : vector<1xf32> to vector<1x1xf32>
    %378 = vector.broadcast %377 : vector<1x1xf32> to vector<1x16xf32>
    %379 = arith.subf %375, %378 : vector<1x16xf32>
    %380 = math.exp %379 : vector<1x16xf32>
    %cst_156 = arith.constant dense<0.000000e+00> : vector<1xf32>
    %381 = vector.multi_reduction <add>, %380, %cst_156 [1] : vector<1x16xf32> to vector<1xf32>
    %382 = vector.shape_cast %381 : vector<1xf32> to vector<1x1xf32>
    %383 = vector.broadcast %382 : vector<1x1xf32> to vector<1x16xf32>
    %384 = arith.divf %380, %383 : vector<1x16xf32>
    %385 = vector.extract_strided_slice %322 {offsets = [0, 24], sizes = [16, 8], strides = [1, 1]} : vector<16x32xf32> to vector<16x8xf32>
    %cst_157 = arith.constant dense<0.000000e+00> : vector<1x8xf32>
    %386 = tpu.matmul %384, %385, %cst_157 {dimension_numbers = #tpu.dot_dimension_numbers<[1], [0], [0], [1], [0, 0, 1, 1], [], []>} : vector<1x16xf32>, vector<16x8xf32>, vector<1x8xf32> -> vector<1x8xf32>
    %387 = tpu.concatenate %338, %354, %370, %386 in 1 : vector<1x8xf32>, vector<1x8xf32>, vector<1x8xf32>, vector<1x8xf32> -> vector<1x32xf32>
    %388 = vector.extract_strided_slice %241 {offsets = [2, 0], sizes = [1, 32], strides = [1, 1]} : vector<16x32xf32> to vector<1x32xf32>
    %389 = vector.extract_strided_slice %246 {offsets = [32, 0], sizes = [16, 32], strides = [1, 1]} : vector<128x32xf32> to vector<16x32xf32>
    %390 = vector.extract_strided_slice %251 {offsets = [32, 0], sizes = [16, 32], strides = [1, 1]} : vector<128x32xf32> to vector<16x32xf32>
    %391 = vector.extract_strided_slice %388 {offsets = [0, 0], sizes = [1, 8], strides = [1, 1]} : vector<1x32xf32> to vector<1x8xf32>
    %cst_158 = arith.constant 0.353553385 : f32
    %392 = vector.broadcast %cst_158 : f32 to vector<1x8xf32>
    %393 = arith.mulf %391, %392 : vector<1x8xf32>
    %394 = vector.extract_strided_slice %389 {offsets = [0, 0], sizes = [16, 8], strides = [1, 1]} : vector<16x32xf32> to vector<16x8xf32>
    %cst_159 = arith.constant dense<0.000000e+00> : vector<1x16xf32>
    %395 = tpu.matmul %393, %394, %cst_159 {dimension_numbers = #tpu.dot_dimension_numbers<[1], [1], [0], [0], [0, 0, 1, 0], [], []>} : vector<1x8xf32>, vector<16x8xf32>, vector<1x16xf32> -> vector<1x16xf32>
    %cst_160 = arith.constant dense<0xFF800000> : vector<1xf32>
    %396 = vector.multi_reduction <maximumf>, %395, %cst_160 [1] : vector<1x16xf32> to vector<1xf32>
    %397 = vector.shape_cast %396 : vector<1xf32> to vector<1x1xf32>
    %398 = vector.broadcast %397 : vector<1x1xf32> to vector<1x16xf32>
    %399 = arith.subf %395, %398 : vector<1x16xf32>
    %400 = math.exp %399 : vector<1x16xf32>
    %cst_161 = arith.constant dense<0.000000e+00> : vector<1xf32>
    %401 = vector.multi_reduction <add>, %400, %cst_161 [1] : vector<1x16xf32> to vector<1xf32>
    %402 = vector.shape_cast %401 : vector<1xf32> to vector<1x1xf32>
    %403 = vector.broadcast %402 : vector<1x1xf32> to vector<1x16xf32>
    %404 = arith.divf %400, %403 : vector<1x16xf32>
    %405 = vector.extract_strided_slice %390 {offsets = [0, 0], sizes = [16, 8], strides = [1, 1]} : vector<16x32xf32> to vector<16x8xf32>
    %cst_162 = arith.constant dense<0.000000e+00> : vector<1x8xf32>
    %406 = tpu.matmul %404, %405, %cst_162 {dimension_numbers = #tpu.dot_dimension_numbers<[1], [0], [0], [1], [0, 0, 1, 1], [], []>} : vector<1x16xf32>, vector<16x8xf32>, vector<1x8xf32> -> vector<1x8xf32>
    %407 = vector.extract_strided_slice %388 {offsets = [0, 8], sizes = [1, 8], strides = [1, 1]} : vector<1x32xf32> to vector<1x8xf32>
    %cst_163 = arith.constant 0.353553385 : f32
    %408 = vector.broadcast %cst_163 : f32 to vector<1x8xf32>
    %409 = arith.mulf %407, %408 : vector<1x8xf32>
    %410 = vector.extract_strided_slice %389 {offsets = [0, 8], sizes = [16, 8], strides = [1, 1]} : vector<16x32xf32> to vector<16x8xf32>
    %cst_164 = arith.constant dense<0.000000e+00> : vector<1x16xf32>
    %411 = tpu.matmul %409, %410, %cst_164 {dimension_numbers = #tpu.dot_dimension_numbers<[1], [1], [0], [0], [0, 0, 1, 0], [], []>} : vector<1x8xf32>, vector<16x8xf32>, vector<1x16xf32> -> vector<1x16xf32>
    %cst_165 = arith.constant dense<0xFF800000> : vector<1xf32>
    %412 = vector.multi_reduction <maximumf>, %411, %cst_165 [1] : vector<1x16xf32> to vector<1xf32>
    %413 = vector.shape_cast %412 : vector<1xf32> to vector<1x1xf32>
    %414 = vector.broadcast %413 : vector<1x1xf32> to vector<1x16xf32>
    %415 = arith.subf %411, %414 : vector<1x16xf32>
    %416 = math.exp %415 : vector<1x16xf32>
    %cst_166 = arith.constant dense<0.000000e+00> : vector<1xf32>
    %417 = vector.multi_reduction <add>, %416, %cst_166 [1] : vector<1x16xf32> to vector<1xf32>
    %418 = vector.shape_cast %417 : vector<1xf32> to vector<1x1xf32>
    %419 = vector.broadcast %418 : vector<1x1xf32> to vector<1x16xf32>
    %420 = arith.divf %416, %419 : vector<1x16xf32>
    %421 = vector.extract_strided_slice %390 {offsets = [0, 8], sizes = [16, 8], strides = [1, 1]} : vector<16x32xf32> to vector<16x8xf32>
    %cst_167 = arith.constant dense<0.000000e+00> : vector<1x8xf32>
    %422 = tpu.matmul %420, %421, %cst_167 {dimension_numbers = #tpu.dot_dimension_numbers<[1], [0], [0], [1], [0, 0, 1, 1], [], []>} : vector<1x16xf32>, vector<16x8xf32>, vector<1x8xf32> -> vector<1x8xf32>
    %423 = vector.extract_strided_slice %388 {offsets = [0, 16], sizes = [1, 8], strides = [1, 1]} : vector<1x32xf32> to vector<1x8xf32>
    %cst_168 = arith.constant 0.353553385 : f32
    %424 = vector.broadcast %cst_168 : f32 to vector<1x8xf32>
    %425 = arith.mulf %423, %424 : vector<1x8xf32>
    %426 = vector.extract_strided_slice %389 {offsets = [0, 16], sizes = [16, 8], strides = [1, 1]} : vector<16x32xf32> to vector<16x8xf32>
    %cst_169 = arith.constant dense<0.000000e+00> : vector<1x16xf32>
    %427 = tpu.matmul %425, %426, %cst_169 {dimension_numbers = #tpu.dot_dimension_numbers<[1], [1], [0], [0], [0, 0, 1, 0], [], []>} : vector<1x8xf32>, vector<16x8xf32>, vector<1x16xf32> -> vector<1x16xf32>
    %cst_170 = arith.constant dense<0xFF800000> : vector<1xf32>
    %428 = vector.multi_reduction <maximumf>, %427, %cst_170 [1] : vector<1x16xf32> to vector<1xf32>
    %429 = vector.shape_cast %428 : vector<1xf32> to vector<1x1xf32>
    %430 = vector.broadcast %429 : vector<1x1xf32> to vector<1x16xf32>
    %431 = arith.subf %427, %430 : vector<1x16xf32>
    %432 = math.exp %431 : vector<1x16xf32>
    %cst_171 = arith.constant dense<0.000000e+00> : vector<1xf32>
    %433 = vector.multi_reduction <add>, %432, %cst_171 [1] : vector<1x16xf32> to vector<1xf32>
    %434 = vector.shape_cast %433 : vector<1xf32> to vector<1x1xf32>
    %435 = vector.broadcast %434 : vector<1x1xf32> to vector<1x16xf32>
    %436 = arith.divf %432, %435 : vector<1x16xf32>
    %437 = vector.extract_strided_slice %390 {offsets = [0, 16], sizes = [16, 8], strides = [1, 1]} : vector<16x32xf32> to vector<16x8xf32>
    %cst_172 = arith.constant dense<0.000000e+00> : vector<1x8xf32>
    %438 = tpu.matmul %436, %437, %cst_172 {dimension_numbers = #tpu.dot_dimension_numbers<[1], [0], [0], [1], [0, 0, 1, 1], [], []>} : vector<1x16xf32>, vector<16x8xf32>, vector<1x8xf32> -> vector<1x8xf32>
    %439 = vector.extract_strided_slice %388 {offsets = [0, 24], sizes = [1, 8], strides = [1, 1]} : vector<1x32xf32> to vector<1x8xf32>
    %cst_173 = arith.constant 0.353553385 : f32
    %440 = vector.broadcast %cst_173 : f32 to vector<1x8xf32>
    %441 = arith.mulf %439, %440 : vector<1x8xf32>
    %442 = vector.extract_strided_slice %389 {offsets = [0, 24], sizes = [16, 8], strides = [1, 1]} : vector<16x32xf32> to vector<16x8xf32>
    %cst_174 = arith.constant dense<0.000000e+00> : vector<1x16xf32>
    %443 = tpu.matmul %441, %442, %cst_174 {dimension_numbers = #tpu.dot_dimension_numbers<[1], [1], [0], [0], [0, 0, 1, 0], [], []>} : vector<1x8xf32>, vector<16x8xf32>, vector<1x16xf32> -> vector<1x16xf32>
    %cst_175 = arith.constant dense<0xFF800000> : vector<1xf32>
    %444 = vector.multi_reduction <maximumf>, %443, %cst_175 [1] : vector<1x16xf32> to vector<1xf32>
    %445 = vector.shape_cast %444 : vector<1xf32> to vector<1x1xf32>
    %446 = vector.broadcast %445 : vector<1x1xf32> to vector<1x16xf32>
    %447 = arith.subf %443, %446 : vector<1x16xf32>
    %448 = math.exp %447 : vector<1x16xf32>
    %cst_176 = arith.constant dense<0.000000e+00> : vector<1xf32>
    %449 = vector.multi_reduction <add>, %448, %cst_176 [1] : vector<1x16xf32> to vector<1xf32>
    %450 = vector.shape_cast %449 : vector<1xf32> to vector<1x1xf32>
    %451 = vector.broadcast %450 : vector<1x1xf32> to vector<1x16xf32>
    %452 = arith.divf %448, %451 : vector<1x16xf32>
    %453 = vector.extract_strided_slice %390 {offsets = [0, 24], sizes = [16, 8], strides = [1, 1]} : vector<16x32xf32> to vector<16x8xf32>
    %cst_177 = arith.constant dense<0.000000e+00> : vector<1x8xf32>
    %454 = tpu.matmul %452, %453, %cst_177 {dimension_numbers = #tpu.dot_dimension_numbers<[1], [0], [0], [1], [0, 0, 1, 1], [], []>} : vector<1x16xf32>, vector<16x8xf32>, vector<1x8xf32> -> vector<1x8xf32>
    %455 = tpu.concatenate %406, %422, %438, %454 in 1 : vector<1x8xf32>, vector<1x8xf32>, vector<1x8xf32>, vector<1x8xf32> -> vector<1x32xf32>
    %456 = vector.extract_strided_slice %241 {offsets = [8, 0], sizes = [1, 32], strides = [1, 1]} : vector<16x32xf32> to vector<1x32xf32>
    %457 = vector.extract_strided_slice %246 {offsets = [48, 0], sizes = [16, 32], strides = [1, 1]} : vector<128x32xf32> to vector<16x32xf32>
    %458 = vector.extract_strided_slice %251 {offsets = [48, 0], sizes = [16, 32], strides = [1, 1]} : vector<128x32xf32> to vector<16x32xf32>
    %459 = vector.extract_strided_slice %456 {offsets = [0, 0], sizes = [1, 8], strides = [1, 1]} : vector<1x32xf32> to vector<1x8xf32>
    %cst_178 = arith.constant 0.353553385 : f32
    %460 = vector.broadcast %cst_178 : f32 to vector<1x8xf32>
    %461 = arith.mulf %459, %460 : vector<1x8xf32>
    %462 = vector.extract_strided_slice %457 {offsets = [0, 0], sizes = [16, 8], strides = [1, 1]} : vector<16x32xf32> to vector<16x8xf32>
    %cst_179 = arith.constant dense<0.000000e+00> : vector<1x16xf32>
    %463 = tpu.matmul %461, %462, %cst_179 {dimension_numbers = #tpu.dot_dimension_numbers<[1], [1], [0], [0], [0, 0, 1, 0], [], []>} : vector<1x8xf32>, vector<16x8xf32>, vector<1x16xf32> -> vector<1x16xf32>
    %cst_180 = arith.constant dense<0xFF800000> : vector<1xf32>
    %464 = vector.multi_reduction <maximumf>, %463, %cst_180 [1] : vector<1x16xf32> to vector<1xf32>
    %465 = vector.shape_cast %464 : vector<1xf32> to vector<1x1xf32>
    %466 = vector.broadcast %465 : vector<1x1xf32> to vector<1x16xf32>
    %467 = arith.subf %463, %466 : vector<1x16xf32>
    %468 = math.exp %467 : vector<1x16xf32>
    %cst_181 = arith.constant dense<0.000000e+00> : vector<1xf32>
    %469 = vector.multi_reduction <add>, %468, %cst_181 [1] : vector<1x16xf32> to vector<1xf32>
    %470 = vector.shape_cast %469 : vector<1xf32> to vector<1x1xf32>
    %471 = vector.broadcast %470 : vector<1x1xf32> to vector<1x16xf32>
    %472 = arith.divf %468, %471 : vector<1x16xf32>
    %473 = vector.extract_strided_slice %458 {offsets = [0, 0], sizes = [16, 8], strides = [1, 1]} : vector<16x32xf32> to vector<16x8xf32>
    %cst_182 = arith.constant dense<0.000000e+00> : vector<1x8xf32>
    %474 = tpu.matmul %472, %473, %cst_182 {dimension_numbers = #tpu.dot_dimension_numbers<[1], [0], [0], [1], [0, 0, 1, 1], [], []>} : vector<1x16xf32>, vector<16x8xf32>, vector<1x8xf32> -> vector<1x8xf32>
    %475 = vector.extract_strided_slice %456 {offsets = [0, 8], sizes = [1, 8], strides = [1, 1]} : vector<1x32xf32> to vector<1x8xf32>
    %cst_183 = arith.constant 0.353553385 : f32
    %476 = vector.broadcast %cst_183 : f32 to vector<1x8xf32>
    %477 = arith.mulf %475, %476 : vector<1x8xf32>
    %478 = vector.extract_strided_slice %457 {offsets = [0, 8], sizes = [16, 8], strides = [1, 1]} : vector<16x32xf32> to vector<16x8xf32>
    %cst_184 = arith.constant dense<0.000000e+00> : vector<1x16xf32>
    %479 = tpu.matmul %477, %478, %cst_184 {dimension_numbers = #tpu.dot_dimension_numbers<[1], [1], [0], [0], [0, 0, 1, 0], [], []>} : vector<1x8xf32>, vector<16x8xf32>, vector<1x16xf32> -> vector<1x16xf32>
    %cst_185 = arith.constant dense<0xFF800000> : vector<1xf32>
    %480 = vector.multi_reduction <maximumf>, %479, %cst_185 [1] : vector<1x16xf32> to vector<1xf32>
    %481 = vector.shape_cast %480 : vector<1xf32> to vector<1x1xf32>
    %482 = vector.broadcast %481 : vector<1x1xf32> to vector<1x16xf32>
    %483 = arith.subf %479, %482 : vector<1x16xf32>
    %484 = math.exp %483 : vector<1x16xf32>
    %cst_186 = arith.constant dense<0.000000e+00> : vector<1xf32>
    %485 = vector.multi_reduction <add>, %484, %cst_186 [1] : vector<1x16xf32> to vector<1xf32>
    %486 = vector.shape_cast %485 : vector<1xf32> to vector<1x1xf32>
    %487 = vector.broadcast %486 : vector<1x1xf32> to vector<1x16xf32>
    %488 = arith.divf %484, %487 : vector<1x16xf32>
    %489 = vector.extract_strided_slice %458 {offsets = [0, 8], sizes = [16, 8], strides = [1, 1]} : vector<16x32xf32> to vector<16x8xf32>
    %cst_187 = arith.constant dense<0.000000e+00> : vector<1x8xf32>
    %490 = tpu.matmul %488, %489, %cst_187 {dimension_numbers = #tpu.dot_dimension_numbers<[1], [0], [0], [1], [0, 0, 1, 1], [], []>} : vector<1x16xf32>, vector<16x8xf32>, vector<1x8xf32> -> vector<1x8xf32>
    %491 = vector.extract_strided_slice %456 {offsets = [0, 16], sizes = [1, 8], strides = [1, 1]} : vector<1x32xf32> to vector<1x8xf32>
    %cst_188 = arith.constant 0.353553385 : f32
    %492 = vector.broadcast %cst_188 : f32 to vector<1x8xf32>
    %493 = arith.mulf %491, %492 : vector<1x8xf32>
    %494 = vector.extract_strided_slice %457 {offsets = [0, 16], sizes = [16, 8], strides = [1, 1]} : vector<16x32xf32> to vector<16x8xf32>
    %cst_189 = arith.constant dense<0.000000e+00> : vector<1x16xf32>
    %495 = tpu.matmul %493, %494, %cst_189 {dimension_numbers = #tpu.dot_dimension_numbers<[1], [1], [0], [0], [0, 0, 1, 0], [], []>} : vector<1x8xf32>, vector<16x8xf32>, vector<1x16xf32> -> vector<1x16xf32>
    %cst_190 = arith.constant dense<0xFF800000> : vector<1xf32>
    %496 = vector.multi_reduction <maximumf>, %495, %cst_190 [1] : vector<1x16xf32> to vector<1xf32>
    %497 = vector.shape_cast %496 : vector<1xf32> to vector<1x1xf32>
    %498 = vector.broadcast %497 : vector<1x1xf32> to vector<1x16xf32>
    %499 = arith.subf %495, %498 : vector<1x16xf32>
    %500 = math.exp %499 : vector<1x16xf32>
    %cst_191 = arith.constant dense<0.000000e+00> : vector<1xf32>
    %501 = vector.multi_reduction <add>, %500, %cst_191 [1] : vector<1x16xf32> to vector<1xf32>
    %502 = vector.shape_cast %501 : vector<1xf32> to vector<1x1xf32>
    %503 = vector.broadcast %502 : vector<1x1xf32> to vector<1x16xf32>
    %504 = arith.divf %500, %503 : vector<1x16xf32>
    %505 = vector.extract_strided_slice %458 {offsets = [0, 16], sizes = [16, 8], strides = [1, 1]} : vector<16x32xf32> to vector<16x8xf32>
    %cst_192 = arith.constant dense<0.000000e+00> : vector<1x8xf32>
    %506 = tpu.matmul %504, %505, %cst_192 {dimension_numbers = #tpu.dot_dimension_numbers<[1], [0], [0], [1], [0, 0, 1, 1], [], []>} : vector<1x16xf32>, vector<16x8xf32>, vector<1x8xf32> -> vector<1x8xf32>
    %507 = vector.extract_strided_slice %456 {offsets = [0, 24], sizes = [1, 8], strides = [1, 1]} : vector<1x32xf32> to vector<1x8xf32>
    %cst_193 = arith.constant 0.353553385 : f32
    %508 = vector.broadcast %cst_193 : f32 to vector<1x8xf32>
    %509 = arith.mulf %507, %508 : vector<1x8xf32>
    %510 = vector.extract_strided_slice %457 {offsets = [0, 24], sizes = [16, 8], strides = [1, 1]} : vector<16x32xf32> to vector<16x8xf32>
    %cst_194 = arith.constant dense<0.000000e+00> : vector<1x16xf32>
    %511 = tpu.matmul %509, %510, %cst_194 {dimension_numbers = #tpu.dot_dimension_numbers<[1], [1], [0], [0], [0, 0, 1, 0], [], []>} : vector<1x8xf32>, vector<16x8xf32>, vector<1x16xf32> -> vector<1x16xf32>
    %cst_195 = arith.constant dense<0xFF800000> : vector<1xf32>
    %512 = vector.multi_reduction <maximumf>, %511, %cst_195 [1] : vector<1x16xf32> to vector<1xf32>
    %513 = vector.shape_cast %512 : vector<1xf32> to vector<1x1xf32>
    %514 = vector.broadcast %513 : vector<1x1xf32> to vector<1x16xf32>
    %515 = arith.subf %511, %514 : vector<1x16xf32>
    %516 = math.exp %515 : vector<1x16xf32>
    %cst_196 = arith.constant dense<0.000000e+00> : vector<1xf32>
    %517 = vector.multi_reduction <add>, %516, %cst_196 [1] : vector<1x16xf32> to vector<1xf32>
    %518 = vector.shape_cast %517 : vector<1xf32> to vector<1x1xf32>
    %519 = vector.broadcast %518 : vector<1x1xf32> to vector<1x16xf32>
    %520 = arith.divf %516, %519 : vector<1x16xf32>
    %521 = vector.extract_strided_slice %458 {offsets = [0, 24], sizes = [16, 8], strides = [1, 1]} : vector<16x32xf32> to vector<16x8xf32>
    %cst_197 = arith.constant dense<0.000000e+00> : vector<1x8xf32>
    %522 = tpu.matmul %520, %521, %cst_197 {dimension_numbers = #tpu.dot_dimension_numbers<[1], [0], [0], [1], [0, 0, 1, 1], [], []>} : vector<1x16xf32>, vector<16x8xf32>, vector<1x8xf32> -> vector<1x8xf32>
    %523 = tpu.concatenate %474, %490, %506, %522 in 1 : vector<1x8xf32>, vector<1x8xf32>, vector<1x8xf32>, vector<1x8xf32> -> vector<1x32xf32>
    %524 = vector.extract_strided_slice %241 {offsets = [9, 0], sizes = [1, 32], strides = [1, 1]} : vector<16x32xf32> to vector<1x32xf32>
    %525 = vector.extract_strided_slice %246 {offsets = [64, 0], sizes = [16, 32], strides = [1, 1]} : vector<128x32xf32> to vector<16x32xf32>
    %526 = vector.extract_strided_slice %251 {offsets = [64, 0], sizes = [16, 32], strides = [1, 1]} : vector<128x32xf32> to vector<16x32xf32>
    %527 = vector.extract_strided_slice %524 {offsets = [0, 0], sizes = [1, 8], strides = [1, 1]} : vector<1x32xf32> to vector<1x8xf32>
    %cst_198 = arith.constant 0.353553385 : f32
    %528 = vector.broadcast %cst_198 : f32 to vector<1x8xf32>
    %529 = arith.mulf %527, %528 : vector<1x8xf32>
    %530 = vector.extract_strided_slice %525 {offsets = [0, 0], sizes = [16, 8], strides = [1, 1]} : vector<16x32xf32> to vector<16x8xf32>
    %cst_199 = arith.constant dense<0.000000e+00> : vector<1x16xf32>
    %531 = tpu.matmul %529, %530, %cst_199 {dimension_numbers = #tpu.dot_dimension_numbers<[1], [1], [0], [0], [0, 0, 1, 0], [], []>} : vector<1x8xf32>, vector<16x8xf32>, vector<1x16xf32> -> vector<1x16xf32>
    %cst_200 = arith.constant dense<0xFF800000> : vector<1xf32>
    %532 = vector.multi_reduction <maximumf>, %531, %cst_200 [1] : vector<1x16xf32> to vector<1xf32>
    %533 = vector.shape_cast %532 : vector<1xf32> to vector<1x1xf32>
    %534 = vector.broadcast %533 : vector<1x1xf32> to vector<1x16xf32>
    %535 = arith.subf %531, %534 : vector<1x16xf32>
    %536 = math.exp %535 : vector<1x16xf32>
    %cst_201 = arith.constant dense<0.000000e+00> : vector<1xf32>
    %537 = vector.multi_reduction <add>, %536, %cst_201 [1] : vector<1x16xf32> to vector<1xf32>
    %538 = vector.shape_cast %537 : vector<1xf32> to vector<1x1xf32>
    %539 = vector.broadcast %538 : vector<1x1xf32> to vector<1x16xf32>
    %540 = arith.divf %536, %539 : vector<1x16xf32>
    %541 = vector.extract_strided_slice %526 {offsets = [0, 0], sizes = [16, 8], strides = [1, 1]} : vector<16x32xf32> to vector<16x8xf32>
    %cst_202 = arith.constant dense<0.000000e+00> : vector<1x8xf32>
    %542 = tpu.matmul %540, %541, %cst_202 {dimension_numbers = #tpu.dot_dimension_numbers<[1], [0], [0], [1], [0, 0, 1, 1], [], []>} : vector<1x16xf32>, vector<16x8xf32>, vector<1x8xf32> -> vector<1x8xf32>
    %543 = vector.extract_strided_slice %524 {offsets = [0, 8], sizes = [1, 8], strides = [1, 1]} : vector<1x32xf32> to vector<1x8xf32>
    %cst_203 = arith.constant 0.353553385 : f32
    %544 = vector.broadcast %cst_203 : f32 to vector<1x8xf32>
    %545 = arith.mulf %543, %544 : vector<1x8xf32>
    %546 = vector.extract_strided_slice %525 {offsets = [0, 8], sizes = [16, 8], strides = [1, 1]} : vector<16x32xf32> to vector<16x8xf32>
    %cst_204 = arith.constant dense<0.000000e+00> : vector<1x16xf32>
    %547 = tpu.matmul %545, %546, %cst_204 {dimension_numbers = #tpu.dot_dimension_numbers<[1], [1], [0], [0], [0, 0, 1, 0], [], []>} : vector<1x8xf32>, vector<16x8xf32>, vector<1x16xf32> -> vector<1x16xf32>
    %cst_205 = arith.constant dense<0xFF800000> : vector<1xf32>
    %548 = vector.multi_reduction <maximumf>, %547, %cst_205 [1] : vector<1x16xf32> to vector<1xf32>
    %549 = vector.shape_cast %548 : vector<1xf32> to vector<1x1xf32>
    %550 = vector.broadcast %549 : vector<1x1xf32> to vector<1x16xf32>
    %551 = arith.subf %547, %550 : vector<1x16xf32>
    %552 = math.exp %551 : vector<1x16xf32>
    %cst_206 = arith.constant dense<0.000000e+00> : vector<1xf32>
    %553 = vector.multi_reduction <add>, %552, %cst_206 [1] : vector<1x16xf32> to vector<1xf32>
    %554 = vector.shape_cast %553 : vector<1xf32> to vector<1x1xf32>
    %555 = vector.broadcast %554 : vector<1x1xf32> to vector<1x16xf32>
    %556 = arith.divf %552, %555 : vector<1x16xf32>
    %557 = vector.extract_strided_slice %526 {offsets = [0, 8], sizes = [16, 8], strides = [1, 1]} : vector<16x32xf32> to vector<16x8xf32>
    %cst_207 = arith.constant dense<0.000000e+00> : vector<1x8xf32>
    %558 = tpu.matmul %556, %557, %cst_207 {dimension_numbers = #tpu.dot_dimension_numbers<[1], [0], [0], [1], [0, 0, 1, 1], [], []>} : vector<1x16xf32>, vector<16x8xf32>, vector<1x8xf32> -> vector<1x8xf32>
    %559 = vector.extract_strided_slice %524 {offsets = [0, 16], sizes = [1, 8], strides = [1, 1]} : vector<1x32xf32> to vector<1x8xf32>
    %cst_208 = arith.constant 0.353553385 : f32
    %560 = vector.broadcast %cst_208 : f32 to vector<1x8xf32>
    %561 = arith.mulf %559, %560 : vector<1x8xf32>
    %562 = vector.extract_strided_slice %525 {offsets = [0, 16], sizes = [16, 8], strides = [1, 1]} : vector<16x32xf32> to vector<16x8xf32>
    %cst_209 = arith.constant dense<0.000000e+00> : vector<1x16xf32>
    %563 = tpu.matmul %561, %562, %cst_209 {dimension_numbers = #tpu.dot_dimension_numbers<[1], [1], [0], [0], [0, 0, 1, 0], [], []>} : vector<1x8xf32>, vector<16x8xf32>, vector<1x16xf32> -> vector<1x16xf32>
    %cst_210 = arith.constant dense<0xFF800000> : vector<1xf32>
    %564 = vector.multi_reduction <maximumf>, %563, %cst_210 [1] : vector<1x16xf32> to vector<1xf32>
    %565 = vector.shape_cast %564 : vector<1xf32> to vector<1x1xf32>
    %566 = vector.broadcast %565 : vector<1x1xf32> to vector<1x16xf32>
    %567 = arith.subf %563, %566 : vector<1x16xf32>
    %568 = math.exp %567 : vector<1x16xf32>
    %cst_211 = arith.constant dense<0.000000e+00> : vector<1xf32>
    %569 = vector.multi_reduction <add>, %568, %cst_211 [1] : vector<1x16xf32> to vector<1xf32>
    %570 = vector.shape_cast %569 : vector<1xf32> to vector<1x1xf32>
    %571 = vector.broadcast %570 : vector<1x1xf32> to vector<1x16xf32>
    %572 = arith.divf %568, %571 : vector<1x16xf32>
    %573 = vector.extract_strided_slice %526 {offsets = [0, 16], sizes = [16, 8], strides = [1, 1]} : vector<16x32xf32> to vector<16x8xf32>
    %cst_212 = arith.constant dense<0.000000e+00> : vector<1x8xf32>
    %574 = tpu.matmul %572, %573, %cst_212 {dimension_numbers = #tpu.dot_dimension_numbers<[1], [0], [0], [1], [0, 0, 1, 1], [], []>} : vector<1x16xf32>, vector<16x8xf32>, vector<1x8xf32> -> vector<1x8xf32>
    %575 = vector.extract_strided_slice %524 {offsets = [0, 24], sizes = [1, 8], strides = [1, 1]} : vector<1x32xf32> to vector<1x8xf32>
    %cst_213 = arith.constant 0.353553385 : f32
    %576 = vector.broadcast %cst_213 : f32 to vector<1x8xf32>
    %577 = arith.mulf %575, %576 : vector<1x8xf32>
    %578 = vector.extract_strided_slice %525 {offsets = [0, 24], sizes = [16, 8], strides = [1, 1]} : vector<16x32xf32> to vector<16x8xf32>
    %cst_214 = arith.constant dense<0.000000e+00> : vector<1x16xf32>
    %579 = tpu.matmul %577, %578, %cst_214 {dimension_numbers = #tpu.dot_dimension_numbers<[1], [1], [0], [0], [0, 0, 1, 0], [], []>} : vector<1x8xf32>, vector<16x8xf32>, vector<1x16xf32> -> vector<1x16xf32>
    %cst_215 = arith.constant dense<0xFF800000> : vector<1xf32>
    %580 = vector.multi_reduction <maximumf>, %579, %cst_215 [1] : vector<1x16xf32> to vector<1xf32>
    %581 = vector.shape_cast %580 : vector<1xf32> to vector<1x1xf32>
    %582 = vector.broadcast %581 : vector<1x1xf32> to vector<1x16xf32>
    %583 = arith.subf %579, %582 : vector<1x16xf32>
    %584 = math.exp %583 : vector<1x16xf32>
    %cst_216 = arith.constant dense<0.000000e+00> : vector<1xf32>
    %585 = vector.multi_reduction <add>, %584, %cst_216 [1] : vector<1x16xf32> to vector<1xf32>
    %586 = vector.shape_cast %585 : vector<1xf32> to vector<1x1xf32>
    %587 = vector.broadcast %586 : vector<1x1xf32> to vector<1x16xf32>
    %588 = arith.divf %584, %587 : vector<1x16xf32>
    %589 = vector.extract_strided_slice %526 {offsets = [0, 24], sizes = [16, 8], strides = [1, 1]} : vector<16x32xf32> to vector<16x8xf32>
    %cst_217 = arith.constant dense<0.000000e+00> : vector<1x8xf32>
    %590 = tpu.matmul %588, %589, %cst_217 {dimension_numbers = #tpu.dot_dimension_numbers<[1], [0], [0], [1], [0, 0, 1, 1], [], []>} : vector<1x16xf32>, vector<16x8xf32>, vector<1x8xf32> -> vector<1x8xf32>
    %591 = tpu.concatenate %542, %558, %574, %590 in 1 : vector<1x8xf32>, vector<1x8xf32>, vector<1x8xf32>, vector<1x8xf32> -> vector<1x32xf32>
    %592 = vector.extract_strided_slice %241 {offsets = [10, 0], sizes = [1, 32], strides = [1, 1]} : vector<16x32xf32> to vector<1x32xf32>
    %593 = vector.extract_strided_slice %246 {offsets = [80, 0], sizes = [16, 32], strides = [1, 1]} : vector<128x32xf32> to vector<16x32xf32>
    %594 = vector.extract_strided_slice %251 {offsets = [80, 0], sizes = [16, 32], strides = [1, 1]} : vector<128x32xf32> to vector<16x32xf32>
    %595 = vector.extract_strided_slice %592 {offsets = [0, 0], sizes = [1, 8], strides = [1, 1]} : vector<1x32xf32> to vector<1x8xf32>
    %cst_218 = arith.constant 0.353553385 : f32
    %596 = vector.broadcast %cst_218 : f32 to vector<1x8xf32>
    %597 = arith.mulf %595, %596 : vector<1x8xf32>
    %598 = vector.extract_strided_slice %593 {offsets = [0, 0], sizes = [16, 8], strides = [1, 1]} : vector<16x32xf32> to vector<16x8xf32>
    %cst_219 = arith.constant dense<0.000000e+00> : vector<1x16xf32>
    %599 = tpu.matmul %597, %598, %cst_219 {dimension_numbers = #tpu.dot_dimension_numbers<[1], [1], [0], [0], [0, 0, 1, 0], [], []>} : vector<1x8xf32>, vector<16x8xf32>, vector<1x16xf32> -> vector<1x16xf32>
    %cst_220 = arith.constant dense<0xFF800000> : vector<1xf32>
    %600 = vector.multi_reduction <maximumf>, %599, %cst_220 [1] : vector<1x16xf32> to vector<1xf32>
    %601 = vector.shape_cast %600 : vector<1xf32> to vector<1x1xf32>
    %602 = vector.broadcast %601 : vector<1x1xf32> to vector<1x16xf32>
    %603 = arith.subf %599, %602 : vector<1x16xf32>
    %604 = math.exp %603 : vector<1x16xf32>
    %cst_221 = arith.constant dense<0.000000e+00> : vector<1xf32>
    %605 = vector.multi_reduction <add>, %604, %cst_221 [1] : vector<1x16xf32> to vector<1xf32>
    %606 = vector.shape_cast %605 : vector<1xf32> to vector<1x1xf32>
    %607 = vector.broadcast %606 : vector<1x1xf32> to vector<1x16xf32>
    %608 = arith.divf %604, %607 : vector<1x16xf32>
    %609 = vector.extract_strided_slice %594 {offsets = [0, 0], sizes = [16, 8], strides = [1, 1]} : vector<16x32xf32> to vector<16x8xf32>
    %cst_222 = arith.constant dense<0.000000e+00> : vector<1x8xf32>
    %610 = tpu.matmul %608, %609, %cst_222 {dimension_numbers = #tpu.dot_dimension_numbers<[1], [0], [0], [1], [0, 0, 1, 1], [], []>} : vector<1x16xf32>, vector<16x8xf32>, vector<1x8xf32> -> vector<1x8xf32>
    %611 = vector.extract_strided_slice %592 {offsets = [0, 8], sizes = [1, 8], strides = [1, 1]} : vector<1x32xf32> to vector<1x8xf32>
    %cst_223 = arith.constant 0.353553385 : f32
    %612 = vector.broadcast %cst_223 : f32 to vector<1x8xf32>
    %613 = arith.mulf %611, %612 : vector<1x8xf32>
    %614 = vector.extract_strided_slice %593 {offsets = [0, 8], sizes = [16, 8], strides = [1, 1]} : vector<16x32xf32> to vector<16x8xf32>
    %cst_224 = arith.constant dense<0.000000e+00> : vector<1x16xf32>
    %615 = tpu.matmul %613, %614, %cst_224 {dimension_numbers = #tpu.dot_dimension_numbers<[1], [1], [0], [0], [0, 0, 1, 0], [], []>} : vector<1x8xf32>, vector<16x8xf32>, vector<1x16xf32> -> vector<1x16xf32>
    %cst_225 = arith.constant dense<0xFF800000> : vector<1xf32>
    %616 = vector.multi_reduction <maximumf>, %615, %cst_225 [1] : vector<1x16xf32> to vector<1xf32>
    %617 = vector.shape_cast %616 : vector<1xf32> to vector<1x1xf32>
    %618 = vector.broadcast %617 : vector<1x1xf32> to vector<1x16xf32>
    %619 = arith.subf %615, %618 : vector<1x16xf32>
    %620 = math.exp %619 : vector<1x16xf32>
    %cst_226 = arith.constant dense<0.000000e+00> : vector<1xf32>
    %621 = vector.multi_reduction <add>, %620, %cst_226 [1] : vector<1x16xf32> to vector<1xf32>
    %622 = vector.shape_cast %621 : vector<1xf32> to vector<1x1xf32>
    %623 = vector.broadcast %622 : vector<1x1xf32> to vector<1x16xf32>
    %624 = arith.divf %620, %623 : vector<1x16xf32>
    %625 = vector.extract_strided_slice %594 {offsets = [0, 8], sizes = [16, 8], strides = [1, 1]} : vector<16x32xf32> to vector<16x8xf32>
    %cst_227 = arith.constant dense<0.000000e+00> : vector<1x8xf32>
    %626 = tpu.matmul %624, %625, %cst_227 {dimension_numbers = #tpu.dot_dimension_numbers<[1], [0], [0], [1], [0, 0, 1, 1], [], []>} : vector<1x16xf32>, vector<16x8xf32>, vector<1x8xf32> -> vector<1x8xf32>
    %627 = vector.extract_strided_slice %592 {offsets = [0, 16], sizes = [1, 8], strides = [1, 1]} : vector<1x32xf32> to vector<1x8xf32>
    %cst_228 = arith.constant 0.353553385 : f32
    %628 = vector.broadcast %cst_228 : f32 to vector<1x8xf32>
    %629 = arith.mulf %627, %628 : vector<1x8xf32>
    %630 = vector.extract_strided_slice %593 {offsets = [0, 16], sizes = [16, 8], strides = [1, 1]} : vector<16x32xf32> to vector<16x8xf32>
    %cst_229 = arith.constant dense<0.000000e+00> : vector<1x16xf32>
    %631 = tpu.matmul %629, %630, %cst_229 {dimension_numbers = #tpu.dot_dimension_numbers<[1], [1], [0], [0], [0, 0, 1, 0], [], []>} : vector<1x8xf32>, vector<16x8xf32>, vector<1x16xf32> -> vector<1x16xf32>
    %cst_230 = arith.constant dense<0xFF800000> : vector<1xf32>
    %632 = vector.multi_reduction <maximumf>, %631, %cst_230 [1] : vector<1x16xf32> to vector<1xf32>
    %633 = vector.shape_cast %632 : vector<1xf32> to vector<1x1xf32>
    %634 = vector.broadcast %633 : vector<1x1xf32> to vector<1x16xf32>
    %635 = arith.subf %631, %634 : vector<1x16xf32>
    %636 = math.exp %635 : vector<1x16xf32>
    %cst_231 = arith.constant dense<0.000000e+00> : vector<1xf32>
    %637 = vector.multi_reduction <add>, %636, %cst_231 [1] : vector<1x16xf32> to vector<1xf32>
    %638 = vector.shape_cast %637 : vector<1xf32> to vector<1x1xf32>
    %639 = vector.broadcast %638 : vector<1x1xf32> to vector<1x16xf32>
    %640 = arith.divf %636, %639 : vector<1x16xf32>
    %641 = vector.extract_strided_slice %594 {offsets = [0, 16], sizes = [16, 8], strides = [1, 1]} : vector<16x32xf32> to vector<16x8xf32>
    %cst_232 = arith.constant dense<0.000000e+00> : vector<1x8xf32>
    %642 = tpu.matmul %640, %641, %cst_232 {dimension_numbers = #tpu.dot_dimension_numbers<[1], [0], [0], [1], [0, 0, 1, 1], [], []>} : vector<1x16xf32>, vector<16x8xf32>, vector<1x8xf32> -> vector<1x8xf32>
    %643 = vector.extract_strided_slice %592 {offsets = [0, 24], sizes = [1, 8], strides = [1, 1]} : vector<1x32xf32> to vector<1x8xf32>
    %cst_233 = arith.constant 0.353553385 : f32
    %644 = vector.broadcast %cst_233 : f32 to vector<1x8xf32>
    %645 = arith.mulf %643, %644 : vector<1x8xf32>
    %646 = vector.extract_strided_slice %593 {offsets = [0, 24], sizes = [16, 8], strides = [1, 1]} : vector<16x32xf32> to vector<16x8xf32>
    %cst_234 = arith.constant dense<0.000000e+00> : vector<1x16xf32>
    %647 = tpu.matmul %645, %646, %cst_234 {dimension_numbers = #tpu.dot_dimension_numbers<[1], [1], [0], [0], [0, 0, 1, 0], [], []>} : vector<1x8xf32>, vector<16x8xf32>, vector<1x16xf32> -> vector<1x16xf32>
    %cst_235 = arith.constant dense<0xFF800000> : vector<1xf32>
    %648 = vector.multi_reduction <maximumf>, %647, %cst_235 [1] : vector<1x16xf32> to vector<1xf32>
    %649 = vector.shape_cast %648 : vector<1xf32> to vector<1x1xf32>
    %650 = vector.broadcast %649 : vector<1x1xf32> to vector<1x16xf32>
    %651 = arith.subf %647, %650 : vector<1x16xf32>
    %652 = math.exp %651 : vector<1x16xf32>
    %cst_236 = arith.constant dense<0.000000e+00> : vector<1xf32>
    %653 = vector.multi_reduction <add>, %652, %cst_236 [1] : vector<1x16xf32> to vector<1xf32>
    %654 = vector.shape_cast %653 : vector<1xf32> to vector<1x1xf32>
    %655 = vector.broadcast %654 : vector<1x1xf32> to vector<1x16xf32>
    %656 = arith.divf %652, %655 : vector<1x16xf32>
    %657 = vector.extract_strided_slice %594 {offsets = [0, 24], sizes = [16, 8], strides = [1, 1]} : vector<16x32xf32> to vector<16x8xf32>
    %cst_237 = arith.constant dense<0.000000e+00> : vector<1x8xf32>
    %658 = tpu.matmul %656, %657, %cst_237 {dimension_numbers = #tpu.dot_dimension_numbers<[1], [0], [0], [1], [0, 0, 1, 1], [], []>} : vector<1x16xf32>, vector<16x8xf32>, vector<1x8xf32> -> vector<1x8xf32>
    %659 = tpu.concatenate %610, %626, %642, %658 in 1 : vector<1x8xf32>, vector<1x8xf32>, vector<1x8xf32>, vector<1x8xf32> -> vector<1x32xf32>
    %660 = vector.extract_strided_slice %241 {offsets = [11, 0], sizes = [1, 32], strides = [1, 1]} : vector<16x32xf32> to vector<1x32xf32>
    %661 = vector.extract_strided_slice %246 {offsets = [96, 0], sizes = [16, 32], strides = [1, 1]} : vector<128x32xf32> to vector<16x32xf32>
    %662 = vector.extract_strided_slice %251 {offsets = [96, 0], sizes = [16, 32], strides = [1, 1]} : vector<128x32xf32> to vector<16x32xf32>
    %663 = vector.extract_strided_slice %660 {offsets = [0, 0], sizes = [1, 8], strides = [1, 1]} : vector<1x32xf32> to vector<1x8xf32>
    %cst_238 = arith.constant 0.353553385 : f32
    %664 = vector.broadcast %cst_238 : f32 to vector<1x8xf32>
    %665 = arith.mulf %663, %664 : vector<1x8xf32>
    %666 = vector.extract_strided_slice %661 {offsets = [0, 0], sizes = [16, 8], strides = [1, 1]} : vector<16x32xf32> to vector<16x8xf32>
    %cst_239 = arith.constant dense<0.000000e+00> : vector<1x16xf32>
    %667 = tpu.matmul %665, %666, %cst_239 {dimension_numbers = #tpu.dot_dimension_numbers<[1], [1], [0], [0], [0, 0, 1, 0], [], []>} : vector<1x8xf32>, vector<16x8xf32>, vector<1x16xf32> -> vector<1x16xf32>
    %cst_240 = arith.constant dense<0xFF800000> : vector<1xf32>
    %668 = vector.multi_reduction <maximumf>, %667, %cst_240 [1] : vector<1x16xf32> to vector<1xf32>
    %669 = vector.shape_cast %668 : vector<1xf32> to vector<1x1xf32>
    %670 = vector.broadcast %669 : vector<1x1xf32> to vector<1x16xf32>
    %671 = arith.subf %667, %670 : vector<1x16xf32>
    %672 = math.exp %671 : vector<1x16xf32>
    %cst_241 = arith.constant dense<0.000000e+00> : vector<1xf32>
    %673 = vector.multi_reduction <add>, %672, %cst_241 [1] : vector<1x16xf32> to vector<1xf32>
    %674 = vector.shape_cast %673 : vector<1xf32> to vector<1x1xf32>
    %675 = vector.broadcast %674 : vector<1x1xf32> to vector<1x16xf32>
    %676 = arith.divf %672, %675 : vector<1x16xf32>
    %677 = vector.extract_strided_slice %662 {offsets = [0, 0], sizes = [16, 8], strides = [1, 1]} : vector<16x32xf32> to vector<16x8xf32>
    %cst_242 = arith.constant dense<0.000000e+00> : vector<1x8xf32>
    %678 = tpu.matmul %676, %677, %cst_242 {dimension_numbers = #tpu.dot_dimension_numbers<[1], [0], [0], [1], [0, 0, 1, 1], [], []>} : vector<1x16xf32>, vector<16x8xf32>, vector<1x8xf32> -> vector<1x8xf32>
    %679 = vector.extract_strided_slice %660 {offsets = [0, 8], sizes = [1, 8], strides = [1, 1]} : vector<1x32xf32> to vector<1x8xf32>
    %cst_243 = arith.constant 0.353553385 : f32
    %680 = vector.broadcast %cst_243 : f32 to vector<1x8xf32>
    %681 = arith.mulf %679, %680 : vector<1x8xf32>
    %682 = vector.extract_strided_slice %661 {offsets = [0, 8], sizes = [16, 8], strides = [1, 1]} : vector<16x32xf32> to vector<16x8xf32>
    %cst_244 = arith.constant dense<0.000000e+00> : vector<1x16xf32>
    %683 = tpu.matmul %681, %682, %cst_244 {dimension_numbers = #tpu.dot_dimension_numbers<[1], [1], [0], [0], [0, 0, 1, 0], [], []>} : vector<1x8xf32>, vector<16x8xf32>, vector<1x16xf32> -> vector<1x16xf32>
    %cst_245 = arith.constant dense<0xFF800000> : vector<1xf32>
    %684 = vector.multi_reduction <maximumf>, %683, %cst_245 [1] : vector<1x16xf32> to vector<1xf32>
    %685 = vector.shape_cast %684 : vector<1xf32> to vector<1x1xf32>
    %686 = vector.broadcast %685 : vector<1x1xf32> to vector<1x16xf32>
    %687 = arith.subf %683, %686 : vector<1x16xf32>
    %688 = math.exp %687 : vector<1x16xf32>
    %cst_246 = arith.constant dense<0.000000e+00> : vector<1xf32>
    %689 = vector.multi_reduction <add>, %688, %cst_246 [1] : vector<1x16xf32> to vector<1xf32>
    %690 = vector.shape_cast %689 : vector<1xf32> to vector<1x1xf32>
    %691 = vector.broadcast %690 : vector<1x1xf32> to vector<1x16xf32>
    %692 = arith.divf %688, %691 : vector<1x16xf32>
    %693 = vector.extract_strided_slice %662 {offsets = [0, 8], sizes = [16, 8], strides = [1, 1]} : vector<16x32xf32> to vector<16x8xf32>
    %cst_247 = arith.constant dense<0.000000e+00> : vector<1x8xf32>
    %694 = tpu.matmul %692, %693, %cst_247 {dimension_numbers = #tpu.dot_dimension_numbers<[1], [0], [0], [1], [0, 0, 1, 1], [], []>} : vector<1x16xf32>, vector<16x8xf32>, vector<1x8xf32> -> vector<1x8xf32>
    %695 = vector.extract_strided_slice %660 {offsets = [0, 16], sizes = [1, 8], strides = [1, 1]} : vector<1x32xf32> to vector<1x8xf32>
    %cst_248 = arith.constant 0.353553385 : f32
    %696 = vector.broadcast %cst_248 : f32 to vector<1x8xf32>
    %697 = arith.mulf %695, %696 : vector<1x8xf32>
    %698 = vector.extract_strided_slice %661 {offsets = [0, 16], sizes = [16, 8], strides = [1, 1]} : vector<16x32xf32> to vector<16x8xf32>
    %cst_249 = arith.constant dense<0.000000e+00> : vector<1x16xf32>
    %699 = tpu.matmul %697, %698, %cst_249 {dimension_numbers = #tpu.dot_dimension_numbers<[1], [1], [0], [0], [0, 0, 1, 0], [], []>} : vector<1x8xf32>, vector<16x8xf32>, vector<1x16xf32> -> vector<1x16xf32>
    %cst_250 = arith.constant dense<0xFF800000> : vector<1xf32>
    %700 = vector.multi_reduction <maximumf>, %699, %cst_250 [1] : vector<1x16xf32> to vector<1xf32>
    %701 = vector.shape_cast %700 : vector<1xf32> to vector<1x1xf32>
    %702 = vector.broadcast %701 : vector<1x1xf32> to vector<1x16xf32>
    %703 = arith.subf %699, %702 : vector<1x16xf32>
    %704 = math.exp %703 : vector<1x16xf32>
    %cst_251 = arith.constant dense<0.000000e+00> : vector<1xf32>
    %705 = vector.multi_reduction <add>, %704, %cst_251 [1] : vector<1x16xf32> to vector<1xf32>
    %706 = vector.shape_cast %705 : vector<1xf32> to vector<1x1xf32>
    %707 = vector.broadcast %706 : vector<1x1xf32> to vector<1x16xf32>
    %708 = arith.divf %704, %707 : vector<1x16xf32>
    %709 = vector.extract_strided_slice %662 {offsets = [0, 16], sizes = [16, 8], strides = [1, 1]} : vector<16x32xf32> to vector<16x8xf32>
    %cst_252 = arith.constant dense<0.000000e+00> : vector<1x8xf32>
    %710 = tpu.matmul %708, %709, %cst_252 {dimension_numbers = #tpu.dot_dimension_numbers<[1], [0], [0], [1], [0, 0, 1, 1], [], []>} : vector<1x16xf32>, vector<16x8xf32>, vector<1x8xf32> -> vector<1x8xf32>
    %711 = vector.extract_strided_slice %660 {offsets = [0, 24], sizes = [1, 8], strides = [1, 1]} : vector<1x32xf32> to vector<1x8xf32>
    %cst_253 = arith.constant 0.353553385 : f32
    %712 = vector.broadcast %cst_253 : f32 to vector<1x8xf32>
    %713 = arith.mulf %711, %712 : vector<1x8xf32>
    %714 = vector.extract_strided_slice %661 {offsets = [0, 24], sizes = [16, 8], strides = [1, 1]} : vector<16x32xf32> to vector<16x8xf32>
    %cst_254 = arith.constant dense<0.000000e+00> : vector<1x16xf32>
    %715 = tpu.matmul %713, %714, %cst_254 {dimension_numbers = #tpu.dot_dimension_numbers<[1], [1], [0], [0], [0, 0, 1, 0], [], []>} : vector<1x8xf32>, vector<16x8xf32>, vector<1x16xf32> -> vector<1x16xf32>
    %cst_255 = arith.constant dense<0xFF800000> : vector<1xf32>
    %716 = vector.multi_reduction <maximumf>, %715, %cst_255 [1] : vector<1x16xf32> to vector<1xf32>
    %717 = vector.shape_cast %716 : vector<1xf32> to vector<1x1xf32>
    %718 = vector.broadcast %717 : vector<1x1xf32> to vector<1x16xf32>
    %719 = arith.subf %715, %718 : vector<1x16xf32>
    %720 = math.exp %719 : vector<1x16xf32>
    %cst_256 = arith.constant dense<0.000000e+00> : vector<1xf32>
    %721 = vector.multi_reduction <add>, %720, %cst_256 [1] : vector<1x16xf32> to vector<1xf32>
    %722 = vector.shape_cast %721 : vector<1xf32> to vector<1x1xf32>
    %723 = vector.broadcast %722 : vector<1x1xf32> to vector<1x16xf32>
    %724 = arith.divf %720, %723 : vector<1x16xf32>
    %725 = vector.extract_strided_slice %662 {offsets = [0, 24], sizes = [16, 8], strides = [1, 1]} : vector<16x32xf32> to vector<16x8xf32>
    %cst_257 = arith.constant dense<0.000000e+00> : vector<1x8xf32>
    %726 = tpu.matmul %724, %725, %cst_257 {dimension_numbers = #tpu.dot_dimension_numbers<[1], [0], [0], [1], [0, 0, 1, 1], [], []>} : vector<1x16xf32>, vector<16x8xf32>, vector<1x8xf32> -> vector<1x8xf32>
    %727 = tpu.concatenate %678, %694, %710, %726 in 1 : vector<1x8xf32>, vector<1x8xf32>, vector<1x8xf32>, vector<1x8xf32> -> vector<1x32xf32>
    %728 = vector.extract_strided_slice %241 {offsets = [12, 0], sizes = [1, 32], strides = [1, 1]} : vector<16x32xf32> to vector<1x32xf32>
    %729 = vector.extract_strided_slice %246 {offsets = [112, 0], sizes = [16, 32], strides = [1, 1]} : vector<128x32xf32> to vector<16x32xf32>
    %730 = vector.extract_strided_slice %251 {offsets = [112, 0], sizes = [16, 32], strides = [1, 1]} : vector<128x32xf32> to vector<16x32xf32>
    %731 = vector.extract_strided_slice %728 {offsets = [0, 0], sizes = [1, 8], strides = [1, 1]} : vector<1x32xf32> to vector<1x8xf32>
    %cst_258 = arith.constant 0.353553385 : f32
    %732 = vector.broadcast %cst_258 : f32 to vector<1x8xf32>
    %733 = arith.mulf %731, %732 : vector<1x8xf32>
    %734 = vector.extract_strided_slice %729 {offsets = [0, 0], sizes = [16, 8], strides = [1, 1]} : vector<16x32xf32> to vector<16x8xf32>
    %cst_259 = arith.constant dense<0.000000e+00> : vector<1x16xf32>
    %735 = tpu.matmul %733, %734, %cst_259 {dimension_numbers = #tpu.dot_dimension_numbers<[1], [1], [0], [0], [0, 0, 1, 0], [], []>} : vector<1x8xf32>, vector<16x8xf32>, vector<1x16xf32> -> vector<1x16xf32>
    %cst_260 = arith.constant dense<0xFF800000> : vector<1xf32>
    %736 = vector.multi_reduction <maximumf>, %735, %cst_260 [1] : vector<1x16xf32> to vector<1xf32>
    %737 = vector.shape_cast %736 : vector<1xf32> to vector<1x1xf32>
    %738 = vector.broadcast %737 : vector<1x1xf32> to vector<1x16xf32>
    %739 = arith.subf %735, %738 : vector<1x16xf32>
    %740 = math.exp %739 : vector<1x16xf32>
    %cst_261 = arith.constant dense<0.000000e+00> : vector<1xf32>
    %741 = vector.multi_reduction <add>, %740, %cst_261 [1] : vector<1x16xf32> to vector<1xf32>
    %742 = vector.shape_cast %741 : vector<1xf32> to vector<1x1xf32>
    %743 = vector.broadcast %742 : vector<1x1xf32> to vector<1x16xf32>
    %744 = arith.divf %740, %743 : vector<1x16xf32>
    %745 = vector.extract_strided_slice %730 {offsets = [0, 0], sizes = [16, 8], strides = [1, 1]} : vector<16x32xf32> to vector<16x8xf32>
    %cst_262 = arith.constant dense<0.000000e+00> : vector<1x8xf32>
    %746 = tpu.matmul %744, %745, %cst_262 {dimension_numbers = #tpu.dot_dimension_numbers<[1], [0], [0], [1], [0, 0, 1, 1], [], []>} : vector<1x16xf32>, vector<16x8xf32>, vector<1x8xf32> -> vector<1x8xf32>
    %747 = vector.extract_strided_slice %728 {offsets = [0, 8], sizes = [1, 8], strides = [1, 1]} : vector<1x32xf32> to vector<1x8xf32>
    %cst_263 = arith.constant 0.353553385 : f32
    %748 = vector.broadcast %cst_263 : f32 to vector<1x8xf32>
    %749 = arith.mulf %747, %748 : vector<1x8xf32>
    %750 = vector.extract_strided_slice %729 {offsets = [0, 8], sizes = [16, 8], strides = [1, 1]} : vector<16x32xf32> to vector<16x8xf32>
    %cst_264 = arith.constant dense<0.000000e+00> : vector<1x16xf32>
    %751 = tpu.matmul %749, %750, %cst_264 {dimension_numbers = #tpu.dot_dimension_numbers<[1], [1], [0], [0], [0, 0, 1, 0], [], []>} : vector<1x8xf32>, vector<16x8xf32>, vector<1x16xf32> -> vector<1x16xf32>
    %cst_265 = arith.constant dense<0xFF800000> : vector<1xf32>
    %752 = vector.multi_reduction <maximumf>, %751, %cst_265 [1] : vector<1x16xf32> to vector<1xf32>
    %753 = vector.shape_cast %752 : vector<1xf32> to vector<1x1xf32>
    %754 = vector.broadcast %753 : vector<1x1xf32> to vector<1x16xf32>
    %755 = arith.subf %751, %754 : vector<1x16xf32>
    %756 = math.exp %755 : vector<1x16xf32>
    %cst_266 = arith.constant dense<0.000000e+00> : vector<1xf32>
    %757 = vector.multi_reduction <add>, %756, %cst_266 [1] : vector<1x16xf32> to vector<1xf32>
    %758 = vector.shape_cast %757 : vector<1xf32> to vector<1x1xf32>
    %759 = vector.broadcast %758 : vector<1x1xf32> to vector<1x16xf32>
    %760 = arith.divf %756, %759 : vector<1x16xf32>
    %761 = vector.extract_strided_slice %730 {offsets = [0, 8], sizes = [16, 8], strides = [1, 1]} : vector<16x32xf32> to vector<16x8xf32>
    %cst_267 = arith.constant dense<0.000000e+00> : vector<1x8xf32>
    %762 = tpu.matmul %760, %761, %cst_267 {dimension_numbers = #tpu.dot_dimension_numbers<[1], [0], [0], [1], [0, 0, 1, 1], [], []>} : vector<1x16xf32>, vector<16x8xf32>, vector<1x8xf32> -> vector<1x8xf32>
    %763 = vector.extract_strided_slice %728 {offsets = [0, 16], sizes = [1, 8], strides = [1, 1]} : vector<1x32xf32> to vector<1x8xf32>
    %cst_268 = arith.constant 0.353553385 : f32
    %764 = vector.broadcast %cst_268 : f32 to vector<1x8xf32>
    %765 = arith.mulf %763, %764 : vector<1x8xf32>
    %766 = vector.extract_strided_slice %729 {offsets = [0, 16], sizes = [16, 8], strides = [1, 1]} : vector<16x32xf32> to vector<16x8xf32>
    %cst_269 = arith.constant dense<0.000000e+00> : vector<1x16xf32>
    %767 = tpu.matmul %765, %766, %cst_269 {dimension_numbers = #tpu.dot_dimension_numbers<[1], [1], [0], [0], [0, 0, 1, 0], [], []>} : vector<1x8xf32>, vector<16x8xf32>, vector<1x16xf32> -> vector<1x16xf32>
    %cst_270 = arith.constant dense<0xFF800000> : vector<1xf32>
    %768 = vector.multi_reduction <maximumf>, %767, %cst_270 [1] : vector<1x16xf32> to vector<1xf32>
    %769 = vector.shape_cast %768 : vector<1xf32> to vector<1x1xf32>
    %770 = vector.broadcast %769 : vector<1x1xf32> to vector<1x16xf32>
    %771 = arith.subf %767, %770 : vector<1x16xf32>
    %772 = math.exp %771 : vector<1x16xf32>
    %cst_271 = arith.constant dense<0.000000e+00> : vector<1xf32>
    %773 = vector.multi_reduction <add>, %772, %cst_271 [1] : vector<1x16xf32> to vector<1xf32>
    %774 = vector.shape_cast %773 : vector<1xf32> to vector<1x1xf32>
    %775 = vector.broadcast %774 : vector<1x1xf32> to vector<1x16xf32>
    %776 = arith.divf %772, %775 : vector<1x16xf32>
    %777 = vector.extract_strided_slice %730 {offsets = [0, 16], sizes = [16, 8], strides = [1, 1]} : vector<16x32xf32> to vector<16x8xf32>
    %cst_272 = arith.constant dense<0.000000e+00> : vector<1x8xf32>
    %778 = tpu.matmul %776, %777, %cst_272 {dimension_numbers = #tpu.dot_dimension_numbers<[1], [0], [0], [1], [0, 0, 1, 1], [], []>} : vector<1x16xf32>, vector<16x8xf32>, vector<1x8xf32> -> vector<1x8xf32>
    %779 = vector.extract_strided_slice %728 {offsets = [0, 24], sizes = [1, 8], strides = [1, 1]} : vector<1x32xf32> to vector<1x8xf32>
    %cst_273 = arith.constant 0.353553385 : f32
    %780 = vector.broadcast %cst_273 : f32 to vector<1x8xf32>
    %781 = arith.mulf %779, %780 : vector<1x8xf32>
    %782 = vector.extract_strided_slice %729 {offsets = [0, 24], sizes = [16, 8], strides = [1, 1]} : vector<16x32xf32> to vector<16x8xf32>
    %cst_274 = arith.constant dense<0.000000e+00> : vector<1x16xf32>
    %783 = tpu.matmul %781, %782, %cst_274 {dimension_numbers = #tpu.dot_dimension_numbers<[1], [1], [0], [0], [0, 0, 1, 0], [], []>} : vector<1x8xf32>, vector<16x8xf32>, vector<1x16xf32> -> vector<1x16xf32>
    %cst_275 = arith.constant dense<0xFF800000> : vector<1xf32>
    %784 = vector.multi_reduction <maximumf>, %783, %cst_275 [1] : vector<1x16xf32> to vector<1xf32>
    %785 = vector.shape_cast %784 : vector<1xf32> to vector<1x1xf32>
    %786 = vector.broadcast %785 : vector<1x1xf32> to vector<1x16xf32>
    %787 = arith.subf %783, %786 : vector<1x16xf32>
    %788 = math.exp %787 : vector<1x16xf32>
    %cst_276 = arith.constant dense<0.000000e+00> : vector<1xf32>
    %789 = vector.multi_reduction <add>, %788, %cst_276 [1] : vector<1x16xf32> to vector<1xf32>
    %790 = vector.shape_cast %789 : vector<1xf32> to vector<1x1xf32>
    %791 = vector.broadcast %790 : vector<1x1xf32> to vector<1x16xf32>
    %792 = arith.divf %788, %791 : vector<1x16xf32>
    %793 = vector.extract_strided_slice %730 {offsets = [0, 24], sizes = [16, 8], strides = [1, 1]} : vector<16x32xf32> to vector<16x8xf32>
    %cst_277 = arith.constant dense<0.000000e+00> : vector<1x8xf32>
    %794 = tpu.matmul %792, %793, %cst_277 {dimension_numbers = #tpu.dot_dimension_numbers<[1], [0], [0], [1], [0, 0, 1, 1], [], []>} : vector<1x16xf32>, vector<16x8xf32>, vector<1x8xf32> -> vector<1x8xf32>
    %795 = tpu.concatenate %746, %762, %778, %794 in 1 : vector<1x8xf32>, vector<1x8xf32>, vector<1x8xf32>, vector<1x8xf32> -> vector<1x32xf32>
    %796 = tpu.concatenate %319, %387, %455, %523, %591, %659, %727, %795 in 0 : vector<1x32xf32>, vector<1x32xf32>, vector<1x32xf32>, vector<1x32xf32>, vector<1x32xf32>, vector<1x32xf32>, vector<1x32xf32>, vector<1x32xf32> -> vector<8x32xf32>
    %c0_278 = arith.constant 0 : index
    %c0_279 = arith.constant 0 : index
    %797 = vector.load %arg28[%c0_278, %c0_279] : memref<32x32xf32, #tpu.memory_space<vmem>>, vector<32x32xf32>
    %cst_280 = arith.constant dense<0.000000e+00> : vector<8x32xf32>
    %798 = tpu.matmul %796, %797, %cst_280 {dimension_numbers = #tpu.dot_dimension_numbers<[1], [0], [0], [1], [0, 0, 1, 1], [], []>} : vector<8x32xf32>, vector<32x32xf32>, vector<8x32xf32> -> vector<8x32xf32>
    %c0_281 = arith.constant 0 : index
    %c0_282 = arith.constant 0 : index
    %799 = vector.load %arg29[%c0_281, %c0_282] : memref<1x32xf32, #tpu.memory_space<vmem>>, vector<1x32xf32>
    %800 = vector.broadcast %799 : vector<1x32xf32> to vector<8x32xf32>
    %801 = arith.addf %798, %800 : vector<8x32xf32>
    %802 = vector.extract_strided_slice %801 {offsets = [0, 0], sizes = [3, 32], strides = [1, 1]} : vector<8x32xf32> to vector<3x32xf32>
    %cst_283 = arith.constant 0.000000e+00 : f32
    %803 = vector.broadcast %cst_283 : f32 to vector<5x32xf32>
    %804 = tpu.concatenate %802, %803 in 0 : vector<3x32xf32>, vector<5x32xf32> -> vector<8x32xf32>
    %805 = vector.extract_strided_slice %801 {offsets = [3, 0], sizes = [5, 32], strides = [1, 1]} : vector<8x32xf32> to vector<5x32xf32>
    %cst_284 = arith.constant 0.000000e+00 : f32
    %806 = vector.broadcast %cst_284 : f32 to vector<3x32xf32>
    %807 = tpu.concatenate %805, %806 in 0 : vector<5x32xf32>, vector<3x32xf32> -> vector<8x32xf32>
    %808 = tpu.concatenate %804, %807 in 0 : vector<8x32xf32>, vector<8x32xf32> -> vector<16x32xf32>
    %809 = arith.addf %210, %808 : vector<16x32xf32>
    %cst_285 = arith.constant dense<0.000000e+00> : vector<16xf32>
    %810 = vector.multi_reduction <add>, %809, %cst_285 [1] : vector<16x32xf32> to vector<16xf32>
    %811 = vector.shape_cast %810 : vector<16xf32> to vector<16x1xf32>
    %cst_286 = arith.constant 3.200000e+01 : f32
    %812 = vector.broadcast %cst_286 : f32 to vector<16x1xf32>
    %813 = arith.divf %811, %812 : vector<16x1xf32>
    %814 = vector.broadcast %813 : vector<16x1xf32> to vector<16x32xf32>
    %815 = arith.subf %809, %814 : vector<16x32xf32>
    %816 = arith.mulf %815, %815 : vector<16x32xf32>
    %cst_287 = arith.constant dense<0.000000e+00> : vector<16xf32>
    %817 = vector.multi_reduction <add>, %816, %cst_287 [1] : vector<16x32xf32> to vector<16xf32>
    %818 = vector.shape_cast %817 : vector<16xf32> to vector<16x1xf32>
    %cst_288 = arith.constant 3.200000e+01 : f32
    %819 = vector.broadcast %cst_288 : f32 to vector<16x1xf32>
    %820 = arith.divf %818, %819 : vector<16x1xf32>
    %821 = vector.broadcast %813 : vector<16x1xf32> to vector<16x32xf32>
    %822 = arith.subf %809, %821 : vector<16x32xf32>
    %cst_289 = arith.constant 9.99999974E-6 : f32
    %823 = vector.broadcast %cst_289 : f32 to vector<16x1xf32>
    %824 = arith.addf %820, %823 : vector<16x1xf32>
    %825 = math.rsqrt %824 : vector<16x1xf32>
    %826 = vector.broadcast %825 : vector<16x1xf32> to vector<16x32xf32>
    %827 = arith.mulf %822, %826 : vector<16x32xf32>
    %c0_290 = arith.constant 0 : index
    %c0_291 = arith.constant 0 : index
    %828 = vector.load %arg30[%c0_290, %c0_291] : memref<1x32xf32, #tpu.memory_space<vmem>>, vector<1x32xf32>
    %829 = vector.broadcast %828 : vector<1x32xf32> to vector<16x32xf32>
    %830 = arith.mulf %827, %829 : vector<16x32xf32>
    %c0_292 = arith.constant 0 : index
    %c0_293 = arith.constant 0 : index
    %831 = vector.load %arg31[%c0_292, %c0_293] : memref<1x32xf32, #tpu.memory_space<vmem>>, vector<1x32xf32>
    %832 = vector.broadcast %831 : vector<1x32xf32> to vector<16x32xf32>
    %833 = arith.addf %830, %832 : vector<16x32xf32>
    %c0_294 = arith.constant 0 : index
    %c0_295 = arith.constant 0 : index
    %834 = vector.load %arg32[%c0_294, %c0_295] : memref<32x64xf32, #tpu.memory_space<vmem>>, vector<32x64xf32>
    %cst_296 = arith.constant dense<0.000000e+00> : vector<16x64xf32>
    %835 = tpu.matmul %833, %834, %cst_296 {dimension_numbers = #tpu.dot_dimension_numbers<[1], [0], [0], [1], [0, 0, 1, 1], [], []>} : vector<16x32xf32>, vector<32x64xf32>, vector<16x64xf32> -> vector<16x64xf32>
    %c0_297 = arith.constant 0 : index
    %c0_298 = arith.constant 0 : index
    %836 = vector.load %arg33[%c0_297, %c0_298] : memref<1x64xf32, #tpu.memory_space<vmem>>, vector<1x64xf32>
    %837 = vector.broadcast %836 : vector<1x64xf32> to vector<16x64xf32>
    %838 = arith.addf %835, %837 : vector<16x64xf32>
    %cst_299 = arith.constant 0.000000e+00 : f32
    %839 = vector.broadcast %cst_299 : f32 to vector<16x64xf32>
    %840 = arith.maximumf %838, %839 : vector<16x64xf32>
    %c0_300 = arith.constant 0 : index
    %c0_301 = arith.constant 0 : index
    %841 = vector.load %arg34[%c0_300, %c0_301] : memref<64x32xf32, #tpu.memory_space<vmem>>, vector<64x32xf32>
    %cst_302 = arith.constant dense<0.000000e+00> : vector<16x32xf32>
    %842 = tpu.matmul %840, %841, %cst_302 {dimension_numbers = #tpu.dot_dimension_numbers<[1], [0], [0], [1], [0, 0, 1, 1], [], []>} : vector<16x64xf32>, vector<64x32xf32>, vector<16x32xf32> -> vector<16x32xf32>
    %c0_303 = arith.constant 0 : index
    %c0_304 = arith.constant 0 : index
    %843 = vector.load %arg35[%c0_303, %c0_304] : memref<1x32xf32, #tpu.memory_space<vmem>>, vector<1x32xf32>
    %844 = vector.broadcast %843 : vector<1x32xf32> to vector<16x32xf32>
    %845 = arith.addf %842, %844 : vector<16x32xf32>
    %846 = arith.addf %833, %845 : vector<16x32xf32>
    %cst_305 = arith.constant dense<0.000000e+00> : vector<16xf32>
    %847 = vector.multi_reduction <add>, %846, %cst_305 [1] : vector<16x32xf32> to vector<16xf32>
    %848 = vector.shape_cast %847 : vector<16xf32> to vector<16x1xf32>
    %cst_306 = arith.constant 3.200000e+01 : f32
    %849 = vector.broadcast %cst_306 : f32 to vector<16x1xf32>
    %850 = arith.divf %848, %849 : vector<16x1xf32>
    %851 = vector.broadcast %850 : vector<16x1xf32> to vector<16x32xf32>
    %852 = arith.subf %846, %851 : vector<16x32xf32>
    %853 = arith.mulf %852, %852 : vector<16x32xf32>
    %cst_307 = arith.constant dense<0.000000e+00> : vector<16xf32>
    %854 = vector.multi_reduction <add>, %853, %cst_307 [1] : vector<16x32xf32> to vector<16xf32>
    %855 = vector.shape_cast %854 : vector<16xf32> to vector<16x1xf32>
    %cst_308 = arith.constant 3.200000e+01 : f32
    %856 = vector.broadcast %cst_308 : f32 to vector<16x1xf32>
    %857 = arith.divf %855, %856 : vector<16x1xf32>
    %858 = vector.broadcast %850 : vector<16x1xf32> to vector<16x32xf32>
    %859 = arith.subf %846, %858 : vector<16x32xf32>
    %cst_309 = arith.constant 9.99999974E-6 : f32
    %860 = vector.broadcast %cst_309 : f32 to vector<16x1xf32>
    %861 = arith.addf %857, %860 : vector<16x1xf32>
    %862 = math.rsqrt %861 : vector<16x1xf32>
    %863 = vector.broadcast %862 : vector<16x1xf32> to vector<16x32xf32>
    %864 = arith.mulf %859, %863 : vector<16x32xf32>
    %c0_310 = arith.constant 0 : index
    %c0_311 = arith.constant 0 : index
    %865 = vector.load %arg36[%c0_310, %c0_311] : memref<1x32xf32, #tpu.memory_space<vmem>>, vector<1x32xf32>
    %866 = vector.broadcast %865 : vector<1x32xf32> to vector<16x32xf32>
    %867 = arith.mulf %864, %866 : vector<16x32xf32>
    %c0_312 = arith.constant 0 : index
    %c0_313 = arith.constant 0 : index
    %868 = vector.load %arg37[%c0_312, %c0_313] : memref<1x32xf32, #tpu.memory_space<vmem>>, vector<1x32xf32>
    %869 = vector.broadcast %868 : vector<1x32xf32> to vector<16x32xf32>
    %870 = arith.addf %867, %869 : vector<16x32xf32>
    %c0_314 = arith.constant 0 : index
    %c0_315 = arith.constant 0 : index
    %871 = vector.load %arg38[%c0_314, %c0_315] : memref<16x32xf32, #tpu.memory_space<vmem>>, vector<16x32xf32>
    tpu.vector_store %arg38[%c0_314, %c0_315], %870 {strides = array<i32>} : memref<16x32xf32, #tpu.memory_space<vmem>>, vector<16x32xf32>,
    return
  }
  func.func @transform_0(%arg0: i32) -> (i32, i32) {
    %c0_i32 = arith.constant 0 : i32
    %c0_i32_0 = arith.constant 0 : i32
    %c0_i32_1 = arith.constant 0 : i32
    return %c0_i32, %c0_i32_0 : i32, i32
  }
  func.func @transform_1(%arg0: i32) -> (i32, i32) {
    %c0_i32 = arith.constant 0 : i32
    %c0_i32_0 = arith.constant 0 : i32
    %c0_i32_1 = arith.constant 0 : i32
    return %c0_i32, %c0_i32_0 : i32, i32
  }
  func.func @transform_2(%arg0: i32) -> (i32, i32) {
    %c0_i32 = arith.constant 0 : i32
    %c0_i32_0 = arith.constant 0 : i32
    %c0_i32_1 = arith.constant 0 : i32
    return %c0_i32, %c0_i32_0 : i32, i32
  }
  func.func @transform_3(%arg0: i32) -> (i32, i32) {
    %c0_i32 = arith.constant 0 : i32
    %c0_i32_0 = arith.constant 0 : i32
    %c0_i32_1 = arith.constant 0 : i32
    return %c0_i32, %c0_i32_0 : i32, i32
  }
  func.func @transform_4(%arg0: i32) -> (i32, i32) {
    %c0_i32 = arith.constant 0 : i32
    %c0_i32_0 = arith.constant 0 : i32
    %c0_i32_1 = arith.constant 0 : i32
    return %c0_i32, %c0_i32_0 : i32, i32
  }
  func.func @transform_5(%arg0: i32) -> (i32, i32) {
    %c0_i32 = arith.constant 0 : i32
    %c0_i32_0 = arith.constant 0 : i32
    %c0_i32_1 = arith.constant 0 : i32
    return %c0_i32, %c0_i32_0 : i32, i32
  }
  func.func @transform_6(%arg0: i32) -> (i32, i32) {
    %c0_i32 = arith.constant 0 : i32
    %c0_i32_0 = arith.constant 0 : i32
    %c0_i32_1 = arith.constant 0 : i32
    return %c0_i32, %c0_i32_0 : i32, i32
  }
  func.func @transform_7(%arg0: i32) -> (i32, i32) {
    %c0_i32 = arith.constant 0 : i32
    %c0_i32_0 = arith.constant 0 : i32
    %c0_i32_1 = arith.constant 0 : i32
    return %c0_i32, %c0_i32_0 : i32, i32
  }
  func.func @transform_8(%arg0: i32) -> (i32, i32) {
    %c0_i32 = arith.constant 0 : i32
    %c0_i32_0 = arith.constant 0 : i32
    %c0_i32_1 = arith.constant 0 : i32
    return %c0_i32, %c0_i32_0 : i32, i32
  }
  func.func @transform_9(%arg0: i32) -> (i32, i32) {
    %c0_i32 = arith.constant 0 : i32
    %c0_i32_0 = arith.constant 0 : i32
    %c0_i32_1 = arith.constant 0 : i32
    return %c0_i32, %c0_i32_0 : i32, i32
  }
  func.func @transform_10(%arg0: i32) -> (i32, i32) {
    %c0_i32 = arith.constant 0 : i32
    %c0_i32_0 = arith.constant 0 : i32
    %c0_i32_1 = arith.constant 0 : i32
    return %c0_i32, %c0_i32_0 : i32, i32
  }
  func.func @transform_11(%arg0: i32) -> (i32, i32) {
    %c0_i32 = arith.constant 0 : i32
    %c0_i32_0 = arith.constant 0 : i32
    %c0_i32_1 = arith.constant 0 : i32
    return %c0_i32, %c0_i32_0 : i32, i32
  }
  func.func @transform_12(%arg0: i32) -> (i32, i32) {
    %c0_i32 = arith.constant 0 : i32
    %c0_i32_0 = arith.constant 0 : i32
    %c0_i32_1 = arith.constant 0 : i32
    return %c0_i32, %c0_i32_0 : i32, i32
  }
  func.func @transform_13(%arg0: i32) -> (i32, i32) {
    %c0_i32 = arith.constant 0 : i32
    %c0_i32_0 = arith.constant 0 : i32
    %c0_i32_1 = arith.constant 0 : i32
    return %c0_i32, %c0_i32_0 : i32, i32
  }
  func.func @transform_14(%arg0: i32) -> (i32, i32) {
    %c0_i32 = arith.constant 0 : i32
    %c0_i32_0 = arith.constant 0 : i32
    %c0_i32_1 = arith.constant 0 : i32
    return %c0_i32, %c0_i32_0 : i32, i32
  }
  func.func @transform_15(%arg0: i32) -> (i32, i32) {
    %c0_i32 = arith.constant 0 : i32
    %c0_i32_0 = arith.constant 0 : i32
    %c0_i32_1 = arith.constant 0 : i32
    return %c0_i32, %c0_i32_0 : i32, i32
  }
  func.func @transform_16(%arg0: i32) -> (i32, i32) {
    %c0_i32 = arith.constant 0 : i32
    %c0_i32_0 = arith.constant 0 : i32
    %c0_i32_1 = arith.constant 0 : i32
    return %c0_i32, %c0_i32_0 : i32, i32
  }
  func.func @transform_17(%arg0: i32) -> (i32, i32) {
    %c0_i32 = arith.constant 0 : i32
    %c0_i32_0 = arith.constant 0 : i32
    %c0_i32_1 = arith.constant 0 : i32
    return %c0_i32, %c0_i32_0 : i32, i32
  }
  func.func @transform_18(%arg0: i32) -> (i32, i32) {
    %c0_i32 = arith.constant 0 : i32
    %c0_i32_0 = arith.constant 0 : i32
    %c0_i32_1 = arith.constant 0 : i32
    return %c0_i32, %c0_i32_0 : i32, i32
  }
  func.func @transform_19(%arg0: i32) -> (i32, i32) {
    %c0_i32 = arith.constant 0 : i32
    %c0_i32_0 = arith.constant 0 : i32
    %c0_i32_1 = arith.constant 0 : i32
    return %c0_i32, %c0_i32_0 : i32, i32
  }
  func.func @transform_20(%arg0: i32) -> (i32, i32) {
    %c0_i32 = arith.constant 0 : i32
    %c0_i32_0 = arith.constant 0 : i32
    %c0_i32_1 = arith.constant 0 : i32
    return %c0_i32, %c0_i32_0 : i32, i32
  }
  func.func @transform_21(%arg0: i32) -> (i32, i32) {
    %c0_i32 = arith.constant 0 : i32
    %c0_i32_0 = arith.constant 0 : i32
    %c0_i32_1 = arith.constant 0 : i32
    return %c0_i32, %c0_i32_0 : i32, i32
  }
  func.func @transform_22(%arg0: i32) -> (i32, i32) {
    %c0_i32 = arith.constant 0 : i32
    %c0_i32_0 = arith.constant 0 : i32
    %c0_i32_1 = arith.constant 0 : i32
    return %c0_i32, %c0_i32_0 : i32, i32
  }
  func.func @transform_23(%arg0: i32) -> (i32, i32) {
    %c0_i32 = arith.constant 0 : i32
    %c0_i32_0 = arith.constant 0 : i32
    %c0_i32_1 = arith.constant 0 : i32
    return %c0_i32, %c0_i32_0 : i32, i32
  }
  func.func @transform_24(%arg0: i32) -> (i32, i32) {
    %c0_i32 = arith.constant 0 : i32
    %c0_i32_0 = arith.constant 0 : i32
    %c0_i32_1 = arith.constant 0 : i32
    return %c0_i32, %c0_i32_0 : i32, i32
  }
  func.func @transform_25(%arg0: i32) -> (i32, i32) {
    %c0_i32 = arith.constant 0 : i32
    %c0_i32_0 = arith.constant 0 : i32
    %c0_i32_1 = arith.constant 0 : i32
    return %c0_i32, %c0_i32_0 : i32, i32
  }
  func.func @transform_26(%arg0: i32) -> (i32, i32) {
    %c0_i32 = arith.constant 0 : i32
    %c0_i32_0 = arith.constant 0 : i32
    %c0_i32_1 = arith.constant 0 : i32
    return %c0_i32, %c0_i32_0 : i32, i32
  }
  func.func @transform_27(%arg0: i32) -> (i32, i32) {
    %c0_i32 = arith.constant 0 : i32
    %c0_i32_0 = arith.constant 0 : i32
    %c0_i32_1 = arith.constant 0 : i32
    return %c0_i32, %c0_i32_0 : i32, i32
  }
  func.func @transform_28(%arg0: i32) -> (i32, i32) {
    %c0_i32 = arith.constant 0 : i32
    %c0_i32_0 = arith.constant 0 : i32
    %c0_i32_1 = arith.constant 0 : i32
    return %c0_i32, %c0_i32_0 : i32, i32
  }
  func.func @transform_29(%arg0: i32) -> (i32, i32) {
    %c0_i32 = arith.constant 0 : i32
    %c0_i32_0 = arith.constant 0 : i32
    %c0_i32_1 = arith.constant 0 : i32
    return %c0_i32, %c0_i32_0 : i32, i32
  }
  func.func @transform_30(%arg0: i32) -> (i32, i32) {
    %c0_i32 = arith.constant 0 : i32
    %c0_i32_0 = arith.constant 0 : i32
    %c0_i32_1 = arith.constant 0 : i32
    return %c0_i32, %c0_i32_0 : i32, i32
  }
  func.func @transform_31(%arg0: i32) -> (i32, i32) {
    %c0_i32 = arith.constant 0 : i32
    %c0_i32_0 = arith.constant 0 : i32
    %c0_i32_1 = arith.constant 0 : i32
    return %c0_i32, %c0_i32_0 : i32, i32
  }
  func.func @transform_32(%arg0: i32) -> (i32, i32) {
    %c0_i32 = arith.constant 0 : i32
    %c0_i32_0 = arith.constant 0 : i32
    %c0_i32_1 = arith.constant 0 : i32
    return %c0_i32, %c0_i32_0 : i32, i32
  }
  func.func @transform_33(%arg0: i32) -> (i32, i32) {
    %c0_i32 = arith.constant 0 : i32
    %c0_i32_0 = arith.constant 0 : i32
    %c0_i32_1 = arith.constant 0 : i32
    return %c0_i32, %c0_i32_0 : i32, i32
  }
  func.func @transform_34(%arg0: i32) -> (i32, i32) {
    %c0_i32 = arith.constant 0 : i32
    %c0_i32_0 = arith.constant 0 : i32
    %c0_i32_1 = arith.constant 0 : i32
    return %c0_i32, %c0_i32_0 : i32, i32
  }
  func.func @transform_35(%arg0: i32) -> (i32, i32) {
    %c0_i32 = arith.constant 0 : i32
    %c0_i32_0 = arith.constant 0 : i32
    %c0_i32_1 = arith.constant 0 : i32
    return %c0_i32, %c0_i32_0 : i32, i32
  }
  func.func @transform_36(%arg0: i32) -> (i32, i32) {
    %c0_i32 = arith.constant 0 : i32
    %c0_i32_0 = arith.constant 0 : i32
    %c0_i32_1 = arith.constant 0 : i32
    return %c0_i32, %c0_i32_0 : i32, i32
  }
  func.func @transform_37(%arg0: i32) -> (i32, i32) {
    %c0_i32 = arith.constant 0 : i32
    %c0_i32_0 = arith.constant 0 : i32
    %c0_i32_1 = arith.constant 0 : i32
    return %c0_i32, %c0_i32_0 : i32, i32
  }
  func.func @transform_38(%arg0: i32) -> (i32, i32) {
    %c0_i32 = arith.constant 0 : i32
    %c0_i32_0 = arith.constant 0 : i32
    %c0_i32_1 = arith.constant 0 : i32
    return %c0_i32, %c0_i32_0 : i32, i32
  }
}

</mosaic_0001>

<bundles_post_ra>
// kernel: tpu_custom_call.1
= control target key start
LH: loop header
LB: loop body
LE: loop exit
PB: predicated region body
PF: predicated region fallthrough
CT: control target
= control target key end

     0   :  { %s11918_s6 = smov 1   ;;  %s11919_s10 = smov 2   ;;  %s13612_s0 = inlined_call_operand.smem [shape: u32[39], index: -1, kind: input, shape index: {}] }
   0x1   :  { %s11977_s5 = sld [smem:[%s13612_s0]]   ;;  %s11920_s14 = smov 3  }
   0x2   :  { %s11982_s9 = sld [smem:[%s13612_s0 + %s11918_s6]]   ;;  %s11921_s18 = smov 4  }
   0x3   :  { %s11987_s13 = sld [smem:[%s13612_s0 + %s11919_s10]]   ;;  %s11922_s22 = smov 5  }
   0x4   :  { %s11992_s17 = sld [smem:[%s13612_s0 + %s11920_s14]]   ;;  %s11923_s26 = smov 6  }
   0x5   :  { %s11997_s21 = sld [smem:[%s13612_s0 + %s11921_s18]]   ;;  %s11924_s30 = smov 7  }
   0x6   :  { %s12002_s25 = sld [smem:[%s13612_s0 + %s11922_s22]]   ;;  %s11925_s4 = smov 8  }
   0x7   :  { %s12007_s29 = sld [smem:[%s13612_s0 + %s11923_s26]]   ;;  %s11926_s10 = smov 9  }
   0x8   :  { %s12012_s3 = sld [smem:[%s13612_s0 + %s11924_s30]]   ;;  %s11927_s15 = smov 10  }
   0x9   :  { %13624 = sst [smem:[#allocation5_spill]] %s11987_s13  ;;  %s11928_s20 = smov 11  }
   0xa   :  { %13625 = sst [smem:[#allocation6_spill]] %s11992_s17  ;;  %s11929_s26 = smov 12  }
   0xb   :  { %13626 = sst [smem:[#allocation7_spill]] %s11997_s21  ;;  %s11930_s1 = smov 13  }
   0xc   :  { %s12017_s8 = sld [smem:[%s13612_s0 + %s11925_s4]]   ;;  %s11931_s7 = smov 14  }
   0xd   :  { %s12022_s14 = sld [smem:[%s13612_s0 + %s11926_s10]]   ;;  %s11933_s22 = smov 16  }
   0xe   :  { %s12027_s19 = sld [smem:[%s13612_s0 + %s11927_s15]]   ;;  %s11932_s15 = smov 15  }
   0xf   :  { %s12032_s24 = sld [smem:[%s13612_s0 + %s11928_s20]]   ;;  %s11934_s28 = smov 17  }
  0x10   :  { %s12037_s30 = sld [smem:[%s13612_s0 + %s11929_s26]]  }
  0x11   :  { %s12042_s6 = sld [smem:[%s13612_s0 + %s11930_s1]]  }
  0x12   :  { %s12047_s12 = sld [smem:[%s13612_s0 + %s11931_s7]]   ;;  %s11935_s7 = smov 18  }
  0x13   :  { %s12052_s20 = sld [smem:[%s13612_s0 + %s11932_s15]]   ;;  %s11936_s15 = smov 19  }
  0x14   :  { %s12057_s27 = sld [smem:[%s13612_s0 + %s11933_s22]]   ;;  %s11937_s22 = smov 20  }
  0x15   :  { %s12062_s4 = sld [smem:[%s13612_s0 + %s11934_s28]]   ;;  %s11938_s28 = smov 21  }
  0x16   :  { %s12067_s21 = sld [smem:[%s13612_s0 + %s11935_s7]]   ;;  %s11939_s7 = smov 22  }
  0x17   :  { %s12072_s13 = sld [smem:[%s13612_s0 + %s11936_s15]]   ;;  %s11940_s15 = smov 23  }
  0x18   :  { %s12092_s17 = sld [smem:[%s13612_s0 + %s11940_s15]]   ;;  %s11944_s15 = smov 27  }
  0x19   :  { %13627 = sst [smem:[#allocation8_spill]] %s12052_s20 }
  0x1a   :  { %13628 = sst [smem:[#allocation9_spill]] %s12057_s27 }
  0x1b   :  { %s12077_s27 = sld [smem:[%s13612_s0 + %s11937_s22]]   ;;  %s11941_s22 = smov 24  }
  0x1c   :  { %13629 = sst [smem:[#allocation10_spill]] %s12067_s21 }
  0x1d   :  { %s12082_s20 = sld [smem:[%s13612_s0 + %s11938_s28]]   ;;  %s11942_s28 = smov 25  }
  0x1e   :  { %s12087_s21 = sld [smem:[%s13612_s0 + %s11939_s7]]   ;;  %s11943_s7 = smov 26  }
  0x1f   :  { %13633 = sst [smem:[#allocation14_spill]] %s12092_s17 }
  0x20   :  { %s12112_s17 = sld [smem:[%s13612_s0 + %s11944_s15]]   ;;  %s11948_s15 = smov 31  }
  0x21   :  { %13630 = sst [smem:[#allocation11_spill]] %s12077_s27 }
  0x22   :  { %s12097_s27 = sld [smem:[%s13612_s0 + %s11941_s22]]   ;;  %s11945_s22 = smov 28  }
  0x23   :  { %13631 = sst [smem:[#allocation12_spill]] %s12082_s20 }
  0x24   :  { %13632 = sst [smem:[#allocation13_spill]] %s12087_s21 }
  0x25   :  { %s12102_s20 = sld [smem:[%s13612_s0 + %s11942_s28]]   ;;  %s11946_s28 = smov 29  }
  0x26   :  { %s12107_s21 = sld [smem:[%s13612_s0 + %s11943_s7]]   ;;  %s11947_s7 = smov 30  }
  0x27   :  { %13637 = sst [smem:[#allocation18_spill]] %s12112_s17 }
  0x28   :  { %13634 = sst [smem:[#allocation15_spill]] %s12097_s27 }
  0x29   :  { %s12117_s27 = sld [smem:[%s13612_s0 + %s11945_s22]]   ;;  %s11949_s22 = smov 32  }
  0x2a   :  { %s12132_s17 = sld [smem:[%s13612_s0 + %s11948_s15]]   ;;  %s11952_s15 = smov 35  }
  0x2b   :  { %13635 = sst [smem:[#allocation16_spill]] %s12102_s20 }
  0x2c   :  { %13636 = sst [smem:[#allocation17_spill]] %s12107_s21 }
  0x2d   :  { %s12122_s20 = sld [smem:[%s13612_s0 + %s11946_s28]]   ;;  %s11950_s28 = smov 33  }
  0x2e   :  { %s12127_s21 = sld [smem:[%s13612_s0 + %s11947_s7]]   ;;  %s11951_s7 = smov 34  }
  0x2f   :  { %13638 = sst [smem:[#allocation19_spill]] %s12117_s27 }
  0x30   :  { %13641 = sst [smem:[#allocation22_spill]] %s12132_s17 }
  0x31   :  { %s12137_s27 = sld [smem:[%s13612_s0 + %s11949_s22]]   ;;  %s11953_s22 = smov 36  }
  0x32   :  { %s12152_s17 = sld [smem:[%s13612_s0 + %s11952_s15]]  }
  0x33   :  { %13639 = sst [smem:[#allocation20_spill]] %s12122_s20 }
  0x34   :  { %13640 = sst [smem:[#allocation21_spill]] %s12127_s21 }
  0x35   :  { %s12142_s20 = sld [smem:[%s13612_s0 + %s11950_s28]]   ;;  %s11954_s28 = smov 37  }
  0x36   :  { %s12147_s21 = sld [smem:[%s13612_s0 + %s11951_s7]]   ;;  %s11955_s7 = smov 38  }
  0x37   :  { %13642 = sst [smem:[#allocation23_spill]] %s12137_s27 }
  0x38   :  { %s12157_s27 = sld [smem:[%s13612_s0 + %s11953_s22]]  }
  0x3b   :  { %13643 = sst [smem:[#allocation24_spill]] %s12142_s20 }
  0x3c   :  { %13644 = sst [smem:[#allocation25_spill]] %s12147_s21 }
  0x3d   :  { %s12162_s20 = sld [smem:[%s13612_s0 + %s11954_s28]]  }
  0x3e   :  { %s12167_s21 = sld [smem:[%s13612_s0 + %s11955_s7]]  }
  0x3f   :  { %v162_v0 = vld [vmem:[%s12002_s25] sm:$0xff]  ;;  %v163_v1 = vld [vmem:[%s12002_s25 + $0x8] sm:$0xff]  ;;  %v164_v5 = vld [vmem:[%s12002_s25 + $0x10] sm:$0xff]  ;;  %vm181_vm0 = vcmask 785408   ;;  %s11956_s0 = smov 96  }
  0x40   :  { %v263_v2 = vld [vmem:[%s12012_s3] sm:$0xff]  ;;  %v10962_v3 = vpack.c.bf16 %v163_v1, %v162_v0  ;;  %v264_v4 = vld [vmem:[%s12012_s3 + $0x8] sm:$0xff]  ;;  %v165_v6 = vld [vmem:[%s12002_s25 + $0x18] sm:$0xff] }
  0x41   :  { %v10986_v7 = vpack.c.bf16 %v264_v4, %v263_v2  ;;  %v10966_v8 = vpack.c.bf16 %v165_v6, %v164_v5  ;;  %v265_v9 = vld [vmem:[%s12012_s3 + $0x10] sm:$0xff]  ;;  %v266_v10 = vld [vmem:[%s12012_s3 + $0x18] sm:$0xff]  ;;  %v166_v11 = vld [vmem:[%s12002_s25 + $0x20] sm:$0xff] }
  0x42   :  { %10963 = vmatprep.subr.bf16.mxu0 %v10962_v3  ;;  %v10990_v12 = vpack.c.bf16 %v266_v10, %v265_v9  ;;  %v167_v13 = vld [vmem:[%s12002_s25 + $0x28] sm:$0xff]  ;;  %v267_v14 = vld [vmem:[%s12012_s3 + $0x20] sm:$0xff]  ;;  %v168_v18 = vld [vmem:[%s12002_s25 + $0x30] sm:$0xff] }
  0x43   :  { %v268_v15 = vld [vmem:[%s12012_s3 + $0x28] sm:$0xff]  ;;  %10987 = vmatprep.subr.bf16.mxu1 %v10986_v7  ;;  %10965 = vmatpush3.bf16.msra.mxu0 %v10962_v3  ;;  %v10970_v16 = vpack.c.bf16 %v167_v13, %v166_v11  ;;  %v169_v19 = vld [vmem:[%s12002_s25 + $0x38] sm:$0xff]  ;;  %v269_v20 = vld [vmem:[%s12012_s3 + $0x30] sm:$0xff] }
  0x44   :  { %10989 = vmatpush3.bf16.msra.mxu1 %v10986_v7  ;;  %10967 = vmatprep.subr.bf16.mxu0 %v10966_v8  ;;  %v10994_v17 = vpack.c.bf16 %v268_v15, %v267_v14  ;;  %v270_v21 = vld [vmem:[%s12012_s3 + $0x38] sm:$0xff]  ;;  %v158_v22 = vld [vmem:[%s11977_s5] sm:$0xff]  ;;  %v10974_v24 = vpack.c.bf16 %v169_v19, %v168_v18  ;;  %v451_v25 = vld [vmem:[%s12032_s24 + $0x8] sm:$0xff] }
  0x45   :  { %10991 = vmatprep.subr.bf16.mxu1 %v10990_v12  ;;  %v450_v23 = vld [vmem:[%s12032_s24] sm:$0xff]  ;;  %v452_v26 = vld [vmem:[%s12032_s24 + $0x10] sm:$0xff]  ;;  %v453_v27 = vld [vmem:[%s12032_s24 + $0x18] sm:$0xff]  ;;  %v10998_v28 = vpack.c.bf16 %v270_v21, %v269_v20  ;;  %10123 = vmatprep.mubr.msk.f32.mxu0 %vm181_vm0, %v158_v22 }
  0x46   :  { %v170_v29 = vld [vmem:[%s12002_s25 + $0x40] sm:$0xff]  ;;  %v171_v30 = vld [vmem:[%s12002_s25 + $0x48] sm:$0xff]  ;;  %v12193_v31 = vpack.i.bf16 %v451_v25, %v450_v23  ;;  %10150 = vmatprep.mubr.msk.f32.mxu1 %vm181_vm0, %v158_v22  ;;  %v12200_v34 = vpack.i.bf16 %v453_v27, %v452_v26 }
  0x47   :  { %10969 = vmatpush3.bf16.msra.mxu0 %v10966_v8  ;;  %v271_v32 = vld [vmem:[%s12012_s3 + $0x40] sm:$0xff]  ;;  %v272_v33 = vld [vmem:[%s12012_s3 + $0x48] sm:$0xff] }
  0x48   :  { %10993 = vmatpush3.bf16.msra.mxu1 %v10990_v12  ;;  %10971 = vmatprep.subr.bf16.mxu0 %v10970_v16 }
  0x49   :  { %10995 = vmatprep.subr.bf16.mxu1 %v10994_v17  ;;  %11442 = vrot.lane.b32.xlu0 %v12193_v31, %s11956_s0 }
  0x4b   :  { %10973 = vmatpush3.bf16.msra.mxu0 %v10970_v16 }
  0x4c   :  { %83 = vsyncpa [#allocation3], 0  ;;  %10997 = vmatpush3.bf16.msra.mxu1 %v10994_v17  ;;  %10975 = vmatprep.subr.bf16.mxu0 %v10974_v24  ;;  %v10978_v35 = vpack.c.bf16 %v171_v30, %v170_v29  ;;  %v11002_v36 = vpack.c.bf16 %v272_v33, %v271_v32  ;;  %v172_v37 = vld [vmem:[%s12002_s25 + $0x50] sm:$0xff]  ;;  %v173_v38 = vld [vmem:[%s12002_s25 + $0x58] sm:$0xff]  ;;  %vm368_vm1 = vcmask 261120   ;;  %v11018_v51 = vpack.c.bf16 %v451_v25, %v450_v23  ;;  %s11961_s25 = smov 104  }
  0x4d   :  { %10999 = vmatprep.subr.bf16.mxu1 %v10998_v28  ;;  %v273_v39 = vld [vmem:[%s12012_s3 + $0x50] sm:$0xff]  ;;  %v274_v40 = vld [vmem:[%s12012_s3 + $0x58] sm:$0xff]  ;;  %11447 = vrot.lane.b32.xlu0 %v12200_v34, %s11956_s0  ;;  %v10982_v41 = vpack.c.bf16 %v173_v38, %v172_v37  ;;  %v357_v43 = vld [vmem:[%s12022_s14] sm:$0xff]  ;;  %v11022_v53 = vpack.c.bf16 %v453_v27, %v452_v26  ;;  %v11957_v14 = vmov 0.0   ;;  %vm11958_vm2 = vmmov 0   ;;  %s11963_s3 = smov 8  }
  0x4e   :  { %v11006_v42 = vpack.c.bf16 %v274_v40, %v273_v39  ;;  %v358_v44 = vld [vmem:[%s12022_s14 + $0x8] sm:$0xff]  ;;  %v359_v46 = vld [vmem:[%s12022_s14 + $0x10] sm:$0xff]  ;;  %v360_v47 = vld [vmem:[%s12022_s14 + $0x18] sm:$0xff]  ;;  %vm739_vm3 = vcmask 64512   ;;  %s11965_s14 = smov 24   ;;  %vm1413_vm4 = vcmask 130048  }
  0x4f   :  { %10977 = vmatpush3.bf16.msra.mxu0 %v10974_v24  ;;  %v11010_v45 = vpack.c.bf16 %v358_v44, %v357_v43  ;;  %v159_v48 = vld [vmem:[%s11977_s5 + $0x8] sm:$0xff]  ;;  %v11014_v49 = vpack.c.bf16 %v360_v47, %v359_v46  ;;  %v12214_v50 = vld [vmem:[%s11982_s9] sm:$0xff]  ;;  %s11959_s5 = smov 120   ;;  %vm1415_vm5 = vcmask 195584   ;;  %s13647_s24 = sld [smem:[#allocation16_spill]]  ;;  %vm2463_vm6 = vcmask 523264   ;;  %vm12665_vm7 = vmpackc.low %vm739_vm3, %vm739_vm3 }
  0x50   :  { %11001 = vmatpush3.bf16.msra.mxu1 %v10998_v28  ;;  %10979 = vmatprep.subr.bf16.mxu0 %v10978_v35  ;;  %v12221_v52 = vld [vmem:[%s11982_s9 + $0x8] sm:$0xff]  ;;  %v12226_v54 = vld [vmem:[%s12037_s30] ss:$0 sm:$0xff]  ;;  %s11960_s9 = smov 112   ;;  %s13648_s30 = sld [smem:[#allocation8_spill]]  ;;  %vm3469_vm8 = vcmask 122880  }
  0x51   :  { %11003 = vmatprep.subr.bf16.mxu1 %v11002_v36  ;;  %558 = vrot.lane.b32.xlu1 %v12226_v54, %s11956_s0  ;;  %v9426_v63 = vld [vmem:[%s12007_s29] ss:$0 sm:$0xff]  ;;  %s11962_s29 = smov 64   ;;  %s13654_s15 = sld [smem:[#allocation17_spill]]  ;;  %vm8981_vm9 = vcmask 1040384   ;;  %vm8983_vm10 = vcmask 1041408  }
  0x52   :  { %v9429_v1 = vld [vmem:[%s12017_s8] ss:$0 sm:$0xff]  ;;  %s11964_s8 = smov 16   ;;  %s13655_s16 = sld [smem:[#allocation10_spill]]  ;;  %vm8985_vm11 = vcmask 1042432   ;;  %vm8987_vm12 = vcmask 1043456  }
  0x53   :  { %10981 = vmatpush3.bf16.msra.mxu0 %v10978_v35  ;;  %v9432_v9 = vld [vmem:[%s12027_s19] ss:$0 sm:$0xff]  ;;  %s13646_s19 = sld [smem:[#allocation6_spill]]  ;;  %s13656_s18 = sld [smem:[#allocation11_spill]]  ;;  %vm8989_vm13 = vcmask 1044480   ;;  %vm8991_vm14 = vcmask 1045504  }
  0x54   :  { %11005 = vmatpush3.bf16.msra.mxu1 %v11002_v36  ;;  %10983 = vmatprep.subr.bf16.mxu0 %v10982_v41  ;;  %s13657_s22 = sld [smem:[#allocation13_spill]]  ;;  %s13658_s23 = sld [smem:[#allocation15_spill]]  ;;  %vm8993_vm15 = vcmask 1046528  }
  0x55   :  { %11007 = vmatprep.subr.bf16.mxu1 %v11006_v42  ;;  %s13675_s26 = sld [smem:[#allocation18_spill]]  ;;  %s13676_s28 = sld [smem:[#allocation19_spill]] }
  0x56   :  { %s13678_s1 = sld [smem:[#allocation22_spill]]  ;;  %s13679_s2 = sld [smem:[#allocation24_spill]] }
  0x57   :  { %10985 = vmatpush3.bf16.msra.mxu0 %v10982_v41  ;;  %s13680_s7 = sld [smem:[#allocation20_spill]]  ;;  %s13681_s10 = sld [smem:[#allocation21_spill]] }
  0x58   :  { %11009 = vmatpush3.bf16.msra.mxu1 %v11006_v42  ;;  %s13682_s11 = sld [smem:[#allocation23_spill]] }
  0x59   :  { %11011 = vmatprep.subr.bf16.mxu1 %v11010_v45 }
  0x5a   :  { %10124 = vmatmul.mubr.msk.f32.vlgmr.msra.gmra.mrb[0].mxu0 %vm181_vm0, %v159_v48 }
  0x5b   :  { %10151 = vmatmul.mubr.msk.f32.vlgmr.msra.gmra.mrb[0].mxu1 %vm181_vm0, %v159_v48 }
  0x5c   :  { %11013 = vmatpush3.bf16.msra.mxu1 %v11010_v45  ;;  %10161 = vmatprep.mubr.msk.f32.mxu1 %vm368_vm1, %v12214_v50 }
  0x5d   :  { %11015 = vmatprep.subr.bf16.mxu1 %v11014_v49 }
  0x60   :  { %11017 = vmatpush3.bf16.msra.mxu1 %v11014_v49 }
  0x61   :  { %11019 = vmatprep.subr.bf16.mxu1 %v11018_v51 }
  0x63   :  { %10162 = vmatmul.mubr.msk.f32.vlgmr.msra.gmra.mrb[2].mxu1 %vm368_vm1, %v12221_v52 }
  0x64   :  { %11021 = vmatpush3.bf16.msra.mxu1 %v11018_v51 }
  0x65   :  { %11023 = vmatprep.subr.bf16.mxu1 %v11022_v53 }
  0x68   :  { %11025 = vmatpush3.bf16.msra.mxu1 %v11022_v53 }
  0xbb   :  { %v11443_v55 = vpop.permute.xlu0 %11442 }
  0xbc   :  { %v11445_v56 = vunpack.i.h.bf16 %v11443_v55  ;;  %v11444_v57 = vunpack.i.l.bf16 %v11443_v55 }
  0xbe   :  { %v11026_v58 = vpack.c.bf16 %v11445_v56, %v11444_v57 }
  0xbf   :  { %v11448_v59 = vpop.permute.xlu0 %11447 }
  0xc0   :  { %v11450_v60 = vunpack.i.h.bf16 %v11448_v59  ;;  %v11449_v61 = vunpack.i.l.bf16 %v11448_v59  ;;  %11027 = vmatprep.subr.bf16.mxu0 %v11026_v58 }
  0xc1   :  { %11029 = vmatpush3.bf16.msra.mxu0 %v11026_v58 }
  0xc2   :  { %v11030_v62 = vpack.c.bf16 %v11450_v60, %v11449_v61 }
  0xc3   :  { %v559_v15 = vpop.permute.xlu1 %558 }
  0xc4   :  { %11031 = vmatprep.subr.bf16.mxu0 %v11030_v62 }
  0xc5   :  { %11033 = vmatpush3.bf16.msra.mxu0 %v11030_v62 }
  0xc6   :  { %10197 = vmatprep.subr.mxu0 %v11957_v14 }
 0x12d   :  { %v10125_v0 = vpop.f32.mrb[0].mxu0 }
 0x12e   :  { %v260_v2 = vadd.f32 %v10125_v0, %v9426_v63  ;;  %v10152_v3 = vpop.f32.mrb[0].mxu1  ;;  %v254_v4 = vpop.f32.mrb[1].mxu0 }
 0x12f   :  { %v255_v5 = vadd.f32 %v9426_v63, %v254_v4  ;;  %v348_v6 = vpop.f32.mrb[1].mxu1  ;;  %v354_v8 = vadd.f32 %v10152_v3, %v9429_v1 }
 0x130   :  { %v349_v7 = vadd.f32 %v9429_v1, %v348_v6 }
 0x131   :  { %10172 = vmatprep.mubr.msk.f32.mxu1 %vm368_vm1, %v255_v5 }
 0x132   :  { %10183 = vmatprep.mubr.msk.f32.mxu0 %vm368_vm1, %v349_v7  ;;  %10173 = vmatmul.mubr.msk.f32.vlgmr.msra.gmra.mrb[4].mxu1 %vm368_vm1, %v260_v2 }
 0x133   :  { %10184 = vmatmul.mubr.msk.f32.vlgmr.msra.gmra.mrb[2].mxu0 %vm368_vm1, %v354_v8 }
 0x134   :  { %10199 = vmatprep.mubr.msk.f32.mxu0 %vm11958_vm2, %v11957_v14 }
 0x136   :  { %v10163_v10 = vpop.f32.mrb[2].mxu1 }
 0x137   :  { %v12237_v11 = vadd.f32 %v10163_v10, %v9432_v9  ;;  %v441_v12 = vpop.f32.mrb[3].mxu1 }
 0x138   :  { %v442_v13 = vadd.f32 %v9432_v9, %v441_v12 }
 0x13a   :  { %10194 = vmatprep.mubr.msk.f32.mxu1 %vm368_vm1, %v442_v13 }
 0x205   :  { %v10174_v16 = vpop.f32.mrb[4].mxu1 }
 0x206   :  { %v10185_v17 = vpop.f32.mrb[2].mxu0  ;;  %v533_v18 = vpop.f32.mrb[5].mxu1  ;;  %v539_v23 = vadd.f32 %v10174_v16, %v12226_v54 }
 0x207   :  { %v534_v19 = vadd.f32 %v12226_v54, %v533_v18  ;;  %v633_v20 = vpop.f32.mrb[3].mxu0  ;;  %v639_v24 = vadd.f32 %v10185_v17, %v559_v15 }
 0x208   :  { %v634_v21 = vadd.f32 %v633_v20, %v559_v15  ;;  %v1419_v25 = vmul.f32 0.35355338, %v539_v23 }
 0x209   :  { %v738_v22 = vmul.f32 0.35355338, %v534_v19 }
 0x20a   :  { %903 = vrot.lane.b32.xlu1 %v634_v21, %s11959_s5  ;;  %10198 = vmatpush3.xpose.msk.msra.mxu0 %vm739_vm3, %v634_v21 }
 0x20b   :  { %901 = vrot.lane.b32.xlu0 %v738_v22, %s11959_s5  ;;  %10207 = vmatprep.subr.mxu0 %v11957_v14 }
 0x20d   :  { %10200 = vmatmul.mubr.msk.f32.vlgmr.msra.gmra.mrb[4].mxu0 %vm739_vm3, %v738_v22 }
 0x20e   :  { %1070 = vrot.lane.b32.xlu1 %v634_v21, %s11960_s9  ;;  %10209 = vmatprep.mubr.msk.f32.mxu0 %vm11958_vm2, %v11957_v14 }
 0x20f   :  { %1068 = vrot.lane.b32.xlu0 %v738_v22, %s11960_s9 }
 0x212   :  { %1236 = vrot.lane.b32.xlu1 %v634_v21, %s11961_s25 }
 0x213   :  { %1234 = vrot.lane.b32.xlu0 %v738_v22, %s11961_s25 }
 0x216   :  { %1583 = vrot.lane.b32.xlu1 %v639_v24, %s11959_s5 }
 0x217   :  { %1581 = vrot.lane.b32.xlu0 %v1419_v25, %s11959_s5 }
 0x21a   :  { %1750 = vrot.lane.b32.xlu1 %v639_v24, %s11960_s9 }
 0x21b   :  { %1748 = vrot.lane.b32.xlu0 %v1419_v25, %s11960_s9 }
 0x21e   :  { %1916 = vrot.lane.b32.xlu1 %v639_v24, %s11961_s25 }
 0x21f   :  { %1914 = vrot.lane.b32.xlu0 %v1419_v25, %s11961_s25 }
 0x222   :  { %11452 = vrot.lane.b32.xlu1 %v12193_v31, %s11962_s29 }
 0x223   :  { %11457 = vrot.lane.b32.xlu0 %v12200_v34, %s11962_s29 }
 0x27c   :  { %v904_v26 = vpop.permute.xlu1 %903 }
 0x27d   :  { %10208 = vmatpush3.xpose.msk.msra.mxu0 %vm739_vm3, %v904_v26  ;;  %v902_v27 = vpop.permute.xlu0 %901 }
 0x27e   :  { %10217 = vmatprep.subr.mxu0 %v11957_v14 }
 0x280   :  { %v1071_v28 = vpop.permute.xlu1 %1070  ;;  %10210 = vmatmul.mubr.msk.f32.vlgmr.msra.gmra.mrb[6].mxu0 %vm739_vm3, %v902_v27 }
 0x281   :  { %10218 = vmatpush3.xpose.msk.msra.mxu0 %vm739_vm3, %v1071_v28  ;;  %v1069_v29 = vpop.permute.xlu0 %1068  ;;  %10219 = vmatprep.mubr.msk.f32.mxu0 %vm11958_vm2, %v11957_v14 }
 0x282   :  { %10227 = vmatprep.subr.mxu0 %v11957_v14 }
 0x284   :  { %v1237_v30 = vpop.permute.xlu1 %1236  ;;  %10220 = vmatmul.mubr.msk.f32.vlgmr.msra.gmra.mrb[8].mxu0 %vm739_vm3, %v1069_v29 }
 0x285   :  { %10228 = vmatpush3.xpose.msk.msra.mxu0 %vm739_vm3, %v1237_v30  ;;  %v1235_v31 = vpop.permute.xlu0 %1234  ;;  %10229 = vmatprep.mubr.msk.f32.mxu0 %vm11958_vm2, %v11957_v14 }
 0x286   :  { %10237 = vmatprep.subr.mxu0 %v11957_v14 }
 0x288   :  { %v1584_v32 = vpop.permute.xlu1 %1583  ;;  %10230 = vmatmul.mubr.msk.f32.vlgmr.msra.gmra.mrb[10].mxu0 %vm739_vm3, %v1235_v31 }
 0x289   :  { %10238 = vmatpush3.xpose.msk.msra.mxu0 %vm739_vm3, %v639_v24  ;;  %v1582_v33 = vpop.permute.xlu0 %1581  ;;  %10239 = vmatprep.mubr.msk.f32.mxu0 %vm11958_vm2, %v11957_v14 }
 0x28a   :  { %10247 = vmatprep.subr.mxu0 %v11957_v14 }
 0x28c   :  { %v1751_v34 = vpop.permute.xlu1 %1750  ;;  %10240 = vmatmul.mubr.msk.f32.vlgmr.msra.gmra.mrb[12].mxu0 %vm739_vm3, %v1419_v25 }
 0x28d   :  { %10248 = vmatpush3.xpose.msk.msra.mxu0 %vm739_vm3, %v1584_v32  ;;  %v1749_v35 = vpop.permute.xlu0 %1748  ;;  %10249 = vmatprep.mubr.msk.f32.mxu0 %vm11958_vm2, %v11957_v14 }
 0x28e   :  { %10257 = vmatprep.subr.mxu0 %v11957_v14 }
 0x290   :  { %v1917_v36 = vpop.permute.xlu1 %1916  ;;  %10250 = vmatmul.mubr.msk.f32.vlgmr.msra.gmra.mrb[14].mxu0 %vm739_vm3, %v1582_v33 }
 0x291   :  { %10258 = vmatpush3.xpose.msk.msra.mxu0 %vm739_vm3, %v1751_v34  ;;  %v1915_v37 = vpop.permute.xlu0 %1914  ;;  %10259 = vmatprep.mubr.msk.f32.mxu0 %vm11958_vm2, %v11957_v14 }
 0x292   :  { %10267 = vmatprep.subr.mxu0 %v11957_v14 }
 0x294   :  { %v11453_v38 = vpop.permute.xlu1 %11452  ;;  %10260 = vmatmul.mubr.msk.f32.vlgmr.msra.gmra.mrb[16].mxu0 %vm739_vm3, %v1749_v35 }
 0x295   :  { %v11455_v39 = vunpack.i.h.bf16 %v11453_v38  ;;  %v11454_v40 = vunpack.i.l.bf16 %v11453_v38  ;;  %10268 = vmatpush3.xpose.msk.msra.mxu0 %vm739_vm3, %v1917_v36  ;;  %10269 = vmatprep.mubr.msk.f32.mxu0 %vm11958_vm2, %v11957_v14  ;;  %v11458_v41 = vpop.permute.xlu0 %11457 }
 0x296   :  { %v11460_v42 = vunpack.i.h.bf16 %v11458_v41  ;;  %v11459_v43 = vunpack.i.l.bf16 %v11458_v41 }
 0x297   :  { %v11034_v44 = vpack.c.bf16 %v11455_v39, %v11454_v40 }
 0x298   :  { %10270 = vmatmul.mubr.msk.f32.vlgmr.msra.gmra.mrb[18].mxu0 %vm739_vm3, %v1915_v37  ;;  %v11038_v45 = vpack.c.bf16 %v11460_v42, %v11459_v43 }
 0x299   :  { %11035 = vmatprep.subr.bf16.mxu1 %v11034_v44 }
 0x29a   :  { %11037 = vmatpush3.bf16.msra.mxu1 %v11034_v44 }
 0x29b   :  { %11039 = vmatprep.subr.bf16.mxu1 %v11038_v45 }
 0x29e   :  { %11041 = vmatpush3.bf16.msra.mxu1 %v11038_v45 }
 0x29f   :  { %10202 = vmatprep.subr.mxu1 %v11957_v14 }
 0x2a1   :  { %10195 = vmatmul.mubr.msk.f32.vlgmr.msra.gmra.mrb[6].mxu1 %vm368_vm1, %v12237_v11 }
 0x2a2   :  { %10204 = vmatprep.mubr.msk.f32.mxu1 %vm11958_vm2, %v11957_v14 }
 0x2e0   :  { %v812_v46 = vpop.f32.mrb[4].mxu0 }
 0x2e1   :  { %v10201_v47 = vpop.f32.mrb[5].mxu0  ;;  %v816_v48 = vsel %vm739_vm3, %v812_v46, -inf }
 0x2e2   :  { %817 = vmax.xlane.f32.xlu1 %v816_v48 }
 0x353   :  { %v975_v49 = vpop.f32.mrb[6].mxu0 }
 0x354   :  { %v10211_v51 = vpop.f32.mrb[7].mxu0  ;;  %v979_v53 = vsel %vm739_vm3, %v975_v49, -inf }
 0x355   :  { %980 = vmax.xlane.f32.xlu0 %v979_v53 }
 0x357   :  { %v1142_v55 = vpop.f32.mrb[8].mxu0 }
 0x358   :  { %v10221_v56 = vpop.f32.mrb[9].mxu0  ;;  %v1146_v57 = vsel %vm739_vm3, %v1142_v55, -inf }
 0x359   :  { %1147 = vmax.xlane.f32.xlu0 %v1146_v57 }
 0x35b   :  { %v1308_v58 = vpop.f32.mrb[10].mxu0 }
 0x35c   :  { %v10231_v59 = vpop.f32.mrb[11].mxu0  ;;  %v1312_v60 = vsel %vm739_vm3, %v1308_v58, -inf }
 0x35d   :  { %1313 = vmax.xlane.f32.xlu1 %v1312_v60 }
 0x35f   :  { %v1492_v61 = vpop.f32.mrb[12].mxu0 }
 0x360   :  { %v10241_v62 = vpop.f32.mrb[13].mxu0  ;;  %v1496_v63 = vsel %vm739_vm3, %v1492_v61, -inf }
 0x361   :  { %1497 = vmax.xlane.f32.xlu0 %v1496_v63 }
 0x363   :  { %v1655_v0 = vpop.f32.mrb[14].mxu0 }
 0x364   :  { %v10251_v1 = vpop.f32.mrb[15].mxu0  ;;  %v1659_v2 = vsel %vm739_vm3, %v1655_v0, -inf }
 0x365   :  { %1660 = vmax.xlane.f32.xlu1 %v1659_v2 }
 0x367   :  { %v1822_v3 = vpop.f32.mrb[16].mxu0 }
 0x368   :  { %v10261_v4 = vpop.f32.mrb[17].mxu0  ;;  %v1826_v5 = vsel %vm739_vm3, %v1822_v3, -inf }
 0x369   :  { %1827 = vmax.xlane.f32.xlu0 %v1826_v5 }
 0x36b   :  { %v12310_v6 = vpop.f32.mrb[18].mxu0 }
 0x36c   :  { %v10271_v7 = vpop.f32.mrb[19].mxu0  ;;  %v1992_v21 = vsel %vm739_vm3, %v12310_v6, -inf }
 0x36f   :  { %v818_v22 = vpop.xlane.xlu1 %817 }
 0x370   :  { %v819_v23 = vsub.f32 %v812_v46, %v818_v22 }
 0x372   :  { %v820_v24 = vmul.f32 1.442695, %v819_v23 }
 0x374   :  { %v10196_v8 = vpop.f32.mrb[6].mxu1 }
 0x375   :  { %v729_v9 = vpop.f32.mrb[7].mxu1 }
 0x37f   :  { %654 = vrot.lane.b32.xlu0 %v12226_v54, %s11962_s29 }
 0x3e2   :  { %v981_v10 = vpop.xlane.xlu0 %980 }
 0x3e3   :  { %v982_v25 = vsub.f32 %v975_v49, %v981_v10 }
 0x3e5   :  { %v983_v26 = vmul.f32 1.442695, %v982_v25 }
 0x3e6   :  { %v1148_v11 = vpop.xlane.xlu0 %1147 }
 0x3e7   :  { %v1149_v27 = vsub.f32 %v1142_v55, %v1148_v11 }
 0x3e9   :  { %v1150_v29 = vmul.f32 1.442695, %v1149_v27 }
 0x3ea   :  { %v1314_v28 = vpop.xlane.xlu1 %1313 }
 0x3eb   :  { %v1315_v30 = vsub.f32 %v1308_v58, %v1314_v28 }
 0x3ed   :  { %v1316_v31 = vmul.f32 1.442695, %v1315_v30 }
 0x3ee   :  { %v1498_v12 = vpop.xlane.xlu0 %1497 }
 0x3ef   :  { %v1499_v32 = vsub.f32 %v1492_v61, %v1498_v12 }
 0x3f1   :  { %v1500_v35 = vmul.f32 1.442695, %v1499_v32 }
 0x3f2   :  { %v1661_v33 = vpop.xlane.xlu1 %1660 }
 0x3f3   :  { %v1662_v36 = vsub.f32 %v1655_v0, %v1661_v33 }
 0x3f5   :  { %v1663_v39 = vmul.f32 1.442695, %v1662_v36 }
 0x3f6   :  { %v1828_v13 = vpop.xlane.xlu0 %1827 }
 0x3f7   :  { %v1829_v15 = vsub.f32 %v1822_v3, %v1828_v13 }
 0x3f9   :  { %v1830_v16 = vmul.f32 1.442695, %v1829_v15 }
 0x3fa   :  { %v655_v17 = vpop.permute.xlu0 %654 }
 0x3fb   :  { %11721 = vpow2.f32 %v1830_v16  ;;  %v730_v18 = vadd.f32 %v729_v9, %v655_v17  ;;  %v12321_v20 = vadd.f32 %v10196_v8, %v655_v17 }
 0x3fc   :  { %11723 = vpow2.f32 %v820_v24 }
 0x3fd   :  { %991 = vrot.lane.b32.xlu1 %v730_v18, %s11959_s5  ;;  %10203 = vmatpush3.msra.mxu1 %v730_v18  ;;  %11725 = vpow2.f32 %v983_v26 }
 0x3fe   :  { %10212 = vmatprep.subr.mxu1 %v11957_v14  ;;  %11727 = vpow2.f32 %v1150_v29 }
 0x3ff   :  { %11729 = vpow2.f32 %v1316_v31 }
 0x400   :  { %11731 = vpow2.f32 %v1500_v35 }
 0x401   :  { %1157 = vrot.lane.b32.xlu1 %v730_v18, %s11960_s9  ;;  %11733 = vpow2.f32 %v1663_v39  ;;  %v2098_v39 = vld [vmem:[%s12042_s6 + $0x8] sm:$0xff] }
 0x405   :  { %v12317_v19 = vpop.eup %11721 }
 0x406   :  { %v1832_v54 = vsel %vm739_vm3, %v12317_v19, 0.0  ;;  %v11724_v34 = vpop.eup %11723 }
 0x407   :  { %1833 = vadd.xlane.f32.xlu0 %v1832_v54  ;;  %v822_v37 = vsel %vm739_vm3, %v11724_v34, 0.0  ;;  %v11726_v38 = vpop.eup %11725 }
 0x408   :  { %v985_v40 = vsel %vm739_vm3, %v11726_v38, 0.0  ;;  %v11728_v41 = vpop.eup %11727 }
 0x409   :  { %v1152_v42 = vsel %vm739_vm3, %v11728_v41, 0.0  ;;  %v11730_v43 = vpop.eup %11729 }
 0x40a   :  { %v1318_v44 = vsel %vm739_vm3, %v11730_v43, 0.0  ;;  %v11732_v45 = vpop.eup %11731 }
 0x40b   :  { %v1502_v46 = vsel %vm739_vm3, %v11732_v45, 0.0  ;;  %v12333_v47 = vpop.eup %11733 }
 0x40c   :  { %v1665_v48 = vsel %vm739_vm3, %v12333_v47, 0.0 }
 0x41d   :  { %1671 = vrot.lane.b32.xlu0 %v12321_v20, %s11959_s5 }
 0x425   :  { %1993 = vmax.xlane.f32.xlu1 %v1992_v21 }
 0x436   :  { %1323 = vrot.lane.b32.xlu1 %v730_v18, %s11961_s25 }
 0x45a   :  { %823 = vadd.xlane.f32.xlu1 %v822_v37 }
 0x45e   :  { %986 = vadd.xlane.f32.xlu1 %v985_v40  ;;  %v2099_v40 = vld [vmem:[%s12042_s6 + $0x10] sm:$0xff] }
 0x462   :  { %1153 = vadd.xlane.f32.xlu1 %v1152_v42 }
 0x466   :  { %1319 = vadd.xlane.f32.xlu1 %v1318_v44 }
 0x46a   :  { %1503 = vadd.xlane.f32.xlu1 %v1502_v46 }
 0x46e   :  { %1666 = vadd.xlane.f32.xlu1 %v1665_v48 }
 0x46f   :  { %v992_v49 = vpop.permute.xlu1 %991 }
 0x473   :  { %v1158_v51 = vpop.permute.xlu1 %1157 }
 0x47f   :  { %1837 = vrot.lane.b32.xlu1 %v12321_v20, %s11960_s9 }
 0x494   :  { %v1834_v5 = vpop.xlane.xlu0 %1833 }
 0x498   :  { %v1672_v54 = vpop.permute.xlu0 %1671 }
 0x4b2   :  { %v1994_v53 = vpop.xlane.xlu1 %1993 }
 0x4b3   :  { %v1995_v55 = vsub.f32 %v12310_v6, %v1994_v53 }
 0x4b5   :  { %v1996_v56 = vmul.f32 1.442695, %v1995_v55 }
 0x4b6   :  { %v1324_v59 = vpop.permute.xlu1 %1323 }
 0x4b7   :  { %11735 = vpow2.f32 %v1996_v56 }
 0x4c1   :  { %v12340_v57 = vpop.eup %11735 }
 0x4c2   :  { %v1998_v58 = vsel %vm739_vm3, %v12340_v57, 0.0 }
 0x4c3   :  { %1999 = vadd.xlane.f32.xlu1 %v1998_v58 }
 0x4d4   :  { %2003 = vrot.lane.b32.xlu1 %v12321_v20, %s11961_s25 }
 0x4e7   :  { %v824_v60 = vpop.xlane.xlu1 %823 }
 0x4e8   :  { %11737 = vrcp.f32 %v824_v60 }
 0x4eb   :  { %v987_v61 = vpop.xlane.xlu1 %986 }
 0x4ec   :  { %11739 = vrcp.f32 %v987_v61 }
 0x4ef   :  { %v1154_v62 = vpop.xlane.xlu1 %1153 }
 0x4f0   :  { %11741 = vrcp.f32 %v1154_v62 }
 0x4f2   :  { %v11738_v63 = vpop.eup %11737 }
 0x4f3   :  { %v1320_v0 = vpop.xlane.xlu1 %1319  ;;  %v826_v1 = vmul.f32 %v11738_v63, %v11724_v34 }
 0x4f4   :  { %11743 = vrcp.f32 %v1320_v0 }
 0x4f5   :  { %10205 = vmatmul.mubr.msk.f32.vlgmr.msra.gmra.mrb[8].mxu1 %vm739_vm3, %v826_v1 }
 0x4f6   :  { %v11740_v2 = vpop.eup %11739  ;;  %10213 = vmatpush3.msra.mxu1 %v992_v49  ;;  %10214 = vmatprep.mubr.msk.f32.mxu1 %vm11958_vm2, %v11957_v14 }
 0x4f7   :  { %v1504_v3 = vpop.xlane.xlu1 %1503  ;;  %10222 = vmatprep.subr.mxu1 %v11957_v14  ;;  %v989_v4 = vmul.f32 %v11740_v2, %v11726_v38  ;;  %v2097_v38 = vld [vmem:[%s12042_s6] sm:$0xff] }
 0x4f8   :  { %11745 = vrcp.f32 %v1504_v3  ;;  %v11042_v42 = vpack.c.bf16 %v2098_v39, %v2097_v38 }
 0x4f9   :  { %10215 = vmatmul.mubr.msk.f32.vlgmr.msra.gmra.mrb[10].mxu1 %vm739_vm3, %v989_v4  ;;  %11747 = vrcp.f32 %v1834_v5  ;;  %v1067_v9 = vadd.f32 %v989_v4, %v826_v1  ;;  %v9466_v4 = vld [vmem:[%s12047_s12] ss:$0 sm:$0xff]  ;;  %s13650_s12 = sld [smem:[#allocation5_spill]] }
 0x4fa   :  { %v11742_v6 = vpop.eup %11741  ;;  %10223 = vmatpush3.msra.mxu1 %v1158_v51  ;;  %10224 = vmatprep.mubr.msk.f32.mxu1 %vm11958_vm2, %v11957_v14 }
 0x4fb   :  { %v1667_v7 = vpop.xlane.xlu1 %1666  ;;  %10232 = vmatprep.subr.mxu1 %v11957_v14  ;;  %v1156_v8 = vmul.f32 %v11742_v6, %v11728_v41  ;;  %11043 = vmatprep.subr.bf16.mxu0 %v11042_v42 }
 0x4fc   :  { %11749 = vrcp.f32 %v1667_v7  ;;  %11045 = vmatpush3.bf16.msra.mxu0 %v11042_v42 }
 0x4fd   :  { %10225 = vmatmul.mubr.msk.f32.vlgmr.msra.gmra.mrb[12].mxu1 %vm739_vm3, %v1156_v8  ;;  %v1233_v11 = vadd.f32 %v1156_v8, %v1067_v9 }
 0x4fe   :  { %v11744_v10 = vpop.eup %11743  ;;  %10233 = vmatpush3.msra.mxu1 %v1324_v59  ;;  %10234 = vmatprep.mubr.msk.f32.mxu1 %vm11958_vm2, %v11957_v14 }
 0x4ff   :  { %10242 = vmatprep.subr.mxu1 %v11957_v14  ;;  %v1322_v12 = vmul.f32 %v11744_v10, %v11730_v43  ;;  %v1838_v22 = vpop.permute.xlu1 %1837  ;;  %v2100_v43 = vld [vmem:[%s12042_s6 + $0x18] sm:$0xff]  ;;  %s13649_s6 = sld [smem:[#allocation9_spill]] }
 0x500   :  { %v11046_v44 = vpack.c.bf16 %v2100_v43, %v2099_v40  ;;  %v2433_v43 = vld [vmem:[%s13646_s19 + $0x8] sm:$0xff] }
 0x501   :  { %10235 = vmatmul.mubr.msk.f32.vlgmr.msra.gmra.mrb[14].mxu1 %vm739_vm3, %v1322_v12  ;;  %v1399_v13 = vadd.f32 %v1322_v12, %v1233_v11 }
 0x502   :  { %v11746_v15 = vpop.eup %11745  ;;  %10243 = vmatpush3.msra.mxu1 %v12321_v20  ;;  %10244 = vmatprep.mubr.msk.f32.mxu1 %vm11958_vm2, %v11957_v14 }
 0x503   :  { %v1417_v16 = vmul.f32 0.25, %v1399_v13  ;;  %10252 = vmatprep.subr.mxu1 %v11957_v14  ;;  %v1506_v17 = vmul.f32 %v11746_v15, %v11732_v45  ;;  %v11748_v18 = vpop.eup %11747  ;;  %11047 = vmatprep.subr.bf16.mxu0 %v11046_v44 }
 0x504   :  { %v1836_v24 = vmul.f32 %v11748_v18, %v12317_v19  ;;  %11049 = vmatpush3.bf16.msra.mxu0 %v11046_v44  ;;  %v2877_v44 = vld [vmem:[%s13647_s24] sm:$0xff] }
 0x505   :  { %1418 = vst.msk [vmem:[%s12167_s21] sm:$0xff] %vm739_vm3, %v1417_v16  ;;  %10245 = vmatmul.mubr.msk.f32.vlgmr.msra.gmra.mrb[16].mxu1 %vm739_vm3, %v1506_v17 }
 0x506   :  { %v11750_v21 = vpop.eup %11749  ;;  %10253 = vmatpush3.msra.mxu1 %v1672_v54  ;;  %10254 = vmatprep.mubr.msk.f32.mxu1 %vm11958_vm2, %v11957_v14 }
 0x507   :  { %10262 = vmatprep.subr.mxu1 %v11957_v14  ;;  %v1669_v20 = vmul.f32 %v11750_v21, %v12333_v47 }
 0x509   :  { %10255 = vmatmul.mubr.msk.f32.vlgmr.msra.gmra.mrb[18].mxu1 %vm739_vm3, %v1669_v20  ;;  %v1747_v23 = vadd.f32 %v1669_v20, %v1506_v17 }
 0x50a   :  { %10263 = vmatpush3.msra.mxu1 %v1838_v22  ;;  %10264 = vmatprep.mubr.msk.f32.mxu1 %vm11958_vm2, %v11957_v14  ;;  %v2236_v22 = vld [vmem:[%s12062_s4] sm:$0xff] }
 0x50b   :  { %v1913_v25 = vadd.f32 %v1836_v24, %v1747_v23  ;;  %10272 = vmatprep.subr.mxu1 %v11957_v14  ;;  %v2237_v23 = vld [vmem:[%s12062_s4 + $0x8] sm:$0xff] }
 0x50d   :  { %10265 = vmatmul.mubr.msk.f32.vlgmr.msra.gmra.mrb[20].mxu1 %vm739_vm3, %v1836_v24  ;;  %v2238_v24 = vld [vmem:[%s12062_s4 + $0x10] sm:$0xff] }
 0x50e   :  { %10274 = vmatprep.mubr.msk.f32.mxu1 %vm11958_vm2, %v11957_v14 }
 0x550   :  { %v2000_v26 = vpop.xlane.xlu1 %1999 }
 0x551   :  { %11751 = vrcp.f32 %v2000_v26  ;;  %v2239_v26 = vld [vmem:[%s12062_s4 + $0x18] sm:$0xff]  ;;  %s13653_s4 = sld [smem:[#allocation7_spill]] }
 0x554   :  { %v2004_v27 = vpop.permute.xlu1 %2003 }
 0x555   :  { %10273 = vmatpush3.msra.mxu1 %v2004_v27  ;;  %v11054_v27 = vpack.c.bf16 %v2239_v26, %v2238_v24  ;;  %v2334_v24 = vld [vmem:[%s12072_s13 + $0x20] sm:$0xff]  ;;  %v2336_v26 = vld [vmem:[%s12072_s13 + $0x30] sm:$0xff] }
 0x55b   :  { %v11752_v28 = vpop.eup %11751 }
 0x55c   :  { %v2002_v19 = vmul.f32 %v11752_v28, %v12340_v57  ;;  %v2330_v28 = vld [vmem:[%s12072_s13] sm:$0xff] }
 0x55e   :  { %10275 = vmatmul.mubr.msk.f32.vlgmr.msra.gmra.mrb[22].mxu1 %vm739_vm3, %v2002_v19  ;;  %v2079_v29 = vadd.f32 %v2002_v19, %v1913_v25  ;;  %v11050_v25 = vpack.c.bf16 %v2237_v23, %v2236_v22  ;;  %v2331_v19 = vld [vmem:[%s12072_s13 + $0x8] sm:$0xff]  ;;  %v2328_v23 = vld [vmem:[%s13650_s12] sm:$0xff] }
 0x560   :  { %v2095_v30 = vmul.f32 0.25, %v2079_v29  ;;  %11051 = vmatprep.subr.bf16.mxu1 %v11050_v25  ;;  %v12421_v29 = vpack.c.bf16 %v2331_v19, %v2330_v28  ;;  %v2338_v19 = vld [vmem:[%s12072_s13 + $0x40] sm:$0xff] }
 0x561   :  { %11053 = vmatpush3.bf16.msra.mxu1 %v11050_v25  ;;  %v2335_v25 = vld [vmem:[%s12072_s13 + $0x28] sm:$0xff] }
 0x562   :  { %2096 = vst.msk [vmem:[%s12167_s21 + $0x8] sm:$0xff] %vm739_vm3, %v2095_v30  ;;  %s13645_s21 = sld [smem:[#allocation12_spill]]  ;;  %11055 = vmatprep.subr.bf16.mxu1 %v11054_v27 }
 0x565   :  { %11057 = vmatpush3.bf16.msra.mxu1 %v11054_v27  ;;  %v2337_v27 = vld [vmem:[%s12072_s13 + $0x38] sm:$0xff] }
 0x566   :  { %11059 = vmatprep.subr.bf16.mxu1 %v12421_v29  ;;  %v11070_v28 = vpack.c.bf16 %v2337_v27, %v2336_v26  ;;  %v9477_v27 = vld [vmem:[%s13657_s22] ss:$0 sm:$0xff] }
 0x568   :  { %v2448_v30 = vld [vmem:[%s13645_s21] sm:$0xff]  ;;  %v2454_v39 = vld [vmem:[%s13645_s21 + $0x30] sm:$0xff]  ;;  %v2455_v40 = vld [vmem:[%s13645_s21 + $0x38] sm:$0xff] }
 0x569   :  { %v11094_v42 = vpack.c.bf16 %v2455_v40, %v2454_v39 }
 0x5c8   :  { %v896_v31 = vpop.f32.mrb[8].mxu1 }
 0x5c9   :  { %v10206_v32 = vpop.f32.mrb[9].mxu1 }
 0x5cc   :  { %v1063_v33 = vpop.f32.mrb[10].mxu1 }
 0x5cd   :  { %1401 = vrot.lane.b32.xlu1 %v1063_v33, %s11963_s3  ;;  %v10216_v34 = vpop.f32.mrb[11].mxu1  ;;  %v2450_v33 = vld [vmem:[%s13645_s21 + $0x10] sm:$0xff] }
 0x5ce   :  { %v2451_v34 = vld [vmem:[%s13645_s21 + $0x18] sm:$0xff] }
 0x5d0   :  { %v1229_v35 = vpop.f32.mrb[12].mxu1 }
 0x5d1   :  { %1405 = vrot.lane.b32.xlu1 %v1229_v35, %s11964_s8  ;;  %v10226_v36 = vpop.f32.mrb[13].mxu1  ;;  %v11086_v35 = vpack.c.bf16 %v2451_v34, %v2450_v33  ;;  %v2341_v33 = vld [vmem:[%s12072_s13 + $0x58] sm:$0xff]  ;;  %v2329_v34 = vld [vmem:[%s13650_s12 + $0x8] sm:$0xff] }
 0x5d2   :  { %v2452_v36 = vld [vmem:[%s13645_s21 + $0x20] sm:$0xff] }
 0x5d4   :  { %v1395_v37 = vpop.f32.mrb[14].mxu1 }
 0x5d5   :  { %1409 = vrot.lane.b32.xlu1 %v1395_v37, %s11965_s14  ;;  %v10236_v41 = vpop.f32.mrb[15].mxu1  ;;  %v2453_v37 = vld [vmem:[%s13645_s21 + $0x28] sm:$0xff] }
 0x5d6   :  { %v11090_v38 = vpack.c.bf16 %v2453_v37, %v2452_v36  ;;  %v2432_v41 = vld [vmem:[%s13646_s19] sm:$0xff] }
 0x5d8   :  { %v1576_v45 = vpop.f32.mrb[16].mxu1 }
 0x5d9   :  { %v10246_v46 = vpop.f32.mrb[17].mxu1 }
 0x5da   :  { %v12438_v46 = vld [vmem:[%s13647_s24 + $0x10] sm:$0xff] }
 0x5dc   :  { %v1743_v47 = vpop.f32.mrb[18].mxu1 }
 0x5dd   :  { %2081 = vrot.lane.b32.xlu1 %v1743_v47, %s11963_s3  ;;  %v10256_v48 = vpop.f32.mrb[19].mxu1  ;;  %v2434_v47 = vld [vmem:[%s13646_s19 + $0x10] sm:$0xff] }
 0x5e0   :  { %v1909_v49 = vpop.f32.mrb[20].mxu1 }
 0x5e1   :  { %2085 = vrot.lane.b32.xlu0 %v1909_v49, %s11964_s8  ;;  %v10266_v51 = vpop.f32.mrb[21].mxu1  ;;  %v12444_v49 = vld [vmem:[%s13647_s24 + $0x18] sm:$0xff] }
 0x631   :  { %v2075_v53 = vpop.f32.mrb[22].mxu1 }
 0x632   :  { %2089 = vrot.lane.b32.xlu1 %v2075_v53, %s11965_s14  ;;  %v10276_v55 = vpop.f32.mrb[23].mxu1  ;;  %v12448_v53 = vpack.i.bf16 %v12444_v49, %v12438_v46 }
 0x633   :  { %v2435_v55 = vld [vmem:[%s13646_s19 + $0x18] sm:$0xff] }
 0x63f   :  { %v1402_v56 = vpop.permute.xlu1 %1401 }
 0x640   :  { %v1412_v58 = vsel %vm739_vm3, %v896_v31, %v1402_v56  ;;  %v2449_v31 = vld [vmem:[%s13645_s21 + $0x8] sm:$0xff]  ;;  %v2436_v56 = vld [vmem:[%s13646_s19 + $0x20] sm:$0xff] }
 0x641   :  { %v11082_v32 = vpack.c.bf16 %v2449_v31, %v2448_v30  ;;  %v2339_v30 = vld [vmem:[%s12072_s13 + $0x48] sm:$0xff] }
 0x642   :  { %v11074_v31 = vpack.c.bf16 %v2339_v30, %v2338_v19 }
 0x643   :  { %v1406_v57 = vpop.permute.xlu1 %1405  ;;  %11083 = vmatprep.subr.bf16.mxu0 %v11082_v32 }
 0x644   :  { %v1414_v59 = vsel %vm1413_vm4, %v1412_v58, %v1406_v57  ;;  %v2437_v57 = vld [vmem:[%s13646_s19 + $0x28] sm:$0xff]  ;;  %v2438_v58 = vld [vmem:[%s13646_s19 + $0x30] sm:$0xff] }
 0x647   :  { %v1410_v60 = vpop.permute.xlu1 %1409 }
 0x648   :  { %v1416_v61 = vsel %vm1415_vm5, %v1414_v59, %v1410_v60  ;;  %v2439_v59 = vld [vmem:[%s13646_s19 + $0x38] sm:$0xff]  ;;  %v2440_v60 = vld [vmem:[%s13646_s19 + $0x40] sm:$0xff] }
 0x649   :  { %10285 = vmatprep.mubr.msk.f32.mxu0 %vm368_vm1, %v1416_v61  ;;  %v2441_v61 = vld [vmem:[%s13646_s19 + $0x48] sm:$0xff] }
 0x64f   :  { %v2082_v62 = vpop.permute.xlu1 %2081 }
 0x650   :  { %v2092_v0 = vsel %vm739_vm3, %v1576_v45, %v2082_v62  ;;  %v2878_v45 = vld [vmem:[%s13647_s24 + $0x8] sm:$0xff]  ;;  %v2442_v62 = vld [vmem:[%s13646_s19 + $0x50] sm:$0xff] }
 0x651   :  { %v12441_v48 = vpack.i.bf16 %v2878_v45, %v2877_v44  ;;  %v11106_v51 = vpack.c.bf16 %v2878_v45, %v2877_v44 }
 0x653   :  { %v2086_v63 = vpop.permute.xlu0 %2085 }
 0x654   :  { %v2093_v1 = vsel %vm1413_vm4, %v2092_v0, %v2086_v63  ;;  %v2443_v63 = vld [vmem:[%s13646_s19 + $0x58] sm:$0xff]  ;;  %v2444_v0 = vld [vmem:[%s13646_s19 + $0x60] sm:$0xff] }
 0x6a4   :  { %v2090_v2 = vpop.permute.xlu1 %2089 }
 0x6a5   :  { %v2094_v3 = vsel %vm1415_vm5, %v2093_v1, %v2090_v2  ;;  %v2445_v1 = vld [vmem:[%s13646_s19 + $0x68] sm:$0xff]  ;;  %v2446_v2 = vld [vmem:[%s13646_s19 + $0x70] sm:$0xff] }
 0x6a6   :  { %10286 = vmatmul.mubr.msk.f32.vlgmr.msra.gmra.mrb[20].mxu0 %vm368_vm1, %v2094_v3  ;;  %v2447_v3 = vld [vmem:[%s13646_s19 + $0x78] sm:$0xff] }
 0x6a7   :  { %11085 = vmatpush3.bf16.msra.mxu0 %v11082_v32  ;;  %10342 = vmatprep.mubr.msk.f32.mxu0 %vm2463_vm6, %v2432_v41  ;;  %v2340_v32 = vld [vmem:[%s12072_s13 + $0x50] sm:$0xff] }
 0x6a8   :  { %11087 = vmatprep.subr.bf16.mxu0 %v11086_v35 }
 0x6ab   :  { %11089 = vmatpush3.bf16.msra.mxu0 %v11086_v35  ;;  %v11110_v35 = vpack.c.bf16 %v12444_v49, %v12438_v46 }
 0x6ac   :  { %11091 = vmatprep.subr.bf16.mxu0 %v11090_v38 }
 0x6af   :  { %11093 = vmatpush3.bf16.msra.mxu0 %v11090_v38 }
 0x6b0   :  { %11095 = vmatprep.subr.bf16.mxu0 %v11094_v42 }
 0x6b3   :  { %11097 = vmatpush3.bf16.msra.mxu0 %v11094_v42 }
 0x6b4   :  { %11107 = vmatprep.subr.bf16.mxu0 %v11106_v51 }
 0x6b6   :  { %10343 = vmatmul.mubr.msk.f32.vlgmr.msra.gmra.mrb[22].mxu0 %vm2463_vm6, %v2433_v43 }
 0x6b7   :  { %10345 = vmatprep.mubr.msk.f32.mxu0 %vm2463_vm6, %v2434_v47  ;;  %11109 = vmatpush3.bf16.msra.mxu0 %v11106_v51 }
 0x6b8   :  { %11111 = vmatprep.subr.bf16.mxu0 %v11110_v35 }
 0x6ba   :  { %10346 = vmatmul.mubr.msk.f32.gmra.mrb[24].mxu0 %vm2463_vm6, %v2435_v55 }
 0x6bb   :  { %10348 = vmatprep.mubr.msk.f32.mxu0 %vm2463_vm6, %v2436_v56  ;;  %11113 = vmatpush3.bf16.msra.mxu0 %v11110_v35 }
 0x6be   :  { %10349 = vmatmul.mubr.msk.f32.gmra.mrb[26].mxu0 %vm2463_vm6, %v2437_v57 }
 0x6bf   :  { %10351 = vmatprep.mubr.msk.f32.mxu0 %vm2463_vm6, %v2438_v58 }
 0x6c2   :  { %10352 = vmatmul.mubr.msk.f32.gmra.mrb[28].mxu0 %vm2463_vm6, %v2439_v59 }
 0x6c3   :  { %10354 = vmatprep.mubr.msk.f32.mxu0 %vm2463_vm6, %v2440_v60 }
 0x6c6   :  { %10355 = vmatmul.mubr.msk.f32.gmra.mrb[30].mxu0 %vm2463_vm6, %v2441_v61 }
 0x6c7   :  { %10357 = vmatprep.mubr.msk.f32.mxu0 %vm2463_vm6, %v2442_v62 }
 0x6ca   :  { %10358 = vmatmul.mubr.msk.f32.gmra.mrb[32].mxu0 %vm2463_vm6, %v2443_v63 }
 0x6cb   :  { %10360 = vmatprep.mubr.msk.f32.mxu0 %vm2463_vm6, %v2444_v0 }
 0x6ce   :  { %10361 = vmatmul.mubr.msk.f32.gmra.mrb[34].mxu0 %vm2463_vm6, %v2445_v1 }
 0x6cf   :  { %10363 = vmatprep.mubr.msk.f32.mxu0 %vm2463_vm6, %v2446_v2  ;;  %v2657_v2 = vld [vmem:[%s13653_s4] sm:$0xff] }
 0x6d2   :  { %10364 = vmatmul.mubr.msk.f32.gmra.mrb[36].mxu0 %vm2463_vm6, %v2447_v3 }
 0x779   :  { %v10287_v5 = vpop.f32.mrb[20].mxu0 }
 0x77a   :  { %v2186_v6 = vadd.f32 %v10287_v5, %v9466_v4  ;;  %v2180_v7 = vpop.f32.mrb[21].mxu0 }
 0x77b   :  { %v2181_v8 = vadd.f32 %v9466_v4, %v2180_v7 }
 0x77c   :  { %v2190_v9 = vadd.f32 %v2186_v6, %v12221_v52 }
 0x77d   :  { %v2189_v10 = vadd.f32 %v2181_v8, %v12214_v50 }
 0x77e   :  { %v2194_v11 = vsel %vm368_vm1, %v2190_v9, 0.0 }
 0x77f   :  { %2195 = vadd.xlane.f32.xlu1 %v2194_v11  ;;  %v2191_v12 = vsel %vm368_vm1, %v2189_v10, 0.0  ;;  %v9469_v11 = vld [vmem:[%s13648_s30] ss:$0 sm:$0xff] }
 0x780   :  { %2192 = vadd.xlane.f32.xlu0 %v2191_v12 }
 0x789   :  { %v12514_v40 = vpop.f32.mrb[22].mxu0 }
 0x78a   :  { %v12516_v41 = vpop.f32.mrb[23].mxu0 }
 0x78b   :  { %v2579_v30 = vadd.f32 %v9477_v27, %v12516_v41 }
 0x78d   :  { %v12518_v42 = vpop.f32.mrb[24].mxu0 }
 0x78e   :  { %v12520_v43 = vpop.f32.mrb[25].mxu0 }
 0x790   :  { %11467 = vrot.lane.b32.xlu1 %v12448_v53, %s11956_s0 }
 0x791   :  { %v12522_v44 = vpop.f32.mrb[26].mxu0 }
 0x792   :  { %v12524_v45 = vpop.f32.mrb[27].mxu0 }
 0x793   :  { %v2599_v35 = vadd.f32 %v9477_v27, %v12524_v45 }
 0x795   :  { %v12526_v46 = vpop.f32.mrb[28].mxu0 }
 0x796   :  { %v12528_v47 = vpop.f32.mrb[29].mxu0 }
 0x799   :  { %v12530_v49 = vpop.f32.mrb[30].mxu0 }
 0x79a   :  { %v12532_v51 = vpop.f32.mrb[31].mxu0 }
 0x79d   :  { %v12534_v55 = vpop.f32.mrb[32].mxu0 }
 0x79e   :  { %v12536_v56 = vpop.f32.mrb[33].mxu0 }
 0x79f   :  { %v2629_v41 = vadd.f32 %v9477_v27, %v12536_v56 }
 0x7a1   :  { %v12538_v57 = vpop.f32.mrb[34].mxu0 }
 0x7a2   :  { %v12540_v58 = vpop.f32.mrb[35].mxu0 }
 0x7a5   :  { %v12542_v59 = vpop.f32.mrb[36].mxu0 }
 0x7a6   :  { %v12544_v60 = vpop.f32.mrb[37].mxu0 }
 0x7a7   :  { %v2649_v45 = vadd.f32 %v9477_v27, %v12544_v60 }
 0x80c   :  { %v2196_v13 = vpop.xlane.xlu1 %2195 }
 0x80d   :  { %v2199_v15 = vmul.f32 0.03125, %v2196_v13  ;;  %v2193_v16 = vpop.xlane.xlu0 %2192  ;;  %v9470_v13 = vld [vmem:[%s13649_s6] ss:$0 sm:$0xff] }
 0x80e   :  { %v2198_v17 = vmul.f32 0.03125, %v2193_v16 }
 0x80f   :  { %v12405_v18 = vsub.f32 %v2190_v9, %v2199_v15 }
 0x810   :  { %v12407_v54 = vsub.f32 %v2189_v10, %v2198_v17 }
 0x811   :  { %v2203_v21 = vmul.f32 %v12405_v18, %v12405_v18 }
 0x812   :  { %v2202_v50 = vmul.f32 %v12407_v54, %v12407_v54 }
 0x813   :  { %v2207_v20 = vsel %vm368_vm1, %v2203_v21, 0.0  ;;  %v2333_v21 = vld [vmem:[%s12072_s13 + $0x18] sm:$0xff] }
 0x814   :  { %v2204_v52 = vsel %vm368_vm1, %v2202_v50, 0.0 }
 0x815   :  { %2205 = vadd.xlane.f32.xlu0 %v2204_v52  ;;  %v2332_v52 = vld [vmem:[%s12072_s13 + $0x10] sm:$0xff]  ;;  %s13652_s13 = sld [smem:[#allocation14_spill]] }
 0x819   :  { %2208 = vadd.xlane.f32.xlu0 %v2207_v20 }
 0x81b   :  { %v2673_v61 = vld [vmem:[%s13652_s13] sm:$0xff]  ;;  %v2674_v62 = vld [vmem:[%s13652_s13 + $0x8] sm:$0xff]  ;;  %v2675_v63 = vld [vmem:[%s13652_s13 + $0x10] sm:$0xff] }
 0x81c   :  { %v11098_v0 = vpack.c.bf16 %v2674_v62, %v2673_v61  ;;  %v2676_v1 = vld [vmem:[%s13652_s13 + $0x18] sm:$0xff]  ;;  %v9494_v62 = vld [vmem:[%s13658_s23] ss:$0 sm:$0xff] }
 0x81d   :  { %v11102_v3 = vpack.c.bf16 %v2676_v1, %v2675_v63 }
 0x82f   :  { %11462 = vrot.lane.b32.xlu0 %v12441_v48, %s11956_s0 }
 0x833   :  { %11477 = vrot.lane.b32.xlu0 %v12448_v53, %s11962_s29  ;;  %v2660_v53 = vld [vmem:[%s13653_s4 + $0x18] sm:$0xff] }
 0x8a2   :  { %v2206_v4 = vpop.xlane.xlu0 %2205 }
 0x8a3   :  { %v2210_v5 = vmul.f32 0.03125, %v2206_v4  ;;  %v12553_v4 = vld [vmem:[%s13654_s15] ss:$0 sm:$0xff] }
 0x8a4   :  { %2985 = vrot.lane.b32.xlu1 %v12553_v4, %s11956_s0  ;;  %s13683_s0 = sld [smem:[#allocation25_spill]] }
 0x8a5   :  { %v2212_v6 = vadd.f32 1e-05, %v2210_v5  ;;  %v2658_v5 = vld [vmem:[%s13653_s4 + $0x8] sm:$0xff] }
 0x8a6   :  { %v2209_v7 = vpop.xlane.xlu0 %2208 }
 0x8a7   :  { %11753 = vrsqrt.f32 %v2212_v6  ;;  %v2211_v8 = vmul.f32 0.03125, %v2209_v7  ;;  %v2659_v6 = vld [vmem:[%s13653_s4 + $0x10] sm:$0xff]  ;;  %v2661_v7 = vld [vmem:[%s13653_s4 + $0x20] sm:$0xff] }
 0x8a8   :  { %11472 = vrot.lane.b32.xlu1 %v12441_v48, %s11962_s29  ;;  %v2663_v48 = vld [vmem:[%s13653_s4 + $0x30] sm:$0xff] }
 0x8a9   :  { %v2213_v9 = vadd.f32 1e-05, %v2211_v8  ;;  %v2662_v8 = vld [vmem:[%s13653_s4 + $0x28] sm:$0xff] }
 0x8aa   :  { %v11463_v36 = vpop.permute.xlu0 %11462 }
 0x8ab   :  { %11755 = vrsqrt.f32 %v2213_v9  ;;  %v11465_v37 = vunpack.i.h.bf16 %v11463_v36  ;;  %v11464_v38 = vunpack.i.l.bf16 %v11463_v36  ;;  %v2664_v9 = vld [vmem:[%s13653_s4 + $0x38] sm:$0xff]  ;;  %v2604_v36 = vadd.f32 %v12522_v44, %v9477_v27 }
 0x8ac   :  { %v2644_v44 = vadd.f32 %v12538_v57, %v9477_v27 }
 0x8ad   :  { %v12511_v39 = vpack.c.bf16 %v11465_v37, %v11464_v38  ;;  %v2609_v37 = vadd.f32 %v9477_v27, %v12528_v47  ;;  %v2614_v38 = vadd.f32 %v12526_v46, %v9477_v27  ;;  %v2654_v46 = vadd.f32 %v12542_v59, %v9477_v27 }
 0x8ae   :  { %v11966_v47 = vmov 0.0|0.0  }
 0x8af   :  { %11115 = vmatprep.subr.bf16.mxu0 %v12511_v39 }
 0x8b1   :  { %v11754_v10 = vpop.eup %11753 }
 0x8b2   :  { %v2216_v12 = vmul.f32 %v11754_v10, %v12407_v54  ;;  %v11062_v54 = vpack.c.bf16 %v2333_v21, %v2332_v52  ;;  %v2665_v10 = vld [vmem:[%s13653_s4 + $0x40] sm:$0xff]  ;;  %v2672_v52 = vld [vmem:[%s13653_s4 + $0x78] sm:$0xff] }
 0x8b3   :  { %v9471_v21 = vld [vmem:[%s13655_s16] ss:$0 sm:$0xff] }
 0x8b4   :  { %v2225_v15 = vmul.f32 %v9469_v11, %v2216_v12  ;;  %v2667_v12 = vld [vmem:[%s13653_s4 + $0x50] sm:$0xff] }
 0x8b5   :  { %v11756_v16 = vpop.eup %11755 }
 0x8b6   :  { %v2217_v17 = vmul.f32 %v11756_v16, %v12405_v18  ;;  %v12486_v50 = vadd.f32 %v9470_v13, %v2225_v15  ;;  %v11066_v18 = vpack.c.bf16 %v2335_v25, %v2334_v24  ;;  %v2669_v15 = vld [vmem:[%s13653_s4 + $0x60] sm:$0xff]  ;;  %v2670_v16 = vld [vmem:[%s13653_s4 + $0x68] sm:$0xff] }
 0x8b8   :  { %v2226_v20 = vmul.f32 %v9469_v11, %v2217_v17  ;;  %10296 = vmatprep.mubr.msk.f32.mxu1 %vm368_vm1, %v12486_v50  ;;  %v2666_v11 = vld [vmem:[%s13653_s4 + $0x48] sm:$0xff]  ;;  %v2671_v17 = vld [vmem:[%s13653_s4 + $0x70] sm:$0xff] }
 0x8ba   :  { %v12492_v22 = vadd.f32 %v9470_v13, %v2226_v20  ;;  %v2668_v13 = vld [vmem:[%s13653_s4 + $0x58] sm:$0xff]  ;;  %v11468_v20 = vpop.permute.xlu1 %11467 }
 0x8bb   :  { %v11469_v26 = vunpack.i.l.bf16 %v11468_v20 }
 0x8bc   :  { %13651 = vst [vmem:[#allocation26_spill] sm:$0xff] %v12492_v22  ;;  %10297 = vmatmul.mubr.msk.f32.vlgmr.msra.gmra.mrb[24].mxu1 %vm368_vm1, %v12492_v22 }
 0x8bd   :  { %11061 = vmatpush3.bf16.msra.mxu1 %v12421_v29  ;;  %10323 = vmatprep.mubr.msk.f32.mxu1 %vm181_vm0, %v2328_v23  ;;  %v11078_v29 = vpack.c.bf16 %v2341_v33, %v2340_v32  ;;  %v9474_v23 = vld [vmem:[%s13656_s18] ss:$0 sm:$0xff]  ;;  %v2589_v33 = vadd.f32 %v9477_v27, %v12520_v43  ;;  %v2639_v43 = vadd.f32 %v9477_v27, %v12540_v58 }
 0x8be   :  { %11063 = vmatprep.subr.bf16.mxu1 %v11062_v54 }
 0x8c1   :  { %11065 = vmatpush3.bf16.msra.mxu1 %v11062_v54 }
 0x8c2   :  { %11067 = vmatprep.subr.bf16.mxu1 %v11066_v18 }
 0x8c5   :  { %11069 = vmatpush3.bf16.msra.mxu1 %v11066_v18  ;;  %v11470_v18 = vunpack.i.h.bf16 %v11468_v20 }
 0x8c6   :  { %11071 = vmatprep.subr.bf16.mxu1 %v11070_v28 }
 0x8c7   :  { %v11118_v32 = vpack.c.bf16 %v11470_v18, %v11469_v26 }
 0x8c9   :  { %11073 = vmatpush3.bf16.msra.mxu1 %v11070_v28 }
 0x8ca   :  { %11075 = vmatprep.subr.bf16.mxu1 %v11074_v31 }
 0x8cd   :  { %11077 = vmatpush3.bf16.msra.mxu1 %v11074_v31 }
 0x8ce   :  { %11079 = vmatprep.subr.bf16.mxu1 %v11078_v29 }
 0x8d1   :  { %11081 = vmatpush3.bf16.msra.mxu1 %v11078_v29  ;;  %v2584_v29 = vadd.f32 %v12514_v40, %v9477_v27  ;;  %v2624_v40 = vadd.f32 %v12530_v49, %v9477_v27 }
 0x8d2   :  { %11099 = vmatprep.subr.bf16.mxu1 %v11098_v0 }
 0x8d4   :  { %10324 = vmatmul.mubr.msk.f32.vlgmr.msra.gmra.mrb[24].mxu1 %vm181_vm0, %v2329_v34  ;;  %v2594_v34 = vadd.f32 %v12518_v42, %v9477_v27  ;;  %v2634_v42 = vadd.f32 %v12534_v55, %v9477_v27  ;;  %v11478_v55 = vpop.permute.xlu0 %11477 }
 0x8d5   :  { %10374 = vmatprep.mubr.msk.f32.mxu1 %vm368_vm1, %v2657_v2  ;;  %11101 = vmatpush3.bf16.msra.mxu1 %v11098_v0  ;;  %v11480_v58 = vunpack.i.h.bf16 %v11478_v55  ;;  %v11479_v59 = vunpack.i.l.bf16 %v11478_v55 }
 0x8d6   :  { %11103 = vmatprep.subr.bf16.mxu1 %v11102_v3 }
 0x8d7   :  { %v11126_v61 = vpack.c.bf16 %v11480_v58, %v11479_v59 }
 0x8d9   :  { %11105 = vmatpush3.bf16.msra.mxu1 %v11102_v3 }
 0x8dc   :  { %10375 = vmatmul.mubr.msk.f32.vlgmr.msra.gmra.mrb[26].mxu1 %vm368_vm1, %v2658_v5 }
 0x8dd   :  { %10377 = vmatprep.mubr.msk.f32.mxu1 %vm368_vm1, %v2659_v6 }
 0x8e0   :  { %10378 = vmatmul.mubr.msk.f32.gmra.mrb[28].mxu1 %vm368_vm1, %v2660_v53 }
 0x8e1   :  { %10380 = vmatprep.mubr.msk.f32.mxu1 %vm368_vm1, %v2661_v7 }
 0x8e4   :  { %10381 = vmatmul.mubr.msk.f32.gmra.mrb[30].mxu1 %vm368_vm1, %v2662_v8 }
 0x8e5   :  { %10383 = vmatprep.mubr.msk.f32.mxu1 %vm368_vm1, %v2663_v48 }
 0x8e8   :  { %10384 = vmatmul.mubr.msk.f32.gmra.mrb[32].mxu1 %vm368_vm1, %v2664_v9 }
 0x8e9   :  { %10386 = vmatprep.mubr.msk.f32.mxu1 %vm368_vm1, %v2665_v10 }
 0x8ec   :  { %10387 = vmatmul.mubr.msk.f32.gmra.mrb[34].mxu1 %vm368_vm1, %v2666_v11 }
 0x8ed   :  { %10389 = vmatprep.mubr.msk.f32.mxu1 %vm368_vm1, %v2667_v12 }
 0x8f0   :  { %10390 = vmatmul.mubr.msk.f32.gmra.mrb[36].mxu1 %vm368_vm1, %v2668_v13 }
 0x8f1   :  { %10392 = vmatprep.mubr.msk.f32.mxu1 %vm368_vm1, %v2669_v15 }
 0x8f4   :  { %10393 = vmatmul.mubr.msk.f32.gmra.mrb[38].mxu1 %vm368_vm1, %v2670_v16 }
 0x8f5   :  { %10395 = vmatprep.mubr.msk.f32.mxu1 %vm368_vm1, %v2671_v17 }
 0x8f8   :  { %10396 = vmatmul.mubr.msk.f32.gmra.mrb[40].mxu1 %vm368_vm1, %v2672_v52 }
 0x916   :  { %v12632_v49 = vpop.permute.xlu1 %2985 }
 0x9a7   :  { %v10325_v54 = vpop.f32.mrb[24].mxu1 }
 0x9a8   :  { %v11384_v24 = vadd.f32 %v10325_v54, %v9471_v21  ;;  %v2421_v25 = vpop.f32.mrb[25].mxu1 }
 0x9a9   :  { %v11386_v28 = vadd.f32 %v9471_v21, %v2421_v25 }
 0x9aa   :  { %v11385_v31 = vadd.f32 %v11384_v24, %v9474_v23 }
 0x9ab   :  { %v11387_v19 = vadd.f32 %v11386_v28, %v9474_v23 }
 0x9ad   :  { %10406 = vmatprep.mubr.msk.f32.mxu0 %vm368_vm1, %v11387_v19 }
 0x9ae   :  { %10407 = vmatmul.mubr.msk.f32.vlgmr.msra.gmra.mrb[38].mxu0 %vm368_vm1, %v11385_v31 }
 0x9af   :  { %11117 = vmatpush3.bf16.msra.mxu0 %v12511_v39  ;;  %10417 = vmatprep.mubr.msk.f32.mxu0 %vm368_vm1, %v2579_v30  ;;  %v2619_v39 = vadd.f32 %v9477_v27, %v12532_v51  ;;  %v11473_v51 = vpop.permute.xlu1 %11472  ;;  %v10376_v63 = vpop.f32.mrb[26].mxu1 }
 0x9b0   :  { %11119 = vmatprep.subr.bf16.mxu0 %v11118_v32  ;;  %v11475_v56 = vunpack.i.h.bf16 %v11473_v51  ;;  %v11474_v57 = vunpack.i.l.bf16 %v11473_v51  ;;  %v2798_v0 = vpop.f32.mrb[27].mxu1  ;;  %v2804_v1 = vadd.f32 %v10376_v63, %v9494_v62 }
 0x9b1   :  { %v2799_v2 = vadd.f32 %v9494_v62, %v2798_v0 }
 0x9b2   :  { %v11122_v60 = vpack.c.bf16 %v11475_v56, %v11474_v57 }
 0x9b3   :  { %11121 = vmatpush3.bf16.msra.mxu0 %v11118_v32  ;;  %v10379_v3 = vpop.f32.mrb[28].mxu1  ;;  %10449 = vmatprep.mubr.msk.f32.mxu1 %vm368_vm1, %v2799_v2 }
 0x9b4   :  { %11130 = vmatprep.subr.bf16.mxu0 %v11966_v47  ;;  %11123 = vmatprep.subr.bf16.mxu1 %v11122_v60  ;;  %v2808_v5 = vpop.f32.mrb[29].mxu1  ;;  %v2814_v6 = vadd.f32 %v10379_v3, %v9494_v62 }
 0x9b5   :  { %11125 = vmatpush3.bf16.msra.mxu1 %v11122_v60  ;;  %v2809_v53 = vadd.f32 %v9494_v62, %v2808_v5 }
 0x9b6   :  { %10418 = vmatmul.mubr.msk.f32.vlgmr.msra.gmra.mrb[40].mxu0 %vm368_vm1, %v2584_v29  ;;  %11127 = vmatprep.subr.bf16.mxu1 %v11126_v61 }
 0x9b7   :  { %10420 = vmatprep.mubr.msk.f32.mxu0 %vm368_vm1, %v2589_v33  ;;  %v10382_v7 = vpop.f32.mrb[30].mxu1 }
 0x9b8   :  { %v2818_v8 = vpop.f32.mrb[31].mxu1  ;;  %v2824_v48 = vadd.f32 %v10382_v7, %v9494_v62 }
 0x9b9   :  { %11129 = vmatpush3.bf16.msra.mxu1 %v11126_v61  ;;  %v2819_v9 = vadd.f32 %v9494_v62, %v2818_v8 }
 0x9ba   :  { %10421 = vmatmul.mubr.msk.f32.gmra.mrb[42].mxu0 %vm368_vm1, %v2594_v34  ;;  %11137 = vmatprep.subr.bf16.mxu1 %v11966_v47 }
 0x9bb   :  { %10423 = vmatprep.mubr.msk.f32.mxu0 %vm368_vm1, %v2599_v35  ;;  %v10385_v10 = vpop.f32.mrb[32].mxu1 }
 0x9bc   :  { %10450 = vmatmul.mubr.msk.f32.vlgmr.msra.gmra.mrb[42].mxu1 %vm368_vm1, %v2804_v1  ;;  %v2828_v11 = vpop.f32.mrb[33].mxu1  ;;  %v2834_v12 = vadd.f32 %v10385_v10, %v9494_v62 }
 0x9bd   :  { %10452 = vmatprep.mubr.msk.f32.mxu1 %vm368_vm1, %v2809_v53  ;;  %v2829_v13 = vadd.f32 %v9494_v62, %v2828_v11 }
 0x9be   :  { %10424 = vmatmul.mubr.msk.f32.gmra.mrb[44].mxu0 %vm368_vm1, %v2604_v36 }
 0x9bf   :  { %10426 = vmatprep.mubr.msk.f32.mxu0 %vm368_vm1, %v2609_v37  ;;  %v10388_v15 = vpop.f32.mrb[34].mxu1 }
 0x9c0   :  { %10453 = vmatmul.mubr.msk.f32.gmra.mrb[44].mxu1 %vm368_vm1, %v2814_v6  ;;  %v2838_v16 = vpop.f32.mrb[35].mxu1  ;;  %v2844_v17 = vadd.f32 %v10388_v15, %v9494_v62 }
 0x9c1   :  { %10455 = vmatprep.mubr.msk.f32.mxu1 %vm368_vm1, %v2819_v9  ;;  %v2839_v52 = vadd.f32 %v9494_v62, %v2838_v16 }
 0x9c2   :  { %10427 = vmatmul.mubr.msk.f32.gmra.mrb[46].mxu0 %vm368_vm1, %v2614_v38 }
 0x9c3   :  { %10429 = vmatprep.mubr.msk.f32.mxu0 %vm368_vm1, %v2619_v39  ;;  %v10391_v21 = vpop.f32.mrb[36].mxu1 }
 0x9c4   :  { %10456 = vmatmul.mubr.msk.f32.gmra.mrb[46].mxu1 %vm368_vm1, %v2824_v48  ;;  %v2854_v20 = vadd.f32 %v10391_v21, %v9494_v62  ;;  %v2848_v54 = vpop.f32.mrb[37].mxu1 }
 0x9c5   :  { %10458 = vmatprep.mubr.msk.f32.mxu1 %vm368_vm1, %v2829_v13  ;;  %v2849_v23 = vadd.f32 %v9494_v62, %v2848_v54 }
 0x9c6   :  { %10430 = vmatmul.mubr.msk.f32.gmra.mrb[48].mxu0 %vm368_vm1, %v2624_v40 }
 0x9c7   :  { %10432 = vmatprep.mubr.msk.f32.mxu0 %vm368_vm1, %v2629_v41  ;;  %v10394_v24 = vpop.f32.mrb[38].mxu1 }
 0x9c8   :  { %10459 = vmatmul.mubr.msk.f32.gmra.mrb[48].mxu1 %vm368_vm1, %v2834_v12  ;;  %v2858_v25 = vpop.f32.mrb[39].mxu1  ;;  %v2864_v26 = vadd.f32 %v10394_v24, %v9494_v62 }
 0x9c9   :  { %10461 = vmatprep.mubr.msk.f32.mxu1 %vm368_vm1, %v2839_v52  ;;  %v2859_v18 = vadd.f32 %v9494_v62, %v2858_v25 }
 0x9ca   :  { %10433 = vmatmul.mubr.msk.f32.gmra.mrb[50].mxu0 %vm368_vm1, %v2634_v42 }
 0x9cb   :  { %10435 = vmatprep.mubr.msk.f32.mxu0 %vm368_vm1, %v2639_v43  ;;  %v10397_v28 = vpop.f32.mrb[40].mxu1 }
 0x9cc   :  { %10462 = vmatmul.mubr.msk.f32.gmra.mrb[50].mxu1 %vm368_vm1, %v2844_v17  ;;  %v2868_v30 = vpop.f32.mrb[41].mxu1  ;;  %v2874_v33 = vadd.f32 %v10397_v28, %v9494_v62 }
 0x9cd   :  { %10464 = vmatprep.mubr.msk.f32.mxu1 %vm368_vm1, %v2849_v23  ;;  %v2869_v32 = vadd.f32 %v9494_v62, %v2868_v30 }
 0x9ce   :  { %10436 = vmatmul.mubr.msk.f32.gmra.mrb[52].mxu0 %vm368_vm1, %v2644_v44 }
 0x9cf   :  { %10438 = vmatprep.mubr.msk.f32.mxu0 %vm368_vm1, %v2649_v45 }
 0x9d0   :  { %10465 = vmatmul.mubr.msk.f32.gmra.mrb[52].mxu1 %vm368_vm1, %v2854_v20 }
 0x9d1   :  { %10467 = vmatprep.mubr.msk.f32.mxu1 %vm368_vm1, %v2859_v18 }
 0x9d2   :  { %10439 = vmatmul.mubr.msk.f32.gmra.mrb[54].mxu0 %vm368_vm1, %v2654_v46 }
 0x9d3   :  { %10477 = vmatprep.mubr.msk.f32.mxu0 %vm11958_vm2, %v11957_v14 }
 0x9d4   :  { %10468 = vmatmul.mubr.msk.f32.gmra.mrb[54].mxu1 %vm368_vm1, %v2864_v26 }
 0x9d5   :  { %10470 = vmatprep.mubr.msk.f32.mxu1 %vm368_vm1, %v2869_v32 }
 0x9d8   :  { %10471 = vmatmul.mubr.msk.f32.gmra.mrb[56].mxu1 %vm368_vm1, %v2874_v33 }
 0x9d9   :  { %10491 = vmatprep.mubr.msk.f32.mxu1 %vm11958_vm2, %v11957_v14 }
 0xa81   :  { %v12649_v27 = vpop.f32.mrb[38].mxu0 }
 0xa82   :  { %v2960_v19 = vpop.f32.mrb[39].mxu0 }
 0xa83   :  { %v2961_v31 = vadd.f32 %v12553_v4, %v2960_v19 }
 0xa85   :  { %v12653_v29 = vmul.f32 0.35355338, %v2961_v31 }
 0xa87   :  { %3554 = vrot.lane.b32.xlu0 %v12653_v29, %s11959_s5 }
 0xa89   :  { %v10419_v34 = vpop.f32.mrb[40].mxu0 }
 0xa8a   :  { %v3108_v35 = vadd.f32 %v10419_v34, %v12632_v49  ;;  %v3102_v36 = vpop.f32.mrb[41].mxu0 }
 0xa8b   :  { %v3103_v37 = vadd.f32 %v3102_v36, %v12632_v49 }
 0xa8d   :  { %v11131_v39 = vpack.c.bf16 %v3108_v35, %v3103_v37  ;;  %v10422_v40 = vpop.f32.mrb[42].mxu0  ;;  %v12669_v41 = vpack.i.bf16 %v3108_v35, %v3103_v37 }
 0xa8e   :  { %v12672_v42 = vadd.f32 %v10422_v40, %v12632_v49  ;;  %v3112_v43 = vpop.f32.mrb[43].mxu0 }
 0xa8f   :  { %v12675_v44 = vadd.f32 %v3112_v43, %v12632_v49  ;;  %11482 = vrot.lane.b32.xlu1 %v12669_v41, %s11959_s5  ;;  %11133 = vmatpush3.bf16.xpose.msk.msra.mxu0 %vm12665_vm7, %v11131_v39  ;;  %v10451_v31 = vpop.f32.mrb[42].mxu1 }
 0xa90   :  { %11134 = vmatprep.subr.bf16.mxu0 %v11966_v47  ;;  %v3310_v32 = vpop.f32.mrb[43].mxu1 }
 0xa91   :  { %v10425_v46 = vpop.f32.mrb[44].mxu0  ;;  %v12686_v51 = vpack.i.bf16 %v12672_v42, %v12675_v44 }
 0xa92   :  { %v12689_v55 = vadd.f32 %v10425_v46, %v12632_v49  ;;  %v3122_v56 = vpop.f32.mrb[45].mxu0 }
 0xa93   :  { %v12692_v57 = vadd.f32 %v3122_v56, %v12632_v49  ;;  %v10454_v33 = vpop.f32.mrb[44].mxu1 }
 0xa94   :  { %v3320_v34 = vpop.f32.mrb[45].mxu1 }
 0xa95   :  { %v10428_v59 = vpop.f32.mrb[46].mxu0  ;;  %v12698_v60 = vpack.i.bf16 %v12689_v55, %v12692_v57 }
 0xa96   :  { %v12701_v61 = vadd.f32 %v10428_v59, %v12632_v49  ;;  %v3132_v62 = vpop.f32.mrb[47].mxu0  ;;  %10478 = vmatmul.mubr.msk.f32.vlgmr.msra.gmra.mrb[56].mxu0 %vm739_vm3, %v12653_v29 }
 0xa97   :  { %v12706_v63 = vadd.f32 %v3132_v62, %v12632_v49  ;;  %10484 = vmatprep.mubr.msk.f32.mxu0 %vm11958_vm2, %v11957_v14  ;;  %v10457_v35 = vpop.f32.mrb[46].mxu1 }
 0xa98   :  { %v3330_v36 = vpop.f32.mrb[47].mxu1 }
 0xa99   :  { %v10431_v1 = vpop.f32.mrb[48].mxu0  ;;  %v12714_v2 = vpack.i.bf16 %v12701_v61, %v12706_v63 }
 0xa9a   :  { %v12717_v3 = vadd.f32 %v10431_v1, %v12632_v49  ;;  %v3142_v5 = vpop.f32.mrb[49].mxu0 }
 0xa9b   :  { %v12720_v6 = vadd.f32 %v3142_v5, %v12632_v49  ;;  %v10460_v37 = vpop.f32.mrb[48].mxu1 }
 0xa9c   :  { %v3340_v39 = vpop.f32.mrb[49].mxu1 }
 0xa9d   :  { %v10434_v7 = vpop.f32.mrb[50].mxu0  ;;  %v12726_v8 = vpack.i.bf16 %v12717_v3, %v12720_v6 }
 0xa9e   :  { %v12729_v48 = vadd.f32 %v10434_v7, %v12632_v49  ;;  %v3152_v9 = vpop.f32.mrb[51].mxu0 }
 0xa9f   :  { %v12732_v10 = vadd.f32 %v3152_v9, %v12632_v49  ;;  %v10463_v40 = vpop.f32.mrb[50].mxu1 }
 0xaa0   :  { %v3350_v43 = vpop.f32.mrb[51].mxu1 }
 0xaa1   :  { %v10437_v12 = vpop.f32.mrb[52].mxu0  ;;  %v12738_v13 = vpack.i.bf16 %v12729_v48, %v12732_v10 }
 0xaa2   :  { %v12741_v15 = vadd.f32 %v10437_v12, %v12632_v49  ;;  %v3162_v16 = vpop.f32.mrb[53].mxu0 }
 0xaa3   :  { %v12744_v17 = vadd.f32 %v3162_v16, %v12632_v49  ;;  %v10466_v46 = vpop.f32.mrb[52].mxu1 }
 0xaa4   :  { %v3360_v56 = vpop.f32.mrb[53].mxu1 }
 0xaa5   :  { %v10440_v21 = vpop.f32.mrb[54].mxu0  ;;  %v12750_v20 = vpack.i.bf16 %v12741_v15, %v12744_v17 }
 0xaa6   :  { %v12753_v54 = vadd.f32 %v10440_v21, %v12632_v49  ;;  %v3172_v23 = vpop.f32.mrb[55].mxu0 }
 0xaa7   :  { %v12756_v24 = vadd.f32 %v3172_v23, %v12632_v49  ;;  %v10469_v59 = vpop.f32.mrb[54].mxu1 }
 0xaa8   :  { %v3370_v62 = vpop.f32.mrb[55].mxu1 }
 0xaa9   :  { %v12762_v18 = vpack.i.bf16 %v12753_v54, %v12756_v24 }
 0xaab   :  { %v10472_v1 = vpop.f32.mrb[56].mxu1 }
 0xaac   :  { %v3380_v5 = vpop.f32.mrb[57].mxu1 }
 0xaf9   :  { %v3555_v49 = vpop.permute.xlu0 %3554 }
 0xb01   :  { %v11483_v26 = vpop.permute.xlu1 %11482 }
 0xb02   :  { %v11485_v28 = vunpack.i.h.bf16 %v11483_v26  ;;  %v11484_v19 = vunpack.i.l.bf16 %v11483_v26 }
 0xb04   :  { %v11138_v30 = vpack.c.bf16 %v11485_v28, %v11484_v19 }
 0xb06   :  { %11140 = vmatpush3.bf16.xpose.msk.msra.mxu1 %vm12665_vm7, %v11138_v30 }
 0xb07   :  { %11148 = vmatprep.subr.bf16.mxu1 %v11966_v47 }
 0xb0d   :  { %10492 = vmatmul.mubr.msk.f32.vlgmr.msra.gmra.mrb[58].mxu1 %vm739_vm3, %v3555_v49 }
 0xb0e   :  { %10512 = vmatprep.mubr.msk.f32.mxu1 %vm11958_vm2, %v11957_v14 }
 0xb69   :  { %v3465_v7 = vpop.f32.mrb[56].mxu0 }
 0xb6a   :  { %v10479_v9 = vpop.f32.mrb[57].mxu0  ;;  %v3470_v12 = vsel %vm3469_vm8, %v3465_v7, -inf }
 0xb6b   :  { %3471 = vmax.xlane.f32.xlu1 %v3470_v12 }
 0xbe0   :  { %v3632_v16 = vpop.f32.mrb[58].mxu1 }
 0xbe1   :  { %v10493_v21 = vpop.f32.mrb[59].mxu1  ;;  %v3636_v23 = vsel %vm3469_vm8, %v3632_v16, -inf }
 0xbe2   :  { %3637 = vmax.xlane.f32.xlu0 %v3636_v23 }
 0xbf8   :  { %3193 = vrot.lane.b32.xlu0 %v12553_v4, %s11962_s29  ;;  %v3472_v26 = vpop.xlane.xlu1 %3471 }
 0xbf9   :  { %v3473_v28 = vsub.f32 %v3465_v7, %v3472_v26 }
 0xbfb   :  { %v3474_v19 = vmul.f32 1.442695, %v3473_v28 }
 0xbfc   :  { %11492 = vrot.lane.b32.xlu0 %v12669_v41, %s11960_s9 }
 0xbfd   :  { %11757 = vpow2.f32 %v3474_v19 }
 0xc00   :  { %3728 = vrot.lane.b32.xlu0 %v12653_v29, %s11960_s9 }
 0xc07   :  { %v11758_v30 = vpop.eup %11757 }
 0xc08   :  { %v3476_v49 = vsel %vm3469_vm8, %v11758_v30, 0.0 }
 0xc09   :  { %3477 = vadd.xlane.f32.xlu1 %v3476_v49 }
 0xc6f   :  { %v3638_v9 = vpop.xlane.xlu0 %3637 }
 0xc70   :  { %v3639_v12 = vsub.f32 %v3632_v16, %v3638_v9 }
 0xc72   :  { %v3640_v21 = vmul.f32 1.442695, %v3639_v12 }
 0xc73   :  { %v3194_v23 = vpop.permute.xlu0 %3193 }
 0xc74   :  { %11759 = vpow2.f32 %v3640_v21  ;;  %v3311_v4 = vadd.f32 %v3310_v32, %v3194_v23  ;;  %v3316_v25 = vadd.f32 %v10451_v31, %v3194_v23  ;;  %v12779_v7 = vadd.f32 %v3320_v34, %v3194_v23 }
 0xc75   :  { %v12781_v26 = vadd.f32 %v10454_v33, %v3194_v23  ;;  %v12783_v28 = vadd.f32 %v3330_v36, %v3194_v23  ;;  %v12785_v19 = vadd.f32 %v10457_v35, %v3194_v23  ;;  %v12787_v52 = vadd.f32 %v3340_v39, %v3194_v23 }
 0xc76   :  { %v11135_v11 = vpack.c.bf16 %v3316_v25, %v3311_v4  ;;  %v12789_v53 = vpack.i.bf16 %v3316_v25, %v3311_v4  ;;  %v12804_v34 = vadd.f32 %v10460_v37, %v3194_v23  ;;  %v12806_v25 = vadd.f32 %v3350_v43, %v3194_v23 }
 0xc77   :  { %v12795_v32 = vpack.i.bf16 %v12781_v26, %v12779_v7  ;;  %v12801_v33 = vpack.i.bf16 %v12785_v19, %v12783_v28  ;;  %v12808_v35 = vadd.f32 %v10463_v40, %v3194_v23  ;;  %v12810_v36 = vadd.f32 %v3360_v56, %v3194_v23  ;;  %v11493_v31 = vpop.permute.xlu0 %11492 }
 0xc78   :  { %11136 = vmatpush3.bf16.msra.mxu0 %v11135_v11  ;;  %v12812_v39 = vadd.f32 %v10466_v46, %v3194_v23  ;;  %v12818_v11 = vpack.i.bf16 %v12804_v34, %v12787_v52  ;;  %v12832_v46 = vadd.f32 %v3370_v62, %v3194_v23  ;;  %v12834_v12 = vadd.f32 %v10469_v59, %v3194_v23 }
 0xc79   :  { %11141 = vmatprep.subr.bf16.mxu0 %v11966_v47  ;;  %v12824_v37 = vpack.i.bf16 %v12808_v35, %v12806_v25  ;;  %v12836_v21 = vadd.f32 %v3380_v5, %v3194_v23  ;;  %v12838_v4 = vadd.f32 %v10472_v1, %v3194_v23  ;;  %v11495_v16 = vunpack.i.h.bf16 %v11493_v31 }
 0xc7a   :  { %v12830_v43 = vpack.i.bf16 %v12812_v39, %v12810_v36  ;;  %v12845_v40 = vpack.i.bf16 %v12834_v12, %v12832_v46 }
 0xc7b   :  { %v12851_v59 = vpack.i.bf16 %v12838_v4, %v12836_v21 }
 0xc7e   :  { %v11760_v56 = vpop.eup %11759 }
 0xc7f   :  { %v3642_v9 = vsel %vm3469_vm8, %v11760_v56, 0.0 }
 0xc80   :  { %3643 = vadd.xlane.f32.xlu1 %v3642_v9 }
 0xc91   :  { %11487 = vrot.lane.b32.xlu1 %v12789_v53, %s11959_s5 }
 0xc96   :  { %v3478_v1 = vpop.xlane.xlu1 %3477 }
 0xc97   :  { %11761 = vrcp.f32 %v3478_v1  ;;  %v11494_v1 = vunpack.i.l.bf16 %v11493_v31 }
 0xca1   :  { %v11762_v5 = vpop.eup %11761 }
 0xca2   :  { %v3480_v23 = vmul.f32 %v11762_v5, %v11758_v30  ;;  %v11145_v30 = vpack.c.bf16 %v11495_v16, %v11494_v1 }
 0xca4   :  { %10485 = vmatmul.mubr.msk.f32.vlgmr.msra.gmra.mrb[58].mxu0 %vm1413_vm4, %v3480_v23 }
 0xca5   :  { %10498 = vmatprep.mubr.msk.f32.mxu0 %vm11958_vm2, %v11957_v14 }
 0xd0d   :  { %v3644_v9 = vpop.xlane.xlu1 %3643 }
 0xd0e   :  { %11763 = vrcp.f32 %v3644_v9 }
 0xd11   :  { %v11488_v0 = vpop.permute.xlu1 %11487 }
 0xd12   :  { %v11490_v62 = vunpack.i.h.bf16 %v11488_v0  ;;  %v11489_v49 = vunpack.i.l.bf16 %v11488_v0  ;;  %v3729_v0 = vpop.permute.xlu0 %3728 }
 0xd14   :  { %v11142_v58 = vpack.c.bf16 %v11490_v62, %v11489_v49 }
 0xd16   :  { %11143 = vmatpush3.bf16.msra.mxu0 %v11142_v58 }
 0xd17   :  { %11144 = vmatprep.subr.bf16.mxu0 %v11966_v47 }
 0xd18   :  { %v11764_v45 = vpop.eup %11763 }
 0xd19   :  { %v3646_v22 = vmul.f32 %v11764_v45, %v11760_v56 }
 0xd1b   :  { %10499 = vmatmul.mubr.msk.f32.vlgmr.msra.gmra.mrb[60].mxu0 %vm1413_vm4, %v3646_v22 }
 0xd1c   :  { %10505 = vmatprep.mubr.msk.f32.mxu0 %vm11958_vm2, %v11957_v14 }
 0xd1f   :  { %11147 = vmatpush3.bf16.xpose.msk.msra.mxu0 %vm12665_vm7, %v11145_v30 }
 0xd20   :  { %11155 = vmatprep.subr.bf16.mxu0 %v11966_v47 }
 0xd26   :  { %10506 = vmatmul.mubr.msk.f32.vlgmr.msra.gmra.mrb[62].mxu0 %vm739_vm3, %v3729_v0 }
 0xd27   :  { %10526 = vmatprep.mubr.msk.f32.mxu0 %vm11958_vm2, %v11957_v14 }
 0xd77   :  { %v12868_v58 = vpop.f32.mrb[58].mxu0 }
 0xd78   :  { %v10486_v45 = vpop.f32.mrb[59].mxu0 }
 0xdee   :  { %v12870_v31 = vpop.f32.mrb[60].mxu0 }
 0xdef   :  { %v10500_v22 = vpop.f32.mrb[61].mxu0 }
 0xdf9   :  { %v3806_v49 = vpop.f32.mrb[62].mxu0 }
 0xdfa   :  { %v10507_v56 = vpop.f32.mrb[63].mxu0  ;;  %v3810_v16 = vsel %vm3469_vm8, %v3806_v49, -inf }
 0xdfb   :  { %3811 = vmax.xlane.f32.xlu1 %v3810_v16 }
 0xe0c   :  { %11502 = vrot.lane.b32.xlu1 %v12669_v41, %s11961_s25 }
 0xe10   :  { %3900 = vrot.lane.b32.xlu1 %v12653_v29, %s11961_s25 }
 0xe88   :  { %v3812_v62 = vpop.xlane.xlu1 %3811 }
 0xe89   :  { %v3813_v5 = vsub.f32 %v3806_v49, %v3812_v62 }
 0xe8b   :  { %v3814_v23 = vmul.f32 1.442695, %v3813_v5 }
 0xe8c   :  { %v11503_v56 = vpop.permute.xlu1 %11502 }
 0xe8d   :  { %11765 = vpow2.f32 %v3814_v23  ;;  %v11505_v16 = vunpack.i.h.bf16 %v11503_v56  ;;  %v11504_v62 = vunpack.i.l.bf16 %v11503_v56  ;;  %v12900_v56 = vrot.slane %v12653_v29, 1 }
 0xe8f   :  { %v11152_v23 = vpack.c.bf16 %v11505_v16, %v11504_v62 }
 0xe97   :  { %v11766_v9 = vpop.eup %11765 }
 0xe98   :  { %v3816_v1 = vsel %vm3469_vm8, %v11766_v9, 0.0 }
 0xe99   :  { %3817 = vadd.xlane.f32.xlu0 %v3816_v1  ;;  %v3901_v1 = vpop.permute.xlu1 %3900 }
 0xeaf   :  { %11497 = vrot.lane.b32.xlu0 %v12789_v53, %s11960_s9 }
 0xf26   :  { %v3818_v30 = vpop.xlane.xlu0 %3817 }
 0xf27   :  { %11767 = vrcp.f32 %v3818_v30  ;;  %v13661_v30 = vpack.c.bf16 %v12781_v26, %v12779_v7 }
 0xf2a   :  { %v11498_v0 = vpop.permute.xlu0 %11497 }
 0xf2b   :  { %v11500_v45 = vunpack.i.h.bf16 %v11498_v0  ;;  %v11499_v22 = vunpack.i.l.bf16 %v11498_v0 }
 0xf2d   :  { %v11149_v41 = vpack.c.bf16 %v11500_v45, %v11499_v22 }
 0xf2f   :  { %11150 = vmatpush3.bf16.msra.mxu1 %v11149_v41 }
 0xf30   :  { %11151 = vmatprep.subr.bf16.mxu1 %v11966_v47 }
 0xf31   :  { %v11768_v49 = vpop.eup %11767 }
 0xf32   :  { %v3820_v5 = vmul.f32 %v11768_v49, %v11766_v9 }
 0xf34   :  { %10513 = vmatmul.mubr.msk.f32.vlgmr.msra.gmra.mrb[60].mxu1 %vm1413_vm4, %v3820_v5 }
 0xf35   :  { %10519 = vmatprep.mubr.msk.f32.mxu1 %vm11958_vm2, %v11957_v14 }
 0xf38   :  { %11154 = vmatpush3.bf16.xpose.msk.msra.mxu1 %vm12665_vm7, %v11152_v23 }
 0xf39   :  { %11162 = vmatprep.subr.bf16.mxu1 %v11966_v47 }
 0xf3f   :  { %10520 = vmatmul.mubr.msk.f32.vlgmr.msra.gmra.mrb[62].mxu1 %vm739_vm3, %v3901_v1 }
 0xf40   :  { %11164 = vmatpush3.bf16.msra.mxu1 %v13661_v30  ;;  %10540 = vmatprep.mubr.msk.f32.mxu1 %vm11958_vm2, %v11957_v14 }
 0xf41   :  { %11165 = vmatprep.subr.bf16.mxu1 %v11966_v47 }
0x1007   :  { %v12894_v9 = vpop.f32.mrb[60].mxu1 }
0x1008   :  { %v10514_v0 = vpop.f32.mrb[61].mxu1 }
0x1012   :  { %v3978_v45 = vpop.f32.mrb[62].mxu1 }
0x1013   :  { %v10521_v22 = vpop.f32.mrb[63].mxu1  ;;  %v3982_v41 = vsel %vm3469_vm8, %v3978_v45, -inf }
0x1014   :  { %3983 = vmax.xlane.f32.xlu0 %v3982_v41 }
0x102a   :  { %11507 = vrot.lane.b32.xlu0 %v12789_v53, %s11961_s25 }
0x102e   :  { %4250 = vrot.lane.b32.xlu0 %v12900_v56, %s11959_s5 }
0x10a1   :  { %v3984_v7 = vpop.xlane.xlu0 %3983 }
0x10a2   :  { %v3985_v26 = vsub.f32 %v3978_v45, %v3984_v7  ;;  %v13662_v45 = vpack.c.bf16 %v12672_v42, %v12675_v44 }
0x10a4   :  { %v3986_v49 = vmul.f32 1.442695, %v3985_v26 }
0x10a5   :  { %v11508_v16 = vpop.permute.xlu0 %11507 }
0x10a6   :  { %11769 = vpow2.f32 %v3986_v49  ;;  %v11510_v62 = vunpack.i.h.bf16 %v11508_v16  ;;  %v11509_v5 = vunpack.i.l.bf16 %v11508_v16 }
0x10a8   :  { %v11156_v23 = vpack.c.bf16 %v11510_v62, %v11509_v5 }
0x10aa   :  { %11157 = vmatpush3.bf16.msra.mxu0 %v11156_v23 }
0x10ab   :  { %11158 = vmatprep.subr.bf16.mxu0 %v11966_v47 }
0x10b0   :  { %v11770_v1 = vpop.eup %11769 }
0x10b1   :  { %v3988_v53 = vsel %vm3469_vm8, %v11770_v1, 0.0 }
0x10b2   :  { %3989 = vadd.xlane.f32.xlu1 %v3988_v53 }
0x113f   :  { %v3990_v30 = vpop.xlane.xlu1 %3989 }
0x1140   :  { %11771 = vrcp.f32 %v3990_v30 }
0x114a   :  { %v11772_v0 = vpop.eup %11771 }
0x114b   :  { %v3992_v22 = vmul.f32 %v11772_v0, %v11770_v1 }
0x114d   :  { %10527 = vmatmul.mubr.msk.f32.vlgmr.msra.gmra.mrb[64].mxu0 %vm1413_vm4, %v3992_v22 }
0x114e   :  { %11161 = vmatpush3.bf16.xpose.msk.msra.mxu0 %vm12665_vm7, %v13662_v45  ;;  %10533 = vmatprep.mubr.msk.f32.mxu0 %vm11958_vm2, %v11957_v14 }
0x114f   :  { %11169 = vmatprep.subr.bf16.mxu0 %v11966_v47 }
0x1155   :  { %10534 = vmatmul.mubr.msk.f32.vlgmr.msra.gmra.mrb[66].mxu0 %vm739_vm3, %v12900_v56 }
0x1156   :  { %10554 = vmatprep.mubr.msk.f32.mxu0 %vm11958_vm2, %v11957_v14 }
0x1220   :  { %v12919_v41 = vpop.f32.mrb[64].mxu0 }
0x1221   :  { %v10528_v7 = vpop.f32.mrb[65].mxu0 }
0x1228   :  { %v4162_v26 = vpop.f32.mrb[66].mxu0 }
0x1229   :  { %v10535_v49 = vpop.f32.mrb[67].mxu0  ;;  %v4166_v42 = vsel %vm3469_vm8, %v4162_v26, -inf }
0x122a   :  { %4167 = vmax.xlane.f32.xlu1 %v4166_v42 }
0x12b7   :  { %v4168_v44 = vpop.xlane.xlu1 %4167 }
0x12b8   :  { %v4169_v16 = vsub.f32 %v4162_v26, %v4168_v44  ;;  %v4251_v26 = vpop.permute.xlu0 %4250 }
0x12ba   :  { %v4170_v62 = vmul.f32 1.442695, %v4169_v16 }
0x12bc   :  { %11773 = vpow2.f32 %v4170_v62 }
0x12c6   :  { %v11774_v5 = vpop.eup %11773 }
0x12c7   :  { %v4172_v23 = vsel %vm3469_vm8, %v11774_v5, 0.0 }
0x12c8   :  { %4173 = vadd.xlane.f32.xlu1 %v4172_v23 }
0x12d9   :  { %11512 = vrot.lane.b32.xlu1 %v12686_v51, %s11959_s5 }
0x1355   :  { %v4174_v1 = vpop.xlane.xlu1 %4173 }
0x1356   :  { %11775 = vrcp.f32 %v4174_v1 }
0x1359   :  { %v11513_v53 = vpop.permute.xlu1 %11512 }
0x135a   :  { %v11515_v30 = vunpack.i.h.bf16 %v11513_v53  ;;  %v11514_v0 = vunpack.i.l.bf16 %v11513_v53 }
0x135c   :  { %v11166_v7 = vpack.c.bf16 %v11515_v30, %v11514_v0 }
0x1360   :  { %v11776_v22 = vpop.eup %11775 }
0x1361   :  { %v4176_v45 = vmul.f32 %v11776_v22, %v11774_v5 }
0x1363   :  { %10541 = vmatmul.mubr.msk.f32.vlgmr.msra.gmra.mrb[64].mxu1 %vm1413_vm4, %v4176_v45 }
0x1364   :  { %11168 = vmatpush3.bf16.xpose.msk.msra.mxu1 %vm12665_vm7, %v11166_v7  ;;  %10547 = vmatprep.mubr.msk.f32.mxu1 %vm11958_vm2, %v11957_v14 }
0x1365   :  { %11176 = vmatprep.subr.bf16.mxu1 %v11966_v47 }
0x136b   :  { %10548 = vmatmul.mubr.msk.f32.vlgmr.msra.gmra.mrb[66].mxu1 %vm739_vm3, %v4251_v26 }
0x136c   :  { %10568 = vmatprep.mubr.msk.f32.mxu1 %vm11958_vm2, %v11957_v14 }
0x1436   :  { %v12934_v49 = vpop.f32.mrb[64].mxu1 }
0x1437   :  { %v10542_v42 = vpop.f32.mrb[65].mxu1 }
0x143e   :  { %v4328_v44 = vpop.f32.mrb[66].mxu1 }
0x143f   :  { %v10549_v16 = vpop.f32.mrb[67].mxu1  ;;  %v4332_v62 = vsel %vm3469_vm8, %v4328_v44, -inf }
0x1440   :  { %4333 = vmax.xlane.f32.xlu0 %v4332_v62 }
0x1456   :  { %11517 = vrot.lane.b32.xlu0 %v12795_v32, %s11959_s5 }
0x145a   :  { %4424 = vrot.lane.b32.xlu0 %v12900_v56, %s11960_s9 }
0x14cd   :  { %v4334_v5 = vpop.xlane.xlu0 %4333 }
0x14ce   :  { %v4335_v23 = vsub.f32 %v4328_v44, %v4334_v5 }
0x14d0   :  { %v4336_v1 = vmul.f32 1.442695, %v4335_v23 }
0x14d1   :  { %v11518_v53 = vpop.permute.xlu0 %11517 }
0x14d2   :  { %11777 = vpow2.f32 %v4336_v1  ;;  %v11520_v30 = vunpack.i.h.bf16 %v11518_v53  ;;  %v11519_v0 = vunpack.i.l.bf16 %v11518_v53 }
0x14d4   :  { %v11170_v22 = vpack.c.bf16 %v11520_v30, %v11519_v0 }
0x14d5   :  { %v4425_v1 = vpop.permute.xlu0 %4424 }
0x14d6   :  { %11171 = vmatpush3.bf16.msra.mxu0 %v11170_v22 }
0x14d7   :  { %11172 = vmatprep.subr.bf16.mxu0 %v11966_v47 }
0x14dc   :  { %v11778_v45 = vpop.eup %11777 }
0x14dd   :  { %v4338_v7 = vsel %vm3469_vm8, %v11778_v45, 0.0 }
0x14de   :  { %4339 = vadd.xlane.f32.xlu1 %v4338_v7 }
0x14ef   :  { %11522 = vrot.lane.b32.xlu1 %v12686_v51, %s11960_s9 }
0x156b   :  { %v4340_v26 = vpop.xlane.xlu1 %4339 }
0x156c   :  { %11779 = vrcp.f32 %v4340_v26 }
0x156f   :  { %v11523_v42 = vpop.permute.xlu1 %11522 }
0x1570   :  { %v11525_v44 = vunpack.i.h.bf16 %v11523_v42  ;;  %v11524_v16 = vunpack.i.l.bf16 %v11523_v42 }
0x1572   :  { %v11173_v23 = vpack.c.bf16 %v11525_v44, %v11524_v16 }
0x1576   :  { %v11780_v62 = vpop.eup %11779 }
0x1577   :  { %v4342_v5 = vmul.f32 %v11780_v62, %v11778_v45 }
0x1579   :  { %10555 = vmatmul.mubr.msk.f32.vlgmr.msra.gmra.mrb[68].mxu0 %vm1413_vm4, %v4342_v5 }
0x157a   :  { %11175 = vmatpush3.bf16.xpose.msk.msra.mxu0 %vm12665_vm7, %v11173_v23  ;;  %10561 = vmatprep.mubr.msk.f32.mxu0 %vm11958_vm2, %v11957_v14 }
0x157b   :  { %11183 = vmatprep.subr.bf16.mxu0 %v11966_v47 }
0x1581   :  { %10562 = vmatmul.mubr.msk.f32.vlgmr.msra.gmra.mrb[70].mxu0 %vm739_vm3, %v4425_v1 }
0x1582   :  { %10582 = vmatprep.mubr.msk.f32.mxu0 %vm11958_vm2, %v11957_v14 }
0x164c   :  { %v12954_v53 = vpop.f32.mrb[68].mxu0 }
0x164d   :  { %v10556_v30 = vpop.f32.mrb[69].mxu0 }
0x1654   :  { %v4502_v0 = vpop.f32.mrb[70].mxu0 }
0x1655   :  { %v10563_v22 = vpop.f32.mrb[71].mxu0  ;;  %v4506_v45 = vsel %vm3469_vm8, %v4502_v0, -inf }
0x1656   :  { %4507 = vmax.xlane.f32.xlu0 %v4506_v45 }
0x166c   :  { %11527 = vrot.lane.b32.xlu0 %v12795_v32, %s11960_s9 }
0x1670   :  { %4596 = vrot.lane.b32.xlu0 %v12900_v56, %s11961_s25 }
0x16e3   :  { %v4508_v7 = vpop.xlane.xlu0 %4507 }
0x16e4   :  { %v4509_v26 = vsub.f32 %v4502_v0, %v4508_v7 }
0x16e6   :  { %v4510_v42 = vmul.f32 1.442695, %v4509_v26 }
0x16e7   :  { %v11528_v44 = vpop.permute.xlu0 %11527 }
0x16e8   :  { %11781 = vpow2.f32 %v4510_v42  ;;  %v11530_v16 = vunpack.i.h.bf16 %v11528_v44  ;;  %v11529_v62 = vunpack.i.l.bf16 %v11528_v44 }
0x16ea   :  { %v11177_v5 = vpack.c.bf16 %v11530_v16, %v11529_v62 }
0x16eb   :  { %v4597_v42 = vpop.permute.xlu0 %4596 }
0x16ec   :  { %11178 = vmatpush3.bf16.msra.mxu1 %v11177_v5 }
0x16ed   :  { %11179 = vmatprep.subr.bf16.mxu1 %v11966_v47 }
0x16f2   :  { %v11782_v23 = vpop.eup %11781 }
0x16f3   :  { %v4512_v1 = vsel %vm3469_vm8, %v11782_v23, 0.0 }
0x16f4   :  { %4513 = vadd.xlane.f32.xlu1 %v4512_v1 }
0x1705   :  { %11532 = vrot.lane.b32.xlu1 %v12686_v51, %s11961_s25  ;;  %v13663_v51 = vpack.c.bf16 %v12785_v19, %v12783_v28  ;;  %v12985_v19 = vrot.slane %v12653_v29, 2  ;;  %v13664_v29 = vpack.c.bf16 %v12689_v55, %v12692_v57 }
0x1781   :  { %v4514_v30 = vpop.xlane.xlu1 %4513 }
0x1782   :  { %11783 = vrcp.f32 %v4514_v30 }
0x1785   :  { %v11533_v56 = vpop.permute.xlu1 %11532 }
0x1786   :  { %v11535_v0 = vunpack.i.h.bf16 %v11533_v56  ;;  %v11534_v22 = vunpack.i.l.bf16 %v11533_v56 }
0x1788   :  { %v11180_v26 = vpack.c.bf16 %v11535_v0, %v11534_v22 }
0x178c   :  { %v11784_v45 = vpop.eup %11783 }
0x178d   :  { %v4516_v7 = vmul.f32 %v11784_v45, %v11782_v23 }
0x178f   :  { %10569 = vmatmul.mubr.msk.f32.vlgmr.msra.gmra.mrb[68].mxu1 %vm1413_vm4, %v4516_v7 }
0x1790   :  { %11182 = vmatpush3.bf16.xpose.msk.msra.mxu1 %vm12665_vm7, %v11180_v26  ;;  %10575 = vmatprep.mubr.msk.f32.mxu1 %vm11958_vm2, %v11957_v14 }
0x1791   :  { %11190 = vmatprep.subr.bf16.mxu1 %v11966_v47 }
0x1797   :  { %10576 = vmatmul.mubr.msk.f32.vlgmr.msra.gmra.mrb[70].mxu1 %vm739_vm3, %v4597_v42 }
0x1798   :  { %11192 = vmatpush3.bf16.msra.mxu1 %v13663_v51  ;;  %10596 = vmatprep.mubr.msk.f32.mxu1 %vm11958_vm2, %v11957_v14 }
0x1799   :  { %11193 = vmatprep.subr.bf16.mxu1 %v11966_v47 }
0x1862   :  { %v12978_v44 = vpop.f32.mrb[68].mxu1 }
0x1863   :  { %v10570_v16 = vpop.f32.mrb[69].mxu1 }
0x186a   :  { %v4674_v62 = vpop.f32.mrb[70].mxu1 }
0x186b   :  { %v10577_v5 = vpop.f32.mrb[71].mxu1  ;;  %v4678_v23 = vsel %vm3469_vm8, %v4674_v62, -inf }
0x186c   :  { %4679 = vmax.xlane.f32.xlu1 %v4678_v23 }
0x18f9   :  { %v4680_v1 = vpop.xlane.xlu1 %4679 }
0x18fa   :  { %v4681_v30 = vsub.f32 %v4674_v62, %v4680_v1 }
0x18fc   :  { %v4682_v56 = vmul.f32 1.442695, %v4681_v30 }
0x18fe   :  { %11785 = vpow2.f32 %v4682_v56 }
0x1908   :  { %v11786_v0 = vpop.eup %11785 }
0x1909   :  { %v4684_v28 = vsel %vm3469_vm8, %v11786_v0, 0.0 }
0x190a   :  { %4685 = vadd.xlane.f32.xlu0 %v4684_v28 }
0x1920   :  { %11537 = vrot.lane.b32.xlu0 %v12795_v32, %s11961_s25 }
0x1924   :  { %4946 = vrot.lane.b32.xlu0 %v12985_v19, %s11959_s5 }
0x1997   :  { %v4686_v22 = vpop.xlane.xlu0 %4685 }
0x1998   :  { %11787 = vrcp.f32 %v4686_v22 }
0x199b   :  { %v11538_v45 = vpop.permute.xlu0 %11537 }
0x199c   :  { %v11540_v7 = vunpack.i.h.bf16 %v11538_v45  ;;  %v11539_v26 = vunpack.i.l.bf16 %v11538_v45 }
0x199e   :  { %v11184_v42 = vpack.c.bf16 %v11540_v7, %v11539_v26 }
0x19a0   :  { %11185 = vmatpush3.bf16.msra.mxu0 %v11184_v42 }
0x19a1   :  { %11186 = vmatprep.subr.bf16.mxu0 %v11966_v47 }
0x19a2   :  { %v11788_v51 = vpop.eup %11787 }
0x19a3   :  { %v4688_v16 = vmul.f32 %v11788_v51, %v11786_v0 }
0x19a5   :  { %10583 = vmatmul.mubr.msk.f32.vlgmr.msra.gmra.mrb[72].mxu0 %vm1413_vm4, %v4688_v16  ;;  %v4947_v16 = vpop.permute.xlu0 %4946 }
0x19a6   :  { %10589 = vmatprep.mubr.msk.f32.mxu0 %vm11958_vm2, %v11957_v14 }
0x19a9   :  { %11189 = vmatpush3.bf16.xpose.msk.msra.mxu0 %vm12665_vm7, %v13664_v29 }
0x19aa   :  { %11197 = vmatprep.subr.bf16.mxu0 %v11966_v47 }
0x19b0   :  { %10590 = vmatmul.mubr.msk.f32.vlgmr.msra.gmra.mrb[74].mxu0 %vm739_vm3, %v12985_v19 }
0x19b1   :  { %10610 = vmatprep.mubr.msk.f32.mxu0 %vm11958_vm2, %v11957_v14 }
0x1a78   :  { %v13003_v32 = vpop.f32.mrb[72].mxu0 }
0x1a79   :  { %v10584_v62 = vpop.f32.mrb[73].mxu0 }
0x1a83   :  { %v4858_v5 = vpop.f32.mrb[74].mxu0 }
0x1a84   :  { %v10591_v23 = vpop.f32.mrb[75].mxu0  ;;  %v4862_v1 = vsel %vm3469_vm8, %v4858_v5, -inf }
0x1a85   :  { %4863 = vmax.xlane.f32.xlu1 %v4862_v1 }
0x1b12   :  { %v4864_v55 = vpop.xlane.xlu1 %4863 }
0x1b13   :  { %v4865_v57 = vsub.f32 %v4858_v5, %v4864_v55 }
0x1b15   :  { %v4866_v30 = vmul.f32 1.442695, %v4865_v57 }
0x1b17   :  { %11789 = vpow2.f32 %v4866_v30 }
0x1b21   :  { %v11790_v56 = vpop.eup %11789 }
0x1b22   :  { %v4868_v0 = vsel %vm3469_vm8, %v11790_v56, 0.0 }
0x1b23   :  { %4869 = vadd.xlane.f32.xlu1 %v4868_v0 }
0x1b34   :  { %11542 = vrot.lane.b32.xlu1 %v12698_v60, %s11959_s5 }
0x1bb0   :  { %v4870_v28 = vpop.xlane.xlu1 %4869 }
0x1bb1   :  { %11791 = vrcp.f32 %v4870_v28 }
0x1bb4   :  { %v11543_v22 = vpop.permute.xlu1 %11542 }
0x1bb5   :  { %v11545_v45 = vunpack.i.h.bf16 %v11543_v22  ;;  %v11544_v7 = vunpack.i.l.bf16 %v11543_v22 }
0x1bb7   :  { %v11194_v51 = vpack.c.bf16 %v11545_v45, %v11544_v7 }
0x1bbb   :  { %v11792_v26 = vpop.eup %11791 }
0x1bbc   :  { %v4872_v42 = vmul.f32 %v11792_v26, %v11790_v56 }
0x1bbe   :  { %10597 = vmatmul.mubr.msk.f32.vlgmr.msra.gmra.mrb[72].mxu1 %vm1413_vm4, %v4872_v42 }
0x1bbf   :  { %11196 = vmatpush3.bf16.xpose.msk.msra.mxu1 %vm12665_vm7, %v11194_v51  ;;  %10603 = vmatprep.mubr.msk.f32.mxu1 %vm11958_vm2, %v11957_v14 }
0x1bc0   :  { %11204 = vmatprep.subr.bf16.mxu1 %v11966_v47 }
0x1bc6   :  { %10604 = vmatmul.mubr.msk.f32.vlgmr.msra.gmra.mrb[74].mxu1 %vm739_vm3, %v4947_v16 }
0x1bc7   :  { %10624 = vmatprep.mubr.msk.f32.mxu1 %vm11958_vm2, %v11957_v14 }
0x1c91   :  { %v13018_v29 = vpop.f32.mrb[72].mxu1 }
0x1c92   :  { %v10598_v62 = vpop.f32.mrb[73].mxu1 }
0x1c99   :  { %v5024_v5 = vpop.f32.mrb[74].mxu1 }
0x1c9a   :  { %v10605_v23 = vpop.f32.mrb[75].mxu1  ;;  %v5028_v1 = vsel %vm3469_vm8, %v5024_v5, -inf }
0x1c9b   :  { %5029 = vmax.xlane.f32.xlu0 %v5028_v1 }
0x1cb1   :  { %11547 = vrot.lane.b32.xlu0 %v12801_v33, %s11959_s5 }
0x1cb5   :  { %5120 = vrot.lane.b32.xlu0 %v12985_v19, %s11960_s9 }
0x1d28   :  { %v5030_v55 = vpop.xlane.xlu0 %5029 }
0x1d29   :  { %v5031_v57 = vsub.f32 %v5024_v5, %v5030_v55 }
0x1d2b   :  { %v5032_v30 = vmul.f32 1.442695, %v5031_v57 }
0x1d2c   :  { %v11548_v56 = vpop.permute.xlu0 %11547 }
0x1d2d   :  { %11793 = vpow2.f32 %v5032_v30  ;;  %v11550_v0 = vunpack.i.h.bf16 %v11548_v56  ;;  %v11549_v28 = vunpack.i.l.bf16 %v11548_v56 }
0x1d2f   :  { %v11198_v22 = vpack.c.bf16 %v11550_v0, %v11549_v28 }
0x1d30   :  { %v5121_v1 = vpop.permute.xlu0 %5120 }
0x1d31   :  { %11199 = vmatpush3.bf16.msra.mxu0 %v11198_v22 }
0x1d32   :  { %11200 = vmatprep.subr.bf16.mxu0 %v11966_v47 }
0x1d37   :  { %v11794_v45 = vpop.eup %11793 }
0x1d38   :  { %v5034_v7 = vsel %vm3469_vm8, %v11794_v45, 0.0 }
0x1d39   :  { %5035 = vadd.xlane.f32.xlu1 %v5034_v7 }
0x1d4a   :  { %11552 = vrot.lane.b32.xlu1 %v12698_v60, %s11960_s9 }
0x1dc6   :  { %v5036_v26 = vpop.xlane.xlu1 %5035 }
0x1dc7   :  { %11795 = vrcp.f32 %v5036_v26 }
0x1dca   :  { %v11553_v42 = vpop.permute.xlu1 %11552 }
0x1dcb   :  { %v11555_v51 = vunpack.i.h.bf16 %v11553_v42  ;;  %v11554_v16 = vunpack.i.l.bf16 %v11553_v42 }
0x1dcd   :  { %v11201_v23 = vpack.c.bf16 %v11555_v51, %v11554_v16 }
0x1dd1   :  { %v11796_v62 = vpop.eup %11795 }
0x1dd2   :  { %v5038_v5 = vmul.f32 %v11796_v62, %v11794_v45 }
0x1dd4   :  { %10611 = vmatmul.mubr.msk.f32.vlgmr.msra.gmra.mrb[76].mxu0 %vm1413_vm4, %v5038_v5 }
0x1dd5   :  { %11203 = vmatpush3.bf16.xpose.msk.msra.mxu0 %vm12665_vm7, %v11201_v23  ;;  %10617 = vmatprep.mubr.msk.f32.mxu0 %vm11958_vm2, %v11957_v14 }
0x1dd6   :  { %11211 = vmatprep.subr.bf16.mxu0 %v11966_v47 }
0x1ddc   :  { %10618 = vmatmul.mubr.msk.f32.vlgmr.msra.gmra.mrb[78].mxu0 %vm739_vm3, %v5121_v1 }
0x1ddd   :  { %10638 = vmatprep.mubr.msk.f32.mxu0 %vm11958_vm2, %v11957_v14 }
0x1ea7   :  { %v13038_v55 = vpop.f32.mrb[76].mxu0 }
0x1ea8   :  { %v10612_v57 = vpop.f32.mrb[77].mxu0 }
0x1eaf   :  { %v5198_v30 = vpop.f32.mrb[78].mxu0 }
0x1eb0   :  { %v10619_v56 = vpop.f32.mrb[79].mxu0  ;;  %v5202_v0 = vsel %vm3469_vm8, %v5198_v30, -inf }
0x1eb1   :  { %5203 = vmax.xlane.f32.xlu1 %v5202_v0  ;;  %v13665_v0 = vpack.c.bf16 %v12804_v34, %v12787_v52 }
0x1ec2   :  { %11562 = vrot.lane.b32.xlu1 %v12698_v60, %s11961_s25 }
0x1ec6   :  { %5292 = vrot.lane.b32.xlu1 %v12985_v19, %s11961_s25 }
0x1f3e   :  { %v5204_v28 = vpop.xlane.xlu1 %5203 }
0x1f3f   :  { %v5205_v22 = vsub.f32 %v5198_v30, %v5204_v28 }
0x1f41   :  { %v5206_v45 = vmul.f32 1.442695, %v5205_v22 }
0x1f42   :  { %v11563_v5 = vpop.permute.xlu1 %11562 }
0x1f43   :  { %11797 = vpow2.f32 %v5206_v45  ;;  %v11565_v23 = vunpack.i.h.bf16 %v11563_v5  ;;  %v11564_v1 = vunpack.i.l.bf16 %v11563_v5 }
0x1f45   :  { %v11208_v30 = vpack.c.bf16 %v11565_v23, %v11564_v1 }
0x1f46   :  { %v5293_v56 = vpop.permute.xlu1 %5292 }
0x1f4d   :  { %v11798_v7 = vpop.eup %11797 }
0x1f4e   :  { %v5208_v26 = vsel %vm3469_vm8, %v11798_v7, 0.0 }
0x1f4f   :  { %5209 = vadd.xlane.f32.xlu0 %v5208_v26 }
0x1f65   :  { %11557 = vrot.lane.b32.xlu0 %v12801_v33, %s11960_s9 }
0x1fdc   :  { %v5210_v42 = vpop.xlane.xlu0 %5209 }
0x1fdd   :  { %11799 = vrcp.f32 %v5210_v42  ;;  %v11893_v42 = vld [vmem:[%s13654_s15] ss:$0 sm:$0xff] }
0x1fe0   :  { %v11558_v51 = vpop.permute.xlu0 %11557 }
0x1fe1   :  { %v11560_v16 = vunpack.i.h.bf16 %v11558_v51  ;;  %v11559_v62 = vunpack.i.l.bf16 %v11558_v51  ;;  %v2966_v51 = vadd.f32 %v11893_v42, %v12649_v27 }
0x1fe3   :  { %v11205_v60 = vpack.c.bf16 %v11560_v16, %v11559_v62  ;;  %v13069_v52 = vmul.f32 0.35355338, %v2966_v51 }
0x1fe5   :  { %11206 = vmatpush3.bf16.msra.mxu1 %v11205_v60 }
0x1fe6   :  { %11207 = vmatprep.subr.bf16.mxu1 %v11966_v47 }
0x1fe7   :  { %v11800_v19 = vpop.eup %11799 }
0x1fe8   :  { %v5212_v57 = vmul.f32 %v11800_v19, %v11798_v7 }
0x1fea   :  { %10625 = vmatmul.mubr.msk.f32.vlgmr.msra.gmra.mrb[76].mxu1 %vm1413_vm4, %v5212_v57 }
0x1feb   :  { %10631 = vmatprep.mubr.msk.f32.mxu1 %vm11958_vm2, %v11957_v14 }
0x1fee   :  { %11210 = vmatpush3.bf16.xpose.msk.msra.mxu1 %vm12665_vm7, %v11208_v30 }
0x1fef   :  { %11218 = vmatprep.subr.bf16.mxu1 %v11966_v47 }
0x1ff5   :  { %10632 = vmatmul.mubr.msk.f32.vlgmr.msra.gmra.mrb[78].mxu1 %vm739_vm3, %v5293_v56  ;;  %v13666_v56 = vpack.c.bf16 %v12701_v61, %v12706_v63 }
0x1ff6   :  { %11220 = vmatpush3.bf16.msra.mxu1 %v13665_v0  ;;  %10652 = vmatprep.mubr.msk.f32.mxu1 %vm11958_vm2, %v11957_v14 }
0x1ff7   :  { %11221 = vmatprep.subr.bf16.mxu1 %v11966_v47 }
0x20bd   :  { %v13062_v28 = vpop.f32.mrb[76].mxu1 }
0x20be   :  { %v10626_v22 = vpop.f32.mrb[77].mxu1 }
0x20c8   :  { %v5370_v45 = vpop.f32.mrb[78].mxu1 }
0x20c9   :  { %v10633_v7 = vpop.f32.mrb[79].mxu1  ;;  %v5374_v26 = vsel %vm3469_vm8, %v5370_v45, -inf }
0x20ca   :  { %5375 = vmax.xlane.f32.xlu0 %v5374_v26 }
0x20e0   :  { %11567 = vrot.lane.b32.xlu0 %v12801_v33, %s11961_s25 }
0x20e4   :  { %5643 = vrot.lane.b32.xlu0 %v13069_v52, %s11959_s5 }
0x2157   :  { %v5376_v34 = vpop.xlane.xlu0 %5375 }
0x2158   :  { %v5377_v16 = vsub.f32 %v5370_v45, %v5376_v34 }
0x215a   :  { %v5378_v62 = vmul.f32 1.442695, %v5377_v16 }
0x215b   :  { %v11568_v60 = vpop.permute.xlu0 %11567 }
0x215c   :  { %11801 = vpow2.f32 %v5378_v62  ;;  %v11570_v5 = vunpack.i.h.bf16 %v11568_v60  ;;  %v11569_v19 = vunpack.i.l.bf16 %v11568_v60 }
0x215e   :  { %v11212_v23 = vpack.c.bf16 %v11570_v5, %v11569_v19 }
0x2160   :  { %11213 = vmatpush3.bf16.msra.mxu0 %v11212_v23 }
0x2161   :  { %11214 = vmatprep.subr.bf16.mxu0 %v11966_v47 }
0x2166   :  { %v11802_v27 = vpop.eup %11801 }
0x2167   :  { %v5380_v1 = vsel %vm3469_vm8, %v11802_v27, 0.0 }
0x2168   :  { %5381 = vadd.xlane.f32.xlu1 %v5380_v1  ;;  %v5644_v1 = vpop.permute.xlu0 %5643 }
0x21f5   :  { %v5382_v33 = vpop.xlane.xlu1 %5381 }
0x21f6   :  { %11803 = vrcp.f32 %v5382_v33 }
0x2200   :  { %v11804_v57 = vpop.eup %11803 }
0x2201   :  { %v5384_v30 = vmul.f32 %v11804_v57, %v11802_v27 }
0x2203   :  { %10639 = vmatmul.mubr.msk.f32.vlgmr.msra.gmra.mrb[80].mxu0 %vm1413_vm4, %v5384_v30 }
0x2204   :  { %11217 = vmatpush3.bf16.xpose.msk.msra.mxu0 %vm12665_vm7, %v13666_v56  ;;  %10645 = vmatprep.mubr.msk.f32.mxu0 %vm11958_vm2, %v11957_v14 }
0x2205   :  { %11225 = vmatprep.subr.bf16.mxu0 %v11966_v47 }
0x220b   :  { %10646 = vmatmul.mubr.msk.f32.vlgmr.msra.gmra.mrb[82].mxu0 %vm739_vm3, %v13069_v52 }
0x220c   :  { %10666 = vmatprep.mubr.msk.f32.mxu0 %vm11958_vm2, %v11957_v14 }
0x22d6   :  { %v13088_v0 = vpop.f32.mrb[80].mxu0 }
0x22d7   :  { %v10640_v22 = vpop.f32.mrb[81].mxu0 }
0x22de   :  { %v5555_v45 = vpop.f32.mrb[82].mxu0 }
0x22df   :  { %v10647_v7 = vpop.f32.mrb[83].mxu0  ;;  %v5559_v61 = vsel %vm3469_vm8, %v5555_v45, -inf }
0x22e0   :  { %5560 = vmax.xlane.f32.xlu1 %v5559_v61 }
0x236d   :  { %v5561_v63 = vpop.xlane.xlu1 %5560 }
0x236e   :  { %v5562_v26 = vsub.f32 %v5555_v45, %v5561_v63 }
0x2370   :  { %v5563_v42 = vmul.f32 1.442695, %v5562_v26 }
0x2372   :  { %11805 = vpow2.f32 %v5563_v42 }
0x237c   :  { %v11806_v51 = vpop.eup %11805 }
0x237d   :  { %v5565_v34 = vsel %vm3469_vm8, %v11806_v51, 0.0 }
0x237e   :  { %5566 = vadd.xlane.f32.xlu1 %v5565_v34 }
0x238f   :  { %11572 = vrot.lane.b32.xlu1 %v12714_v2, %s11959_s5 }
0x240b   :  { %v5567_v16 = vpop.xlane.xlu1 %5566 }
0x240c   :  { %11807 = vrcp.f32 %v5567_v16 }
0x240f   :  { %v11573_v62 = vpop.permute.xlu1 %11572 }
0x2410   :  { %v11575_v60 = vunpack.i.h.bf16 %v11573_v62  ;;  %v11574_v5 = vunpack.i.l.bf16 %v11573_v62 }
0x2412   :  { %v11222_v27 = vpack.c.bf16 %v11575_v60, %v11574_v5 }
0x2416   :  { %v11808_v19 = vpop.eup %11807 }
0x2417   :  { %v5569_v23 = vmul.f32 %v11808_v19, %v11806_v51 }
0x2419   :  { %10653 = vmatmul.mubr.msk.f32.vlgmr.msra.gmra.mrb[80].mxu1 %vm1413_vm4, %v5569_v23 }
0x241a   :  { %11224 = vmatpush3.bf16.xpose.msk.msra.mxu1 %vm12665_vm7, %v11222_v27  ;;  %10659 = vmatprep.mubr.msk.f32.mxu1 %vm11958_vm2, %v11957_v14 }
0x241b   :  { %11232 = vmatprep.subr.bf16.mxu1 %v11966_v47 }
0x2421   :  { %10660 = vmatmul.mubr.msk.f32.vlgmr.msra.gmra.mrb[82].mxu1 %vm739_vm3, %v5644_v1 }
0x2422   :  { %10680 = vmatprep.mubr.msk.f32.mxu1 %vm11958_vm2, %v11957_v14 }
0x24ec   :  { %v13103_v33 = vpop.f32.mrb[80].mxu1 }
0x24ed   :  { %v10654_v57 = vpop.f32.mrb[81].mxu1 }
0x24f4   :  { %v5721_v30 = vpop.f32.mrb[82].mxu1 }
0x24f5   :  { %v10661_v56 = vpop.f32.mrb[83].mxu1  ;;  %v5725_v22 = vsel %vm3469_vm8, %v5721_v30, -inf }
0x24f6   :  { %5726 = vmax.xlane.f32.xlu0 %v5725_v22 }
0x250c   :  { %11577 = vrot.lane.b32.xlu0 %v12818_v11, %s11959_s5 }
0x2510   :  { %5817 = vrot.lane.b32.xlu0 %v13069_v52, %s11960_s9 }
0x2583   :  { %v5727_v45 = vpop.xlane.xlu0 %5726 }
0x2584   :  { %v5728_v7 = vsub.f32 %v5721_v30, %v5727_v45 }
0x2586   :  { %v5729_v61 = vmul.f32 1.442695, %v5728_v7 }
0x2587   :  { %v11578_v63 = vpop.permute.xlu0 %11577 }
0x2588   :  { %11809 = vpow2.f32 %v5729_v61  ;;  %v11580_v26 = vunpack.i.h.bf16 %v11578_v63  ;;  %v11579_v42 = vunpack.i.l.bf16 %v11578_v63 }
0x258a   :  { %v11226_v51 = vpack.c.bf16 %v11580_v26, %v11579_v42 }
0x258b   :  { %v5818_v57 = vpop.permute.xlu0 %5817 }
0x258c   :  { %11227 = vmatpush3.bf16.msra.mxu0 %v11226_v51 }
0x258d   :  { %11228 = vmatprep.subr.bf16.mxu0 %v11966_v47 }
0x2592   :  { %v11810_v34 = vpop.eup %11809 }
0x2593   :  { %v5731_v16 = vsel %vm3469_vm8, %v11810_v34, 0.0 }
0x2594   :  { %5732 = vadd.xlane.f32.xlu1 %v5731_v16 }
0x25a5   :  { %11582 = vrot.lane.b32.xlu1 %v12714_v2, %s11960_s9 }
0x2621   :  { %v5733_v62 = vpop.xlane.xlu1 %5732 }
0x2622   :  { %11811 = vrcp.f32 %v5733_v62 }
0x2625   :  { %v11583_v60 = vpop.permute.xlu1 %11582 }
0x2626   :  { %v11585_v5 = vunpack.i.h.bf16 %v11583_v60  ;;  %v11584_v19 = vunpack.i.l.bf16 %v11583_v60 }
0x2628   :  { %v11229_v1 = vpack.c.bf16 %v11585_v5, %v11584_v19 }
0x262c   :  { %v11812_v23 = vpop.eup %11811 }
0x262d   :  { %v5735_v27 = vmul.f32 %v11812_v23, %v11810_v34 }
0x262f   :  { %10667 = vmatmul.mubr.msk.f32.vlgmr.msra.gmra.mrb[84].mxu0 %vm1413_vm4, %v5735_v27 }
0x2630   :  { %11231 = vmatpush3.bf16.xpose.msk.msra.mxu0 %vm12665_vm7, %v11229_v1  ;;  %10673 = vmatprep.mubr.msk.f32.mxu0 %vm11958_vm2, %v11957_v14 }
0x2631   :  { %11239 = vmatprep.subr.bf16.mxu0 %v11966_v47 }
0x2637   :  { %10674 = vmatmul.mubr.msk.f32.vlgmr.msra.gmra.mrb[86].mxu0 %vm739_vm3, %v5818_v57 }
0x2638   :  { %10694 = vmatprep.mubr.msk.f32.mxu0 %vm11958_vm2, %v11957_v14 }
0x2702   :  { %v13123_v30 = vpop.f32.mrb[84].mxu0 }
0x2703   :  { %v10668_v56 = vpop.f32.mrb[85].mxu0 }
0x270a   :  { %v5895_v22 = vpop.f32.mrb[86].mxu0 }
0x270b   :  { %v10675_v45 = vpop.f32.mrb[87].mxu0  ;;  %v5899_v7 = vsel %vm3469_vm8, %v5895_v22, -inf }
0x270c   :  { %5900 = vmax.xlane.f32.xlu0 %v5899_v7 }
0x2722   :  { %11587 = vrot.lane.b32.xlu0 %v12818_v11, %s11960_s9 }
0x2726   :  { %5989 = vrot.lane.b32.xlu0 %v13069_v52, %s11961_s25 }
0x2799   :  { %v5901_v61 = vpop.xlane.xlu0 %5900 }
0x279a   :  { %v5902_v63 = vsub.f32 %v5895_v22, %v5901_v61 }
0x279c   :  { %v5903_v26 = vmul.f32 1.442695, %v5902_v63 }
0x279d   :  { %v11588_v42 = vpop.permute.xlu0 %11587 }
0x279e   :  { %11813 = vpow2.f32 %v5903_v26  ;;  %v11590_v51 = vunpack.i.h.bf16 %v11588_v42  ;;  %v11589_v34 = vunpack.i.l.bf16 %v11588_v42 }
0x27a0   :  { %v11233_v16 = vpack.c.bf16 %v11590_v51, %v11589_v34 }
0x27a1   :  { %v5990_v22 = vpop.permute.xlu0 %5989 }
0x27a2   :  { %11234 = vmatpush3.bf16.msra.mxu1 %v11233_v16 }
0x27a3   :  { %11235 = vmatprep.subr.bf16.mxu1 %v11966_v47 }
0x27a8   :  { %v11814_v62 = vpop.eup %11813 }
0x27a9   :  { %v5905_v60 = vsel %vm3469_vm8, %v11814_v62, 0.0 }
0x27aa   :  { %5906 = vadd.xlane.f32.xlu1 %v5905_v60 }
0x27bb   :  { %11592 = vrot.lane.b32.xlu1 %v12714_v2, %s11961_s25  ;;  %v13667_v2 = vpack.c.bf16 %v12808_v35, %v12806_v25  ;;  %v13154_v35 = vrot.slane %v13069_v52, 1 }
0x2837   :  { %v5907_v5 = vpop.xlane.xlu1 %5906 }
0x2838   :  { %11815 = vrcp.f32 %v5907_v5 }
0x283b   :  { %v11593_v19 = vpop.permute.xlu1 %11592 }
0x283c   :  { %v11595_v23 = vunpack.i.h.bf16 %v11593_v19  ;;  %v11594_v27 = vunpack.i.l.bf16 %v11593_v19 }
0x283e   :  { %v11236_v56 = vpack.c.bf16 %v11595_v23, %v11594_v27 }
0x2842   :  { %v11816_v1 = vpop.eup %11815 }
0x2843   :  { %v5909_v57 = vmul.f32 %v11816_v1, %v11814_v62 }
0x2845   :  { %10681 = vmatmul.mubr.msk.f32.vlgmr.msra.gmra.mrb[84].mxu1 %vm1413_vm4, %v5909_v57 }
0x2846   :  { %11238 = vmatpush3.bf16.xpose.msk.msra.mxu1 %vm12665_vm7, %v11236_v56  ;;  %10687 = vmatprep.mubr.msk.f32.mxu1 %vm11958_vm2, %v11957_v14 }
0x2847   :  { %11246 = vmatprep.subr.bf16.mxu1 %v11966_v47 }
0x284d   :  { %10688 = vmatmul.mubr.msk.f32.vlgmr.msra.gmra.mrb[86].mxu1 %vm739_vm3, %v5990_v22 }
0x284e   :  { %11248 = vmatpush3.bf16.msra.mxu1 %v13667_v2  ;;  %10708 = vmatprep.mubr.msk.f32.mxu1 %vm11958_vm2, %v11957_v14 }
0x284f   :  { %11249 = vmatprep.subr.bf16.mxu1 %v11966_v47 }
0x2918   :  { %v13147_v45 = vpop.f32.mrb[84].mxu1 }
0x2919   :  { %v10682_v7 = vpop.f32.mrb[85].mxu1 }
0x2920   :  { %v6067_v61 = vpop.f32.mrb[86].mxu1 }
0x2921   :  { %v10689_v63 = vpop.f32.mrb[87].mxu1  ;;  %v6071_v26 = vsel %vm3469_vm8, %v6067_v61, -inf }
0x2922   :  { %6072 = vmax.xlane.f32.xlu1 %v6071_v26 }
0x29af   :  { %v6073_v42 = vpop.xlane.xlu1 %6072 }
0x29b0   :  { %v6074_v51 = vsub.f32 %v6067_v61, %v6073_v42 }
0x29b2   :  { %v6075_v34 = vmul.f32 1.442695, %v6074_v51 }
0x29b4   :  { %11817 = vpow2.f32 %v6075_v34 }
0x29be   :  { %v11818_v16 = vpop.eup %11817 }
0x29bf   :  { %v6077_v25 = vsel %vm3469_vm8, %v11818_v16, 0.0 }
0x29c0   :  { %6078 = vadd.xlane.f32.xlu0 %v6077_v25 }
0x29d6   :  { %11597 = vrot.lane.b32.xlu0 %v12818_v11, %s11961_s25  ;;  %v13668_v11 = vpack.c.bf16 %v12717_v3, %v12720_v6 }
0x29da   :  { %6339 = vrot.lane.b32.xlu0 %v13154_v35, %s11959_s5 }
0x2a4d   :  { %v6079_v62 = vpop.xlane.xlu0 %6078 }
0x2a4e   :  { %11819 = vrcp.f32 %v6079_v62 }
0x2a51   :  { %v11598_v60 = vpop.permute.xlu0 %11597 }
0x2a52   :  { %v11600_v5 = vunpack.i.h.bf16 %v11598_v60  ;;  %v11599_v19 = vunpack.i.l.bf16 %v11598_v60 }
0x2a54   :  { %v11240_v23 = vpack.c.bf16 %v11600_v5, %v11599_v19 }
0x2a55   :  { %v6340_v5 = vpop.permute.xlu0 %6339 }
0x2a56   :  { %11241 = vmatpush3.bf16.msra.mxu0 %v11240_v23 }
0x2a57   :  { %11242 = vmatprep.subr.bf16.mxu0 %v11966_v47 }
0x2a58   :  { %v11820_v27 = vpop.eup %11819 }
0x2a59   :  { %v6081_v1 = vmul.f32 %v11820_v27, %v11818_v16 }
0x2a5b   :  { %10695 = vmatmul.mubr.msk.f32.vlgmr.msra.gmra.mrb[88].mxu0 %vm1413_vm4, %v6081_v1 }
0x2a5c   :  { %10701 = vmatprep.mubr.msk.f32.mxu0 %vm11958_vm2, %v11957_v14 }
0x2a5f   :  { %11245 = vmatpush3.bf16.xpose.msk.msra.mxu0 %vm12665_vm7, %v13668_v11 }
0x2a60   :  { %11253 = vmatprep.subr.bf16.mxu0 %v11966_v47 }
0x2a66   :  { %10702 = vmatmul.mubr.msk.f32.vlgmr.msra.gmra.mrb[90].mxu0 %vm739_vm3, %v13154_v35 }
0x2a67   :  { %10722 = vmatprep.mubr.msk.f32.mxu0 %vm11958_vm2, %v11957_v14 }
0x2b2e   :  { %v13172_v57 = vpop.f32.mrb[88].mxu0 }
0x2b2f   :  { %v10696_v56 = vpop.f32.mrb[89].mxu0 }
0x2b39   :  { %v6251_v22 = vpop.f32.mrb[90].mxu0 }
0x2b3a   :  { %v10703_v2 = vpop.f32.mrb[91].mxu0  ;;  %v6255_v7 = vsel %vm3469_vm8, %v6251_v22, -inf }
0x2b3b   :  { %6256 = vmax.xlane.f32.xlu1 %v6255_v7 }
0x2bc8   :  { %v6257_v3 = vpop.xlane.xlu1 %6256 }
0x2bc9   :  { %v6258_v6 = vsub.f32 %v6251_v22, %v6257_v3 }
0x2bcb   :  { %v6259_v61 = vmul.f32 1.442695, %v6258_v6 }
0x2bcd   :  { %11821 = vpow2.f32 %v6259_v61 }
0x2bd7   :  { %v11822_v63 = vpop.eup %11821 }
0x2bd8   :  { %v6261_v26 = vsel %vm3469_vm8, %v11822_v63, 0.0 }
0x2bd9   :  { %6262 = vadd.xlane.f32.xlu1 %v6261_v26 }
0x2bea   :  { %11602 = vrot.lane.b32.xlu1 %v12726_v8, %s11959_s5 }
0x2c66   :  { %v6263_v42 = vpop.xlane.xlu1 %6262 }
0x2c67   :  { %11823 = vrcp.f32 %v6263_v42 }
0x2c6a   :  { %v11603_v51 = vpop.permute.xlu1 %11602 }
0x2c6b   :  { %v11605_v34 = vunpack.i.h.bf16 %v11603_v51  ;;  %v11604_v16 = vunpack.i.l.bf16 %v11603_v51 }
0x2c6d   :  { %v11250_v60 = vpack.c.bf16 %v11605_v34, %v11604_v16 }
0x2c71   :  { %v11824_v25 = vpop.eup %11823 }
0x2c72   :  { %v6265_v62 = vmul.f32 %v11824_v25, %v11822_v63 }
0x2c74   :  { %10709 = vmatmul.mubr.msk.f32.vlgmr.msra.gmra.mrb[88].mxu1 %vm1413_vm4, %v6265_v62 }
0x2c75   :  { %11252 = vmatpush3.bf16.xpose.msk.msra.mxu1 %vm12665_vm7, %v11250_v60  ;;  %10715 = vmatprep.mubr.msk.f32.mxu1 %vm11958_vm2, %v11957_v14 }
0x2c76   :  { %11260 = vmatprep.subr.bf16.mxu1 %v11966_v47 }
0x2c7c   :  { %10716 = vmatmul.mubr.msk.f32.vlgmr.msra.gmra.mrb[90].mxu1 %vm739_vm3, %v6340_v5 }
0x2c7d   :  { %10736 = vmatprep.mubr.msk.f32.mxu1 %vm11958_vm2, %v11957_v14 }
0x2d47   :  { %v13187_v19 = vpop.f32.mrb[88].mxu1 }
0x2d48   :  { %v10710_v23 = vpop.f32.mrb[89].mxu1 }
0x2d4f   :  { %v6417_v27 = vpop.f32.mrb[90].mxu1 }
0x2d50   :  { %v10717_v1 = vpop.f32.mrb[91].mxu1  ;;  %v6421_v11 = vsel %vm3469_vm8, %v6417_v27, -inf }
0x2d51   :  { %6422 = vmax.xlane.f32.xlu0 %v6421_v11 }
0x2d67   :  { %11607 = vrot.lane.b32.xlu0 %v12824_v37, %s11959_s5 }
0x2d6b   :  { %6513 = vrot.lane.b32.xlu0 %v13154_v35, %s11960_s9 }
0x2dde   :  { %v6423_v56 = vpop.xlane.xlu0 %6422 }
0x2ddf   :  { %v6424_v22 = vsub.f32 %v6417_v27, %v6423_v56 }
0x2de1   :  { %v6425_v2 = vmul.f32 1.442695, %v6424_v22 }
0x2de2   :  { %v11608_v7 = vpop.permute.xlu0 %11607 }
0x2de3   :  { %11825 = vpow2.f32 %v6425_v2  ;;  %v11610_v3 = vunpack.i.h.bf16 %v11608_v7  ;;  %v11609_v6 = vunpack.i.l.bf16 %v11608_v7 }
0x2de5   :  { %v11254_v61 = vpack.c.bf16 %v11610_v3, %v11609_v6 }
0x2de6   :  { %v6514_v5 = vpop.permute.xlu0 %6513 }
0x2de7   :  { %11255 = vmatpush3.bf16.msra.mxu0 %v11254_v61 }
0x2de8   :  { %11256 = vmatprep.subr.bf16.mxu0 %v11966_v47 }
0x2ded   :  { %v11826_v63 = vpop.eup %11825 }
0x2dee   :  { %v6427_v26 = vsel %vm3469_vm8, %v11826_v63, 0.0 }
0x2def   :  { %6428 = vadd.xlane.f32.xlu1 %v6427_v26 }
0x2e00   :  { %11612 = vrot.lane.b32.xlu1 %v12726_v8, %s11960_s9 }
0x2e7c   :  { %v6429_v42 = vpop.xlane.xlu1 %6428 }
0x2e7d   :  { %11827 = vrcp.f32 %v6429_v42 }
0x2e80   :  { %v11613_v51 = vpop.permute.xlu1 %11612 }
0x2e81   :  { %v11615_v34 = vunpack.i.h.bf16 %v11613_v51  ;;  %v11614_v16 = vunpack.i.l.bf16 %v11613_v51 }
0x2e83   :  { %v11257_v60 = vpack.c.bf16 %v11615_v34, %v11614_v16 }
0x2e87   :  { %v11828_v25 = vpop.eup %11827 }
0x2e88   :  { %v6431_v62 = vmul.f32 %v11828_v25, %v11826_v63 }
0x2e8a   :  { %10723 = vmatmul.mubr.msk.f32.vlgmr.msra.gmra.mrb[92].mxu0 %vm1413_vm4, %v6431_v62 }
0x2e8b   :  { %11259 = vmatpush3.bf16.xpose.msk.msra.mxu0 %vm12665_vm7, %v11257_v60  ;;  %10729 = vmatprep.mubr.msk.f32.mxu0 %vm11958_vm2, %v11957_v14 }
0x2e8c   :  { %11267 = vmatprep.subr.bf16.mxu0 %v11966_v47 }
0x2e92   :  { %10730 = vmatmul.mubr.msk.f32.vlgmr.msra.gmra.mrb[94].mxu0 %vm739_vm3, %v6514_v5  ;;  %v13669_v5 = vpack.c.bf16 %v12812_v39, %v12810_v36 }
0x2e93   :  { %10750 = vmatprep.mubr.msk.f32.mxu0 %vm11958_vm2, %v11957_v14 }
0x2f5d   :  { %v13207_v23 = vpop.f32.mrb[92].mxu0 }
0x2f5e   :  { %v10724_v27 = vpop.f32.mrb[93].mxu0 }
0x2f65   :  { %v6591_v1 = vpop.f32.mrb[94].mxu0 }
0x2f66   :  { %v10731_v11 = vpop.f32.mrb[95].mxu0  ;;  %v6595_v56 = vsel %vm3469_vm8, %v6591_v1, -inf }
0x2f67   :  { %6596 = vmax.xlane.f32.xlu1 %v6595_v56 }
0x2f78   :  { %11622 = vrot.lane.b32.xlu1 %v12726_v8, %s11961_s25 }
0x2f7c   :  { %6685 = vrot.lane.b32.xlu1 %v13154_v35, %s11961_s25 }
0x2ff4   :  { %v6597_v22 = vpop.xlane.xlu1 %6596 }
0x2ff5   :  { %v6598_v2 = vsub.f32 %v6591_v1, %v6597_v22 }
0x2ff7   :  { %v6599_v7 = vmul.f32 1.442695, %v6598_v2  ;;  %v13237_v2 = vrot.slane %v13069_v52, 2 }
0x2ff8   :  { %v11623_v51 = vpop.permute.xlu1 %11622 }
0x2ff9   :  { %11829 = vpow2.f32 %v6599_v7  ;;  %v11625_v34 = vunpack.i.h.bf16 %v11623_v51  ;;  %v11624_v16 = vunpack.i.l.bf16 %v11623_v51 }
0x2ffb   :  { %v11264_v62 = vpack.c.bf16 %v11625_v34, %v11624_v16 }
0x2ffc   :  { %v6686_v60 = vpop.permute.xlu1 %6685 }
0x3003   :  { %v11830_v3 = vpop.eup %11829 }
0x3004   :  { %v6601_v6 = vsel %vm3469_vm8, %v11830_v3, 0.0 }
0x3005   :  { %6602 = vadd.xlane.f32.xlu0 %v6601_v6 }
0x301b   :  { %11617 = vrot.lane.b32.xlu0 %v12824_v37, %s11960_s9 }
0x3092   :  { %v6603_v61 = vpop.xlane.xlu0 %6602 }
0x3093   :  { %11831 = vrcp.f32 %v6603_v61 }
0x3096   :  { %v11618_v63 = vpop.permute.xlu0 %11617 }
0x3097   :  { %v11620_v26 = vunpack.i.h.bf16 %v11618_v63  ;;  %v11619_v42 = vunpack.i.l.bf16 %v11618_v63 }
0x3099   :  { %v11261_v8 = vpack.c.bf16 %v11620_v26, %v11619_v42 }
0x309b   :  { %11262 = vmatpush3.bf16.msra.mxu1 %v11261_v8 }
0x309c   :  { %11263 = vmatprep.subr.bf16.mxu1 %v11966_v47 }
0x309d   :  { %v11832_v35 = vpop.eup %11831 }
0x309e   :  { %v6605_v25 = vmul.f32 %v11832_v35, %v11830_v3  ;;  %v13670_v35 = vpack.c.bf16 %v12729_v48, %v12732_v10 }
0x30a0   :  { %10737 = vmatmul.mubr.msk.f32.vlgmr.msra.gmra.mrb[92].mxu1 %vm1413_vm4, %v6605_v25 }
0x30a1   :  { %10743 = vmatprep.mubr.msk.f32.mxu1 %vm11958_vm2, %v11957_v14 }
0x30a4   :  { %11266 = vmatpush3.bf16.xpose.msk.msra.mxu1 %vm12665_vm7, %v11264_v62 }
0x30a5   :  { %11274 = vmatprep.subr.bf16.mxu1 %v11966_v47 }
0x30ab   :  { %10744 = vmatmul.mubr.msk.f32.vlgmr.msra.gmra.mrb[94].mxu1 %vm739_vm3, %v6686_v60 }
0x30ac   :  { %11276 = vmatpush3.bf16.msra.mxu1 %v13669_v5  ;;  %10764 = vmatprep.mubr.msk.f32.mxu1 %vm11958_vm2, %v11957_v14 }
0x30ad   :  { %11277 = vmatprep.subr.bf16.mxu1 %v11966_v47 }
0x3173   :  { %v13231_v27 = vpop.f32.mrb[92].mxu1 }
0x3174   :  { %v10738_v1 = vpop.f32.mrb[93].mxu1 }
0x317e   :  { %v6763_v11 = vpop.f32.mrb[94].mxu1 }
0x317f   :  { %v10745_v56 = vpop.f32.mrb[95].mxu1  ;;  %v6767_v22 = vsel %vm3469_vm8, %v6763_v11, -inf }
0x3180   :  { %6768 = vmax.xlane.f32.xlu0 %v6767_v22 }
0x3196   :  { %11627 = vrot.lane.b32.xlu0 %v12824_v37, %s11961_s25 }
0x319a   :  { %7035 = vrot.lane.b32.xlu0 %v13237_v2, %s11959_s5 }
0x320d   :  { %v6769_v36 = vpop.xlane.xlu0 %6768 }
0x320e   :  { %v6770_v39 = vsub.f32 %v6763_v11, %v6769_v36 }
0x3210   :  { %v6771_v7 = vmul.f32 1.442695, %v6770_v39 }
0x3211   :  { %v11628_v3 = vpop.permute.xlu0 %11627 }
0x3212   :  { %11833 = vpow2.f32 %v6771_v7  ;;  %v11630_v6 = vunpack.i.h.bf16 %v11628_v3  ;;  %v11629_v61 = vunpack.i.l.bf16 %v11628_v3 }
0x3214   :  { %v11268_v63 = vpack.c.bf16 %v11630_v6, %v11629_v61 }
0x3215   :  { %v7036_v61 = vpop.permute.xlu0 %7035 }
0x3216   :  { %11269 = vmatpush3.bf16.msra.mxu0 %v11268_v63 }
0x3217   :  { %11270 = vmatprep.subr.bf16.mxu0 %v11966_v47 }
0x321c   :  { %v11834_v26 = vpop.eup %11833 }
0x321d   :  { %v6773_v37 = vsel %vm3469_vm8, %v11834_v26, 0.0 }
0x321e   :  { %6774 = vadd.xlane.f32.xlu1 %v6773_v37 }
0x32ab   :  { %v6775_v42 = vpop.xlane.xlu1 %6774 }
0x32ac   :  { %11835 = vrcp.f32 %v6775_v42 }
0x32b6   :  { %v11836_v8 = vpop.eup %11835 }
0x32b7   :  { %v6777_v51 = vmul.f32 %v11836_v8, %v11834_v26 }
0x32b9   :  { %10751 = vmatmul.mubr.msk.f32.vlgmr.msra.gmra.mrb[96].mxu0 %vm1413_vm4, %v6777_v51 }
0x32ba   :  { %11273 = vmatpush3.bf16.xpose.msk.msra.mxu0 %vm12665_vm7, %v13670_v35  ;;  %10757 = vmatprep.mubr.msk.f32.mxu0 %vm11958_vm2, %v11957_v14 }
0x32bb   :  { %11281 = vmatprep.subr.bf16.mxu0 %v11966_v47 }
0x32c1   :  { %10758 = vmatmul.mubr.msk.f32.vlgmr.msra.gmra.mrb[98].mxu0 %vm739_vm3, %v13237_v2 }
0x32c2   :  { %10778 = vmatprep.mubr.msk.f32.mxu0 %vm11958_vm2, %v11957_v14 }
0x338c   :  { %v13256_v34 = vpop.f32.mrb[96].mxu0 }
0x338d   :  { %v10752_v16 = vpop.f32.mrb[97].mxu0 }
0x3394   :  { %v6947_v25 = vpop.f32.mrb[98].mxu0 }
0x3395   :  { %v10759_v62 = vpop.f32.mrb[99].mxu0  ;;  %v6951_v48 = vsel %vm3469_vm8, %v6947_v25, -inf }
0x3396   :  { %6952 = vmax.xlane.f32.xlu1 %v6951_v48 }
0x3423   :  { %v6953_v10 = vpop.xlane.xlu1 %6952 }
0x3424   :  { %v6954_v60 = vsub.f32 %v6947_v25, %v6953_v10 }
0x3426   :  { %v6955_v5 = vmul.f32 1.442695, %v6954_v60 }
0x3428   :  { %11837 = vpow2.f32 %v6955_v5 }
0x3432   :  { %v11838_v1 = vpop.eup %11837 }
0x3433   :  { %v6957_v11 = vsel %vm3469_vm8, %v11838_v1, 0.0 }
0x3434   :  { %6958 = vadd.xlane.f32.xlu1 %v6957_v11 }
0x3445   :  { %11632 = vrot.lane.b32.xlu1 %v12738_v13, %s11959_s5 }
0x34c1   :  { %v6959_v56 = vpop.xlane.xlu1 %6958 }
0x34c2   :  { %11839 = vrcp.f32 %v6959_v56 }
0x34c5   :  { %v11633_v22 = vpop.permute.xlu1 %11632 }
0x34c6   :  { %v11635_v36 = vunpack.i.h.bf16 %v11633_v22  ;;  %v11634_v39 = vunpack.i.l.bf16 %v11633_v22 }
0x34c8   :  { %v11278_v6 = vpack.c.bf16 %v11635_v36, %v11634_v39 }
0x34cc   :  { %v11840_v7 = vpop.eup %11839 }
0x34cd   :  { %v6961_v3 = vmul.f32 %v11840_v7, %v11838_v1 }
0x34cf   :  { %10765 = vmatmul.mubr.msk.f32.vlgmr.msra.gmra.mrb[96].mxu1 %vm1413_vm4, %v6961_v3 }
0x34d0   :  { %11280 = vmatpush3.bf16.xpose.msk.msra.mxu1 %vm12665_vm7, %v11278_v6  ;;  %10771 = vmatprep.mubr.msk.f32.mxu1 %vm11958_vm2, %v11957_v14 }
0x34d1   :  { %11288 = vmatprep.subr.bf16.mxu1 %v11966_v47 }
0x34d7   :  { %10772 = vmatmul.mubr.msk.f32.vlgmr.msra.gmra.mrb[98].mxu1 %vm739_vm3, %v7036_v61 }
0x34d8   :  { %10792 = vmatprep.mubr.msk.f32.mxu1 %vm11958_vm2, %v11957_v14 }
0x35a2   :  { %v13271_v63 = vpop.f32.mrb[96].mxu1 }
0x35a3   :  { %v10766_v26 = vpop.f32.mrb[97].mxu1 }
0x35aa   :  { %v7113_v37 = vpop.f32.mrb[98].mxu1 }
0x35ab   :  { %v10773_v42 = vpop.f32.mrb[99].mxu1  ;;  %v7117_v8 = vsel %vm3469_vm8, %v7113_v37, -inf }
0x35ac   :  { %7118 = vmax.xlane.f32.xlu0 %v7117_v8 }
0x35c2   :  { %11637 = vrot.lane.b32.xlu0 %v12830_v43, %s11959_s5 }
0x35c6   :  { %7209 = vrot.lane.b32.xlu0 %v13237_v2, %s11960_s9 }
0x3639   :  { %v7119_v51 = vpop.xlane.xlu0 %7118 }
0x363a   :  { %v7120_v35 = vsub.f32 %v7113_v37, %v7119_v51 }
0x363c   :  { %v7121_v16 = vmul.f32 1.442695, %v7120_v35 }
0x363d   :  { %v11638_v25 = vpop.permute.xlu0 %11637 }
0x363e   :  { %11841 = vpow2.f32 %v7121_v16  ;;  %v11640_v62 = vunpack.i.h.bf16 %v11638_v25  ;;  %v11639_v48 = vunpack.i.l.bf16 %v11638_v25 }
0x3640   :  { %v11282_v10 = vpack.c.bf16 %v11640_v62, %v11639_v48 }
0x3641   :  { %v7210_v3 = vpop.permute.xlu0 %7209 }
0x3642   :  { %11283 = vmatpush3.bf16.msra.mxu0 %v11282_v10 }
0x3643   :  { %11284 = vmatprep.subr.bf16.mxu0 %v11966_v47 }
0x3648   :  { %v11842_v60 = vpop.eup %11841 }
0x3649   :  { %v7123_v5 = vsel %vm3469_vm8, %v11842_v60, 0.0 }
0x364a   :  { %7124 = vadd.xlane.f32.xlu1 %v7123_v5 }
0x365b   :  { %11642 = vrot.lane.b32.xlu1 %v12738_v13, %s11960_s9 }
0x36d7   :  { %v7125_v1 = vpop.xlane.xlu1 %7124 }
0x36d8   :  { %11843 = vrcp.f32 %v7125_v1 }
0x36db   :  { %v11643_v11 = vpop.permute.xlu1 %11642 }
0x36dc   :  { %v11645_v56 = vunpack.i.h.bf16 %v11643_v11  ;;  %v11644_v22 = vunpack.i.l.bf16 %v11643_v11 }
0x36de   :  { %v11285_v7 = vpack.c.bf16 %v11645_v56, %v11644_v22 }
0x36e2   :  { %v11844_v36 = vpop.eup %11843 }
0x36e3   :  { %v7127_v39 = vmul.f32 %v11844_v36, %v11842_v60 }
0x36e5   :  { %10779 = vmatmul.mubr.msk.f32.vlgmr.msra.gmra.mrb[100].mxu0 %vm1413_vm4, %v7127_v39 }
0x36e6   :  { %11287 = vmatpush3.bf16.xpose.msk.msra.mxu0 %vm12665_vm7, %v11285_v7  ;;  %10785 = vmatprep.mubr.msk.f32.mxu0 %vm11958_vm2, %v11957_v14 }
0x36e7   :  { %11295 = vmatprep.subr.bf16.mxu0 %v11966_v47 }
0x36ed   :  { %10786 = vmatmul.mubr.msk.f32.vlgmr.msra.gmra.mrb[102].mxu0 %vm739_vm3, %v7210_v3 }
0x36ee   :  { %10806 = vmatprep.mubr.msk.f32.mxu0 %vm11958_vm2, %v11957_v14 }
0x37b8   :  { %v13291_v6 = vpop.f32.mrb[100].mxu0 }
0x37b9   :  { %v10780_v61 = vpop.f32.mrb[101].mxu0 }
0x37c0   :  { %v7287_v26 = vpop.f32.mrb[102].mxu0 }
0x37c1   :  { %v10787_v37 = vpop.f32.mrb[103].mxu0  ;;  %v7291_v42 = vsel %vm3469_vm8, %v7287_v26, -inf }
0x37c2   :  { %7292 = vmax.xlane.f32.xlu0 %v7291_v42 }
0x37d8   :  { %11647 = vrot.lane.b32.xlu0 %v12830_v43, %s11960_s9 }
0x37dc   :  { %7381 = vrot.lane.b32.xlu0 %v13237_v2, %s11961_s25 }
0x384f   :  { %v7293_v8 = vpop.xlane.xlu0 %7292 }
0x3850   :  { %v7294_v51 = vsub.f32 %v7287_v26, %v7293_v8 }
0x3852   :  { %v7295_v35 = vmul.f32 1.442695, %v7294_v51 }
0x3853   :  { %v11648_v16 = vpop.permute.xlu0 %11647 }
0x3854   :  { %11845 = vpow2.f32 %v7295_v35  ;;  %v11650_v25 = vunpack.i.h.bf16 %v11648_v16  ;;  %v11649_v62 = vunpack.i.l.bf16 %v11648_v16 }
0x3856   :  { %v11289_v48 = vpack.c.bf16 %v11650_v25, %v11649_v62 }
0x3857   :  { %v7382_v39 = vpop.permute.xlu0 %7381 }
0x3858   :  { %11290 = vmatpush3.bf16.msra.mxu1 %v11289_v48 }
0x3859   :  { %11291 = vmatprep.subr.bf16.mxu1 %v11966_v47 }
0x385e   :  { %v11846_v10 = vpop.eup %11845 }
0x385f   :  { %v7297_v60 = vsel %vm3469_vm8, %v11846_v10, 0.0 }
0x3860   :  { %7298 = vadd.xlane.f32.xlu1 %v7297_v60 }
0x3871   :  { %11652 = vrot.lane.b32.xlu1 %v12738_v13, %s11961_s25  ;;  %v13671_v13 = vpack.c.bf16 %v12834_v12, %v12832_v46  ;;  %v13322_v12 = vrot.slane %v13069_v52, 3 }
0x38ed   :  { %v7299_v5 = vpop.xlane.xlu1 %7298 }
0x38ee   :  { %11847 = vrcp.f32 %v7299_v5 }
0x38f1   :  { %v11653_v2 = vpop.permute.xlu1 %11652 }
0x38f2   :  { %v11655_v1 = vunpack.i.h.bf16 %v11653_v2  ;;  %v11654_v11 = vunpack.i.l.bf16 %v11653_v2 }
0x38f4   :  { %v11292_v36 = vpack.c.bf16 %v11655_v1, %v11654_v11 }
0x38f8   :  { %v11848_v56 = vpop.eup %11847 }
0x38f9   :  { %v7301_v22 = vmul.f32 %v11848_v56, %v11846_v10 }
0x38fb   :  { %10793 = vmatmul.mubr.msk.f32.vlgmr.msra.gmra.mrb[100].mxu1 %vm1413_vm4, %v7301_v22 }
0x38fc   :  { %11294 = vmatpush3.bf16.xpose.msk.msra.mxu1 %vm12665_vm7, %v11292_v36  ;;  %10799 = vmatprep.mubr.msk.f32.mxu1 %vm11958_vm2, %v11957_v14 }
0x38fd   :  { %11302 = vmatprep.subr.bf16.mxu1 %v11966_v47 }
0x3903   :  { %10800 = vmatmul.mubr.msk.f32.vlgmr.msra.gmra.mrb[102].mxu1 %vm739_vm3, %v7382_v39 }
0x3904   :  { %11304 = vmatpush3.bf16.msra.mxu1 %v13671_v13  ;;  %10820 = vmatprep.mubr.msk.f32.mxu1 %vm11958_vm2, %v11957_v14 }
0x3905   :  { %11305 = vmatprep.subr.bf16.mxu1 %v11966_v47 }
0x39ce   :  { %v13315_v7 = vpop.f32.mrb[100].mxu1 }
0x39cf   :  { %v10794_v3 = vpop.f32.mrb[101].mxu1 }
0x39d6   :  { %v7459_v61 = vpop.f32.mrb[102].mxu1 }
0x39d7   :  { %v10801_v26 = vpop.f32.mrb[103].mxu1  ;;  %v7463_v37 = vsel %vm3469_vm8, %v7459_v61, -inf }
0x39d8   :  { %7464 = vmax.xlane.f32.xlu1 %v7463_v37 }
0x3a65   :  { %v7465_v42 = vpop.xlane.xlu1 %7464 }
0x3a66   :  { %v7466_v8 = vsub.f32 %v7459_v61, %v7465_v42 }
0x3a68   :  { %v7467_v51 = vmul.f32 1.442695, %v7466_v8 }
0x3a6a   :  { %11849 = vpow2.f32 %v7467_v51 }
0x3a74   :  { %v11850_v35 = vpop.eup %11849 }
0x3a75   :  { %v7469_v46 = vsel %vm3469_vm8, %v11850_v35, 0.0 }
0x3a76   :  { %7470 = vadd.xlane.f32.xlu0 %v7469_v46 }
0x3a8c   :  { %11657 = vrot.lane.b32.xlu0 %v12830_v43, %s11961_s25  ;;  %v13672_v43 = vpack.c.bf16 %v12741_v15, %v12744_v17 }
0x3a90   :  { %7731 = vrot.lane.b32.xlu0 %v13322_v12, %s11959_s5 }
0x3b03   :  { %v7471_v16 = vpop.xlane.xlu0 %7470 }
0x3b04   :  { %11851 = vrcp.f32 %v7471_v16 }
0x3b07   :  { %v11658_v25 = vpop.permute.xlu0 %11657 }
0x3b08   :  { %v11660_v62 = vunpack.i.h.bf16 %v11658_v25  ;;  %v11659_v48 = vunpack.i.l.bf16 %v11658_v25 }
0x3b0a   :  { %v11296_v10 = vpack.c.bf16 %v11660_v62, %v11659_v48 }
0x3b0c   :  { %11297 = vmatpush3.bf16.msra.mxu0 %v11296_v10 }
0x3b0d   :  { %11298 = vmatprep.subr.bf16.mxu0 %v11966_v47 }
0x3b0e   :  { %v11852_v60 = vpop.eup %11851 }
0x3b0f   :  { %v7473_v5 = vmul.f32 %v11852_v60, %v11850_v35  ;;  %v7732_v35 = vpop.permute.xlu0 %7731 }
0x3b11   :  { %10807 = vmatmul.mubr.msk.f32.vlgmr.msra.gmra.mrb[104].mxu0 %vm1413_vm4, %v7473_v5 }
0x3b12   :  { %10813 = vmatprep.mubr.msk.f32.mxu0 %vm11958_vm2, %v11957_v14 }
0x3b15   :  { %11301 = vmatpush3.bf16.xpose.msk.msra.mxu0 %vm12665_vm7, %v13672_v43 }
0x3b16   :  { %11309 = vmatprep.subr.bf16.mxu0 %v11966_v47 }
0x3b1c   :  { %10814 = vmatmul.mubr.msk.f32.vlgmr.msra.gmra.mrb[106].mxu0 %vm739_vm3, %v13322_v12 }
0x3b1d   :  { %10834 = vmatprep.mubr.msk.f32.mxu0 %vm11958_vm2, %v11957_v14 }
0x3be4   :  { %v13340_v2 = vpop.f32.mrb[104].mxu0 }
0x3be5   :  { %v10808_v1 = vpop.f32.mrb[105].mxu0 }
0x3bef   :  { %v7643_v11 = vpop.f32.mrb[106].mxu0 }
0x3bf0   :  { %v10815_v56 = vpop.f32.mrb[107].mxu0  ;;  %v7647_v22 = vsel %vm3469_vm8, %v7643_v11, -inf }
0x3bf1   :  { %7648 = vmax.xlane.f32.xlu1 %v7647_v22 }
0x3c7e   :  { %v7649_v15 = vpop.xlane.xlu1 %7648 }
0x3c7f   :  { %v7650_v17 = vsub.f32 %v7643_v11, %v7649_v15 }
0x3c81   :  { %v7651_v36 = vmul.f32 1.442695, %v7650_v17 }
0x3c83   :  { %11853 = vpow2.f32 %v7651_v36 }
0x3c8d   :  { %v11854_v39 = vpop.eup %11853 }
0x3c8e   :  { %v7653_v13 = vsel %vm3469_vm8, %v11854_v39, 0.0 }
0x3c8f   :  { %7654 = vadd.xlane.f32.xlu1 %v7653_v13 }
0x3ca0   :  { %11662 = vrot.lane.b32.xlu1 %v12750_v20, %s11959_s5 }
0x3d1c   :  { %v7655_v3 = vpop.xlane.xlu1 %7654 }
0x3d1d   :  { %11855 = vrcp.f32 %v7655_v3 }
0x3d20   :  { %v11663_v61 = vpop.permute.xlu1 %11662 }
0x3d21   :  { %v11665_v26 = vunpack.i.h.bf16 %v11663_v61  ;;  %v11664_v37 = vunpack.i.l.bf16 %v11663_v61 }
0x3d23   :  { %v11306_v51 = vpack.c.bf16 %v11665_v26, %v11664_v37 }
0x3d27   :  { %v11856_v42 = vpop.eup %11855 }
0x3d28   :  { %v7657_v8 = vmul.f32 %v11856_v42, %v11854_v39 }
0x3d2a   :  { %10821 = vmatmul.mubr.msk.f32.vlgmr.msra.gmra.mrb[104].mxu1 %vm1413_vm4, %v7657_v8 }
0x3d2b   :  { %11308 = vmatpush3.bf16.xpose.msk.msra.mxu1 %vm12665_vm7, %v11306_v51  ;;  %10827 = vmatprep.mubr.msk.f32.mxu1 %vm11958_vm2, %v11957_v14 }
0x3d2c   :  { %11316 = vmatprep.subr.bf16.mxu1 %v11966_v47 }
0x3d32   :  { %10828 = vmatmul.mubr.msk.f32.vlgmr.msra.gmra.mrb[106].mxu1 %vm739_vm3, %v7732_v35 }
0x3d33   :  { %10848 = vmatprep.mubr.msk.f32.mxu1 %vm11958_vm2, %v11957_v14 }
0x3dfd   :  { %v13355_v46 = vpop.f32.mrb[104].mxu1 }
0x3dfe   :  { %v10822_v16 = vpop.f32.mrb[105].mxu1 }
0x3e05   :  { %v7809_v25 = vpop.f32.mrb[106].mxu1 }
0x3e06   :  { %v10829_v62 = vpop.f32.mrb[107].mxu1  ;;  %v7813_v48 = vsel %vm3469_vm8, %v7809_v25, -inf }
0x3e07   :  { %7814 = vmax.xlane.f32.xlu0 %v7813_v48 }
0x3e1d   :  { %11667 = vrot.lane.b32.xlu0 %v12845_v40, %s11959_s5 }
0x3e21   :  { %7905 = vrot.lane.b32.xlu0 %v13322_v12, %s11960_s9 }
0x3e94   :  { %v7815_v10 = vpop.xlane.xlu0 %7814 }
0x3e95   :  { %v7816_v60 = vsub.f32 %v7809_v25, %v7815_v10 }
0x3e97   :  { %v7817_v5 = vmul.f32 1.442695, %v7816_v60 }
0x3e98   :  { %v11668_v43 = vpop.permute.xlu0 %11667 }
0x3e99   :  { %11857 = vpow2.f32 %v7817_v5  ;;  %v11670_v1 = vunpack.i.h.bf16 %v11668_v43  ;;  %v11669_v11 = vunpack.i.l.bf16 %v11668_v43 }
0x3e9b   :  { %v11310_v56 = vpack.c.bf16 %v11670_v1, %v11669_v11 }
0x3e9c   :  { %v7906_v37 = vpop.permute.xlu0 %7905 }
0x3e9d   :  { %11311 = vmatpush3.bf16.msra.mxu0 %v11310_v56 }
0x3e9e   :  { %11312 = vmatprep.subr.bf16.mxu0 %v11966_v47 }
0x3ea3   :  { %v11858_v22 = vpop.eup %11857 }
0x3ea4   :  { %v7819_v15 = vsel %vm3469_vm8, %v11858_v22, 0.0 }
0x3ea5   :  { %7820 = vadd.xlane.f32.xlu1 %v7819_v15 }
0x3eb6   :  { %11672 = vrot.lane.b32.xlu1 %v12750_v20, %s11960_s9 }
0x3f32   :  { %v7821_v17 = vpop.xlane.xlu1 %7820 }
0x3f33   :  { %11859 = vrcp.f32 %v7821_v17 }
0x3f36   :  { %v11673_v36 = vpop.permute.xlu1 %11672 }
0x3f37   :  { %v11675_v39 = vunpack.i.h.bf16 %v11673_v36  ;;  %v11674_v13 = vunpack.i.l.bf16 %v11673_v36 }
0x3f39   :  { %v11313_v26 = vpack.c.bf16 %v11675_v39, %v11674_v13  ;;  %v13673_v13 = vpack.c.bf16 %v12838_v4, %v12836_v21 }
0x3f3d   :  { %v11860_v3 = vpop.eup %11859 }
0x3f3e   :  { %v7823_v61 = vmul.f32 %v11860_v3, %v11858_v22 }
0x3f40   :  { %10835 = vmatmul.mubr.msk.f32.vlgmr.msra.gmra.mrb[108].mxu0 %vm1413_vm4, %v7823_v61 }
0x3f41   :  { %11315 = vmatpush3.bf16.xpose.msk.msra.mxu0 %vm12665_vm7, %v11313_v26  ;;  %10841 = vmatprep.mubr.msk.f32.mxu0 %vm11958_vm2, %v11957_v14 }
0x3f42   :  { %11323 = vmatprep.subr.bf16.mxu0 %v11966_v47 }
0x3f48   :  { %10842 = vmatmul.mubr.msk.f32.vlgmr.msra.gmra.mrb[110].mxu0 %vm739_vm3, %v7906_v37 }
0x3f49   :  { %10862 = vmatprep.mubr.msk.f32.mxu0 %vm11958_vm2, %v11957_v14 }
0x4013   :  { %v13375_v42 = vpop.f32.mrb[108].mxu0 }
0x4014   :  { %v10836_v8 = vpop.f32.mrb[109].mxu0 }
0x401b   :  { %v7983_v51 = vpop.f32.mrb[110].mxu0 }
0x401c   :  { %v10843_v35 = vpop.f32.mrb[111].mxu0  ;;  %v7987_v16 = vsel %vm3469_vm8, %v7983_v51, -inf }
0x401d   :  { %7988 = vmax.xlane.f32.xlu1 %v7987_v16 }
0x402e   :  { %11682 = vrot.lane.b32.xlu1 %v12750_v20, %s11961_s25 }
0x4032   :  { %8077 = vrot.lane.b32.xlu1 %v13322_v12, %s11961_s25 }
0x40aa   :  { %v7989_v25 = vpop.xlane.xlu1 %7988 }
0x40ab   :  { %v7990_v62 = vsub.f32 %v7983_v51, %v7989_v25  ;;  %v13405_v51 = vrot.slane %v13069_v52, 4 }
0x40ad   :  { %v7991_v48 = vmul.f32 1.442695, %v7990_v62 }
0x40ae   :  { %v11683_v56 = vpop.permute.xlu1 %11682 }
0x40af   :  { %11861 = vpow2.f32 %v7991_v48  ;;  %v11685_v22 = vunpack.i.h.bf16 %v11683_v56  ;;  %v11684_v15 = vunpack.i.l.bf16 %v11683_v56 }
0x40b1   :  { %v11320_v36 = vpack.c.bf16 %v11685_v22, %v11684_v15 }
0x40b2   :  { %v8078_v39 = vpop.permute.xlu1 %8077 }
0x40b9   :  { %v11862_v10 = vpop.eup %11861 }
0x40ba   :  { %v7993_v60 = vsel %vm3469_vm8, %v11862_v10, 0.0 }
0x40bb   :  { %7994 = vadd.xlane.f32.xlu0 %v7993_v60 }
0x40d1   :  { %11677 = vrot.lane.b32.xlu0 %v12845_v40, %s11960_s9 }
0x4148   :  { %v7995_v5 = vpop.xlane.xlu0 %7994 }
0x4149   :  { %11863 = vrcp.f32 %v7995_v5 }
0x414c   :  { %v11678_v43 = vpop.permute.xlu0 %11677 }
0x414d   :  { %v11680_v1 = vunpack.i.h.bf16 %v11678_v43  ;;  %v11679_v11 = vunpack.i.l.bf16 %v11678_v43  ;;  %v13674_v43 = vpack.c.bf16 %v12753_v54, %v12756_v24 }
0x414f   :  { %v11317_v20 = vpack.c.bf16 %v11680_v1, %v11679_v11 }
0x4151   :  { %11318 = vmatpush3.bf16.msra.mxu1 %v11317_v20 }
0x4152   :  { %11319 = vmatprep.subr.bf16.mxu1 %v11966_v47 }
0x4153   :  { %v11864_v12 = vpop.eup %11863 }
0x4154   :  { %v7997_v17 = vmul.f32 %v11864_v12, %v11862_v10 }
0x4156   :  { %10849 = vmatmul.mubr.msk.f32.vlgmr.msra.gmra.mrb[108].mxu1 %vm1413_vm4, %v7997_v17 }
0x4157   :  { %10855 = vmatprep.mubr.msk.f32.mxu1 %vm11958_vm2, %v11957_v14 }
0x415a   :  { %11322 = vmatpush3.bf16.xpose.msk.msra.mxu1 %vm12665_vm7, %v11320_v36 }
0x415b   :  { %11330 = vmatprep.subr.bf16.mxu1 %v11966_v47 }
0x4161   :  { %10856 = vmatmul.mubr.msk.f32.vlgmr.msra.gmra.mrb[110].mxu1 %vm739_vm3, %v8078_v39 }
0x4162   :  { %11332 = vmatpush3.bf16.msra.mxu1 %v13673_v13  ;;  %10876 = vmatprep.mubr.msk.f32.mxu1 %vm11958_vm2, %v11957_v14 }
0x4163   :  { %11333 = vmatprep.subr.bf16.mxu1 %v11966_v47 }
0x4229   :  { %v13399_v3 = vpop.f32.mrb[108].mxu1 }
0x422a   :  { %v10850_v61 = vpop.f32.mrb[109].mxu1 }
0x4234   :  { %v8155_v26 = vpop.f32.mrb[110].mxu1 }
0x4235   :  { %v10857_v37 = vpop.f32.mrb[111].mxu1  ;;  %v8159_v8 = vsel %vm3469_vm8, %v8155_v26, -inf }
0x4236   :  { %8160 = vmax.xlane.f32.xlu0 %v8159_v8 }
0x424c   :  { %11687 = vrot.lane.b32.xlu0 %v12845_v40, %s11961_s25 }
0x4250   :  { %8427 = vrot.lane.b32.xlu0 %v13405_v51, %s11959_s5 }
0x42c3   :  { %v8161_v21 = vpop.xlane.xlu0 %8160 }
0x42c4   :  { %v8162_v4 = vsub.f32 %v8155_v26, %v8161_v21 }
0x42c6   :  { %v8163_v35 = vmul.f32 1.442695, %v8162_v4 }
0x42c7   :  { %v11688_v16 = vpop.permute.xlu0 %11687 }
0x42c8   :  { %11865 = vpow2.f32 %v8163_v35  ;;  %v11690_v25 = vunpack.i.h.bf16 %v11688_v16  ;;  %v11689_v62 = vunpack.i.l.bf16 %v11688_v16 }
0x42ca   :  { %v11324_v48 = vpack.c.bf16 %v11690_v25, %v11689_v62 }
0x42cb   :  { %v8428_v21 = vpop.permute.xlu0 %8427 }
0x42cc   :  { %11325 = vmatpush3.bf16.msra.mxu0 %v11324_v48 }
0x42cd   :  { %11326 = vmatprep.subr.bf16.mxu0 %v11966_v47 }
0x42d2   :  { %v11866_v10 = vpop.eup %11865 }
0x42d3   :  { %v8165_v40 = vsel %vm3469_vm8, %v11866_v10, 0.0 }
0x42d4   :  { %8166 = vadd.xlane.f32.xlu1 %v8165_v40 }
0x4361   :  { %v8167_v52 = vpop.xlane.xlu1 %8166 }
0x4362   :  { %11867 = vrcp.f32 %v8167_v52 }
0x436c   :  { %v11868_v60 = vpop.eup %11867 }
0x436d   :  { %v8169_v5 = vmul.f32 %v11868_v60, %v11866_v10 }
0x436f   :  { %10863 = vmatmul.mubr.msk.f32.vlgmr.msra.gmra.mrb[112].mxu0 %vm1413_vm4, %v8169_v5 }
0x4370   :  { %11329 = vmatpush3.bf16.xpose.msk.msra.mxu0 %vm12665_vm7, %v13674_v43  ;;  %10869 = vmatprep.mubr.msk.f32.mxu0 %vm11958_vm2, %v11957_v14 }
0x4371   :  { %11337 = vmatprep.subr.bf16.mxu0 %v11966_v47 }
0x4377   :  { %10870 = vmatmul.mubr.msk.f32.vlgmr.msra.gmra.mrb[114].mxu0 %vm739_vm3, %v13405_v51 }
0x4378   :  { %10890 = vmatprep.mubr.msk.f32.mxu0 %vm11958_vm2, %v11957_v14 }
0x4442   :  { %v13424_v1 = vpop.f32.mrb[112].mxu0 }
0x4443   :  { %v10864_v11 = vpop.f32.mrb[113].mxu0 }
0x444a   :  { %v8339_v20 = vpop.f32.mrb[114].mxu0 }
0x444b   :  { %v10871_v56 = vpop.f32.mrb[115].mxu0  ;;  %v8343_v54 = vsel %vm3469_vm8, %v8339_v20, -inf }
0x444c   :  { %8344 = vmax.xlane.f32.xlu1 %v8343_v54 }
0x44d9   :  { %v8345_v24 = vpop.xlane.xlu1 %8344 }
0x44da   :  { %v8346_v12 = vsub.f32 %v8339_v20, %v8345_v24 }
0x44dc   :  { %v8347_v22 = vmul.f32 1.442695, %v8346_v12 }
0x44de   :  { %11869 = vpow2.f32 %v8347_v22 }
0x44e8   :  { %v11870_v15 = vpop.eup %11869 }
0x44e9   :  { %v8349_v17 = vsel %vm3469_vm8, %v11870_v15, 0.0 }
0x44ea   :  { %8350 = vadd.xlane.f32.xlu1 %v8349_v17 }
0x44fb   :  { %11692 = vrot.lane.b32.xlu1 %v12762_v18, %s11959_s5 }
0x4577   :  { %v8351_v36 = vpop.xlane.xlu1 %8350 }
0x4578   :  { %11871 = vrcp.f32 %v8351_v36 }
0x457b   :  { %v11693_v39 = vpop.permute.xlu1 %11692 }
0x457c   :  { %v11695_v13 = vunpack.i.h.bf16 %v11693_v39  ;;  %v11694_v61 = vunpack.i.l.bf16 %v11693_v39 }
0x457e   :  { %v11334_v8 = vpack.c.bf16 %v11695_v13, %v11694_v61 }
0x4582   :  { %v11872_v26 = vpop.eup %11871 }
0x4583   :  { %v8353_v37 = vmul.f32 %v11872_v26, %v11870_v15 }
0x4585   :  { %10877 = vmatmul.mubr.msk.f32.vlgmr.msra.gmra.mrb[112].mxu1 %vm1413_vm4, %v8353_v37 }
0x4586   :  { %11336 = vmatpush3.bf16.xpose.msk.msra.mxu1 %vm12665_vm7, %v11334_v8  ;;  %10883 = vmatprep.mubr.msk.f32.mxu1 %vm11958_vm2, %v11957_v14 }
0x4587   :  { %11344 = vmatprep.subr.bf16.mxu1 %v11966_v47 }
0x458d   :  { %10884 = vmatmul.mubr.msk.f32.vlgmr.msra.gmra.mrb[114].mxu1 %vm739_vm3, %v8428_v21 }
0x458e   :  { %10904 = vmatprep.mubr.msk.f32.mxu1 %vm11958_vm2, %v11957_v14 }
0x4658   :  { %v13439_v4 = vpop.f32.mrb[112].mxu1 }
0x4659   :  { %v10878_v35 = vpop.f32.mrb[113].mxu1 }
0x4660   :  { %v8505_v16 = vpop.f32.mrb[114].mxu1 }
0x4661   :  { %v10885_v25 = vpop.f32.mrb[115].mxu1  ;;  %v8509_v62 = vsel %vm3469_vm8, %v8505_v16, -inf }
0x4662   :  { %8510 = vmax.xlane.f32.xlu0 %v8509_v62 }
0x4678   :  { %11697 = vrot.lane.b32.xlu0 %v12851_v59, %s11959_s5  ;;  %s11967_s5 = smov [#allocation2]  }
0x467c   :  { %8601 = vrot.lane.b32.xlu0 %v13405_v51, %s11960_s9 }
0x46ef   :  { %v8511_v48 = vpop.xlane.xlu0 %8510 }
0x46f0   :  { %v8512_v10 = vsub.f32 %v8505_v16, %v8511_v48 }
0x46f2   :  { %v8513_v40 = vmul.f32 1.442695, %v8512_v10 }
0x46f3   :  { %v11698_v52 = vpop.permute.xlu0 %11697 }
0x46f4   :  { %11873 = vpow2.f32 %v8513_v40  ;;  %v11700_v60 = vunpack.i.h.bf16 %v11698_v52  ;;  %v11699_v5 = vunpack.i.l.bf16 %v11698_v52 }
0x46f6   :  { %v11338_v43 = vpack.c.bf16 %v11700_v60, %v11699_v5 }
0x46f7   :  { %v8602_v36 = vpop.permute.xlu0 %8601 }
0x46f8   :  { %11339 = vmatpush3.bf16.msra.mxu0 %v11338_v43 }
0x46f9   :  { %11340 = vmatprep.subr.bf16.mxu0 %v11966_v47 }
0x46fe   :  { %v11874_v11 = vpop.eup %11873 }
0x46ff   :  { %v8515_v20 = vsel %vm3469_vm8, %v11874_v11, 0.0 }
0x4700   :  { %8516 = vadd.xlane.f32.xlu1 %v8515_v20 }
0x4711   :  { %11702 = vrot.lane.b32.xlu1 %v12762_v18, %s11960_s9 }
0x478d   :  { %v8517_v56 = vpop.xlane.xlu1 %8516 }
0x478e   :  { %11875 = vrcp.f32 %v8517_v56 }
0x4791   :  { %v11703_v54 = vpop.permute.xlu1 %11702 }
0x4792   :  { %v11705_v24 = vunpack.i.h.bf16 %v11703_v54  ;;  %v11704_v12 = vunpack.i.l.bf16 %v11703_v54 }
0x4794   :  { %v11341_v17 = vpack.c.bf16 %v11705_v24, %v11704_v12 }
0x4798   :  { %v11876_v22 = vpop.eup %11875 }
0x4799   :  { %v8519_v15 = vmul.f32 %v11876_v22, %v11874_v11 }
0x479b   :  { %10891 = vmatmul.mubr.msk.f32.vlgmr.msra.gmra.mrb[116].mxu0 %vm1413_vm4, %v8519_v15 }
0x479c   :  { %11343 = vmatpush3.bf16.xpose.msk.msra.mxu0 %vm12665_vm7, %v11341_v17  ;;  %10897 = vmatprep.mubr.msk.f32.mxu0 %vm11958_vm2, %v11957_v14 }
0x479d   :  { %11351 = vmatprep.subr.bf16.mxu0 %v11966_v47 }
0x47a3   :  { %10898 = vmatmul.mubr.msk.f32.vlgmr.msra.gmra.mrb[118].mxu0 %vm739_vm3, %v8602_v36 }
0x47a4   :  { %10918 = vmatprep.mubr.msk.f32.mxu0 %vm11958_vm2, %v11957_v14 }
0x486e   :  { %v13459_v39 = vpop.f32.mrb[116].mxu0 }
0x486f   :  { %v10892_v13 = vpop.f32.mrb[117].mxu0 }
0x4876   :  { %v8679_v61 = vpop.f32.mrb[118].mxu0 }
0x4877   :  { %v10899_v26 = vpop.f32.mrb[119].mxu0  ;;  %v8683_v37 = vsel %vm3469_vm8, %v8679_v61, -inf }
0x4878   :  { %8684 = vmax.xlane.f32.xlu0 %v8683_v37 }
0x488e   :  { %11707 = vrot.lane.b32.xlu0 %v12851_v59, %s11960_s9  ;;  %s9373_s9 = sshll.u32 %s11967_s5, 4  ;;  %s9374_s9 = int_to_ptr.vmem [resolvable:$true] %s9373_s9 }
0x488f   :  { %p11899_p1 = scmp.lt.s32.totalorder %s9374_s9, %s9374_s9 }
0x4892   :  { %8773 = vrot.lane.b32.xlu0 %v13405_v51, %s11961_s25 }
0x4905   :  { %v8685_v8 = vpop.xlane.xlu0 %8684 }
0x4906   :  { %v8686_v21 = vsub.f32 %v8679_v61, %v8685_v8 }
0x4908   :  { %v8687_v35 = vmul.f32 1.442695, %v8686_v21 }
0x4909   :  { %v11708_v16 = vpop.permute.xlu0 %11707 }
0x490a   :  { %11877 = vpow2.f32 %v8687_v35  ;;  %v11710_v25 = vunpack.i.h.bf16 %v11708_v16  ;;  %v11709_v62 = vunpack.i.l.bf16 %v11708_v16 }
0x490c   :  { %v11345_v48 = vpack.c.bf16 %v11710_v25, %v11709_v62 }
0x490d   :  { %v8774_v56 = vpop.permute.xlu0 %8773 }
0x490e   :  { %11346 = vmatpush3.bf16.msra.mxu1 %v11345_v48 }
0x490f   :  { %11347 = vmatprep.subr.bf16.mxu1 %v11966_v47 }
0x4914   :  { %v11878_v10 = vpop.eup %11877 }
0x4915   :  { %v8689_v40 = vsel %vm3469_vm8, %v11878_v10, 0.0 }
0x4916   :  { %8690 = vadd.xlane.f32.xlu1 %v8689_v40 }
0x4927   :  { %11712 = vrot.lane.b32.xlu1 %v12762_v18, %s11961_s25 }
0x49a3   :  { %v8691_v52 = vpop.xlane.xlu1 %8690 }
0x49a4   :  { %11879 = vrcp.f32 %v8691_v52 }
0x49a7   :  { %v11713_v51 = vpop.permute.xlu1 %11712 }
0x49a8   :  { %v11715_v60 = vunpack.i.h.bf16 %v11713_v51  ;;  %v11714_v5 = vunpack.i.l.bf16 %v11713_v51 }
0x49aa   :  { %v11348_v20 = vpack.c.bf16 %v11715_v60, %v11714_v5 }
0x49ae   :  { %v11880_v43 = vpop.eup %11879 }
0x49af   :  { %v8693_v11 = vmul.f32 %v11880_v43, %v11878_v10 }
0x49b1   :  { %10905 = vmatmul.mubr.msk.f32.vlgmr.msra.gmra.mrb[116].mxu1 %vm1413_vm4, %v8693_v11 }
0x49b2   :  { %11350 = vmatpush3.bf16.xpose.msk.msra.mxu1 %vm12665_vm7, %v11348_v20  ;;  %10911 = vmatprep.mubr.msk.f32.mxu1 %vm11958_vm2, %v11957_v14 }
0x49b9   :  { %10912 = vmatmul.mubr.msk.f32.vlgmr.msra.gmra.mrb[118].mxu1 %vm739_vm3, %v8774_v56 }
0x4a84   :  { %v8769_v18 = vpop.f32.mrb[116].mxu1 }
0x4a85   :  { %v10906_v54 = vpop.f32.mrb[117].mxu1 }
0x4a8c   :  { %v8851_v24 = vpop.f32.mrb[118].mxu1 }
0x4a8d   :  { %v10913_v12 = vpop.f32.mrb[119].mxu1  ;;  %v8855_v22 = vsel %vm3469_vm8, %v8851_v24, -inf }
0x4a8e   :  { %8856 = vmax.xlane.f32.xlu1 %v8855_v22 }
0x4a9f   :  { %4769 = vrot.lane.b32.xlu1 %v12954_v53, %s11963_s3 }
0x4aa3   :  { %4773 = vrot.lane.b32.xlu1 %v12978_v44, %s11964_s8 }
0x4aa7   :  { %4073 = vrot.lane.b32.xlu1 %v12870_v31, %s11963_s3 }
0x4aab   :  { %5469 = vrot.lane.b32.xlu1 %v13062_v28, %s11964_s8 }
0x4aaf   :  { %4077 = vrot.lane.b32.xlu1 %v12894_v9, %s11964_s8 }
0x4ab3   :  { %6166 = vrot.lane.b32.xlu1 %v13147_v45, %s11964_s8 }
0x4ab7   :  { %4081 = vrot.lane.b32.xlu1 %v12919_v41, %s11965_s14 }
0x4abb   :  { %6862 = vrot.lane.b32.xlu1 %v13231_v27, %s11964_s8 }
0x4abf   :  { %6866 = vrot.lane.b32.xlu1 %v13256_v34, %s11965_s14 }
0x4ac3   :  { %8250 = vrot.lane.b32.xlu1 %v13375_v42, %s11963_s3 }
0x4ac7   :  { %8254 = vrot.lane.b32.xlu1 %v13399_v3, %s11964_s8 }
0x4acb   :  { %8258 = vrot.lane.b32.xlu1 %v13424_v1, %s11965_s14 }
0x4b1b   :  { %v8857_v38 = vpop.xlane.xlu1 %8856 }
0x4b1c   :  { %v8858_v31 = vsub.f32 %v8851_v24, %v8857_v38 }
0x4b1e   :  { %v8859_v9 = vmul.f32 1.442695, %v8858_v31 }
0x4b20   :  { %11881 = vpow2.f32 %v8859_v9 }
0x4b2a   :  { %v11882_v41 = vpop.eup %11881 }
0x4b2b   :  { %v8861_v53 = vsel %vm3469_vm8, %v11882_v41, 0.0 }
0x4b2c   :  { %8862 = vadd.xlane.f32.xlu0 %v8861_v53 }
0x4b42   :  { %11717 = vrot.lane.b32.xlu0 %v12851_v59, %s11961_s25  ;;  %v4770_v59 = vpop.permute.xlu1 %4769  ;;  %s11894_s25 = scalar_lea.vmem %s9374_s9, 256 }
0x4b43   :  { %p11895_p0 = scmp.ne.s32.totalorder %s9374_s9, %s11894_s25  ;;  %p11900_p2 = scmp.lt.s32.totalorder %s11894_s25, %s11894_s25 }
0x4b45   :  { %p11901_p3 = por %p11900_p2, %p11899_p1 }
0x4b46   :  { %5465 = vrot.lane.b32.xlu0 %v13038_v55, %s11963_s3  ;;  %v4774_v44 = vpop.permute.xlu1 %4773 }
0x4b47   :  { %p11902_p4 = pnand %p11901_p3, %p11895_p0 }
0x4b4a   :  { %4777 = vrot.lane.b32.xlu0 %v13003_v32, %s11965_s14  ;;  %v4074_v32 = vpop.permute.xlu1 %4073 }
0x4b4b   :  { %v4084_v15 = vsel %vm739_vm3, %v12868_v58, %v4074_v32  ;;  %v8996_v32 = vld [vmem:[%s13675_s26 + $0x8] sm:$0xff] }
0x4b4e   :  { %6162 = vrot.lane.b32.xlu0 %v13123_v30, %s11963_s3  ;;  %v5470_v55 = vpop.permute.xlu1 %5469 }
0x4b52   :  { %5473 = vrot.lane.b32.xlu0 %v13088_v0, %s11965_s14  ;;  %v4078_v28 = vpop.permute.xlu1 %4077 }
0x4b56   :  { %6858 = vrot.lane.b32.xlu0 %v13207_v23, %s11963_s3  ;;  %v6167_v30 = vpop.permute.xlu1 %6166 }
0x4b5a   :  { %6170 = vrot.lane.b32.xlu0 %v13172_v57, %s11965_s14  ;;  %v4082_v27 = vpop.permute.xlu1 %4081 }
0x4b5e   :  { %7554 = vrot.lane.b32.xlu0 %v13291_v6, %s11963_s3  ;;  %v6863_v17 = vpop.permute.xlu1 %6862 }
0x4b62   :  { %7558 = vrot.lane.b32.xlu0 %v13315_v7, %s11964_s8  ;;  %v6867_v58 = vpop.permute.xlu1 %6866 }
0x4b66   :  { %7562 = vrot.lane.b32.xlu0 %v13340_v2, %s11965_s14  ;;  %v4780_v2 = vsel %vm739_vm3, %v12934_v49, %v4770_v59  ;;  %v8251_v48 = vpop.permute.xlu1 %8250 }
0x4b67   :  { %v4781_v42 = vsel %vm1413_vm4, %v4780_v2, %v4774_v44  ;;  %v8261_v54 = vsel %vm739_vm3, %v13355_v46, %v8251_v48  ;;  %v8995_v44 = vld [vmem:[%s13675_s26] sm:$0xff] }
0x4b6a   :  { %8946 = vrot.lane.b32.xlu0 %v13459_v39, %s11963_s3  ;;  %v4085_v39 = vsel %vm1413_vm4, %v4084_v15, %v4078_v28  ;;  %v8255_v43 = vpop.permute.xlu1 %8254  ;;  %v8998_v28 = vld [vmem:[%s13675_s26 + $0x18] sm:$0xff] }
0x4b6b   :  { %v4086_v61 = vsel %vm1415_vm5, %v4085_v39, %v4082_v27  ;;  %v8262_v24 = vsel %vm1413_vm4, %v8261_v54, %v8255_v43  ;;  %v9226_v43 = vld [vmem:[%s13679_s2 + $0x10] sm:$0xff] }
0x4b6e   :  { %8950 = vrot.lane.b32.xlu0 %v8769_v18, %s11964_s8  ;;  %v8259_v18 = vpop.permute.xlu1 %8258 }
0x4b6f   :  { %v8263_v22 = vsel %vm1415_vm5, %v8262_v24, %v8259_v18 }
0x4b70   :  { %v8976_v53 = vrot.slane %v8263_v22, 2 }
0x4bb9   :  { %v8863_v0 = vpop.xlane.xlu0 %8862 }
0x4bba   :  { %11883 = vrcp.f32 %v8863_v0 }
0x4bbd   :  { %v11718_v45 = vpop.permute.xlu0 %11717 }
0x4bbe   :  { %v11720_v57 = vunpack.i.h.bf16 %v11718_v45  ;;  %v11719_v23 = vunpack.i.l.bf16 %v11718_v45 }
0x4bc0   :  { %v11352_v34 = vpack.c.bf16 %v11720_v57, %v11719_v23 }
0x4bc1   :  { %v5466_v6 = vpop.permute.xlu0 %5465 }
0x4bc2   :  { %11353 = vmatpush3.bf16.msra.mxu0 %v11352_v34  ;;  %v5476_v37 = vsel %vm739_vm3, %v13018_v29, %v5466_v6 }
0x4bc3   :  { %11354 = vmatprep.subr.bf16.mxu0 %v11966_v47  ;;  %v5477_v21 = vsel %vm1413_vm4, %v5476_v37, %v5470_v55  ;;  %v11355_v55 = vpack.c.bf16 %v8996_v32, %v8995_v44 }
0x4bc4   :  { %v11884_v7 = vpop.eup %11883 }
0x4bc5   :  { %v8865_v3 = vmul.f32 %v11884_v7, %v11882_v41  ;;  %v4778_v1 = vpop.permute.xlu0 %4777 }
0x4bc6   :  { %v4782_v36 = vsel %vm1415_vm5, %v4781_v42, %v4778_v1  ;;  %v9674_v42 = vld [vmem:[%s13676_s28] ss:$0 sm:$0xff] }
0x4bc7   :  { %v8961_v13 = vrot.slane %v4782_v36, 7  ;;  %10919 = vmatmul.mubr.msk.f32.vlgmr.msra.gmra.mrb[120].mxu0 %vm1413_vm4, %v8865_v3 }
0x4bc8   :  { %10929 = vmatprep.mubr.msk.f32.mxu0 %vm11958_vm2, %v11957_v14  ;;  %11356 = vmatpush3.bf16.msra.mxu0 %v11355_v55 }
0x4bc9   :  { %v8982_v49 = vsel %vm8981_vm9, %v4086_v61, %v8961_v13  ;;  %v6163_v26 = vpop.permute.xlu0 %6162  ;;  %11357 = vmatprep.subr.bf16.mxu0 %v11966_v47  ;;  %v13677_v61 = vld [vmem:[#allocation26_spill] sm:$0xff] }
0x4bca   :  { %v6173_v10 = vsel %vm739_vm3, %v13103_v33, %v6163_v26 }
0x4bcb   :  { %v6174_v51 = vsel %vm1413_vm4, %v6173_v10, %v6167_v30  ;;  %v9130_v10 = vld [vmem:[%s13678_s1] sm:$0xff] }
0x4bcd   :  { %v5474_v8 = vpop.permute.xlu0 %5473 }
0x4bce   :  { %v5478_v35 = vsel %vm1415_vm5, %v5477_v21, %v5474_v8 }
0x4bcf   :  { %v8964_v16 = vrot.slane %v5478_v35, 6 }
0x4bd1   :  { %v8984_v25 = vsel %vm8983_vm10, %v8982_v49, %v8964_v16  ;;  %v6859_v62 = vpop.permute.xlu0 %6858 }
0x4bd2   :  { %v6869_v14 = vsel %vm739_vm3, %v13187_v19, %v6859_v62 }
0x4bd3   :  { %v6870_v40 = vsel %vm1413_vm4, %v6869_v14, %v6863_v17  ;;  %v9131_v14 = vld [vmem:[%s13678_s1 + $0x8] sm:$0xff] }
0x4bd4   :  { %v6871_v29 = vsel %vm1415_vm5, %v6870_v40, %v6867_v58  ;;  %v11360_v40 = vpack.c.bf16 %v9131_v14, %v9130_v10 }
0x4bd5   :  { %v6171_v52 = vpop.permute.xlu0 %6170  ;;  %v8970_v11 = vrot.slane %v6871_v29, 4  ;;  %v9132_v29 = vld [vmem:[%s13678_s1 + $0x10] sm:$0xff] }
0x4bd6   :  { %v6175_v60 = vsel %vm1415_vm5, %v6174_v51, %v6171_v52  ;;  %11361 = vmatprep.subr.bf16.mxu1 %v11360_v40  ;;  %v9133_v52 = vld [vmem:[%s13678_s1 + $0x18] sm:$0xff] }
0x4bd7   :  { %v8967_v5 = vrot.slane %v6175_v60, 5  ;;  %11363 = vmatpush3.bf16.msra.mxu1 %v11360_v40  ;;  %v11364_v51 = vpack.c.bf16 %v9133_v52, %v9132_v29  ;;  %v9224_v60 = vld [vmem:[%s13679_s2] sm:$0xff] }
0x4bd8   :  { %v9684_v29 = vld [vmem:[%s12152_s17] ss:$0 sm:$0xff] }
0x4bd9   :  { %v8986_v20 = vsel %vm8985_vm11, %v8984_v25, %v8967_v5  ;;  %v7555_v33 = vpop.permute.xlu0 %7554  ;;  %11365 = vmatprep.subr.bf16.mxu1 %v11364_v51  ;;  %v9225_v5 = vld [vmem:[%s13679_s2 + $0x8] sm:$0xff] }
0x4bda   :  { %v8988_v56 = vsel %vm8987_vm12, %v8986_v20, %v8970_v11  ;;  %v7565_v12 = vsel %vm739_vm3, %v13271_v63, %v7555_v33  ;;  %v8997_v63 = vld [vmem:[%s13675_s26 + $0x10] sm:$0xff]  ;;  %v11368_v11 = vpack.c.bf16 %v9225_v5, %v9224_v60  ;;  %v9227_v20 = vld [vmem:[%s13679_s2 + $0x18] sm:$0xff]  ;;  %v9685_v5 = vld [vmem:[%s12157_s27] ss:$0 sm:$0xff] }
0x4bdb   :  { %v11358_v0 = vpack.c.bf16 %v8998_v28, %v8997_v63  ;;  %11367 = vmatpush3.bf16.msra.mxu1 %v11364_v51  ;;  %v11372_v33 = vpack.c.bf16 %v9227_v20, %v9226_v43 }
0x4bdd   :  { %v7559_v19 = vpop.permute.xlu0 %7558  ;;  %11359 = vmatpush3.bf16.msra.mxu0 %v11358_v0  ;;  %v9230_v0 = vld [vmem:[%s13679_s2 + $0x30] sm:$0xff] }
0x4bde   :  { %v7566_v38 = vsel %vm1413_vm4, %v7565_v12, %v7559_v19  ;;  %v9229_v19 = vld [vmem:[%s13679_s2 + $0x28] sm:$0xff]  ;;  %11369 = vmatprep.subr.bf16.mxu0 %v11368_v11 }
0x4be1   :  { %v7563_v31 = vpop.permute.xlu0 %7562 }
0x4be2   :  { %v7567_v9 = vsel %vm1415_vm5, %v7566_v38, %v7563_v31 }
0x4be3   :  { %v8973_v41 = vrot.slane %v7567_v9, 3 }
0x4be5   :  { %v8990_v46 = vsel %vm8989_vm13, %v8988_v56, %v8973_v41  ;;  %v8947_v57 = vpop.permute.xlu0 %8946  ;;  %v9228_v56 = vld [vmem:[%s13679_s2 + $0x20] sm:$0xff] }
0x4be6   :  { %v8992_v59 = vsel %vm8991_vm14, %v8990_v46, %v8976_v53  ;;  %v8957_v27 = vsel %vm739_vm3, %v13439_v4, %v8947_v57  ;;  %v11376_v18 = vpack.c.bf16 %v9229_v19, %v9228_v56  ;;  %v9676_v41 = vld [vmem:[%s13680_s7] ss:$0 sm:$0xff] }
0x4be7   :  { %v9677_v46 = vld [vmem:[%s13681_s10] ss:$0 sm:$0xff] }
0x4be8   :  { %v9678_v57 = vld [vmem:[%s13682_s11] ss:$0 sm:$0xff] }
0x4be9   :  { %v8951_v23 = vpop.permute.xlu0 %8950 }
0x4bea   :  { %v8958_v34 = vsel %vm1413_vm4, %v8957_v27, %v8951_v23 }
0x4c9a   :  { %v8941_v30 = vpop.f32.mrb[120].mxu0 }
0x4c9b   :  { %8954 = vrot.lane.b32.xlu1 %v8941_v30, %s11965_s14  ;;  %v10920_v45 = vpop.f32.mrb[121].mxu0  ;;  %v9231_v30 = vld [vmem:[%s13679_s2 + $0x38] sm:$0xff] }
0x4c9c   :  { %v11380_v45 = vpack.c.bf16 %v9231_v30, %v9230_v0 }
0x4d0d   :  { %v8955_v6 = vpop.permute.xlu1 %8954 }
0x4d0e   :  { %v8959_v7 = vsel %vm1415_vm5, %v8958_v34, %v8955_v6 }
0x4d0f   :  { %v8979_v47 = vrot.slane %v8959_v7, 1 }
0x4d11   :  { %v8994_v2 = vsel %vm8993_vm15, %v8992_v59, %v8979_v47 }
0x4d12   :  { %10930 = vmatmul.mubr.msk.f32.vlgmr.msra.gmra.mrb[122].mxu0 %vm368_vm1, %v8994_v2  ;;  %v9681_v2 = vld [vmem:[%s13683_s0] ss:$0 sm:$0xff] }
0x4d13   :  { %11371 = vmatpush3.bf16.msra.mxu0 %v11368_v11 }
0x4d14   :  { %11373 = vmatprep.subr.bf16.mxu0 %v11372_v33 }
0x4d17   :  { %11375 = vmatpush3.bf16.msra.mxu0 %v11372_v33 }
0x4d18   :  { %11377 = vmatprep.subr.bf16.mxu0 %v11376_v18 }
0x4d1b   :  { %11379 = vmatpush3.bf16.msra.mxu0 %v11376_v18 }
0x4d1c   :  { %11381 = vmatprep.subr.bf16.mxu0 %v11380_v45 }
0x4d1f   :  { %11383 = vmatpush3.bf16.msra.mxu0 %v11380_v45 }
0x4de5   :  { %v9075_v3 = vpop.f32.mrb[122].mxu0 }
0x4de6   :  { %v9076_v1 = vadd.f32 %v9674_v42, %v9075_v3  ;;  %v10931_v15 = vpop.f32.mrb[123].mxu0 }
0x4de8   :  { %v9079_v17 = vsel %vm8985_vm11, %v9076_v1, 0.0  ;;  %v9081_v36 = vrot.slane %v9076_v1, 3 }
0x4de9   :  { %v9084_v39 = vadd.f32 %v9079_v17, %v12486_v50 }
0x4dea   :  { %v9083_v4 = vsel %vm8989_vm13, %v9081_v36, 0.0 }
0x4deb   :  { %v9086_v13 = vsel %vm368_vm1, %v9084_v39, 0.0  ;;  %v9085_v49 = vadd.f32 %v9083_v4, %v13677_v61 }
0x4dec   :  { %9087 = vadd.xlane.f32.xlu0 %v9086_v13 }
0x4ded   :  { %v9089_v26 = vsel %vm368_vm1, %v9085_v49, 0.0 }
0x4dee   :  { %9090 = vadd.xlane.f32.xlu1 %v9089_v26 }
0x4e79   :  { %v9088_v37 = vpop.xlane.xlu0 %9087 }
0x4e7a   :  { %v9092_v58 = vmul.f32 0.03125, %v9088_v37 }
0x4e7b   :  { %v9091_v8 = vpop.xlane.xlu1 %9090 }
0x4e7c   :  { %v9094_v21 = vsub.f32 %v9084_v39, %v9092_v58  ;;  %v9093_v35 = vmul.f32 0.03125, %v9091_v8 }
0x4e7e   :  { %v9095_v50 = vsub.f32 %v9085_v49, %v9093_v35  ;;  %v9096_v16 = vmul.f32 %v9094_v21, %v9094_v21 }
0x4e80   :  { %v9098_v25 = vsel %vm368_vm1, %v9096_v16, 0.0  ;;  %v9097_v62 = vmul.f32 %v9095_v50, %v9095_v50 }
0x4e81   :  { %9099 = vadd.xlane.f32.xlu0 %v9098_v25 }
0x4e82   :  { %v9101_v48 = vsel %vm368_vm1, %v9097_v62, 0.0 }
0x4e85   :  { %9102 = vadd.xlane.f32.xlu0 %v9101_v48 }
0x4f0e   :  { %v9100_v54 = vpop.xlane.xlu0 %9099 }
0x4f0f   :  { %v9104_v24 = vmul.f32 0.03125, %v9100_v54 }
0x4f11   :  { %v9106_v12 = vadd.f32 1e-05, %v9104_v24 }
0x4f12   :  { %v9103_v22 = vpop.xlane.xlu0 %9102 }
0x4f13   :  { %11885 = vrsqrt.f32 %v9106_v12  ;;  %v9105_v38 = vmul.f32 0.03125, %v9103_v22 }
0x4f15   :  { %v9107_v31 = vadd.f32 1e-05, %v9105_v38 }
0x4f17   :  { %11887 = vrsqrt.f32 %v9107_v31 }
0x4f1d   :  { %v11886_v9 = vpop.eup %11885 }
0x4f1e   :  { %v9110_v53 = vmul.f32 %v11886_v9, %v9094_v21 }
0x4f20   :  { %v9119_v59 = vmul.f32 %v9676_v41, %v9110_v53 }
0x4f21   :  { %v11888_v44 = vpop.eup %11887 }
0x4f22   :  { %v9111_v32 = vmul.f32 %v11888_v44, %v9095_v50  ;;  %v9128_v55 = vadd.f32 %v9677_v46, %v9119_v59 }
0x4f24   :  { %v9120_v63 = vmul.f32 %v9676_v41, %v9111_v32  ;;  %10940 = vmatprep.mubr.msk.f32.mxu1 %vm368_vm1, %v9128_v55 }
0x4f26   :  { %v9129_v28 = vadd.f32 %v9677_v46, %v9120_v63 }
0x4f28   :  { %10941 = vmatmul.mubr.msk.f32.vlgmr.msra.gmra.mrb[120].mxu1 %vm368_vm1, %v9129_v28 }
0x4ffb   :  { %v10942_v23 = vpop.f32.mrb[120].mxu1 }
0x4ffc   :  { %v9219_v27 = vadd.f32 %v10942_v23, %v9678_v57  ;;  %v9213_v34 = vpop.f32.mrb[121].mxu1 }
0x4ffd   :  { %v9214_v6 = vadd.f32 %v9678_v57, %v9213_v34 }
0x4ffe   :  { %v9223_v47 = vmax.f32 %v9219_v27, 0.0 }
0x4fff   :  { %v9222_v7 = vmax.f32 %v9214_v6, 0.0 }
0x5001   :  { %10959 = vmatprep.mubr.msk.f32.mxu0 %vm2463_vm6, %v9222_v7 }
0x5002   :  { %10960 = vmatmul.mubr.msk.f32.vlgmr.msra.gmra.mrb[124].mxu0 %vm2463_vm6, %v9223_v47 }
0x50d5   :  { %v10961_v42 = vpop.f32.mrb[124].mxu0 }
0x50d6   :  { %v9317_v3 = vadd.f32 %v10961_v42, %v9681_v2  ;;  %v9311_v1 = vpop.f32.mrb[125].mxu0 }
0x50d7   :  { %v9312_v15 = vadd.f32 %v9681_v2, %v9311_v1 }
0x50d8   :  { %v9321_v17 = vadd.f32 %v9317_v3, %v9129_v28 }
0x50d9   :  { %v9320_v36 = vadd.f32 %v9312_v15, %v9128_v55 }
0x50da   :  { %v9325_v39 = vsel %vm368_vm1, %v9321_v17, 0.0 }
0x50db   :  { %9326 = vadd.xlane.f32.xlu1 %v9325_v39  ;;  %v9322_v4 = vsel %vm368_vm1, %v9320_v36, 0.0 }
0x50dc   :  { %9323 = vadd.xlane.f32.xlu0 %v9322_v4 }
0x5168   :  { %v9327_v13 = vpop.xlane.xlu1 %9326 }
0x5169   :  { %v9329_v61 = vmul.f32 0.03125, %v9327_v13  ;;  %v9324_v49 = vpop.xlane.xlu0 %9323 }
0x516a   :  { %v9328_v26 = vmul.f32 0.03125, %v9324_v49 }
0x516b   :  { %v9331_v37 = vsub.f32 %v9321_v17, %v9329_v61 }
0x516c   :  { %v9330_v58 = vsub.f32 %v9320_v36, %v9328_v26 }
0x516d   :  { %v9333_v8 = vmul.f32 %v9331_v37, %v9331_v37 }
0x516e   :  { %v9332_v21 = vmul.f32 %v9330_v58, %v9330_v58 }
0x516f   :  { %v9337_v35 = vsel %vm368_vm1, %v9333_v8, 0.0 }
0x5170   :  { %9338 = vadd.xlane.f32.xlu1 %v9337_v35  ;;  %v9334_v50 = vsel %vm368_vm1, %v9332_v21, 0.0 }
0x5171   :  { %9335 = vadd.xlane.f32.xlu0 %v9334_v50 }
0x51fd   :  { %v9339_v16 = vpop.xlane.xlu1 %9338 }
0x51fe   :  { %v9341_v25 = vmul.f32 0.03125, %v9339_v16  ;;  %v9336_v62 = vpop.xlane.xlu0 %9335 }
0x51ff   :  { %v9340_v48 = vmul.f32 0.03125, %v9336_v62 }
0x5200   :  { %v9343_v10 = vadd.f32 1e-05, %v9341_v25 }
0x5201   :  { %v9342_v14 = vadd.f32 1e-05, %v9340_v48 }
0x5202   :  { %11889 = vrsqrt.f32 %v9343_v10 }
0x5203   :  { %11891 = vrsqrt.f32 %v9342_v14 }
0x520c   :  { %v11890_v40 = vpop.eup %11889 }
0x520d   :  { %v11892_v52 = vpop.eup %11891  ;;  %v9347_v51 = vmul.f32 %v11890_v40, %v9331_v37 }
0x520e   :  { %v9346_v60 = vmul.f32 %v11892_v52, %v9330_v58 }
0x520f   :  { %v9356_v43 = vmul.f32 %v9684_v29, %v9347_v51 }
0x5210   :  { %v9355_v11 = vmul.f32 %v9684_v29, %v9346_v60 }
0x5211   :  { %v9365_v20 = vadd.f32 %v9685_v5, %v9356_v43 }
0x5212   :  { %v9364_v33 = vadd.f32 %v9685_v5, %v9355_v11 }
0x5213   :  { %9367 = vst.msk [vmem:[#allocation2 + $0x8] sm:$0xff] %vm368_vm1, %v9365_v20 }
0x5214   :  { %9366 = vst.msk [vmem:[#allocation2] sm:$0xff] %vm368_vm1, %v9364_v33 }
0x5215   :  { %11905 = shalt.err (!%p11902_p4)
}
0x5216   :  { %s11906_s17 = scalar_lea.hbm %s12162_s20, 256 }
0x5217   :  { %p11907_p5 = scmp.ne.s32.totalorder %s12162_s20, %s11906_s17  ;;  %p11910_p6 = scmp.lt.u32.totalorder %s11906_s17, %s12162_s20 }
0x5219   :  { %p11912_p7 = pnand %p11910_p6, %p11907_p5 }
0x521b   :  { %11915 = shalt.err (!%p11912_p7)
}
0x521c   :  { %s11968_s27 = smov 128  }
0x521d   :  { %9379 = dma.vmem_to_hbm [thread:$0]  %s9374_s9, 256, %s12162_s20, [#allocation3], %s11968_s27, %s11968_s27, %s11963_s3  }
0x521e   :  { %11916 = dma.done.wait [#allocation3], 256  }
0x521f   :  { %11917 = vsyncadd [#allocation3], 4294967040 }
0x5220   :  { %9387 = vsyncpa [#allocation3], 1 }

</bundles_post_ra>
